<compile_context>
chip_gen: v6e
topology: v6e:2x2x1
jax: 0.10.0
libtpu: 0.0.40
codegen_flags: <defaults>
</compile_context>

<pallas_src>
import functools

import jax
import jax.numpy as jnp
from jax import lax
from jax.experimental import pallas as pl
from jax.experimental.pallas import tpu as pltpu


# ----------------------------------------------------------------------------
# Fused Pallas kernel: x -> [Linear -> LayerNorm -> LeakyReLU] * L -> Linear
# ----------------------------------------------------------------------------

def _make_tpbnet_kernel(num_proj_layers, eps, neg_slope):
    """Builds the fused kernel body (static number of projection blocks)."""

    def kernel(*refs):
        # refs = (x, [w, b, gamma, beta] * L, w_last, b_last, out)
        x_ref = refs[0]
        o_ref = refs[-1]

        h = x_ref[...]                       # bf16 tile, fed straight to MXU
        idx = 1
        for _ in range(num_proj_layers):
            w_ref, b_ref, g_ref, beta_ref = refs[idx:idx + 4]
            idx += 4
            # Linear: bf16 MXU inputs, f32 accumulation.
            z = jnp.dot(h, w_ref[...],
                        preferred_element_type=jnp.float32) + b_ref[...]
            # LayerNorm (f32): var via E[z^2] - mu^2, fused affine.
            mu = jnp.mean(z, axis=-1, keepdims=True)
            var = jnp.maximum(
                jnp.mean(z * z, axis=-1, keepdims=True) - mu * mu, 0.0)
            a = lax.rsqrt(var + eps) * g_ref[...]
            c = beta_ref[...] - mu * a
            z = z * a + c
            # LeakyReLU (0 < slope < 1) + cast for the next matmul in one shot.
            h = jnp.maximum(z, neg_slope * z).astype(jnp.bfloat16)

        w_ref, b_ref = refs[idx], refs[idx + 1]
        y = jnp.dot(h, w_ref[...],
                    preferred_element_type=jnp.float32) + b_ref[...]
        o_ref[...] = y.astype(o_ref.dtype)

    return kernel


def _round_up(x, m):
    return ((x + m - 1) // m) * m


def _as_row_f32(v):
    # No-op for pre-cast (1, n) float32 params.
    return jnp.asarray(v, jnp.float32).reshape(1, -1)


def visual_projection(params, x, *, eps=1e-5, neg_slope=0.01, row_tile=512,
                      out_dtype=jnp.float32):
    """Fused visual_projection: x (M, clip_v_dim) -> (M, last_dim)."""
    M, C = x.shape
    layers = params["proj_layers"]
    w_last = jnp.asarray(params["w_last"], jnp.bfloat16)
    b_last = _as_row_f32(params["b_last"])
    last_dim = w_last.shape[1]

    # bf16 activations on the x path (no-op if caller already passes bf16).
    x = x.astype(jnp.bfloat16)

    # Row tile: multiple of 16 (bf16 sublane packing); for small M pick
    # ~M/2 so the "parallel" grid has >=2 steps (keeps both v7x TCs busy).
    tm = max(16, min(row_tile, _round_up(pl.cdiv(M, 2), 16)))
    if M < tm:
        # Tiny inputs only: pad up to a single tile (cheap, bf16).
        x = jnp.pad(x, ((0, tm - M), (0, 0)))
    m_rows = x.shape[0]
    grid = (pl.cdiv(m_rows, tm),)            # ragged last tile for large M

    operands = [x]
    in_specs = [pl.BlockSpec((tm, C), lambda i: (i, 0))]

    def resident(shape):
        # Block == full array, constant block index -> loaded into VMEM once,
        # reused across all row tiles (no re-DMA between grid steps).
        return pl.BlockSpec(shape, lambda i: (0, 0))

    for (w, b, g, beta) in layers:
        w = jnp.asarray(w, jnp.bfloat16)     # no-op for pre-cast params
        n = w.shape[1]
        operands += [w, _as_row_f32(b), _as_row_f32(g), _as_row_f32(beta)]
        in_specs += [resident(w.shape), resident((1, n)),
                     resident((1, n)), resident((1, n))]

    operands += [w_last, b_last]
    in_specs += [resident(w_last.shape), resident((1, last_dim))]

    kernel = _make_tpbnet_kernel(len(layers), eps, neg_slope)

    out = pl.pallas_call(
        kernel,
        out_shape=jax.ShapeDtypeStruct((m_rows, last_dim), out_dtype),
        grid=grid,
        in_specs=in_specs,
        out_specs=pl.BlockSpec((tm, last_dim), lambda i: (i, 0)),
        compiler_params=pltpu.CompilerParams(
            dimension_semantics=("parallel",),       # independent row tiles
            vmem_limit_bytes=48 * 1024 * 1024),      # fits v7x 64 MiB physical
    )(*operands)
    return out[:M]


# ----------------------------------------------------------------------------
# TPBNet forward glue (input selection branches from the torch module)
# ----------------------------------------------------------------------------

def tpbnet_forward(params, hidden_states, *, pooler_output=None,
                   use_global=False, layer_ids=(24,), batch_index=None):
    """hidden_states: (num_layers, B, 1 + Npatch, clip_v_dim) stack (bf16 ok)."""
    if isinstance(layer_ids, int):
        layer_ids = [layer_ids]
    layer_ids = list(layer_ids)
    # TODO(synk): the reference forward leaves projection_input undefined when
    # len(layer_ids) > 1 (bare `pass`); only the single-layer path is implemented.
    assert len(layer_ids) == 1
    layer_id = layer_ids[0]
    assert 0 <= layer_id < 25, "layer_id must be in [0, 24]"

    if use_global:
        projection_input = pooler_output[:, None, :]                 # (B, 1, C)
    elif batch_index is not None:
        projection_input = hidden_states[layer_id][batch_index, 1:, :][None]
    else:
        projection_input = hidden_states[layer_id][:, 1:, :]         # (B, N, C)

    B, N, C = projection_input.shape
    y = visual_projection(params, projection_input.reshape(B * N, C))
    return y.reshape(B, N, -1)


# ----------------------------------------------------------------------------
# Deterministic parameter init. Params are stored in kernel-ready form:
# bf16 (in, out) weights, (1, n) float32 bias / gamma / beta.
# ----------------------------------------------------------------------------

def init_params(key, *, num_cross_proj_layers=2, clip_v_dim=1024, last_dim=768):
    keys = iter(jax.random.split(key, 2 * num_cross_proj_layers + 2))
    layers = []
    for _ in range(num_cross_proj_layers):
        w = (jax.random.normal(next(keys), (clip_v_dim, clip_v_dim), jnp.float32)
             * clip_v_dim ** -0.5).astype(jnp.bfloat16)
        b = (jax.random.normal(next(keys), (clip_v_dim,), jnp.float32)
             * 0.01).reshape(1, -1)
        g = jnp.ones((1, clip_v_dim), jnp.float32)
        beta = jnp.zeros((1, clip_v_dim), jnp.float32)
        layers.append((w, b, g, beta))
    w_last = (jax.random.normal(next(keys), (clip_v_dim, last_dim), jnp.float32)
              * clip_v_dim ** -0.5).astype(jnp.bfloat16)
    b_last = (jax.random.normal(next(keys), (last_dim,), jnp.float32)
              * 0.01).reshape(1, -1)
    return {"proj_layers": layers, "w_last": w_last, "b_last": b_last}


# Pure-JAX f32 reference (same bf16-stored weights upcast) for a loose check.
def _reference(params, x, eps=1e-5, neg_slope=0.01):
    h = x.astype(jnp.float32)
    for (w, b, g, beta) in params["proj_layers"]:
        h = h @ w.astype(jnp.float32) + b.astype(jnp.float32)
        mu = h.mean(-1, keepdims=True)
        var = ((h - mu) ** 2).mean(-1, keepdims=True)
        h = (h - mu) / jnp.sqrt(var + eps) * g + beta
        h = jnp.where(h >= 0.0, h, neg_slope * h)
    return h @ params["w_last"].astype(jnp.float32) + params["b_last"]


# ----------------------------------------------------------------------------
# Driver
# ----------------------------------------------------------------------------

if __name__ == "__main__":
    B, Npatch = 2, 8                     # small batch / token count
    clip_v_dim, last_dim = 1024, 768     # module defaults (lane-aligned)
    num_hidden_layers = 25               # hidden_states indices 0..24

    key = jax.random.PRNGKey(0)
    kp, kh = jax.random.split(key)
    params = init_params(kp, num_cross_proj_layers=2,
                         clip_v_dim=clip_v_dim, last_dim=last_dim)
    # Activations kept in bf16 end-to-end (no per-call conversion pass).
    hidden_states = jax.random.normal(
        kh, (num_hidden_layers, B, 1 + Npatch, clip_v_dim),
        jnp.float32).astype(jnp.bfloat16)

    # NOTE: at tiny M the call is weight-DMA bound (~5.5 MiB bf16 weights);
    # amortize by batching more tokens/images per call in real workloads.
    fwd = jax.jit(functools.partial(tpbnet_forward, layer_ids=(24,)))
    image_embeds = fwd(params, hidden_states)
    jax.block_until_ready(image_embeds)

    assert image_embeds.shape == (B, Npatch, last_dim)
    assert bool(jnp.all(jnp.isfinite(image_embeds)))

    # Loose check vs an all-f32 reference (kernel uses bf16 MXU inputs).
    x_ref = hidden_states[24][:, 1:, :].reshape(B * Npatch, clip_v_dim)
    ref = _reference(params, x_ref).reshape(B, Npatch, last_dim)
    max_err = float(jnp.max(jnp.abs(image_embeds.astype(jnp.float32) - ref)))
    assert max_err < 1e-1, f"max abs error vs reference too large: {max_err}"

    print("KERNEL_OK")
</pallas_src>

<mosaic_0001>
module attributes {stable_mosaic.version = 11 : i64} {
  func.func @kernel(%arg0: i32, %arg1: memref<16x1024xbf16, #tpu.memory_space<vmem>>, %arg2: memref<1024x1024xbf16, #tpu.memory_space<vmem>>, %arg3: memref<1x1024xf32, #tpu.memory_space<vmem>>, %arg4: memref<1x1024xf32, #tpu.memory_space<vmem>>, %arg5: memref<1x1024xf32, #tpu.memory_space<vmem>>, %arg6: memref<1024x1024xbf16, #tpu.memory_space<vmem>>, %arg7: memref<1x1024xf32, #tpu.memory_space<vmem>>, %arg8: memref<1x1024xf32, #tpu.memory_space<vmem>>, %arg9: memref<1x1024xf32, #tpu.memory_space<vmem>>, %arg10: memref<1024x768xbf16, #tpu.memory_space<vmem>>, %arg11: memref<1x768xf32, #tpu.memory_space<vmem>>, %arg12: memref<16x768xf32, #tpu.memory_space<vmem>>) attributes {dimension_semantics = [#tpu.dimension_semantics<parallel>], iteration_bounds = array<i64: 1>, scalar_prefetch = 0 : i64, scratch_operands = 0 : i64, tpu.core_type = #tpu.core_type<tc>, window_params = [{transform_indices = @transform_0, window_bounds = array<i64: 16, 1024>}, {pipeline_mode = #tpu.pipeline_mode<synchronous>, transform_indices = @transform_1, window_bounds = array<i64: 1024, 1024>}, {pipeline_mode = #tpu.pipeline_mode<synchronous>, transform_indices = @transform_2, window_bounds = array<i64: 1, 1024>}, {pipeline_mode = #tpu.pipeline_mode<synchronous>, transform_indices = @transform_3, window_bounds = array<i64: 1, 1024>}, {pipeline_mode = #tpu.pipeline_mode<synchronous>, transform_indices = @transform_4, window_bounds = array<i64: 1, 1024>}, {pipeline_mode = #tpu.pipeline_mode<synchronous>, transform_indices = @transform_5, window_bounds = array<i64: 1024, 1024>}, {pipeline_mode = #tpu.pipeline_mode<synchronous>, transform_indices = @transform_6, window_bounds = array<i64: 1, 1024>}, {pipeline_mode = #tpu.pipeline_mode<synchronous>, transform_indices = @transform_7, window_bounds = array<i64: 1, 1024>}, {pipeline_mode = #tpu.pipeline_mode<synchronous>, transform_indices = @transform_8, window_bounds = array<i64: 1, 1024>}, {pipeline_mode = #tpu.pipeline_mode<synchronous>, transform_indices = @transform_9, window_bounds = array<i64: 1024, 768>}, {pipeline_mode = #tpu.pipeline_mode<synchronous>, transform_indices = @transform_10, window_bounds = array<i64: 1, 768>}, {transform_indices = @transform_11, window_bounds = array<i64: 16, 768>}]} {
    %c0 = arith.constant 0 : index
    %c0_0 = arith.constant 0 : index
    %0 = vector.load %arg1[%c0, %c0_0] : memref<16x1024xbf16, #tpu.memory_space<vmem>>, vector<16x1024xbf16>
    %c0_1 = arith.constant 0 : index
    %c0_2 = arith.constant 0 : index
    %1 = vector.load %arg2[%c0_1, %c0_2] : memref<1024x1024xbf16, #tpu.memory_space<vmem>>, vector<1024x1024xbf16>
    %cst = arith.constant dense<0.000000e+00> : vector<16x1024xf32>
    %2 = tpu.matmul %0, %1, %cst {dimension_numbers = #tpu.dot_dimension_numbers<[1], [0], [0], [1], [0, 0, 1, 1], [], []>} : vector<16x1024xbf16>, vector<1024x1024xbf16>, vector<16x1024xf32> -> vector<16x1024xf32>
    %c0_3 = arith.constant 0 : index
    %c0_4 = arith.constant 0 : index
    %3 = vector.load %arg3[%c0_3, %c0_4] : memref<1x1024xf32, #tpu.memory_space<vmem>>, vector<1x1024xf32>
    %4 = vector.broadcast %3 : vector<1x1024xf32> to vector<16x1024xf32>
    %5 = arith.addf %2, %4 : vector<16x1024xf32>
    %cst_5 = arith.constant dense<0.000000e+00> : vector<16xf32>
    %6 = vector.multi_reduction <add>, %5, %cst_5 [1] : vector<16x1024xf32> to vector<16xf32>
    %7 = vector.shape_cast %6 : vector<16xf32> to vector<16x1xf32>
    %cst_6 = arith.constant 1.024000e+03 : f32
    %8 = vector.broadcast %cst_6 : f32 to vector<16x1xf32>
    %9 = arith.divf %7, %8 : vector<16x1xf32>
    %10 = arith.mulf %5, %5 : vector<16x1024xf32>
    %cst_7 = arith.constant dense<0.000000e+00> : vector<16xf32>
    %11 = vector.multi_reduction <add>, %10, %cst_7 [1] : vector<16x1024xf32> to vector<16xf32>
    %12 = vector.shape_cast %11 : vector<16xf32> to vector<16x1xf32>
    %cst_8 = arith.constant 1.024000e+03 : f32
    %13 = vector.broadcast %cst_8 : f32 to vector<16x1xf32>
    %14 = arith.divf %12, %13 : vector<16x1xf32>
    %15 = arith.mulf %9, %9 : vector<16x1xf32>
    %16 = arith.subf %14, %15 : vector<16x1xf32>
    %cst_9 = arith.constant 0.000000e+00 : f32
    %17 = vector.broadcast %cst_9 : f32 to vector<16x1xf32>
    %18 = arith.maximumf %16, %17 : vector<16x1xf32>
    %cst_10 = arith.constant 9.99999974E-6 : f32
    %19 = vector.broadcast %cst_10 : f32 to vector<16x1xf32>
    %20 = arith.addf %18, %19 : vector<16x1xf32>
    %21 = math.rsqrt %20 : vector<16x1xf32>
    %c0_11 = arith.constant 0 : index
    %c0_12 = arith.constant 0 : index
    %22 = vector.load %arg4[%c0_11, %c0_12] : memref<1x1024xf32, #tpu.memory_space<vmem>>, vector<1x1024xf32>
    %23 = vector.broadcast %21 : vector<16x1xf32> to vector<16x1024xf32>
    %24 = vector.broadcast %22 : vector<1x1024xf32> to vector<16x1024xf32>
    %25 = arith.mulf %23, %24 : vector<16x1024xf32>
    %c0_13 = arith.constant 0 : index
    %c0_14 = arith.constant 0 : index
    %26 = vector.load %arg5[%c0_13, %c0_14] : memref<1x1024xf32, #tpu.memory_space<vmem>>, vector<1x1024xf32>
    %27 = vector.broadcast %9 : vector<16x1xf32> to vector<16x1024xf32>
    %28 = arith.mulf %27, %25 : vector<16x1024xf32>
    %29 = vector.broadcast %26 : vector<1x1024xf32> to vector<16x1024xf32>
    %30 = arith.subf %29, %28 : vector<16x1024xf32>
    %31 = arith.mulf %5, %25 : vector<16x1024xf32>
    %32 = arith.addf %31, %30 : vector<16x1024xf32>
    %cst_15 = arith.constant 0.00999999977 : f32
    %33 = vector.broadcast %cst_15 : f32 to vector<16x1024xf32>
    %34 = arith.mulf %33, %32 : vector<16x1024xf32>
    %35 = arith.maximumf %32, %34 : vector<16x1024xf32>
    %36 = arith.truncf %35 : vector<16x1024xf32> to vector<16x1024xbf16>
    %c0_16 = arith.constant 0 : index
    %c0_17 = arith.constant 0 : index
    %37 = vector.load %arg6[%c0_16, %c0_17] : memref<1024x1024xbf16, #tpu.memory_space<vmem>>, vector<1024x1024xbf16>
    %cst_18 = arith.constant dense<0.000000e+00> : vector<16x1024xf32>
    %38 = tpu.matmul %36, %37, %cst_18 {dimension_numbers = #tpu.dot_dimension_numbers<[1], [0], [0], [1], [0, 0, 1, 1], [], []>} : vector<16x1024xbf16>, vector<1024x1024xbf16>, vector<16x1024xf32> -> vector<16x1024xf32>
    %c0_19 = arith.constant 0 : index
    %c0_20 = arith.constant 0 : index
    %39 = vector.load %arg7[%c0_19, %c0_20] : memref<1x1024xf32, #tpu.memory_space<vmem>>, vector<1x1024xf32>
    %40 = vector.broadcast %39 : vector<1x1024xf32> to vector<16x1024xf32>
    %41 = arith.addf %38, %40 : vector<16x1024xf32>
    %cst_21 = arith.constant dense<0.000000e+00> : vector<16xf32>
    %42 = vector.multi_reduction <add>, %41, %cst_21 [1] : vector<16x1024xf32> to vector<16xf32>
    %43 = vector.shape_cast %42 : vector<16xf32> to vector<16x1xf32>
    %cst_22 = arith.constant 1.024000e+03 : f32
    %44 = vector.broadcast %cst_22 : f32 to vector<16x1xf32>
    %45 = arith.divf %43, %44 : vector<16x1xf32>
    %46 = arith.mulf %41, %41 : vector<16x1024xf32>
    %cst_23 = arith.constant dense<0.000000e+00> : vector<16xf32>
    %47 = vector.multi_reduction <add>, %46, %cst_23 [1] : vector<16x1024xf32> to vector<16xf32>
    %48 = vector.shape_cast %47 : vector<16xf32> to vector<16x1xf32>
    %cst_24 = arith.constant 1.024000e+03 : f32
    %49 = vector.broadcast %cst_24 : f32 to vector<16x1xf32>
    %50 = arith.divf %48, %49 : vector<16x1xf32>
    %51 = arith.mulf %45, %45 : vector<16x1xf32>
    %52 = arith.subf %50, %51 : vector<16x1xf32>
    %cst_25 = arith.constant 0.000000e+00 : f32
    %53 = vector.broadcast %cst_25 : f32 to vector<16x1xf32>
    %54 = arith.maximumf %52, %53 : vector<16x1xf32>
    %cst_26 = arith.constant 9.99999974E-6 : f32
    %55 = vector.broadcast %cst_26 : f32 to vector<16x1xf32>
    %56 = arith.addf %54, %55 : vector<16x1xf32>
    %57 = math.rsqrt %56 : vector<16x1xf32>
    %c0_27 = arith.constant 0 : index
    %c0_28 = arith.constant 0 : index
    %58 = vector.load %arg8[%c0_27, %c0_28] : memref<1x1024xf32, #tpu.memory_space<vmem>>, vector<1x1024xf32>
    %59 = vector.broadcast %57 : vector<16x1xf32> to vector<16x1024xf32>
    %60 = vector.broadcast %58 : vector<1x1024xf32> to vector<16x1024xf32>
    %61 = arith.mulf %59, %60 : vector<16x1024xf32>
    %c0_29 = arith.constant 0 : index
    %c0_30 = arith.constant 0 : index
    %62 = vector.load %arg9[%c0_29, %c0_30] : memref<1x1024xf32, #tpu.memory_space<vmem>>, vector<1x1024xf32>
    %63 = vector.broadcast %45 : vector<16x1xf32> to vector<16x1024xf32>
    %64 = arith.mulf %63, %61 : vector<16x1024xf32>
    %65 = vector.broadcast %62 : vector<1x1024xf32> to vector<16x1024xf32>
    %66 = arith.subf %65, %64 : vector<16x1024xf32>
    %67 = arith.mulf %41, %61 : vector<16x1024xf32>
    %68 = arith.addf %67, %66 : vector<16x1024xf32>
    %cst_31 = arith.constant 0.00999999977 : f32
    %69 = vector.broadcast %cst_31 : f32 to vector<16x1024xf32>
    %70 = arith.mulf %69, %68 : vector<16x1024xf32>
    %71 = arith.maximumf %68, %70 : vector<16x1024xf32>
    %72 = arith.truncf %71 : vector<16x1024xf32> to vector<16x1024xbf16>
    %c0_32 = arith.constant 0 : index
    %c0_33 = arith.constant 0 : index
    %73 = vector.load %arg10[%c0_32, %c0_33] : memref<1024x768xbf16, #tpu.memory_space<vmem>>, vector<1024x768xbf16>
    %cst_34 = arith.constant dense<0.000000e+00> : vector<16x768xf32>
    %74 = tpu.matmul %72, %73, %cst_34 {dimension_numbers = #tpu.dot_dimension_numbers<[1], [0], [0], [1], [0, 0, 1, 1], [], []>} : vector<16x1024xbf16>, vector<1024x768xbf16>, vector<16x768xf32> -> vector<16x768xf32>
    %c0_35 = arith.constant 0 : index
    %c0_36 = arith.constant 0 : index
    %75 = vector.load %arg11[%c0_35, %c0_36] : memref<1x768xf32, #tpu.memory_space<vmem>>, vector<1x768xf32>
    %76 = vector.broadcast %75 : vector<1x768xf32> to vector<16x768xf32>
    %77 = arith.addf %74, %76 : vector<16x768xf32>
    %c0_37 = arith.constant 0 : index
    %c0_38 = arith.constant 0 : index
    %78 = vector.load %arg12[%c0_37, %c0_38] : memref<16x768xf32, #tpu.memory_space<vmem>>, vector<16x768xf32>
    tpu.vector_store %arg12[%c0_37, %c0_38], %77 {strides = array<i32>} : memref<16x768xf32, #tpu.memory_space<vmem>>, vector<16x768xf32>,
    return
  }
  func.func @transform_0(%arg0: i32) -> (i32, i32) {
    %c0_i32 = arith.constant 0 : i32
    %c0_i32_0 = arith.constant 0 : i32
    return %arg0, %c0_i32 : i32, i32
  }
  func.func @transform_1(%arg0: i32) -> (i32, i32) {
    %c0_i32 = arith.constant 0 : i32
    %c0_i32_0 = arith.constant 0 : i32
    %c0_i32_1 = arith.constant 0 : i32
    return %c0_i32, %c0_i32_0 : i32, i32
  }
  func.func @transform_2(%arg0: i32) -> (i32, i32) {
    %c0_i32 = arith.constant 0 : i32
    %c0_i32_0 = arith.constant 0 : i32
    %c0_i32_1 = arith.constant 0 : i32
    return %c0_i32, %c0_i32_0 : i32, i32
  }
  func.func @transform_3(%arg0: i32) -> (i32, i32) {
    %c0_i32 = arith.constant 0 : i32
    %c0_i32_0 = arith.constant 0 : i32
    %c0_i32_1 = arith.constant 0 : i32
    return %c0_i32, %c0_i32_0 : i32, i32
  }
  func.func @transform_4(%arg0: i32) -> (i32, i32) {
    %c0_i32 = arith.constant 0 : i32
    %c0_i32_0 = arith.constant 0 : i32
    %c0_i32_1 = arith.constant 0 : i32
    return %c0_i32, %c0_i32_0 : i32, i32
  }
  func.func @transform_5(%arg0: i32) -> (i32, i32) {
    %c0_i32 = arith.constant 0 : i32
    %c0_i32_0 = arith.constant 0 : i32
    %c0_i32_1 = arith.constant 0 : i32
    return %c0_i32, %c0_i32_0 : i32, i32
  }
  func.func @transform_6(%arg0: i32) -> (i32, i32) {
    %c0_i32 = arith.constant 0 : i32
    %c0_i32_0 = arith.constant 0 : i32
    %c0_i32_1 = arith.constant 0 : i32
    return %c0_i32, %c0_i32_0 : i32, i32
  }
  func.func @transform_7(%arg0: i32) -> (i32, i32) {
    %c0_i32 = arith.constant 0 : i32
    %c0_i32_0 = arith.constant 0 : i32
    %c0_i32_1 = arith.constant 0 : i32
    return %c0_i32, %c0_i32_0 : i32, i32
  }
  func.func @transform_8(%arg0: i32) -> (i32, i32) {
    %c0_i32 = arith.constant 0 : i32
    %c0_i32_0 = arith.constant 0 : i32
    %c0_i32_1 = arith.constant 0 : i32
    return %c0_i32, %c0_i32_0 : i32, i32
  }
  func.func @transform_9(%arg0: i32) -> (i32, i32) {
    %c0_i32 = arith.constant 0 : i32
    %c0_i32_0 = arith.constant 0 : i32
    %c0_i32_1 = arith.constant 0 : i32
    return %c0_i32, %c0_i32_0 : i32, i32
  }
  func.func @transform_10(%arg0: i32) -> (i32, i32) {
    %c0_i32 = arith.constant 0 : i32
    %c0_i32_0 = arith.constant 0 : i32
    %c0_i32_1 = arith.constant 0 : i32
    return %c0_i32, %c0_i32_0 : i32, i32
  }
  func.func @transform_11(%arg0: i32) -> (i32, i32) {
    %c0_i32 = arith.constant 0 : i32
    %c0_i32_0 = arith.constant 0 : i32
    return %arg0, %c0_i32 : i32, i32
  }
}

</mosaic_0001>

<bundles_post_ra>
// kernel: tpbnet_forward.1
= control target key start
LH: loop header
LB: loop body
LE: loop exit
PB: predicated region body
PF: predicated region fallthrough
CT: control target
= control target key end

     0   :  { %16 = vsyncpa [#allocation3], 0  ;;  %s14465_s0 = inlined_call_operand.vmem [shape: bf16[16,1024], index: 0, kind: input, shape index: {}]   ;;  %s14466_s1 = inlined_call_operand.hbm [shape: bf16[1024,1024], index: 1, kind: input, shape index: {}]   ;;  %s14467_s2 = inlined_call_operand.hbm [shape: f32[1,1024], index: 2, kind: input, shape index: {}]   ;;  %s14468_s3 = inlined_call_operand.hbm [shape: f32[1,1024], index: 3, kind: input, shape index: {}]   ;;  %s14469_s4 = inlined_call_operand.hbm [shape: f32[1,1024], index: 4, kind: input, shape index: {}]   ;;  %s14470_s5 = inlined_call_operand.hbm [shape: bf16[1024,1024], index: 5, kind: input, shape index: {}]   ;;  %s14471_s6 = inlined_call_operand.hbm [shape: f32[1,1024], index: 6, kind: input, shape index: {}]   ;;  %s14472_s7 = inlined_call_operand.hbm [shape: f32[1,1024], index: 7, kind: input, shape index: {}]   ;;  %s14473_s8 = inlined_call_operand.hbm [shape: f32[1,1024], index: 8, kind: input, shape index: {}]   ;;  %s14474_s9 = inlined_call_operand.hbm [shape: bf16[1024,768], index: 9, kind: input, shape index: {}]   ;;  %s14475_s10 = inlined_call_operand.hbm [shape: f32[1,768], index: 10, kind: input, shape index: {}]   ;;  %s14476_s11 = inlined_call_operand.hbm [shape: f32[16,768], index: 11, kind: output, shape index: {}]  }
   0x1   :  { %17 = vsyncpa [#allocation6], 0 }
   0x2   :  { %18 = vsyncpa [#allocation9], 0 }
   0x3   :  { %19 = vsyncpa [#allocation12], 0 }
   0x4   :  { %20 = vsyncpa [#allocation15], 0 }
   0x5   :  { %21 = vsyncpa [#allocation18], 0 }
   0x6   :  { %22 = vsyncpa [#allocation4], 0  ;;  %s13491_s17 = smov [#allocation5]   ;;  %s13492_s19 = smov [#allocation8]  }
   0x7   :  { %s43_s18 = sshll.u32 %s13491_s17, 4  ;;  %s63_s20 = sshll.u32 %s13492_s19, 4  ;;  %s44_s18 = int_to_ptr.vmem [resolvable:$true] %s43_s18  ;;  %s64_s20 = int_to_ptr.vmem [resolvable:$true] %s63_s20 }
   0x8   :  { %s13265_s21 = scalar_lea.vmem %s44_s18, 128  ;;  %p13270_p1 = scmp.lt.s32.totalorder %s44_s18, %s44_s18 }
   0x9   :  { %p13266_p0 = scmp.ne.s32.totalorder %s44_s18, %s13265_s21  ;;  %p13271_p2 = scmp.lt.s32.totalorder %s13265_s21, %s13265_s21 }
   0xb   :  { %p13272_p3 = por %p13271_p2, %p13270_p1 }
   0xd   :  { %p13273_p4 = pnand %p13272_p3, %p13266_p0 }
   0xf   :  { %13276 = shalt.err (!%p13273_p4)
}
  0x10   :  { %46 = dma.hbm_to_vmem [thread:$0]  %s14467_s2, 128, %s44_s18, [#allocation6]  }
  0x11   :  { %s13285_s24 = scalar_lea.vmem %s64_s20, 128  ;;  %p13290_p6 = scmp.lt.s32.totalorder %s64_s20, %s64_s20 }
  0x12   :  { %p13286_p5 = scmp.ne.s32.totalorder %s64_s20, %s13285_s24  ;;  %p13291_p7 = scmp.lt.s32.totalorder %s13285_s24, %s13285_s24 }
  0x14   :  { %p13292_p8 = por %p13291_p7, %p13290_p6 }
  0x16   :  { %p13293_p9 = pnand %p13292_p8, %p13286_p5 }
  0x18   :  { %13296 = shalt.err (!%p13293_p9)
}
  0x19   :  { %66 = dma.hbm_to_vmem [thread:$0]  %s14469_s4, 128, %s64_s20, [#allocation9]  }
  0x1a   :  { %s13493_s27 = smov [#allocation11]   ;;  %s13494_s29 = smov [#allocation14]  }
  0x1b   :  { %s85_s28 = sshll.u32 %s13493_s27, 4  ;;  %s105_s30 = sshll.u32 %s13494_s29, 4  ;;  %s86_s28 = int_to_ptr.vmem [resolvable:$true] %s85_s28  ;;  %s106_s30 = int_to_ptr.vmem [resolvable:$true] %s105_s30 }
  0x1c   :  { %s13305_s12 = scalar_lea.vmem %s86_s28, 128  ;;  %p13310_p11 = scmp.lt.s32.totalorder %s86_s28, %s86_s28 }
  0x1d   :  { %p13306_p10 = scmp.ne.s32.totalorder %s86_s28, %s13305_s12  ;;  %p13311_p12 = scmp.lt.s32.totalorder %s13305_s12, %s13305_s12 }
  0x1f   :  { %p13312_p13 = por %p13311_p12, %p13310_p11 }
  0x21   :  { %p13313_p0 = pnand %p13312_p13, %p13306_p10 }
  0x23   :  { %13316 = shalt.err (!%p13313_p0)
}
  0x24   :  { %88 = dma.hbm_to_vmem [thread:$0]  %s14471_s6, 128, %s86_s28, [#allocation12]  }
  0x25   :  { %s13325_s14 = scalar_lea.vmem %s106_s30, 128  ;;  %p13330_p2 = scmp.lt.s32.totalorder %s106_s30, %s106_s30 }
  0x26   :  { %p13326_p1 = scmp.ne.s32.totalorder %s106_s30, %s13325_s14  ;;  %p13331_p3 = scmp.lt.s32.totalorder %s13325_s14, %s13325_s14 }
  0x28   :  { %p13332_p4 = por %p13331_p3, %p13330_p2 }
  0x2a   :  { %p13333_p5 = pnand %p13332_p4, %p13326_p1 }
  0x2c   :  { %13336 = shalt.err (!%p13333_p5)
}
  0x2d   :  { %108 = dma.hbm_to_vmem [thread:$0]  %s14473_s8, 128, %s106_s30, [#allocation15]  }
  0x2e   :  { %s13495_s16 = smov [#allocation2]  }
  0x2f   :  { %s30_s17 = sshll.u32 %s13495_s16, 4  ;;  %s31_s17 = int_to_ptr.vmem [resolvable:$true] %s30_s17 }
  0x30   :  { %s13345_s18 = scalar_lea.vmem %s31_s17, 65536  ;;  %p13350_p7 = scmp.lt.s32.totalorder %s31_s17, %s31_s17 }
  0x31   :  { %p13346_p6 = scmp.ne.s32.totalorder %s31_s17, %s13345_s18  ;;  %p13351_p8 = scmp.lt.s32.totalorder %s13345_s18, %s13345_s18 }
  0x33   :  { %p13352_p9 = por %p13351_p8, %p13350_p7 }
  0x35   :  { %p13353_p10 = pnand %p13352_p9, %p13346_p6 }
  0x37   :  { %13356 = shalt.err (!%p13353_p10)
}
  0x38   :  { %s13496_s6 = smov 512   ;;  %s13497_s19 = smov 32  }
  0x39   :  { %36 = dma.hbm_to_vmem [thread:$0]  %s14466_s1, 65536, %s31_s17, [#allocation3], %s13496_s6, %s13496_s6, %s13497_s19  }
  0x3a   :  { %s13498_s22 = smov [#allocation7]   ;;  %s13499_s8 = smov [#allocation10]  }
  0x3b   :  { %s53_s23 = sshll.u32 %s13498_s22, 4  ;;  %s72_s24 = sshll.u32 %s13499_s8, 4  ;;  %s54_s23 = int_to_ptr.vmem [resolvable:$true] %s53_s23  ;;  %s73_s24 = int_to_ptr.vmem [resolvable:$true] %s72_s24 }
  0x3c   :  { %s13365_s25 = scalar_lea.vmem %s54_s23, 128  ;;  %p13370_p12 = scmp.lt.s32.totalorder %s54_s23, %s54_s23 }
  0x3d   :  { %p13366_p11 = scmp.ne.s32.totalorder %s54_s23, %s13365_s25  ;;  %p13371_p13 = scmp.lt.s32.totalorder %s13365_s25, %s13365_s25 }
  0x3f   :  { %p13372_p0 = por %p13371_p13, %p13370_p12 }
  0x41   :  { %p13373_p1 = pnand %p13372_p0, %p13366_p11 }
  0x43   :  { %13376 = shalt.err (!%p13373_p1)
}
  0x44   :  { %56 = dma.hbm_to_vmem [thread:$0]  %s14468_s3, 128, %s54_s23, [#allocation6]  }
  0x45   :  { %s13385_s28 = scalar_lea.vmem %s73_s24, 65536  ;;  %p13390_p3 = scmp.lt.s32.totalorder %s73_s24, %s73_s24 }
  0x46   :  { %p13386_p2 = scmp.ne.s32.totalorder %s73_s24, %s13385_s28  ;;  %p13391_p4 = scmp.lt.s32.totalorder %s13385_s28, %s13385_s28 }
  0x48   :  { %p13392_p5 = por %p13391_p4, %p13390_p3 }
  0x4a   :  { %p13393_p6 = pnand %p13392_p5, %p13386_p2 }
  0x4c   :  { %13396 = shalt.err (!%p13393_p6)
}
  0x4d   :  { %78 = dma.hbm_to_vmem [thread:$0]  %s14470_s5, 65536, %s73_s24, [#allocation9], %s13496_s6, %s13496_s6, %s13497_s19  }
  0x4e   :  { %s13500_s30 = smov [#allocation13]   ;;  %s13501_s2 = smov [#allocation16]  }
  0x4f   :  { %s95_s12 = sshll.u32 %s13500_s30, 4  ;;  %s114_s13 = sshll.u32 %s13501_s2, 4  ;;  %s96_s12 = int_to_ptr.vmem [resolvable:$true] %s95_s12  ;;  %s115_s13 = int_to_ptr.vmem [resolvable:$true] %s114_s13 }
  0x50   :  { %s13405_s14 = scalar_lea.vmem %s96_s12, 128  ;;  %p13410_p8 = scmp.lt.s32.totalorder %s96_s12, %s96_s12 }
  0x51   :  { %p13406_p7 = scmp.ne.s32.totalorder %s96_s12, %s13405_s14  ;;  %p13411_p9 = scmp.lt.s32.totalorder %s13405_s14, %s13405_s14 }
  0x53   :  { %p13412_p10 = por %p13411_p9, %p13410_p8 }
  0x55   :  { %p13413_p11 = pnand %p13412_p10, %p13406_p7 }
  0x57   :  { %13416 = shalt.err (!%p13413_p11)
}
  0x58   :  { %98 = dma.hbm_to_vmem [thread:$0]  %s14472_s7, 128, %s96_s12, [#allocation12]  }
  0x59   :  { %s13425_s15 = scalar_lea.vmem %s115_s13, 49152  ;;  %p13430_p13 = scmp.lt.s32.totalorder %s115_s13, %s115_s13 }
  0x5a   :  { %p13426_p12 = scmp.ne.s32.totalorder %s115_s13, %s13425_s15  ;;  %p13431_p0 = scmp.lt.s32.totalorder %s13425_s15, %s13425_s15 }
  0x5c   :  { %p13432_p1 = por %p13431_p0, %p13430_p13 }
  0x5e   :  { %p13433_p2 = pnand %p13432_p1, %p13426_p12 }
  0x60   :  { %13436 = shalt.err (!%p13433_p2)
}
  0x61   :  { %s13502_s5 = smov 384   ;;  %s13503_s16 = smov 24  }
  0x62   :  { %120 = dma.hbm_to_vmem [thread:$0]  %s14474_s9, 49152, %s115_s13, [#allocation15], %s13502_s5, %s13502_s5, %s13503_s16  }
  0x63   :  { %s13504_s6 = smov [#allocation17]  }
  0x64   :  { %s127_s19 = sshll.u32 %s13504_s6, 4  ;;  %s128_s19 = int_to_ptr.vmem [resolvable:$true] %s127_s19 }
  0x65   :  { %s13445_s20 = scalar_lea.vmem %s128_s19, 96  ;;  %p13450_p4 = scmp.lt.s32.totalorder %s128_s19, %s128_s19 }
  0x66   :  { %p13446_p3 = scmp.ne.s32.totalorder %s128_s19, %s13445_s20  ;;  %p13451_p5 = scmp.lt.s32.totalorder %s13445_s20, %s13445_s20 }
  0x68   :  { %p13452_p6 = por %p13451_p5, %p13450_p4 }
  0x6a   :  { %p13453_p7 = pnand %p13452_p6, %p13446_p3 }
  0x6c   :  { %13456 = shalt.err (!%p13453_p7)
}
  0x6d   :  { %130 = dma.hbm_to_vmem [thread:$0]  %s14475_s10, 96, %s128_s19, [#allocation18]  }
  0x6e   :  { %13477 = dma.done.wait [#allocation3], 65536  }
  0x6f   :  { %13478 = vsyncadd [#allocation3], 4294901760 }
  0x70   :  { %13479 = dma.done.wait [#allocation6], 256  }
  0x71   :  { %13480 = vsyncadd [#allocation6], 4294967040 }
  0x72   :  { %13481 = dma.done.wait [#allocation9], 65664  }
  0x73   :  { %13482 = vsyncadd [#allocation9], 4294901632 }
  0x74   :  { %13483 = dma.done.wait [#allocation12], 256  }
  0x75   :  { %13484 = vsyncadd [#allocation12], 4294967040 }
  0x76   :  { %13485 = dma.done.wait [#allocation15], 49280  }
  0x77   :  { %13486 = vsyncadd [#allocation15], 4294918016 }
  0x78   :  { %13487 = dma.done.wait [#allocation18], 96  }
  0x79   :  { %13488 = vsyncadd [#allocation18], 4294967200  ;;  %v225_v0 = vld [vmem:[#allocation2 + $0x1c0] sm:$0xff]  ;;  %v13615_v59 = vld [vmem:[%s14465_s0 + $0x8] sm:$0xff] }
  0x7a   :  { %v229_v1 = vld [vmem:[#allocation2 + $0x1e0] sm:$0xff]  ;;  %v13620_v60 = vld [vmem:[%s14465_s0 + $0x28] sm:$0xff] }
  0x7b   :  { %v353_v2 = vld [vmem:[#allocation2 + $0x5c0] sm:$0xff]  ;;  %v11305_v3 = vcombine.high %v225_v0, %v229_v1  ;;  %v11304_v5 = vcombine.low %v225_v0, %v229_v1  ;;  %v13624_v63 = vcombine.high %v13615_v59, %v13620_v60 }
  0x7c   :  { %v357_v4 = vld [vmem:[#allocation2 + $0x5e0] sm:$0xff] }
  0x7d   :  { %v217_v6 = vld [vmem:[#allocation2 + $0x180] sm:$0xff]  ;;  %v11433_v8 = vcombine.high %v353_v2, %v357_v4  ;;  %v11432_v9 = vcombine.low %v353_v2, %v357_v4  ;;  %3323 = vmatprep.subr.bf16.mxu0 %v11305_v3  ;;  %3398 = vmatprep.mubr.bf16.mxu1 %v13624_v63 }
  0x7e   :  { %v221_v7 = vld [vmem:[#allocation2 + $0x1a0] sm:$0xff]  ;;  %3324 = vmatpush1.bf16.msra.mxu0 %v11304_v5 }
  0x7f   :  { %v11297_v10 = vcombine.high %v217_v6, %v221_v7  ;;  %v345_v11 = vld [vmem:[#allocation2 + $0x580] sm:$0xff]  ;;  %3366 = vmatprep.subr.bf16.mxu1 %v11433_v8  ;;  %v11296_v18 = vcombine.low %v217_v6, %v221_v7 }
  0x80   :  { %v349_v12 = vld [vmem:[#allocation2 + $0x5a0] sm:$0xff]  ;;  %3367 = vmatpush1.bf16.msra.mxu1 %v11432_v9 }
  0x81   :  { %v209_v13 = vld [vmem:[#allocation2 + $0x140] sm:$0xff]  ;;  %v11425_v14 = vcombine.high %v345_v11, %v349_v12  ;;  %3325 = vmatprep.subr.bf16.mxu0 %v11297_v10  ;;  %v11424_v19 = vcombine.low %v345_v11, %v349_v12 }
  0x82   :  { %v213_v15 = vld [vmem:[#allocation2 + $0x160] sm:$0xff]  ;;  %3326 = vmatpush1.bf16.msra.mxu0 %v11296_v18 }
  0x83   :  { %v337_v16 = vld [vmem:[#allocation2 + $0x540] sm:$0xff]  ;;  %v11289_v20 = vcombine.high %v209_v13, %v213_v15  ;;  %3368 = vmatprep.subr.bf16.mxu1 %v11425_v14  ;;  %v11288_v26 = vcombine.low %v209_v13, %v213_v15 }
  0x84   :  { %v341_v17 = vld [vmem:[#allocation2 + $0x560] sm:$0xff]  ;;  %3369 = vmatpush1.bf16.msra.mxu1 %v11424_v19 }
  0x85   :  { %v11417_v21 = vcombine.high %v337_v16, %v341_v17  ;;  %v201_v22 = vld [vmem:[#allocation2 + $0x100] sm:$0xff]  ;;  %3327 = vmatprep.subr.bf16.mxu0 %v11289_v20  ;;  %v11416_v27 = vcombine.low %v337_v16, %v341_v17 }
  0x86   :  { %v205_v23 = vld [vmem:[#allocation2 + $0x120] sm:$0xff]  ;;  %3328 = vmatpush1.bf16.msra.mxu0 %v11288_v26 }
  0x87   :  { %v329_v24 = vld [vmem:[#allocation2 + $0x500] sm:$0xff]  ;;  %v11281_v28 = vcombine.high %v201_v22, %v205_v23  ;;  %3370 = vmatprep.subr.bf16.mxu1 %v11417_v21  ;;  %v11280_v34 = vcombine.low %v201_v22, %v205_v23 }
  0x88   :  { %v333_v25 = vld [vmem:[#allocation2 + $0x520] sm:$0xff]  ;;  %3371 = vmatpush1.bf16.msra.mxu1 %v11416_v27 }
  0x89   :  { %v11409_v29 = vcombine.high %v329_v24, %v333_v25  ;;  %v193_v30 = vld [vmem:[#allocation2 + $0xc0] sm:$0xff]  ;;  %3329 = vmatprep.subr.bf16.mxu0 %v11281_v28  ;;  %v11408_v35 = vcombine.low %v329_v24, %v333_v25 }
  0x8a   :  { %v197_v31 = vld [vmem:[#allocation2 + $0xe0] sm:$0xff]  ;;  %3330 = vmatpush1.bf16.msra.mxu0 %v11280_v34 }
  0x8b   :  { %v321_v32 = vld [vmem:[#allocation2 + $0x4c0] sm:$0xff]  ;;  %v11273_v36 = vcombine.high %v193_v30, %v197_v31  ;;  %3372 = vmatprep.subr.bf16.mxu1 %v11409_v29  ;;  %v11272_v42 = vcombine.low %v193_v30, %v197_v31 }
  0x8c   :  { %v325_v33 = vld [vmem:[#allocation2 + $0x4e0] sm:$0xff]  ;;  %3373 = vmatpush1.bf16.msra.mxu1 %v11408_v35 }
  0x8d   :  { %v11401_v37 = vcombine.high %v321_v32, %v325_v33  ;;  %v185_v38 = vld [vmem:[#allocation2 + $0x80] sm:$0xff]  ;;  %3331 = vmatprep.subr.bf16.mxu0 %v11273_v36  ;;  %v11400_v43 = vcombine.low %v321_v32, %v325_v33 }
  0x8e   :  { %v189_v39 = vld [vmem:[#allocation2 + $0xa0] sm:$0xff]  ;;  %3332 = vmatpush1.bf16.msra.mxu0 %v11272_v42 }
  0x8f   :  { %v313_v40 = vld [vmem:[#allocation2 + $0x480] sm:$0xff]  ;;  %v11265_v44 = vcombine.high %v185_v38, %v189_v39  ;;  %3374 = vmatprep.subr.bf16.mxu1 %v11401_v37  ;;  %v11264_v50 = vcombine.low %v185_v38, %v189_v39 }
  0x90   :  { %v317_v41 = vld [vmem:[#allocation2 + $0x4a0] sm:$0xff]  ;;  %3375 = vmatpush1.bf16.msra.mxu1 %v11400_v43 }
  0x91   :  { %v11393_v45 = vcombine.high %v313_v40, %v317_v41  ;;  %v177_v46 = vld [vmem:[#allocation2 + $0x40] sm:$0xff]  ;;  %3333 = vmatprep.subr.bf16.mxu0 %v11265_v44  ;;  %v11392_v51 = vcombine.low %v313_v40, %v317_v41 }
  0x92   :  { %v181_v47 = vld [vmem:[#allocation2 + $0x60] sm:$0xff]  ;;  %3334 = vmatpush1.bf16.msra.mxu0 %v11264_v50 }
  0x93   :  { %v305_v48 = vld [vmem:[#allocation2 + $0x440] sm:$0xff]  ;;  %v11257_v52 = vcombine.high %v177_v46, %v181_v47  ;;  %3376 = vmatprep.subr.bf16.mxu1 %v11393_v45  ;;  %v11256_v0 = vcombine.low %v177_v46, %v181_v47 }
  0x94   :  { %v309_v49 = vld [vmem:[#allocation2 + $0x460] sm:$0xff]  ;;  %3377 = vmatpush1.bf16.msra.mxu1 %v11392_v51 }
  0x95   :  { %v169_v53 = vld [vmem:[#allocation2] sm:$0xff]  ;;  %v11385_v56 = vcombine.high %v305_v48, %v309_v49  ;;  %3335 = vmatprep.subr.bf16.mxu0 %v11257_v52  ;;  %v11384_v1 = vcombine.low %v305_v48, %v309_v49 }
  0x96   :  { %v13601_v54 = vld [vmem:[%s14465_s0] sm:$0xff]  ;;  %3336 = vmatpush1.bf16.msra.mxu0 %v11256_v0 }
  0x97   :  { %v13606_v55 = vld [vmem:[%s14465_s0 + $0x20] sm:$0xff]  ;;  %3378 = vmatprep.subr.bf16.mxu1 %v11385_v56 }
  0x98   :  { %v173_v57 = vld [vmem:[#allocation2 + $0x20] sm:$0xff]  ;;  %v13610_v58 = vcombine.high %v13601_v54, %v13606_v55  ;;  %3379 = vmatpush1.bf16.msra.mxu1 %v11384_v1 }
  0x99   :  { %v297_v61 = vld [vmem:[#allocation2 + $0x400] sm:$0xff]  ;;  %v11249_v2 = vcombine.high %v169_v53, %v173_v57  ;;  %v11248_v8 = vcombine.low %v169_v53, %v173_v57 }
  0x9a   :  { %v301_v62 = vld [vmem:[#allocation2 + $0x420] sm:$0xff]  ;;  %3355 = vmatprep.mubr.bf16.mxu0 %v13610_v58 }
  0x9b   :  { %v11377_v3 = vcombine.high %v297_v61, %v301_v62  ;;  %v289_v4 = vld [vmem:[#allocation2 + $0x3c0] sm:$0xff]  ;;  %3337 = vmatprep.subr.bf16.mxu0 %v11249_v2  ;;  %v11376_v9 = vcombine.low %v297_v61, %v301_v62 }
  0x9c   :  { %v293_v5 = vld [vmem:[#allocation2 + $0x3e0] sm:$0xff]  ;;  %3338 = vmatpush1.bf16.msra.mxu0 %v11248_v8 }
  0x9d   :  { %v417_v6 = vld [vmem:[#allocation2 + $0x7c0] sm:$0xff]  ;;  %v11369_v10 = vcombine.high %v289_v4, %v293_v5  ;;  %3380 = vmatprep.subr.bf16.mxu1 %v11377_v3  ;;  %v11368_v16 = vcombine.low %v289_v4, %v293_v5 }
  0x9e   :  { %v421_v7 = vld [vmem:[#allocation2 + $0x7e0] sm:$0xff]  ;;  %3381 = vmatpush1.bf16.msra.mxu1 %v11376_v9 }
  0x9f   :  { %v11497_v11 = vcombine.high %v417_v6, %v421_v7  ;;  %v281_v12 = vld [vmem:[#allocation2 + $0x380] sm:$0xff]  ;;  %3339 = vmatprep.subr.bf16.mxu0 %v11369_v10  ;;  %v11496_v17 = vcombine.low %v417_v6, %v421_v7 }
  0xa0   :  { %v285_v13 = vld [vmem:[#allocation2 + $0x3a0] sm:$0xff]  ;;  %3340 = vmatpush2.bf16.msra.mxu0 %v11368_v16 }
  0xa1   :  { %v409_v14 = vld [vmem:[#allocation2 + $0x780] sm:$0xff]  ;;  %v11361_v18 = vcombine.high %v281_v12, %v285_v13  ;;  %3382 = vmatprep.subr.bf16.mxu1 %v11497_v11  ;;  %v11360_v24 = vcombine.low %v281_v12, %v285_v13 }
  0xa2   :  { %v413_v15 = vld [vmem:[#allocation2 + $0x7a0] sm:$0xff]  ;;  %3383 = vmatpush2.bf16.msra.mxu1 %v11496_v17 }
  0xa3   :  { %v11489_v19 = vcombine.high %v409_v14, %v413_v15  ;;  %v273_v20 = vld [vmem:[#allocation2 + $0x340] sm:$0xff]  ;;  %3341 = vmatprep.subr.bf16.mxu0 %v11361_v18  ;;  %v11488_v25 = vcombine.low %v409_v14, %v413_v15 }
  0xa4   :  { %v277_v21 = vld [vmem:[#allocation2 + $0x360] sm:$0xff]  ;;  %3342 = vmatpush2.bf16.msra.mxu0 %v11360_v24  ;;  %v13640_v24 = vld [vmem:[%s14465_s0 + $0x30] sm:$0xff] }
  0xa5   :  { %v401_v22 = vld [vmem:[#allocation2 + $0x740] sm:$0xff]  ;;  %v11353_v26 = vcombine.high %v273_v20, %v277_v21  ;;  %3384 = vmatprep.subr.bf16.mxu1 %v11489_v19  ;;  %v11352_v32 = vcombine.low %v273_v20, %v277_v21  ;;  %v13630_v21 = vcombine.low %v13601_v54, %v13606_v55  ;;  %v13649_v54 = vld [vmem:[%s14465_s0 + $0x18] sm:$0xff] }
  0xa6   :  { %v405_v23 = vld [vmem:[#allocation2 + $0x760] sm:$0xff]  ;;  %3385 = vmatpush2.bf16.msra.mxu1 %v11488_v25  ;;  %v13644_v25 = vcombine.low %v13615_v59, %v13620_v60  ;;  %v13654_v55 = vld [vmem:[%s14465_s0 + $0x38] sm:$0xff] }
  0xa7   :  { %v11481_v27 = vcombine.high %v401_v22, %v405_v23  ;;  %v265_v28 = vld [vmem:[#allocation2 + $0x300] sm:$0xff]  ;;  %3343 = vmatprep.subr.bf16.mxu0 %v11353_v26  ;;  %v11480_v33 = vcombine.low %v401_v22, %v405_v23  ;;  %v13635_v23 = vld [vmem:[%s14465_s0 + $0x10] sm:$0xff]  ;;  %s13505_s0 = smov [#allocation19]  }
  0xa8   :  { %v269_v29 = vld [vmem:[#allocation2 + $0x320] sm:$0xff]  ;;  %3344 = vmatpush2.bf16.msra.mxu0 %v11352_v32  ;;  %v13658_v60 = vcombine.high %v13635_v23, %v13640_v24  ;;  %s11223_s14 = sshll.u32 %s13505_s0, 4  ;;  %s11224_s14 = int_to_ptr.vmem [resolvable:$true] %s11223_s14 }
  0xa9   :  { %v393_v30 = vld [vmem:[#allocation2 + $0x700] sm:$0xff]  ;;  %v11345_v34 = vcombine.high %v265_v28, %v269_v29  ;;  %3386 = vmatprep.subr.bf16.mxu1 %v11481_v27  ;;  %v11344_v40 = vcombine.low %v265_v28, %v269_v29  ;;  %s13457_s3 = scalar_lea.vmem %s11224_s14, 1536  ;;  %p13462_p9 = scmp.lt.s32.totalorder %s11224_s14, %s11224_s14 }
  0xaa   :  { %v397_v31 = vld [vmem:[#allocation2 + $0x720] sm:$0xff]  ;;  %3387 = vmatpush2.bf16.msra.mxu1 %v11480_v33  ;;  %v13663_v33 = vcombine.high %v13649_v54, %v13654_v55  ;;  %p13458_p8 = scmp.ne.s32.totalorder %s11224_s14, %s13457_s3  ;;  %p13463_p10 = scmp.lt.s32.totalorder %s13457_s3, %s13457_s3 }
  0xab   :  { %v11473_v35 = vcombine.high %v393_v30, %v397_v31  ;;  %v257_v36 = vld [vmem:[#allocation2 + $0x2c0] sm:$0xff]  ;;  %3345 = vmatprep.subr.bf16.mxu0 %v11345_v34  ;;  %v11472_v41 = vcombine.low %v393_v30, %v397_v31 }
  0xac   :  { %v261_v37 = vld [vmem:[#allocation2 + $0x2e0] sm:$0xff]  ;;  %3346 = vmatpush2.bf16.msra.mxu0 %v11344_v40  ;;  %p13464_p11 = por %p13463_p10, %p13462_p9 }
  0xad   :  { %v385_v38 = vld [vmem:[#allocation2 + $0x6c0] sm:$0xff]  ;;  %v11337_v42 = vcombine.high %v257_v36, %v261_v37  ;;  %3388 = vmatprep.subr.bf16.mxu1 %v11473_v35  ;;  %v11336_v48 = vcombine.low %v257_v36, %v261_v37 }
  0xae   :  { %v389_v39 = vld [vmem:[#allocation2 + $0x6e0] sm:$0xff]  ;;  %3389 = vmatpush2.bf16.msra.mxu1 %v11472_v41  ;;  %p13465_p12 = pnand %p13464_p11, %p13458_p8 }
  0xaf   :  { %v11465_v43 = vcombine.high %v385_v38, %v389_v39  ;;  %v249_v44 = vld [vmem:[#allocation2 + $0x280] sm:$0xff]  ;;  %3347 = vmatprep.subr.bf16.mxu0 %v11337_v42  ;;  %v11464_v49 = vcombine.low %v385_v38, %v389_v39 }
  0xb0   :  { %v253_v45 = vld [vmem:[#allocation2 + $0x2a0] sm:$0xff]  ;;  %3348 = vmatpush2.bf16.msra.mxu0 %v11336_v48 }
  0xb1   :  { %v377_v46 = vld [vmem:[#allocation2 + $0x680] sm:$0xff]  ;;  %v11329_v50 = vcombine.high %v249_v44, %v253_v45  ;;  %3390 = vmatprep.subr.bf16.mxu1 %v11465_v43  ;;  %v11328_v61 = vcombine.low %v249_v44, %v253_v45 }
  0xb2   :  { %v381_v47 = vld [vmem:[#allocation2 + $0x6a0] sm:$0xff]  ;;  %3391 = vmatpush2.bf16.msra.mxu1 %v11464_v49 }
  0xb3   :  { %v11457_v51 = vcombine.high %v377_v46, %v381_v47  ;;  %v241_v52 = vld [vmem:[#allocation2 + $0x240] sm:$0xff]  ;;  %3349 = vmatprep.subr.bf16.mxu0 %v11329_v50  ;;  %v11456_v62 = vcombine.low %v377_v46, %v381_v47 }
  0xb4   :  { %v245_v53 = vld [vmem:[#allocation2 + $0x260] sm:$0xff]  ;;  %3350 = vmatpush2.bf16.msra.mxu0 %v11328_v61 }
  0xb5   :  { %v369_v56 = vld [vmem:[#allocation2 + $0x640] sm:$0xff]  ;;  %v11321_v0 = vcombine.high %v241_v52, %v245_v53  ;;  %3392 = vmatprep.subr.bf16.mxu1 %v11457_v51  ;;  %v11320_v6 = vcombine.low %v241_v52, %v245_v53 }
  0xb6   :  { %v373_v57 = vld [vmem:[#allocation2 + $0x660] sm:$0xff]  ;;  %3393 = vmatpush2.bf16.msra.mxu1 %v11456_v62 }
  0xb7   :  { %v11449_v1 = vcombine.high %v369_v56, %v373_v57  ;;  %v233_v2 = vld [vmem:[#allocation2 + $0x200] sm:$0xff]  ;;  %3351 = vmatprep.subr.bf16.mxu0 %v11321_v0  ;;  %v11448_v7 = vcombine.low %v369_v56, %v373_v57 }
  0xb8   :  { %v237_v3 = vld [vmem:[#allocation2 + $0x220] sm:$0xff]  ;;  %3352 = vmatpush2.bf16.msra.mxu0 %v11320_v6 }
  0xb9   :  { %v361_v4 = vld [vmem:[#allocation2 + $0x600] sm:$0xff]  ;;  %v11313_v8 = vcombine.high %v233_v2, %v237_v3  ;;  %3394 = vmatprep.subr.bf16.mxu1 %v11449_v1  ;;  %v11312_v14 = vcombine.low %v233_v2, %v237_v3 }
  0xba   :  { %v365_v5 = vld [vmem:[#allocation2 + $0x620] sm:$0xff]  ;;  %3395 = vmatpush2.bf16.msra.mxu1 %v11448_v7 }
  0xbb   :  { %v11441_v9 = vcombine.high %v361_v4, %v365_v5  ;;  %v481_v10 = vld [vmem:[#allocation2 + $0x9c0] sm:$0xff]  ;;  %3353 = vmatprep.subr.bf16.mxu0 %v11313_v8  ;;  %v11440_v15 = vcombine.low %v361_v4, %v365_v5 }
  0xbc   :  { %v485_v11 = vld [vmem:[#allocation2 + $0x9e0] sm:$0xff]  ;;  %3354 = vmatpush2.bf16.msra.mxu0 %v11312_v14 }
  0xbd   :  { %v609_v12 = vld [vmem:[#allocation2 + $0xdc0] sm:$0xff]  ;;  %v11561_v16 = vcombine.high %v481_v10, %v485_v11  ;;  %3396 = vmatprep.subr.bf16.mxu1 %v11441_v9  ;;  %v11560_v26 = vcombine.low %v481_v10, %v485_v11 }
  0xbe   :  { %v613_v13 = vld [vmem:[#allocation2 + $0xde0] sm:$0xff]  ;;  %3397 = vmatpush2.bf16.msra.mxu1 %v11440_v15 }
  0xbf   :  { %v11689_v17 = vcombine.high %v609_v12, %v613_v13  ;;  %v473_v18 = vld [vmem:[#allocation2 + $0x980] sm:$0xff]  ;;  %3409 = vmatprep.subr.bf16.mxu0 %v11561_v16  ;;  %v11688_v27 = vcombine.low %v609_v12, %v613_v13  ;;  %3356 = vmatmul.mubr.bf16.vlgmr.msra.gmra.mxu0 %v13630_v21 }
  0xc0   :  { %v477_v19 = vld [vmem:[#allocation2 + $0x9a0] sm:$0xff]  ;;  %3410 = vmatpush1.bf16.msra.mxu0 %v11560_v26  ;;  %3441 = vmatprep.mubr.bf16.mxu0 %v13658_v60 }
  0xc1   :  { %v601_v20 = vld [vmem:[#allocation2 + $0xd80] sm:$0xff]  ;;  %v11553_v28 = vcombine.high %v473_v18, %v477_v19  ;;  %3452 = vmatprep.subr.bf16.mxu1 %v11689_v17  ;;  %3399 = vmatmul.mubr.bf16.vlgmr.msra.gmra.mxu1 %v13644_v25  ;;  %v11552_v34 = vcombine.low %v473_v18, %v477_v19 }
  0xc2   :  { %v605_v22 = vld [vmem:[#allocation2 + $0xda0] sm:$0xff]  ;;  %3453 = vmatpush1.bf16.msra.mxu1 %v11688_v27  ;;  %3484 = vmatprep.mubr.bf16.mxu1 %v13663_v33 }
  0xc3   :  { %v11681_v29 = vcombine.high %v601_v20, %v605_v22  ;;  %v465_v30 = vld [vmem:[#allocation2 + $0x940] sm:$0xff]  ;;  %3411 = vmatprep.subr.bf16.mxu0 %v11553_v28  ;;  %v11680_v35 = vcombine.low %v601_v20, %v605_v22 }
  0xc4   :  { %v469_v59 = vld [vmem:[#allocation2 + $0x960] sm:$0xff]  ;;  %3412 = vmatpush1.bf16.msra.mxu0 %v11552_v34 }
  0xc5   :  { %v593_v31 = vld [vmem:[#allocation2 + $0xd40] sm:$0xff]  ;;  %v11545_v36 = vcombine.high %v465_v30, %v469_v59  ;;  %3454 = vmatprep.subr.bf16.mxu1 %v11681_v29  ;;  %v11544_v42 = vcombine.low %v465_v30, %v469_v59 }
  0xc6   :  { %v597_v32 = vld [vmem:[#allocation2 + $0xd60] sm:$0xff]  ;;  %3455 = vmatpush1.bf16.msra.mxu1 %v11680_v35 }
  0xc7   :  { %v457_v37 = vld [vmem:[#allocation2 + $0x900] sm:$0xff]  ;;  %v11673_v40 = vcombine.high %v593_v31, %v597_v32  ;;  %3413 = vmatprep.subr.bf16.mxu0 %v11545_v36  ;;  %v11672_v43 = vcombine.low %v593_v31, %v597_v32 }
  0xc8   :  { %v461_v38 = vld [vmem:[#allocation2 + $0x920] sm:$0xff]  ;;  %3414 = vmatpush1.bf16.msra.mxu0 %v11544_v42 }
  0xc9   :  { %v585_v39 = vld [vmem:[#allocation2 + $0xd00] sm:$0xff]  ;;  %v11537_v44 = vcombine.high %v457_v37, %v461_v38  ;;  %3456 = vmatprep.subr.bf16.mxu1 %v11673_v40  ;;  %v11536_v50 = vcombine.low %v457_v37, %v461_v38 }
  0xca   :  { %v589_v41 = vld [vmem:[#allocation2 + $0xd20] sm:$0xff]  ;;  %3457 = vmatpush1.bf16.msra.mxu1 %v11672_v43 }
  0xcb   :  { %v449_v45 = vld [vmem:[#allocation2 + $0x8c0] sm:$0xff]  ;;  %v11665_v48 = vcombine.high %v585_v39, %v589_v41  ;;  %3415 = vmatprep.subr.bf16.mxu0 %v11537_v44  ;;  %v11664_v51 = vcombine.low %v585_v39, %v589_v41 }
  0xcc   :  { %v453_v46 = vld [vmem:[#allocation2 + $0x8e0] sm:$0xff]  ;;  %3416 = vmatpush1.bf16.msra.mxu0 %v11536_v50 }
  0xcd   :  { %v577_v47 = vld [vmem:[#allocation2 + $0xcc0] sm:$0xff]  ;;  %v11529_v52 = vcombine.high %v449_v45, %v453_v46  ;;  %3458 = vmatprep.subr.bf16.mxu1 %v11665_v48  ;;  %v11528_v0 = vcombine.low %v449_v45, %v453_v46 }
  0xce   :  { %v581_v49 = vld [vmem:[#allocation2 + $0xce0] sm:$0xff]  ;;  %3459 = vmatpush1.bf16.msra.mxu1 %v11664_v51 }
  0xcf   :  { %v441_v53 = vld [vmem:[#allocation2 + $0x880] sm:$0xff]  ;;  %v11657_v61 = vcombine.high %v577_v47, %v581_v49  ;;  %3417 = vmatprep.subr.bf16.mxu0 %v11529_v52  ;;  %v11656_v1 = vcombine.low %v577_v47, %v581_v49 }
  0xd0   :  { %v445_v56 = vld [vmem:[#allocation2 + $0x8a0] sm:$0xff]  ;;  %3418 = vmatpush1.bf16.msra.mxu0 %v11528_v0 }
  0xd1   :  { %v569_v57 = vld [vmem:[#allocation2 + $0xc80] sm:$0xff]  ;;  %v11521_v2 = vcombine.high %v441_v53, %v445_v56  ;;  %3460 = vmatprep.subr.bf16.mxu1 %v11657_v61  ;;  %v11520_v8 = vcombine.low %v441_v53, %v445_v56 }
  0xd2   :  { %v573_v62 = vld [vmem:[#allocation2 + $0xca0] sm:$0xff]  ;;  %3461 = vmatpush1.bf16.msra.mxu1 %v11656_v1 }
  0xd3   :  { %v433_v3 = vld [vmem:[#allocation2 + $0x840] sm:$0xff]  ;;  %v11649_v6 = vcombine.high %v569_v57, %v573_v62  ;;  %3419 = vmatprep.subr.bf16.mxu0 %v11521_v2  ;;  %v11648_v9 = vcombine.low %v569_v57, %v573_v62 }
  0xd4   :  { %v437_v4 = vld [vmem:[#allocation2 + $0x860] sm:$0xff]  ;;  %3420 = vmatpush1.bf16.msra.mxu0 %v11520_v8 }
  0xd5   :  { %v561_v5 = vld [vmem:[#allocation2 + $0xc40] sm:$0xff]  ;;  %v11513_v10 = vcombine.high %v433_v3, %v437_v4  ;;  %3462 = vmatprep.subr.bf16.mxu1 %v11649_v6  ;;  %v11512_v16 = vcombine.low %v433_v3, %v437_v4 }
  0xd6   :  { %v565_v7 = vld [vmem:[#allocation2 + $0xc60] sm:$0xff]  ;;  %3463 = vmatpush1.bf16.msra.mxu1 %v11648_v9 }
  0xd7   :  { %v425_v11 = vld [vmem:[#allocation2 + $0x800] sm:$0xff]  ;;  %v11641_v14 = vcombine.high %v561_v5, %v565_v7  ;;  %3421 = vmatprep.subr.bf16.mxu0 %v11513_v10  ;;  %v11640_v17 = vcombine.low %v561_v5, %v565_v7 }
  0xd8   :  { %v429_v12 = vld [vmem:[#allocation2 + $0x820] sm:$0xff]  ;;  %3422 = vmatpush1.bf16.msra.mxu0 %v11512_v16 }
  0xd9   :  { %v553_v13 = vld [vmem:[#allocation2 + $0xc00] sm:$0xff]  ;;  %v11505_v18 = vcombine.high %v425_v11, %v429_v12  ;;  %3464 = vmatprep.subr.bf16.mxu1 %v11641_v14  ;;  %v11504_v28 = vcombine.low %v425_v11, %v429_v12 }
  0xda   :  { %v557_v15 = vld [vmem:[#allocation2 + $0xc20] sm:$0xff]  ;;  %3465 = vmatpush1.bf16.msra.mxu1 %v11640_v17 }
  0xdb   :  { %v545_v19 = vld [vmem:[#allocation2 + $0xbc0] sm:$0xff]  ;;  %v11633_v26 = vcombine.high %v553_v13, %v557_v15  ;;  %3423 = vmatprep.subr.bf16.mxu0 %v11505_v18  ;;  %v11632_v29 = vcombine.low %v553_v13, %v557_v15 }
  0xdc   :  { %v549_v20 = vld [vmem:[#allocation2 + $0xbe0] sm:$0xff]  ;;  %3424 = vmatpush1.bf16.msra.mxu0 %v11504_v28 }
  0xdd   :  { %v673_v22 = vld [vmem:[#allocation2 + $0xfc0] sm:$0xff]  ;;  %v11625_v30 = vcombine.high %v545_v19, %v549_v20  ;;  %3466 = vmatprep.subr.bf16.mxu1 %v11633_v26  ;;  %v11624_v36 = vcombine.low %v545_v19, %v549_v20 }
  0xde   :  { %v677_v27 = vld [vmem:[#allocation2 + $0xfe0] sm:$0xff]  ;;  %3467 = vmatpush1.bf16.msra.mxu1 %v11632_v29 }
  0xdf   :  { %v537_v59 = vld [vmem:[#allocation2 + $0xb80] sm:$0xff]  ;;  %v11753_v34 = vcombine.high %v673_v22, %v677_v27  ;;  %3425 = vmatprep.subr.bf16.mxu0 %v11625_v30  ;;  %v11752_v37 = vcombine.low %v673_v22, %v677_v27 }
  0xe0   :  { %v541_v31 = vld [vmem:[#allocation2 + $0xba0] sm:$0xff]  ;;  %3426 = vmatpush2.bf16.msra.mxu0 %v11624_v36 }
  0xe1   :  { %v665_v32 = vld [vmem:[#allocation2 + $0xf80] sm:$0xff]  ;;  %v11617_v38 = vcombine.high %v537_v59, %v541_v31  ;;  %3468 = vmatprep.subr.bf16.mxu1 %v11753_v34  ;;  %v11616_v44 = vcombine.low %v537_v59, %v541_v31  ;;  %v230_v34 = vld [vmem:[#allocation2 + $0x1e8] sm:$0xff] }
  0xe2   :  { %v669_v35 = vld [vmem:[#allocation2 + $0xfa0] sm:$0xff]  ;;  %3469 = vmatpush2.bf16.msra.mxu1 %v11752_v37  ;;  %v358_v37 = vld [vmem:[#allocation2 + $0x5e8] sm:$0xff] }
  0xe3   :  { %v529_v39 = vld [vmem:[#allocation2 + $0xb40] sm:$0xff]  ;;  %v11745_v42 = vcombine.high %v665_v32, %v669_v35  ;;  %3427 = vmatprep.subr.bf16.mxu0 %v11617_v38  ;;  %v11744_v45 = vcombine.low %v665_v32, %v669_v35  ;;  %v226_v32 = vld [vmem:[#allocation2 + $0x1c8] sm:$0xff] }
  0xe4   :  { %v533_v40 = vld [vmem:[#allocation2 + $0xb60] sm:$0xff]  ;;  %3428 = vmatpush2.bf16.msra.mxu0 %v11616_v44  ;;  %v354_v35 = vld [vmem:[#allocation2 + $0x5c8] sm:$0xff] }
  0xe5   :  { %v657_v41 = vld [vmem:[#allocation2 + $0xf40] sm:$0xff]  ;;  %v11609_v46 = vcombine.high %v529_v39, %v533_v40  ;;  %3470 = vmatprep.subr.bf16.mxu1 %v11745_v42  ;;  %v11608_v52 = vcombine.low %v529_v39, %v533_v40  ;;  %v11307_v40 = vcombine.high %v226_v32, %v230_v34  ;;  %v222_v42 = vld [vmem:[#allocation2 + $0x1a8] sm:$0xff]  ;;  %v11435_v44 = vcombine.high %v354_v35, %v358_v37 }
  0xe6   :  { %v661_v43 = vld [vmem:[#allocation2 + $0xf60] sm:$0xff]  ;;  %3471 = vmatpush2.bf16.msra.mxu1 %v11744_v45  ;;  %v350_v45 = vld [vmem:[#allocation2 + $0x5a8] sm:$0xff] }
  0xe7   :  { %v521_v47 = vld [vmem:[#allocation2 + $0xb00] sm:$0xff]  ;;  %v11737_v50 = vcombine.high %v657_v41, %v661_v43  ;;  %3429 = vmatprep.subr.bf16.mxu0 %v11609_v46  ;;  %v11736_v53 = vcombine.low %v657_v41, %v661_v43  ;;  %v218_v41 = vld [vmem:[#allocation2 + $0x188] sm:$0xff]  ;;  %v13670_v46 = vcombine.low %v13635_v23, %v13640_v24 }
  0xe8   :  { %v525_v48 = vld [vmem:[#allocation2 + $0xb20] sm:$0xff]  ;;  %3430 = vmatpush2.bf16.msra.mxu0 %v11608_v52  ;;  %v346_v43 = vld [vmem:[#allocation2 + $0x588] sm:$0xff]  ;;  %v11298_v23 = vcombine.low %v218_v41, %v222_v42 }
  0xe9   :  { %v649_v49 = vld [vmem:[#allocation2 + $0xf00] sm:$0xff]  ;;  %v11601_v56 = vcombine.high %v521_v47, %v525_v48  ;;  %3472 = vmatprep.subr.bf16.mxu1 %v11737_v50  ;;  %v11600_v2 = vcombine.low %v521_v47, %v525_v48  ;;  %v13674_v47 = vcombine.low %v13649_v54, %v13654_v55  ;;  %v11306_v48 = vcombine.low %v226_v32, %v230_v34  ;;  %v214_v52 = vld [vmem:[#allocation2 + $0x168] sm:$0xff] }
  0xea   :  { %v653_v51 = vld [vmem:[#allocation2 + $0xf20] sm:$0xff]  ;;  %3473 = vmatpush2.bf16.msra.mxu1 %v11736_v53  ;;  %v11299_v50 = vcombine.high %v218_v41, %v222_v42  ;;  %v11427_v53 = vcombine.high %v346_v43, %v350_v45  ;;  %v11426_v24 = vcombine.low %v346_v43, %v350_v45  ;;  %v202_v55 = vld [vmem:[#allocation2 + $0x108] sm:$0xff] }
  0xeb   :  { %v513_v57 = vld [vmem:[#allocation2 + $0xac0] sm:$0xff]  ;;  %v11729_v0 = vcombine.high %v649_v49, %v653_v51  ;;  %3431 = vmatprep.subr.bf16.mxu0 %v11601_v56  ;;  %v11728_v3 = vcombine.low %v649_v49, %v653_v51  ;;  %v11434_v49 = vcombine.low %v354_v35, %v358_v37  ;;  %v210_v51 = vld [vmem:[#allocation2 + $0x148] sm:$0xff] }
  0xec   :  { %v517_v61 = vld [vmem:[#allocation2 + $0xae0] sm:$0xff]  ;;  %3432 = vmatpush2.bf16.msra.mxu0 %v11600_v2  ;;  %v338_v56 = vld [vmem:[#allocation2 + $0x548] sm:$0xff]  ;;  %v11291_v54 = vcombine.high %v210_v51, %v214_v52  ;;  %v11290_v2 = vcombine.low %v210_v51, %v214_v52 }
  0xed   :  { %v641_v62 = vld [vmem:[#allocation2 + $0xec0] sm:$0xff]  ;;  %v11593_v4 = vcombine.high %v513_v57, %v517_v61  ;;  %3474 = vmatprep.subr.bf16.mxu1 %v11729_v0  ;;  %v11592_v10 = vcombine.low %v513_v57, %v517_v61  ;;  %v342_v57 = vld [vmem:[#allocation2 + $0x568] sm:$0xff] }
  0xee   :  { %v645_v1 = vld [vmem:[#allocation2 + $0xee0] sm:$0xff]  ;;  %3475 = vmatpush2.bf16.msra.mxu1 %v11728_v3  ;;  %v206_v61 = vld [vmem:[#allocation2 + $0x128] sm:$0xff]  ;;  %v11419_v0 = vcombine.high %v338_v56, %v342_v57  ;;  %v11418_v3 = vcombine.low %v338_v56, %v342_v57 }
  0xef   :  { %v505_v5 = vld [vmem:[#allocation2 + $0xa80] sm:$0xff]  ;;  %v11721_v8 = vcombine.high %v641_v62, %v645_v1  ;;  %3433 = vmatprep.subr.bf16.mxu0 %v11593_v4  ;;  %v11720_v11 = vcombine.low %v641_v62, %v645_v1  ;;  %v330_v62 = vld [vmem:[#allocation2 + $0x508] sm:$0xff]  ;;  %v11283_v4 = vcombine.high %v202_v55, %v206_v61 }
  0xf0   :  { %v509_v6 = vld [vmem:[#allocation2 + $0xaa0] sm:$0xff]  ;;  %3434 = vmatpush2.bf16.msra.mxu0 %v11592_v10  ;;  %v334_v1 = vld [vmem:[#allocation2 + $0x528] sm:$0xff]  ;;  %v11282_v10 = vcombine.low %v202_v55, %v206_v61 }
  0xf1   :  { %v633_v7 = vld [vmem:[#allocation2 + $0xe80] sm:$0xff]  ;;  %v11585_v12 = vcombine.high %v505_v5, %v509_v6  ;;  %3476 = vmatprep.subr.bf16.mxu1 %v11721_v8  ;;  %v11584_v18 = vcombine.low %v505_v5, %v509_v6  ;;  %v194_v5 = vld [vmem:[#allocation2 + $0xc8] sm:$0xff]  ;;  %v11411_v8 = vcombine.high %v330_v62, %v334_v1 }
  0xf2   :  { %v637_v9 = vld [vmem:[#allocation2 + $0xea0] sm:$0xff]  ;;  %3477 = vmatpush2.bf16.msra.mxu1 %v11720_v11  ;;  %v198_v6 = vld [vmem:[#allocation2 + $0xe8] sm:$0xff]  ;;  %v11410_v11 = vcombine.low %v330_v62, %v334_v1 }
  0xf3   :  { %v497_v13 = vld [vmem:[#allocation2 + $0xa40] sm:$0xff]  ;;  %v11713_v16 = vcombine.high %v633_v7, %v637_v9  ;;  %3435 = vmatprep.subr.bf16.mxu0 %v11585_v12  ;;  %v11712_v19 = vcombine.low %v633_v7, %v637_v9  ;;  %v322_v7 = vld [vmem:[#allocation2 + $0x4c8] sm:$0xff]  ;;  %v11275_v12 = vcombine.high %v194_v5, %v198_v6 }
  0xf4   :  { %v501_v14 = vld [vmem:[#allocation2 + $0xa60] sm:$0xff]  ;;  %3436 = vmatpush2.bf16.msra.mxu0 %v11584_v18  ;;  %v326_v9 = vld [vmem:[#allocation2 + $0x4e8] sm:$0xff]  ;;  %v11274_v18 = vcombine.low %v194_v5, %v198_v6 }
  0xf5   :  { %v625_v15 = vld [vmem:[#allocation2 + $0xe40] sm:$0xff]  ;;  %v11577_v20 = vcombine.high %v497_v13, %v501_v14  ;;  %3478 = vmatprep.subr.bf16.mxu1 %v11713_v16  ;;  %v11576_v30 = vcombine.low %v497_v13, %v501_v14  ;;  %v186_v13 = vld [vmem:[#allocation2 + $0x88] sm:$0xff]  ;;  %v11403_v16 = vcombine.high %v322_v7, %v326_v9 }
  0xf6   :  { %v629_v17 = vld [vmem:[#allocation2 + $0xe60] sm:$0xff]  ;;  %3479 = vmatpush2.bf16.msra.mxu1 %v11712_v19  ;;  %v190_v14 = vld [vmem:[#allocation2 + $0xa8] sm:$0xff]  ;;  %v11402_v19 = vcombine.low %v322_v7, %v326_v9 }
  0xf7   :  { %v489_v22 = vld [vmem:[#allocation2 + $0xa00] sm:$0xff]  ;;  %v11705_v28 = vcombine.high %v625_v15, %v629_v17  ;;  %3437 = vmatprep.subr.bf16.mxu0 %v11577_v20  ;;  %v11704_v59 = vcombine.low %v625_v15, %v629_v17  ;;  %v314_v15 = vld [vmem:[#allocation2 + $0x488] sm:$0xff]  ;;  %v11267_v20 = vcombine.high %v186_v13, %v190_v14 }
  0xf8   :  { %v493_v26 = vld [vmem:[#allocation2 + $0xa20] sm:$0xff]  ;;  %3438 = vmatpush2.bf16.msra.mxu0 %v11576_v30  ;;  %v318_v17 = vld [vmem:[#allocation2 + $0x4a8] sm:$0xff]  ;;  %v11266_v30 = vcombine.low %v186_v13, %v190_v14 }
  0xf9   :  { %v617_v27 = vld [vmem:[#allocation2 + $0xe00] sm:$0xff]  ;;  %v11569_v31 = vcombine.high %v489_v22, %v493_v26  ;;  %3480 = vmatprep.subr.bf16.mxu1 %v11705_v28  ;;  %v11568_v38 = vcombine.low %v489_v22, %v493_v26  ;;  %v178_v22 = vld [vmem:[#allocation2 + $0x48] sm:$0xff]  ;;  %v11395_v28 = vcombine.high %v314_v15, %v318_v17 }
  0xfa   :  { %v621_v29 = vld [vmem:[#allocation2 + $0xe20] sm:$0xff]  ;;  %3481 = vmatpush2.bf16.msra.mxu1 %v11704_v59  ;;  %v182_v26 = vld [vmem:[#allocation2 + $0x68] sm:$0xff]  ;;  %v11394_v59 = vcombine.low %v314_v15, %v318_v17 }
  0xfb   :  { %v11697_v36 = vcombine.high %v617_v27, %v621_v29  ;;  %3439 = vmatprep.subr.bf16.mxu0 %v11569_v31  ;;  %v11696_v39 = vcombine.low %v617_v27, %v621_v29  ;;  %v306_v27 = vld [vmem:[#allocation2 + $0x448] sm:$0xff]  ;;  %v11259_v31 = vcombine.high %v178_v22, %v182_v26 }
  0xfc   :  { %3440 = vmatpush2.bf16.msra.mxu0 %v11568_v38  ;;  %v310_v29 = vld [vmem:[#allocation2 + $0x468] sm:$0xff]  ;;  %v11258_v38 = vcombine.low %v178_v22, %v182_v26 }
  0xfd   :  { %3482 = vmatprep.subr.bf16.mxu1 %v11697_v36  ;;  %3495 = vmatprep.subr.bf16.mxu0 %v11307_v40  ;;  %v170_v32 = vld [vmem:[#allocation2 + $0x8] sm:$0xff]  ;;  %v11387_v36 = vcombine.high %v306_v27, %v310_v29 }
  0xfe   :  { %3483 = vmatpush2.bf16.msra.mxu1 %v11696_v39  ;;  %v174_v34 = vld [vmem:[#allocation2 + $0x28] sm:$0xff]  ;;  %v11386_v39 = vcombine.low %v306_v27, %v310_v29 }
  0xff   :  { %3538 = vmatprep.subr.bf16.mxu1 %v11435_v44  ;;  %3442 = vmatmul.mubr.bf16.vlgmr.msra.gmra.mxu0 %v13670_v46  ;;  %v298_v35 = vld [vmem:[#allocation2 + $0x408] sm:$0xff]  ;;  %v11251_v40 = vcombine.high %v170_v32, %v174_v34 }
 0x100   :  { %3496 = vmatpush1.bf16.msra.mxu0 %v11306_v48  ;;  %3527 = vmatprep.mubr.bf16.mxu0 %v13610_v58  ;;  %v302_v37 = vld [vmem:[#allocation2 + $0x428] sm:$0xff]  ;;  %v11250_v48 = vcombine.low %v170_v32, %v174_v34 }
 0x101   :  { %3485 = vmatmul.mubr.bf16.vlgmr.msra.gmra.mxu1 %v13674_v47  ;;  %3497 = vmatprep.subr.bf16.mxu0 %v11299_v50  ;;  %v290_v41 = vld [vmem:[#allocation2 + $0x3c8] sm:$0xff]  ;;  %v11379_v44 = vcombine.high %v298_v35, %v302_v37 }
 0x102   :  { %3539 = vmatpush1.bf16.msra.mxu1 %v11434_v49  ;;  %3570 = vmatprep.mubr.bf16.mxu1 %v13624_v63  ;;  %v294_v42 = vld [vmem:[#allocation2 + $0x3e8] sm:$0xff]  ;;  %v11378_v49 = vcombine.low %v298_v35, %v302_v37 }
 0x103   :  { %3540 = vmatprep.subr.bf16.mxu1 %v11427_v53  ;;  %v418_v43 = vld [vmem:[#allocation2 + $0x7c8] sm:$0xff]  ;;  %v11371_v50 = vcombine.high %v290_v41, %v294_v42 }
 0x104   :  { %3498 = vmatpush1.bf16.msra.mxu0 %v11298_v23  ;;  %v422_v45 = vld [vmem:[#allocation2 + $0x7e8] sm:$0xff]  ;;  %v11370_v23 = vcombine.low %v290_v41, %v294_v42 }
 0x105   :  { %3499 = vmatprep.subr.bf16.mxu0 %v11291_v54  ;;  %v282_v51 = vld [vmem:[#allocation2 + $0x388] sm:$0xff]  ;;  %v11499_v56 = vcombine.high %v418_v43, %v422_v45 }
 0x106   :  { %3541 = vmatpush1.bf16.msra.mxu1 %v11426_v24  ;;  %v286_v52 = vld [vmem:[#allocation2 + $0x3a8] sm:$0xff]  ;;  %v11498_v24 = vcombine.low %v418_v43, %v422_v45 }
 0x107   :  { %3542 = vmatprep.subr.bf16.mxu1 %v11419_v0  ;;  %v410_v53 = vld [vmem:[#allocation2 + $0x788] sm:$0xff]  ;;  %v11363_v54 = vcombine.high %v282_v51, %v286_v52 }
 0x108   :  { %3500 = vmatpush1.bf16.msra.mxu0 %v11290_v2  ;;  %v414_v57 = vld [vmem:[#allocation2 + $0x7a8] sm:$0xff]  ;;  %v11362_v2 = vcombine.low %v282_v51, %v286_v52 }
 0x109   :  { %3501 = vmatprep.subr.bf16.mxu0 %v11283_v4  ;;  %v274_v55 = vld [vmem:[#allocation2 + $0x348] sm:$0xff]  ;;  %v11491_v0 = vcombine.high %v410_v53, %v414_v57 }
 0x10a   :  { %3543 = vmatpush1.bf16.msra.mxu1 %v11418_v3  ;;  %v278_v61 = vld [vmem:[#allocation2 + $0x368] sm:$0xff]  ;;  %v11490_v3 = vcombine.low %v410_v53, %v414_v57 }
 0x10b   :  { %3544 = vmatprep.subr.bf16.mxu1 %v11411_v8  ;;  %v402_v62 = vld [vmem:[#allocation2 + $0x748] sm:$0xff]  ;;  %v11355_v4 = vcombine.high %v274_v55, %v278_v61 }
 0x10c   :  { %3502 = vmatpush1.bf16.msra.mxu0 %v11282_v10  ;;  %v406_v1 = vld [vmem:[#allocation2 + $0x768] sm:$0xff]  ;;  %v11354_v10 = vcombine.low %v274_v55, %v278_v61 }
 0x10d   :  { %3503 = vmatprep.subr.bf16.mxu0 %v11275_v12  ;;  %v266_v5 = vld [vmem:[#allocation2 + $0x308] sm:$0xff]  ;;  %v11483_v8 = vcombine.high %v402_v62, %v406_v1 }
 0x10e   :  { %3545 = vmatpush1.bf16.msra.mxu1 %v11410_v11  ;;  %v270_v6 = vld [vmem:[#allocation2 + $0x328] sm:$0xff]  ;;  %v11482_v11 = vcombine.low %v402_v62, %v406_v1 }
 0x10f   :  { %3546 = vmatprep.subr.bf16.mxu1 %v11403_v16  ;;  %v394_v7 = vld [vmem:[#allocation2 + $0x708] sm:$0xff]  ;;  %v11347_v12 = vcombine.high %v266_v5, %v270_v6 }
 0x110   :  { %3504 = vmatpush1.bf16.msra.mxu0 %v11274_v18  ;;  %v398_v9 = vld [vmem:[#allocation2 + $0x728] sm:$0xff]  ;;  %v11346_v18 = vcombine.low %v266_v5, %v270_v6 }
 0x111   :  { %3505 = vmatprep.subr.bf16.mxu0 %v11267_v20  ;;  %v258_v13 = vld [vmem:[#allocation2 + $0x2c8] sm:$0xff]  ;;  %v11475_v16 = vcombine.high %v394_v7, %v398_v9 }
 0x112   :  { %3547 = vmatpush1.bf16.msra.mxu1 %v11402_v19  ;;  %v262_v14 = vld [vmem:[#allocation2 + $0x2e8] sm:$0xff]  ;;  %v11474_v19 = vcombine.low %v394_v7, %v398_v9 }
 0x113   :  { %3548 = vmatprep.subr.bf16.mxu1 %v11395_v28  ;;  %v386_v15 = vld [vmem:[#allocation2 + $0x6c8] sm:$0xff]  ;;  %v11339_v20 = vcombine.high %v258_v13, %v262_v14 }
 0x114   :  { %3506 = vmatpush1.bf16.msra.mxu0 %v11266_v30  ;;  %v390_v17 = vld [vmem:[#allocation2 + $0x6e8] sm:$0xff]  ;;  %v11338_v30 = vcombine.low %v258_v13, %v262_v14 }
 0x115   :  { %3507 = vmatprep.subr.bf16.mxu0 %v11259_v31  ;;  %v250_v22 = vld [vmem:[#allocation2 + $0x288] sm:$0xff]  ;;  %v11467_v28 = vcombine.high %v386_v15, %v390_v17 }
 0x116   :  { %3549 = vmatpush1.bf16.msra.mxu1 %v11394_v59  ;;  %v254_v26 = vld [vmem:[#allocation2 + $0x2a8] sm:$0xff]  ;;  %v11466_v59 = vcombine.low %v386_v15, %v390_v17 }
 0x117   :  { %3550 = vmatprep.subr.bf16.mxu1 %v11387_v36  ;;  %v378_v27 = vld [vmem:[#allocation2 + $0x688] sm:$0xff]  ;;  %v11331_v31 = vcombine.high %v250_v22, %v254_v26 }
 0x118   :  { %3508 = vmatpush1.bf16.msra.mxu0 %v11258_v38  ;;  %v382_v29 = vld [vmem:[#allocation2 + $0x6a8] sm:$0xff]  ;;  %v11330_v38 = vcombine.low %v250_v22, %v254_v26 }
 0x119   :  { %3509 = vmatprep.subr.bf16.mxu0 %v11251_v40  ;;  %v242_v32 = vld [vmem:[#allocation2 + $0x248] sm:$0xff]  ;;  %v11459_v36 = vcombine.high %v378_v27, %v382_v29 }
 0x11a   :  { %3551 = vmatpush1.bf16.msra.mxu1 %v11386_v39  ;;  %v246_v34 = vld [vmem:[#allocation2 + $0x268] sm:$0xff]  ;;  %v11458_v39 = vcombine.low %v378_v27, %v382_v29 }
 0x11b   :  { %3552 = vmatprep.subr.bf16.mxu1 %v11379_v44  ;;  %v370_v35 = vld [vmem:[#allocation2 + $0x648] sm:$0xff]  ;;  %v11323_v40 = vcombine.high %v242_v32, %v246_v34 }
 0x11c   :  { %3510 = vmatpush1.bf16.msra.mxu0 %v11250_v48  ;;  %v374_v37 = vld [vmem:[#allocation2 + $0x668] sm:$0xff]  ;;  %v11322_v48 = vcombine.low %v242_v32, %v246_v34 }
 0x11d   :  { %3511 = vmatprep.subr.bf16.mxu0 %v11371_v50  ;;  %v234_v41 = vld [vmem:[#allocation2 + $0x208] sm:$0xff]  ;;  %v11451_v44 = vcombine.high %v370_v35, %v374_v37 }
 0x11e   :  { %3553 = vmatpush1.bf16.msra.mxu1 %v11378_v49  ;;  %v238_v42 = vld [vmem:[#allocation2 + $0x228] sm:$0xff]  ;;  %v11450_v49 = vcombine.low %v370_v35, %v374_v37 }
 0x11f   :  { %3554 = vmatprep.subr.bf16.mxu1 %v11499_v56  ;;  %v362_v43 = vld [vmem:[#allocation2 + $0x608] sm:$0xff]  ;;  %v11315_v50 = vcombine.high %v234_v41, %v238_v42 }
 0x120   :  { %3512 = vmatpush2.bf16.msra.mxu0 %v11370_v23  ;;  %v366_v45 = vld [vmem:[#allocation2 + $0x628] sm:$0xff]  ;;  %v11314_v23 = vcombine.low %v234_v41, %v238_v42 }
 0x121   :  { %3513 = vmatprep.subr.bf16.mxu0 %v11363_v54  ;;  %v482_v51 = vld [vmem:[#allocation2 + $0x9c8] sm:$0xff]  ;;  %v11443_v56 = vcombine.high %v362_v43, %v366_v45 }
 0x122   :  { %3555 = vmatpush2.bf16.msra.mxu1 %v11498_v24  ;;  %v486_v52 = vld [vmem:[#allocation2 + $0x9e8] sm:$0xff]  ;;  %v11442_v24 = vcombine.low %v362_v43, %v366_v45 }
 0x123   :  { %3556 = vmatprep.subr.bf16.mxu1 %v11491_v0  ;;  %v610_v53 = vld [vmem:[#allocation2 + $0xdc8] sm:$0xff]  ;;  %v11563_v54 = vcombine.high %v482_v51, %v486_v52 }
 0x124   :  { %3514 = vmatpush2.bf16.msra.mxu0 %v11362_v2  ;;  %v614_v57 = vld [vmem:[#allocation2 + $0xde8] sm:$0xff]  ;;  %v11562_v2 = vcombine.low %v482_v51, %v486_v52 }
 0x125   :  { %3515 = vmatprep.subr.bf16.mxu0 %v11355_v4  ;;  %v474_v55 = vld [vmem:[#allocation2 + $0x988] sm:$0xff]  ;;  %v11691_v0 = vcombine.high %v610_v53, %v614_v57 }
 0x126   :  { %3557 = vmatpush2.bf16.msra.mxu1 %v11490_v3  ;;  %v478_v61 = vld [vmem:[#allocation2 + $0x9a8] sm:$0xff]  ;;  %v11690_v3 = vcombine.low %v610_v53, %v614_v57 }
 0x127   :  { %3558 = vmatprep.subr.bf16.mxu1 %v11483_v8  ;;  %v602_v62 = vld [vmem:[#allocation2 + $0xd88] sm:$0xff]  ;;  %v11555_v4 = vcombine.high %v474_v55, %v478_v61 }
 0x128   :  { %3516 = vmatpush2.bf16.msra.mxu0 %v11354_v10  ;;  %v606_v1 = vld [vmem:[#allocation2 + $0xda8] sm:$0xff]  ;;  %v11554_v10 = vcombine.low %v474_v55, %v478_v61 }
 0x129   :  { %3517 = vmatprep.subr.bf16.mxu0 %v11347_v12  ;;  %v466_v5 = vld [vmem:[#allocation2 + $0x948] sm:$0xff]  ;;  %v11683_v8 = vcombine.high %v602_v62, %v606_v1 }
 0x12a   :  { %3559 = vmatpush2.bf16.msra.mxu1 %v11482_v11  ;;  %v470_v6 = vld [vmem:[#allocation2 + $0x968] sm:$0xff]  ;;  %v11682_v11 = vcombine.low %v602_v62, %v606_v1 }
 0x12b   :  { %3560 = vmatprep.subr.bf16.mxu1 %v11475_v16  ;;  %v594_v7 = vld [vmem:[#allocation2 + $0xd48] sm:$0xff]  ;;  %v11547_v12 = vcombine.high %v466_v5, %v470_v6 }
 0x12c   :  { %3518 = vmatpush2.bf16.msra.mxu0 %v11346_v18  ;;  %v598_v9 = vld [vmem:[#allocation2 + $0xd68] sm:$0xff]  ;;  %v11546_v18 = vcombine.low %v466_v5, %v470_v6 }
 0x12d   :  { %3519 = vmatprep.subr.bf16.mxu0 %v11339_v20  ;;  %v458_v13 = vld [vmem:[#allocation2 + $0x908] sm:$0xff]  ;;  %v11675_v16 = vcombine.high %v594_v7, %v598_v9 }
 0x12e   :  { %3561 = vmatpush2.bf16.msra.mxu1 %v11474_v19  ;;  %v462_v14 = vld [vmem:[#allocation2 + $0x928] sm:$0xff]  ;;  %v11674_v19 = vcombine.low %v594_v7, %v598_v9 }
 0x12f   :  { %3562 = vmatprep.subr.bf16.mxu1 %v11467_v28  ;;  %v586_v15 = vld [vmem:[#allocation2 + $0xd08] sm:$0xff]  ;;  %v11539_v20 = vcombine.high %v458_v13, %v462_v14 }
 0x130   :  { %3520 = vmatpush2.bf16.msra.mxu0 %v11338_v30  ;;  %v590_v17 = vld [vmem:[#allocation2 + $0xd28] sm:$0xff]  ;;  %v11538_v30 = vcombine.low %v458_v13, %v462_v14 }
 0x131   :  { %3521 = vmatprep.subr.bf16.mxu0 %v11331_v31  ;;  %v450_v22 = vld [vmem:[#allocation2 + $0x8c8] sm:$0xff]  ;;  %v11667_v28 = vcombine.high %v586_v15, %v590_v17 }
 0x132   :  { %3563 = vmatpush2.bf16.msra.mxu1 %v11466_v59  ;;  %v454_v26 = vld [vmem:[#allocation2 + $0x8e8] sm:$0xff]  ;;  %v11666_v59 = vcombine.low %v586_v15, %v590_v17 }
 0x133   :  { %3564 = vmatprep.subr.bf16.mxu1 %v11459_v36  ;;  %v578_v27 = vld [vmem:[#allocation2 + $0xcc8] sm:$0xff]  ;;  %v11531_v31 = vcombine.high %v450_v22, %v454_v26 }
 0x134   :  { %3522 = vmatpush2.bf16.msra.mxu0 %v11330_v38  ;;  %v582_v29 = vld [vmem:[#allocation2 + $0xce8] sm:$0xff]  ;;  %v11530_v38 = vcombine.low %v450_v22, %v454_v26 }
 0x135   :  { %3523 = vmatprep.subr.bf16.mxu0 %v11323_v40  ;;  %v442_v32 = vld [vmem:[#allocation2 + $0x888] sm:$0xff]  ;;  %v11659_v36 = vcombine.high %v578_v27, %v582_v29 }
 0x136   :  { %3565 = vmatpush2.bf16.msra.mxu1 %v11458_v39  ;;  %v446_v34 = vld [vmem:[#allocation2 + $0x8a8] sm:$0xff]  ;;  %v11658_v39 = vcombine.low %v578_v27, %v582_v29 }
 0x137   :  { %3566 = vmatprep.subr.bf16.mxu1 %v11451_v44  ;;  %v570_v35 = vld [vmem:[#allocation2 + $0xc88] sm:$0xff]  ;;  %v11523_v40 = vcombine.high %v442_v32, %v446_v34 }
 0x138   :  { %3524 = vmatpush2.bf16.msra.mxu0 %v11322_v48  ;;  %v574_v37 = vld [vmem:[#allocation2 + $0xca8] sm:$0xff]  ;;  %v11522_v48 = vcombine.low %v442_v32, %v446_v34 }
 0x139   :  { %3525 = vmatprep.subr.bf16.mxu0 %v11315_v50  ;;  %v434_v41 = vld [vmem:[#allocation2 + $0x848] sm:$0xff]  ;;  %v11651_v44 = vcombine.high %v570_v35, %v574_v37 }
 0x13a   :  { %3567 = vmatpush2.bf16.msra.mxu1 %v11450_v49  ;;  %v438_v42 = vld [vmem:[#allocation2 + $0x868] sm:$0xff]  ;;  %v11650_v49 = vcombine.low %v570_v35, %v574_v37 }
 0x13b   :  { %3568 = vmatprep.subr.bf16.mxu1 %v11443_v56  ;;  %v562_v43 = vld [vmem:[#allocation2 + $0xc48] sm:$0xff]  ;;  %v11515_v50 = vcombine.high %v434_v41, %v438_v42 }
 0x13c   :  { %3526 = vmatpush2.bf16.msra.mxu0 %v11314_v23  ;;  %v566_v45 = vld [vmem:[#allocation2 + $0xc68] sm:$0xff]  ;;  %v11514_v23 = vcombine.low %v434_v41, %v438_v42 }
 0x13d   :  { %3581 = vmatprep.subr.bf16.mxu0 %v11563_v54  ;;  %v426_v51 = vld [vmem:[#allocation2 + $0x808] sm:$0xff]  ;;  %v11643_v56 = vcombine.high %v562_v43, %v566_v45 }
 0x13e   :  { %3569 = vmatpush2.bf16.msra.mxu1 %v11442_v24  ;;  %v430_v52 = vld [vmem:[#allocation2 + $0x828] sm:$0xff]  ;;  %v11642_v24 = vcombine.low %v562_v43, %v566_v45 }
 0x13f   :  { %3624 = vmatprep.subr.bf16.mxu1 %v11691_v0  ;;  %3528 = vmatmul.mubr.bf16.vlgmr.msra.gmra.mxu0 %v13630_v21  ;;  %v554_v53 = vld [vmem:[#allocation2 + $0xc08] sm:$0xff]  ;;  %v11507_v54 = vcombine.high %v426_v51, %v430_v52 }
 0x140   :  { %3582 = vmatpush1.bf16.msra.mxu0 %v11562_v2  ;;  %3613 = vmatprep.mubr.bf16.mxu0 %v13658_v60  ;;  %v558_v57 = vld [vmem:[#allocation2 + $0xc28] sm:$0xff]  ;;  %v11506_v2 = vcombine.low %v426_v51, %v430_v52 }
 0x141   :  { %3571 = vmatmul.mubr.bf16.vlgmr.msra.gmra.mxu1 %v13644_v25  ;;  %3583 = vmatprep.subr.bf16.mxu0 %v11555_v4  ;;  %v546_v55 = vld [vmem:[#allocation2 + $0xbc8] sm:$0xff]  ;;  %v11635_v0 = vcombine.high %v554_v53, %v558_v57 }
 0x142   :  { %3625 = vmatpush1.bf16.msra.mxu1 %v11690_v3  ;;  %3656 = vmatprep.mubr.bf16.mxu1 %v13663_v33  ;;  %v550_v61 = vld [vmem:[#allocation2 + $0xbe8] sm:$0xff]  ;;  %v11634_v3 = vcombine.low %v554_v53, %v558_v57 }
 0x143   :  { %3626 = vmatprep.subr.bf16.mxu1 %v11683_v8  ;;  %v674_v62 = vld [vmem:[#allocation2 + $0xfc8] sm:$0xff]  ;;  %v11627_v4 = vcombine.high %v546_v55, %v550_v61 }
 0x144   :  { %3584 = vmatpush1.bf16.msra.mxu0 %v11554_v10  ;;  %v678_v1 = vld [vmem:[#allocation2 + $0xfe8] sm:$0xff]  ;;  %v11626_v10 = vcombine.low %v546_v55, %v550_v61 }
 0x145   :  { %3585 = vmatprep.subr.bf16.mxu0 %v11547_v12  ;;  %v538_v5 = vld [vmem:[#allocation2 + $0xb88] sm:$0xff]  ;;  %v11755_v8 = vcombine.high %v674_v62, %v678_v1 }
 0x146   :  { %3627 = vmatpush1.bf16.msra.mxu1 %v11682_v11  ;;  %v542_v6 = vld [vmem:[#allocation2 + $0xba8] sm:$0xff]  ;;  %v11754_v11 = vcombine.low %v674_v62, %v678_v1 }
 0x147   :  { %3628 = vmatprep.subr.bf16.mxu1 %v11675_v16  ;;  %v666_v7 = vld [vmem:[#allocation2 + $0xf88] sm:$0xff]  ;;  %v11619_v12 = vcombine.high %v538_v5, %v542_v6 }
 0x148   :  { %3586 = vmatpush1.bf16.msra.mxu0 %v11546_v18  ;;  %v670_v9 = vld [vmem:[#allocation2 + $0xfa8] sm:$0xff]  ;;  %v11618_v18 = vcombine.low %v538_v5, %v542_v6  ;;  %v227_v5 = vld [vmem:[#allocation2 + $0x1d0] sm:$0xff] }
 0x149   :  { %3587 = vmatprep.subr.bf16.mxu0 %v11539_v20  ;;  %v530_v13 = vld [vmem:[#allocation2 + $0xb48] sm:$0xff]  ;;  %v11747_v16 = vcombine.high %v666_v7, %v670_v9  ;;  %v231_v6 = vld [vmem:[#allocation2 + $0x1f0] sm:$0xff] }
 0x14a   :  { %3629 = vmatpush1.bf16.msra.mxu1 %v11674_v19  ;;  %v534_v14 = vld [vmem:[#allocation2 + $0xb68] sm:$0xff]  ;;  %v11746_v19 = vcombine.low %v666_v7, %v670_v9  ;;  %v355_v7 = vld [vmem:[#allocation2 + $0x5d0] sm:$0xff] }
 0x14b   :  { %3630 = vmatprep.subr.bf16.mxu1 %v11667_v28  ;;  %v658_v15 = vld [vmem:[#allocation2 + $0xf48] sm:$0xff]  ;;  %v11611_v20 = vcombine.high %v530_v13, %v534_v14  ;;  %v359_v9 = vld [vmem:[#allocation2 + $0x5f0] sm:$0xff] }
 0x14c   :  { %3588 = vmatpush1.bf16.msra.mxu0 %v11538_v30  ;;  %v662_v17 = vld [vmem:[#allocation2 + $0xf68] sm:$0xff]  ;;  %v11610_v30 = vcombine.low %v530_v13, %v534_v14  ;;  %v219_v13 = vld [vmem:[#allocation2 + $0x190] sm:$0xff] }
 0x14d   :  { %3589 = vmatprep.subr.bf16.mxu0 %v11531_v31  ;;  %v522_v22 = vld [vmem:[#allocation2 + $0xb08] sm:$0xff]  ;;  %v11739_v28 = vcombine.high %v658_v15, %v662_v17  ;;  %v223_v14 = vld [vmem:[#allocation2 + $0x1b0] sm:$0xff] }
 0x14e   :  { %3631 = vmatpush1.bf16.msra.mxu1 %v11666_v59  ;;  %v526_v26 = vld [vmem:[#allocation2 + $0xb28] sm:$0xff]  ;;  %v11738_v59 = vcombine.low %v658_v15, %v662_v17  ;;  %v347_v15 = vld [vmem:[#allocation2 + $0x590] sm:$0xff] }
 0x14f   :  { %3632 = vmatprep.subr.bf16.mxu1 %v11659_v36  ;;  %v650_v27 = vld [vmem:[#allocation2 + $0xf08] sm:$0xff]  ;;  %v11603_v31 = vcombine.high %v522_v22, %v526_v26  ;;  %v351_v17 = vld [vmem:[#allocation2 + $0x5b0] sm:$0xff] }
 0x150   :  { %3590 = vmatpush1.bf16.msra.mxu0 %v11530_v38  ;;  %v654_v29 = vld [vmem:[#allocation2 + $0xf28] sm:$0xff]  ;;  %v11602_v38 = vcombine.low %v522_v22, %v526_v26  ;;  %v211_v22 = vld [vmem:[#allocation2 + $0x150] sm:$0xff] }
 0x151   :  { %3591 = vmatprep.subr.bf16.mxu0 %v11523_v40  ;;  %v514_v32 = vld [vmem:[#allocation2 + $0xac8] sm:$0xff]  ;;  %v11731_v36 = vcombine.high %v650_v27, %v654_v29  ;;  %v215_v26 = vld [vmem:[#allocation2 + $0x170] sm:$0xff] }
 0x152   :  { %3633 = vmatpush1.bf16.msra.mxu1 %v11658_v39  ;;  %v518_v34 = vld [vmem:[#allocation2 + $0xae8] sm:$0xff]  ;;  %v11730_v39 = vcombine.low %v650_v27, %v654_v29  ;;  %v339_v27 = vld [vmem:[#allocation2 + $0x550] sm:$0xff] }
 0x153   :  { %3634 = vmatprep.subr.bf16.mxu1 %v11651_v44  ;;  %v642_v35 = vld [vmem:[#allocation2 + $0xec8] sm:$0xff]  ;;  %v11595_v40 = vcombine.high %v514_v32, %v518_v34  ;;  %v343_v29 = vld [vmem:[#allocation2 + $0x570] sm:$0xff] }
 0x154   :  { %3592 = vmatpush1.bf16.msra.mxu0 %v11522_v48  ;;  %v646_v37 = vld [vmem:[#allocation2 + $0xee8] sm:$0xff]  ;;  %v11594_v48 = vcombine.low %v514_v32, %v518_v34  ;;  %v11421_v32 = vcombine.high %v339_v27, %v343_v29  ;;  %v203_v34 = vld [vmem:[#allocation2 + $0x110] sm:$0xff] }
 0x155   :  { %3593 = vmatprep.subr.bf16.mxu0 %v11515_v50  ;;  %v506_v41 = vld [vmem:[#allocation2 + $0xa88] sm:$0xff]  ;;  %v11723_v44 = vcombine.high %v642_v35, %v646_v37 }
 0x156   :  { %3635 = vmatpush1.bf16.msra.mxu1 %v11650_v49  ;;  %v510_v42 = vld [vmem:[#allocation2 + $0xaa8] sm:$0xff]  ;;  %v11722_v49 = vcombine.low %v642_v35, %v646_v37  ;;  %v207_v35 = vld [vmem:[#allocation2 + $0x130] sm:$0xff] }
 0x157   :  { %3636 = vmatprep.subr.bf16.mxu1 %v11643_v56  ;;  %v634_v43 = vld [vmem:[#allocation2 + $0xe88] sm:$0xff]  ;;  %v11587_v50 = vcombine.high %v506_v41, %v510_v42  ;;  %v335_v37 = vld [vmem:[#allocation2 + $0x530] sm:$0xff] }
 0x158   :  { %3594 = vmatpush1.bf16.msra.mxu0 %v11514_v23  ;;  %v638_v45 = vld [vmem:[#allocation2 + $0xea8] sm:$0xff]  ;;  %v11586_v23 = vcombine.low %v506_v41, %v510_v42  ;;  %v195_v42 = vld [vmem:[#allocation2 + $0xd0] sm:$0xff] }
 0x159   :  { %3595 = vmatprep.subr.bf16.mxu0 %v11507_v54  ;;  %v498_v51 = vld [vmem:[#allocation2 + $0xa48] sm:$0xff]  ;;  %v11715_v56 = vcombine.high %v634_v43, %v638_v45 }
 0x15a   :  { %3637 = vmatpush1.bf16.msra.mxu1 %v11642_v24  ;;  %v502_v52 = vld [vmem:[#allocation2 + $0xa68] sm:$0xff]  ;;  %v11714_v24 = vcombine.low %v634_v43, %v638_v45  ;;  %v199_v43 = vld [vmem:[#allocation2 + $0xf0] sm:$0xff] }
 0x15b   :  { %3638 = vmatprep.subr.bf16.mxu1 %v11635_v0  ;;  %v626_v53 = vld [vmem:[#allocation2 + $0xe48] sm:$0xff]  ;;  %v11579_v54 = vcombine.high %v498_v51, %v502_v52  ;;  %v327_v45 = vld [vmem:[#allocation2 + $0x4f0] sm:$0xff] }
 0x15c   :  { %3596 = vmatpush1.bf16.msra.mxu0 %v11506_v2  ;;  %v630_v57 = vld [vmem:[#allocation2 + $0xe68] sm:$0xff]  ;;  %v11578_v2 = vcombine.low %v498_v51, %v502_v52  ;;  %v187_v52 = vld [vmem:[#allocation2 + $0x90] sm:$0xff] }
 0x15d   :  { %3597 = vmatprep.subr.bf16.mxu0 %v11627_v4  ;;  %v490_v55 = vld [vmem:[#allocation2 + $0xa08] sm:$0xff]  ;;  %v11707_v0 = vcombine.high %v626_v53, %v630_v57 }
 0x15e   :  { %3639 = vmatpush1.bf16.msra.mxu1 %v11634_v3  ;;  %v494_v61 = vld [vmem:[#allocation2 + $0xa28] sm:$0xff]  ;;  %v11706_v3 = vcombine.low %v626_v53, %v630_v57  ;;  %v191_v53 = vld [vmem:[#allocation2 + $0xb0] sm:$0xff] }
 0x15f   :  { %3640 = vmatprep.subr.bf16.mxu1 %v11755_v8  ;;  %v618_v62 = vld [vmem:[#allocation2 + $0xe08] sm:$0xff]  ;;  %v11571_v4 = vcombine.high %v490_v55, %v494_v61  ;;  %v319_v57 = vld [vmem:[#allocation2 + $0x4b0] sm:$0xff] }
 0x160   :  { %3598 = vmatpush2.bf16.msra.mxu0 %v11626_v10  ;;  %v622_v1 = vld [vmem:[#allocation2 + $0xe28] sm:$0xff]  ;;  %v11570_v10 = vcombine.low %v490_v55, %v494_v61  ;;  %v179_v61 = vld [vmem:[#allocation2 + $0x50] sm:$0xff] }
 0x161   :  { %3599 = vmatprep.subr.bf16.mxu0 %v11619_v12  ;;  %v11699_v8 = vcombine.high %v618_v62, %v622_v1  ;;  %v11309_v12 = vcombine.high %v227_v5, %v231_v6 }
 0x162   :  { %3641 = vmatpush2.bf16.msra.mxu1 %v11754_v11  ;;  %v11698_v11 = vcombine.low %v618_v62, %v622_v1  ;;  %v183_v62 = vld [vmem:[#allocation2 + $0x70] sm:$0xff] }
 0x163   :  { %3642 = vmatprep.subr.bf16.mxu1 %v11747_v16  ;;  %v11437_v16 = vcombine.high %v355_v7, %v359_v9  ;;  %v311_v1 = vld [vmem:[#allocation2 + $0x470] sm:$0xff] }
 0x164   :  { %3600 = vmatpush2.bf16.msra.mxu0 %v11618_v18  ;;  %v11308_v18 = vcombine.low %v227_v5, %v231_v6  ;;  %v171_v6 = vld [vmem:[#allocation2 + $0x10] sm:$0xff] }
 0x165   :  { %3601 = vmatprep.subr.bf16.mxu0 %v11611_v20  ;;  %v11301_v20 = vcombine.high %v219_v13, %v223_v14 }
 0x166   :  { %3643 = vmatpush2.bf16.msra.mxu1 %v11746_v19  ;;  %v11436_v19 = vcombine.low %v355_v7, %v359_v9  ;;  %v175_v7 = vld [vmem:[#allocation2 + $0x30] sm:$0xff] }
 0x167   :  { %3644 = vmatprep.subr.bf16.mxu1 %v11739_v28  ;;  %v11429_v28 = vcombine.high %v347_v15, %v351_v17  ;;  %v303_v9 = vld [vmem:[#allocation2 + $0x430] sm:$0xff] }
 0x168   :  { %3602 = vmatpush2.bf16.msra.mxu0 %v11610_v30  ;;  %v11300_v30 = vcombine.low %v219_v13, %v223_v14  ;;  %v291_v14 = vld [vmem:[#allocation2 + $0x3d0] sm:$0xff] }
 0x169   :  { %3603 = vmatprep.subr.bf16.mxu0 %v11603_v31  ;;  %v11293_v31 = vcombine.high %v211_v22, %v215_v26 }
 0x16a   :  { %3645 = vmatpush2.bf16.msra.mxu1 %v11738_v59  ;;  %v11428_v59 = vcombine.low %v347_v15, %v351_v17  ;;  %v295_v15 = vld [vmem:[#allocation2 + $0x3f0] sm:$0xff] }
 0x16b   :  { %3646 = vmatprep.subr.bf16.mxu1 %v11731_v36  ;;  %v331_v36 = vld [vmem:[#allocation2 + $0x510] sm:$0xff] }
 0x16c   :  { %3604 = vmatpush2.bf16.msra.mxu0 %v11602_v38  ;;  %v11292_v38 = vcombine.low %v211_v22, %v215_v26  ;;  %v11413_v41 = vcombine.high %v331_v36, %v335_v37  ;;  %v423_v17 = vld [vmem:[#allocation2 + $0x7f0] sm:$0xff] }
 0x16d   :  { %3605 = vmatprep.subr.bf16.mxu0 %v11595_v40  ;;  %v11285_v40 = vcombine.high %v203_v34, %v207_v35  ;;  %v283_v26 = vld [vmem:[#allocation2 + $0x390] sm:$0xff] }
 0x16e   :  { %3647 = vmatpush2.bf16.msra.mxu1 %v11730_v39  ;;  %v11420_v39 = vcombine.low %v339_v27, %v343_v29  ;;  %v287_v27 = vld [vmem:[#allocation2 + $0x3b0] sm:$0xff] }
 0x16f   :  { %3648 = vmatprep.subr.bf16.mxu1 %v11723_v44  ;;  %v323_v44 = vld [vmem:[#allocation2 + $0x4d0] sm:$0xff] }
 0x170   :  { %3606 = vmatpush2.bf16.msra.mxu0 %v11594_v48  ;;  %v11284_v48 = vcombine.low %v203_v34, %v207_v35  ;;  %v11405_v51 = vcombine.high %v323_v44, %v327_v45  ;;  %v415_v29 = vld [vmem:[#allocation2 + $0x7b0] sm:$0xff] }
 0x171   :  { %3607 = vmatprep.subr.bf16.mxu0 %v11587_v50  ;;  %v11277_v50 = vcombine.high %v195_v42, %v199_v43  ;;  %v275_v34 = vld [vmem:[#allocation2 + $0x350] sm:$0xff] }
 0x172   :  { %3649 = vmatpush2.bf16.msra.mxu1 %v11722_v49  ;;  %v11412_v49 = vcombine.low %v331_v36, %v335_v37  ;;  %v279_v35 = vld [vmem:[#allocation2 + $0x370] sm:$0xff] }
 0x173   :  { %3650 = vmatprep.subr.bf16.mxu1 %v11715_v56  ;;  %v315_v56 = vld [vmem:[#allocation2 + $0x490] sm:$0xff] }
 0x174   :  { %3608 = vmatpush2.bf16.msra.mxu0 %v11586_v23  ;;  %v11276_v23 = vcombine.low %v195_v42, %v199_v43  ;;  %v11397_v55 = vcombine.high %v315_v56, %v319_v57  ;;  %v403_v36 = vld [vmem:[#allocation2 + $0x750] sm:$0xff] }
 0x175   :  { %3609 = vmatprep.subr.bf16.mxu0 %v11579_v54  ;;  %v11269_v54 = vcombine.high %v187_v52, %v191_v53  ;;  %v407_v37 = vld [vmem:[#allocation2 + $0x770] sm:$0xff] }
 0x176   :  { %3651 = vmatpush2.bf16.msra.mxu1 %v11714_v24  ;;  %v11404_v24 = vcombine.low %v323_v44, %v327_v45  ;;  %v267_v42 = vld [vmem:[#allocation2 + $0x310] sm:$0xff] }
 0x177   :  { %3652 = vmatprep.subr.bf16.mxu1 %v11707_v0  ;;  %v307_v0 = vld [vmem:[#allocation2 + $0x450] sm:$0xff] }
 0x178   :  { %3610 = vmatpush2.bf16.msra.mxu0 %v11578_v2  ;;  %v11268_v2 = vcombine.low %v187_v52, %v191_v53  ;;  %v11389_v5 = vcombine.high %v307_v0, %v311_v1  ;;  %v271_v43 = vld [vmem:[#allocation2 + $0x330] sm:$0xff] }
 0x179   :  { %3611 = vmatprep.subr.bf16.mxu0 %v11571_v4  ;;  %v11261_v4 = vcombine.high %v179_v61, %v183_v62  ;;  %v395_v44 = vld [vmem:[#allocation2 + $0x710] sm:$0xff] }
 0x17a   :  { %3653 = vmatpush2.bf16.msra.mxu1 %v11706_v3  ;;  %v11396_v3 = vcombine.low %v315_v56, %v319_v57  ;;  %v399_v45 = vld [vmem:[#allocation2 + $0x730] sm:$0xff] }
 0x17b   :  { %3654 = vmatprep.subr.bf16.mxu1 %v11699_v8  ;;  %v299_v8 = vld [vmem:[#allocation2 + $0x410] sm:$0xff] }
 0x17c   :  { %3612 = vmatpush2.bf16.msra.mxu0 %v11570_v10  ;;  %v11260_v10 = vcombine.low %v179_v61, %v183_v62  ;;  %v11381_v13 = vcombine.high %v299_v8, %v303_v9  ;;  %v259_v52 = vld [vmem:[#allocation2 + $0x2d0] sm:$0xff] }
 0x17d   :  { %3667 = vmatprep.subr.bf16.mxu0 %v11309_v12  ;;  %v11253_v12 = vcombine.high %v171_v6, %v175_v7  ;;  %v263_v53 = vld [vmem:[#allocation2 + $0x2f0] sm:$0xff] }
 0x17e   :  { %3655 = vmatpush2.bf16.msra.mxu1 %v11698_v11  ;;  %v11388_v11 = vcombine.low %v307_v0, %v311_v1  ;;  %v387_v56 = vld [vmem:[#allocation2 + $0x6d0] sm:$0xff] }
 0x17f   :  { %3710 = vmatprep.subr.bf16.mxu1 %v11437_v16  ;;  %3614 = vmatmul.mubr.bf16.vlgmr.msra.gmra.mxu0 %v13670_v46  ;;  %v419_v16 = vld [vmem:[#allocation2 + $0x7d0] sm:$0xff] }
 0x180   :  { %3668 = vmatpush1.bf16.msra.mxu0 %v11308_v18  ;;  %3699 = vmatprep.mubr.bf16.mxu0 %v13610_v58  ;;  %v11252_v18 = vcombine.low %v171_v6, %v175_v7  ;;  %v11501_v22 = vcombine.high %v419_v16, %v423_v17  ;;  %v391_v57 = vld [vmem:[#allocation2 + $0x6f0] sm:$0xff] }
 0x181   :  { %3657 = vmatmul.mubr.bf16.vlgmr.msra.gmra.mxu1 %v13674_v47  ;;  %3669 = vmatprep.subr.bf16.mxu0 %v11301_v20  ;;  %v11373_v20 = vcombine.high %v291_v14, %v295_v15  ;;  %v251_v61 = vld [vmem:[#allocation2 + $0x290] sm:$0xff] }
 0x182   :  { %3711 = vmatpush1.bf16.msra.mxu1 %v11436_v19  ;;  %3742 = vmatprep.mubr.bf16.mxu1 %v13624_v63  ;;  %v11380_v19 = vcombine.low %v299_v8, %v303_v9  ;;  %v255_v62 = vld [vmem:[#allocation2 + $0x2b0] sm:$0xff] }
 0x183   :  { %3712 = vmatprep.subr.bf16.mxu1 %v11429_v28  ;;  %v411_v28 = vld [vmem:[#allocation2 + $0x790] sm:$0xff] }
 0x184   :  { %3670 = vmatpush1.bf16.msra.mxu0 %v11300_v30  ;;  %v11372_v30 = vcombine.low %v291_v14, %v295_v15  ;;  %v379_v0 = vld [vmem:[#allocation2 + $0x690] sm:$0xff] }
 0x185   :  { %3671 = vmatprep.subr.bf16.mxu0 %v11293_v31  ;;  %v11365_v31 = vcombine.high %v283_v26, %v287_v27  ;;  %v383_v1 = vld [vmem:[#allocation2 + $0x6b0] sm:$0xff] }
 0x186   :  { %3713 = vmatpush1.bf16.msra.mxu1 %v11428_v59  ;;  %v11500_v59 = vcombine.low %v419_v16, %v423_v17  ;;  %v243_v6 = vld [vmem:[#allocation2 + $0x250] sm:$0xff] }
 0x187   :  { %3714 = vmatprep.subr.bf16.mxu1 %v11421_v32  ;;  %v11493_v32 = vcombine.high %v411_v28, %v415_v29  ;;  %v247_v7 = vld [vmem:[#allocation2 + $0x270] sm:$0xff] }
 0x188   :  { %3672 = vmatpush1.bf16.msra.mxu0 %v11292_v38  ;;  %v11364_v38 = vcombine.low %v283_v26, %v287_v27  ;;  %v371_v8 = vld [vmem:[#allocation2 + $0x650] sm:$0xff] }
 0x189   :  { %3673 = vmatprep.subr.bf16.mxu0 %v11285_v40  ;;  %v11357_v40 = vcombine.high %v275_v34, %v279_v35  ;;  %v375_v9 = vld [vmem:[#allocation2 + $0x670] sm:$0xff] }
 0x18a   :  { %3715 = vmatpush1.bf16.msra.mxu1 %v11420_v39  ;;  %v11492_v39 = vcombine.low %v411_v28, %v415_v29  ;;  %v235_v14 = vld [vmem:[#allocation2 + $0x210] sm:$0xff] }
 0x18b   :  { %3716 = vmatprep.subr.bf16.mxu1 %v11413_v41  ;;  %v11485_v41 = vcombine.high %v403_v36, %v407_v37  ;;  %v239_v15 = vld [vmem:[#allocation2 + $0x230] sm:$0xff] }
 0x18c   :  { %3674 = vmatpush1.bf16.msra.mxu0 %v11284_v48  ;;  %v11356_v48 = vcombine.low %v275_v34, %v279_v35  ;;  %v363_v16 = vld [vmem:[#allocation2 + $0x610] sm:$0xff] }
 0x18d   :  { %3675 = vmatprep.subr.bf16.mxu0 %v11277_v50  ;;  %v11349_v50 = vcombine.high %v267_v42, %v271_v43  ;;  %v367_v17 = vld [vmem:[#allocation2 + $0x630] sm:$0xff] }
 0x18e   :  { %3717 = vmatpush1.bf16.msra.mxu1 %v11412_v49  ;;  %v11484_v49 = vcombine.low %v403_v36, %v407_v37  ;;  %v483_v26 = vld [vmem:[#allocation2 + $0x9d0] sm:$0xff] }
 0x18f   :  { %3718 = vmatprep.subr.bf16.mxu1 %v11405_v51  ;;  %v11477_v51 = vcombine.high %v395_v44, %v399_v45  ;;  %v487_v27 = vld [vmem:[#allocation2 + $0x9f0] sm:$0xff] }
 0x190   :  { %3676 = vmatpush1.bf16.msra.mxu0 %v11276_v23  ;;  %v11348_v23 = vcombine.low %v267_v42, %v271_v43  ;;  %v611_v28 = vld [vmem:[#allocation2 + $0xdd0] sm:$0xff] }
 0x191   :  { %3677 = vmatprep.subr.bf16.mxu0 %v11269_v54  ;;  %v11341_v54 = vcombine.high %v259_v52, %v263_v53  ;;  %v615_v29 = vld [vmem:[#allocation2 + $0xdf0] sm:$0xff] }
 0x192   :  { %3719 = vmatpush1.bf16.msra.mxu1 %v11404_v24  ;;  %v11476_v24 = vcombine.low %v395_v44, %v399_v45  ;;  %v475_v34 = vld [vmem:[#allocation2 + $0x990] sm:$0xff] }
 0x193   :  { %3720 = vmatprep.subr.bf16.mxu1 %v11397_v55  ;;  %v11469_v55 = vcombine.high %v387_v56, %v391_v57  ;;  %v479_v35 = vld [vmem:[#allocation2 + $0x9b0] sm:$0xff] }
 0x194   :  { %3678 = vmatpush1.bf16.msra.mxu0 %v11268_v2  ;;  %v11340_v2 = vcombine.low %v259_v52, %v263_v53  ;;  %v603_v36 = vld [vmem:[#allocation2 + $0xd90] sm:$0xff] }
 0x195   :  { %3679 = vmatprep.subr.bf16.mxu0 %v11261_v4  ;;  %v11333_v4 = vcombine.high %v251_v61, %v255_v62  ;;  %v607_v37 = vld [vmem:[#allocation2 + $0xdb0] sm:$0xff] }
 0x196   :  { %3721 = vmatpush1.bf16.msra.mxu1 %v11396_v3  ;;  %v11468_v3 = vcombine.low %v387_v56, %v391_v57  ;;  %v467_v42 = vld [vmem:[#allocation2 + $0x950] sm:$0xff] }
 0x197   :  { %3722 = vmatprep.subr.bf16.mxu1 %v11389_v5  ;;  %v11461_v5 = vcombine.high %v379_v0, %v383_v1  ;;  %v471_v43 = vld [vmem:[#allocation2 + $0x970] sm:$0xff] }
 0x198   :  { %3680 = vmatpush1.bf16.msra.mxu0 %v11260_v10  ;;  %v11332_v10 = vcombine.low %v251_v61, %v255_v62  ;;  %v595_v44 = vld [vmem:[#allocation2 + $0xd50] sm:$0xff] }
 0x199   :  { %3681 = vmatprep.subr.bf16.mxu0 %v11253_v12  ;;  %v11325_v12 = vcombine.high %v243_v6, %v247_v7  ;;  %v599_v45 = vld [vmem:[#allocation2 + $0xd70] sm:$0xff] }
 0x19a   :  { %3723 = vmatpush1.bf16.msra.mxu1 %v11388_v11  ;;  %v11460_v11 = vcombine.low %v379_v0, %v383_v1  ;;  %v459_v52 = vld [vmem:[#allocation2 + $0x910] sm:$0xff] }
 0x19b   :  { %3724 = vmatprep.subr.bf16.mxu1 %v11381_v13  ;;  %v11453_v13 = vcombine.high %v371_v8, %v375_v9  ;;  %v463_v53 = vld [vmem:[#allocation2 + $0x930] sm:$0xff] }
 0x19c   :  { %3682 = vmatpush1.bf16.msra.mxu0 %v11252_v18  ;;  %v11324_v18 = vcombine.low %v243_v6, %v247_v7  ;;  %v587_v56 = vld [vmem:[#allocation2 + $0xd10] sm:$0xff] }
 0x19d   :  { %3683 = vmatprep.subr.bf16.mxu0 %v11373_v20  ;;  %v11317_v20 = vcombine.high %v235_v14, %v239_v15  ;;  %v591_v57 = vld [vmem:[#allocation2 + $0xd30] sm:$0xff] }
 0x19e   :  { %3725 = vmatpush1.bf16.msra.mxu1 %v11380_v19  ;;  %v11452_v19 = vcombine.low %v371_v8, %v375_v9  ;;  %v451_v61 = vld [vmem:[#allocation2 + $0x8d0] sm:$0xff] }
 0x19f   :  { %3726 = vmatprep.subr.bf16.mxu1 %v11501_v22  ;;  %v11445_v22 = vcombine.high %v363_v16, %v367_v17  ;;  %v455_v62 = vld [vmem:[#allocation2 + $0x8f0] sm:$0xff] }
 0x1a0   :  { %3684 = vmatpush2.bf16.msra.mxu0 %v11372_v30  ;;  %v11316_v30 = vcombine.low %v235_v14, %v239_v15  ;;  %v579_v0 = vld [vmem:[#allocation2 + $0xcd0] sm:$0xff] }
 0x1a1   :  { %3685 = vmatprep.subr.bf16.mxu0 %v11365_v31  ;;  %v11565_v31 = vcombine.high %v483_v26, %v487_v27  ;;  %v583_v1 = vld [vmem:[#allocation2 + $0xcf0] sm:$0xff] }
 0x1a2   :  { %3727 = vmatpush2.bf16.msra.mxu1 %v11500_v59  ;;  %v11444_v59 = vcombine.low %v363_v16, %v367_v17  ;;  %v443_v6 = vld [vmem:[#allocation2 + $0x890] sm:$0xff] }
 0x1a3   :  { %3728 = vmatprep.subr.bf16.mxu1 %v11493_v32  ;;  %v11693_v32 = vcombine.high %v611_v28, %v615_v29  ;;  %v447_v7 = vld [vmem:[#allocation2 + $0x8b0] sm:$0xff] }
 0x1a4   :  { %3686 = vmatpush2.bf16.msra.mxu0 %v11364_v38  ;;  %v11564_v38 = vcombine.low %v483_v26, %v487_v27  ;;  %v571_v8 = vld [vmem:[#allocation2 + $0xc90] sm:$0xff] }
 0x1a5   :  { %3687 = vmatprep.subr.bf16.mxu0 %v11357_v40  ;;  %v11557_v40 = vcombine.high %v475_v34, %v479_v35  ;;  %v575_v9 = vld [vmem:[#allocation2 + $0xcb0] sm:$0xff] }
 0x1a6   :  { %3729 = vmatpush2.bf16.msra.mxu1 %v11492_v39  ;;  %v11692_v39 = vcombine.low %v611_v28, %v615_v29  ;;  %v435_v14 = vld [vmem:[#allocation2 + $0x850] sm:$0xff] }
 0x1a7   :  { %3730 = vmatprep.subr.bf16.mxu1 %v11485_v41  ;;  %v11685_v41 = vcombine.high %v603_v36, %v607_v37  ;;  %v439_v15 = vld [vmem:[#allocation2 + $0x870] sm:$0xff] }
 0x1a8   :  { %3688 = vmatpush2.bf16.msra.mxu0 %v11356_v48  ;;  %v11556_v48 = vcombine.low %v475_v34, %v479_v35  ;;  %v563_v16 = vld [vmem:[#allocation2 + $0xc50] sm:$0xff] }
 0x1a9   :  { %3689 = vmatprep.subr.bf16.mxu0 %v11349_v50  ;;  %v11549_v50 = vcombine.high %v467_v42, %v471_v43  ;;  %v567_v17 = vld [vmem:[#allocation2 + $0xc70] sm:$0xff] }
 0x1aa   :  { %3731 = vmatpush2.bf16.msra.mxu1 %v11484_v49  ;;  %v11684_v49 = vcombine.low %v603_v36, %v607_v37  ;;  %v427_v26 = vld [vmem:[#allocation2 + $0x810] sm:$0xff] }
 0x1ab   :  { %3732 = vmatprep.subr.bf16.mxu1 %v11477_v51  ;;  %v11677_v51 = vcombine.high %v595_v44, %v599_v45  ;;  %v431_v27 = vld [vmem:[#allocation2 + $0x830] sm:$0xff] }
 0x1ac   :  { %3690 = vmatpush2.bf16.msra.mxu0 %v11348_v23  ;;  %v11548_v23 = vcombine.low %v467_v42, %v471_v43  ;;  %v555_v28 = vld [vmem:[#allocation2 + $0xc10] sm:$0xff] }
 0x1ad   :  { %3691 = vmatprep.subr.bf16.mxu0 %v11341_v54  ;;  %v11541_v54 = vcombine.high %v459_v52, %v463_v53  ;;  %v559_v29 = vld [vmem:[#allocation2 + $0xc30] sm:$0xff] }
 0x1ae   :  { %3733 = vmatpush2.bf16.msra.mxu1 %v11476_v24  ;;  %v11676_v24 = vcombine.low %v595_v44, %v599_v45  ;;  %v547_v34 = vld [vmem:[#allocation2 + $0xbd0] sm:$0xff] }
 0x1af   :  { %3734 = vmatprep.subr.bf16.mxu1 %v11469_v55  ;;  %v11669_v55 = vcombine.high %v587_v56, %v591_v57  ;;  %v551_v35 = vld [vmem:[#allocation2 + $0xbf0] sm:$0xff] }
 0x1b0   :  { %3692 = vmatpush2.bf16.msra.mxu0 %v11340_v2  ;;  %v11540_v2 = vcombine.low %v459_v52, %v463_v53  ;;  %v675_v36 = vld [vmem:[#allocation2 + $0xfd0] sm:$0xff] }
 0x1b1   :  { %3693 = vmatprep.subr.bf16.mxu0 %v11333_v4  ;;  %v11533_v4 = vcombine.high %v451_v61, %v455_v62  ;;  %v679_v37 = vld [vmem:[#allocation2 + $0xff0] sm:$0xff] }
 0x1b2   :  { %3735 = vmatpush2.bf16.msra.mxu1 %v11468_v3  ;;  %v11668_v3 = vcombine.low %v587_v56, %v591_v57  ;;  %v539_v42 = vld [vmem:[#allocation2 + $0xb90] sm:$0xff] }
 0x1b3   :  { %3736 = vmatprep.subr.bf16.mxu1 %v11461_v5  ;;  %v11661_v5 = vcombine.high %v579_v0, %v583_v1  ;;  %v543_v43 = vld [vmem:[#allocation2 + $0xbb0] sm:$0xff] }
 0x1b4   :  { %3694 = vmatpush2.bf16.msra.mxu0 %v11332_v10  ;;  %v11532_v10 = vcombine.low %v451_v61, %v455_v62  ;;  %v667_v44 = vld [vmem:[#allocation2 + $0xf90] sm:$0xff] }
 0x1b5   :  { %3695 = vmatprep.subr.bf16.mxu0 %v11325_v12  ;;  %v11525_v12 = vcombine.high %v443_v6, %v447_v7  ;;  %v671_v45 = vld [vmem:[#allocation2 + $0xfb0] sm:$0xff] }
 0x1b6   :  { %3737 = vmatpush2.bf16.msra.mxu1 %v11460_v11  ;;  %v11660_v11 = vcombine.low %v579_v0, %v583_v1  ;;  %v531_v52 = vld [vmem:[#allocation2 + $0xb50] sm:$0xff] }
 0x1b7   :  { %3738 = vmatprep.subr.bf16.mxu1 %v11453_v13  ;;  %v11653_v13 = vcombine.high %v571_v8, %v575_v9  ;;  %v535_v53 = vld [vmem:[#allocation2 + $0xb70] sm:$0xff] }
 0x1b8   :  { %3696 = vmatpush2.bf16.msra.mxu0 %v11324_v18  ;;  %v11524_v18 = vcombine.low %v443_v6, %v447_v7  ;;  %v659_v56 = vld [vmem:[#allocation2 + $0xf50] sm:$0xff] }
 0x1b9   :  { %3697 = vmatprep.subr.bf16.mxu0 %v11317_v20  ;;  %v11517_v20 = vcombine.high %v435_v14, %v439_v15  ;;  %v663_v57 = vld [vmem:[#allocation2 + $0xf70] sm:$0xff] }
 0x1ba   :  { %3739 = vmatpush2.bf16.msra.mxu1 %v11452_v19  ;;  %v11652_v19 = vcombine.low %v571_v8, %v575_v9  ;;  %v523_v61 = vld [vmem:[#allocation2 + $0xb10] sm:$0xff] }
 0x1bb   :  { %3740 = vmatprep.subr.bf16.mxu1 %v11445_v22  ;;  %v11645_v22 = vcombine.high %v563_v16, %v567_v17  ;;  %v527_v62 = vld [vmem:[#allocation2 + $0xb30] sm:$0xff] }
 0x1bc   :  { %3698 = vmatpush2.bf16.msra.mxu0 %v11316_v30  ;;  %v11516_v30 = vcombine.low %v435_v14, %v439_v15  ;;  %v651_v0 = vld [vmem:[#allocation2 + $0xf10] sm:$0xff] }
 0x1bd   :  { %3753 = vmatprep.subr.bf16.mxu0 %v11565_v31  ;;  %v11509_v31 = vcombine.high %v427_v26, %v431_v27  ;;  %v655_v1 = vld [vmem:[#allocation2 + $0xf30] sm:$0xff] }
 0x1be   :  { %3741 = vmatpush2.bf16.msra.mxu1 %v11444_v59  ;;  %v11644_v59 = vcombine.low %v563_v16, %v567_v17  ;;  %v515_v6 = vld [vmem:[#allocation2 + $0xad0] sm:$0xff] }
 0x1bf   :  { %3796 = vmatprep.subr.bf16.mxu1 %v11693_v32  ;;  %3700 = vmatmul.mubr.bf16.vlgmr.msra.gmra.mxu0 %v13630_v21  ;;  %v11637_v32 = vcombine.high %v555_v28, %v559_v29  ;;  %v519_v7 = vld [vmem:[#allocation2 + $0xaf0] sm:$0xff] }
 0x1c0   :  { %3754 = vmatpush1.bf16.msra.mxu0 %v11564_v38  ;;  %3785 = vmatprep.mubr.bf16.mxu0 %v13658_v60  ;;  %v11508_v38 = vcombine.low %v427_v26, %v431_v27  ;;  %v643_v8 = vld [vmem:[#allocation2 + $0xed0] sm:$0xff] }
 0x1c1   :  { %3743 = vmatmul.mubr.bf16.vlgmr.msra.gmra.mxu1 %v13644_v25  ;;  %3755 = vmatprep.subr.bf16.mxu0 %v11557_v40  ;;  %v11629_v40 = vcombine.high %v547_v34, %v551_v35  ;;  %v647_v9 = vld [vmem:[#allocation2 + $0xef0] sm:$0xff] }
 0x1c2   :  { %3797 = vmatpush1.bf16.msra.mxu1 %v11692_v39  ;;  %3828 = vmatprep.mubr.bf16.mxu1 %v13663_v33  ;;  %v11636_v39 = vcombine.low %v555_v28, %v559_v29  ;;  %v507_v14 = vld [vmem:[#allocation2 + $0xa90] sm:$0xff] }
 0x1c3   :  { %3798 = vmatprep.subr.bf16.mxu1 %v11685_v41  ;;  %v11757_v41 = vcombine.high %v675_v36, %v679_v37  ;;  %v511_v15 = vld [vmem:[#allocation2 + $0xab0] sm:$0xff] }
 0x1c4   :  { %3756 = vmatpush1.bf16.msra.mxu0 %v11556_v48  ;;  %v11628_v48 = vcombine.low %v547_v34, %v551_v35  ;;  %v635_v16 = vld [vmem:[#allocation2 + $0xe90] sm:$0xff] }
 0x1c5   :  { %3757 = vmatprep.subr.bf16.mxu0 %v11549_v50  ;;  %v11621_v50 = vcombine.high %v539_v42, %v543_v43  ;;  %v639_v17 = vld [vmem:[#allocation2 + $0xeb0] sm:$0xff] }
 0x1c6   :  { %3799 = vmatpush1.bf16.msra.mxu1 %v11684_v49  ;;  %v11756_v49 = vcombine.low %v675_v36, %v679_v37  ;;  %v499_v26 = vld [vmem:[#allocation2 + $0xa50] sm:$0xff] }
 0x1c7   :  { %3800 = vmatprep.subr.bf16.mxu1 %v11677_v51  ;;  %v11749_v51 = vcombine.high %v667_v44, %v671_v45  ;;  %v503_v27 = vld [vmem:[#allocation2 + $0xa70] sm:$0xff] }
 0x1c8   :  { %3758 = vmatpush1.bf16.msra.mxu0 %v11548_v23  ;;  %v11620_v23 = vcombine.low %v539_v42, %v543_v43  ;;  %v627_v28 = vld [vmem:[#allocation2 + $0xe50] sm:$0xff]  ;;  %v228_v42 = vld [vmem:[#allocation2 + $0x1d8] sm:$0xff] }
 0x1c9   :  { %3759 = vmatprep.subr.bf16.mxu0 %v11541_v54  ;;  %v11613_v54 = vcombine.high %v531_v52, %v535_v53  ;;  %v631_v29 = vld [vmem:[#allocation2 + $0xe70] sm:$0xff]  ;;  %v232_v43 = vld [vmem:[#allocation2 + $0x1f8] sm:$0xff] }
 0x1ca   :  { %3801 = vmatpush1.bf16.msra.mxu1 %v11676_v24  ;;  %v11748_v24 = vcombine.low %v667_v44, %v671_v45  ;;  %v491_v34 = vld [vmem:[#allocation2 + $0xa10] sm:$0xff]  ;;  %v356_v44 = vld [vmem:[#allocation2 + $0x5d8] sm:$0xff] }
 0x1cb   :  { %3802 = vmatprep.subr.bf16.mxu1 %v11669_v55  ;;  %v11741_v55 = vcombine.high %v659_v56, %v663_v57  ;;  %v495_v35 = vld [vmem:[#allocation2 + $0xa30] sm:$0xff]  ;;  %v360_v45 = vld [vmem:[#allocation2 + $0x5f8] sm:$0xff] }
 0x1cc   :  { %3760 = vmatpush1.bf16.msra.mxu0 %v11540_v2  ;;  %v11612_v2 = vcombine.low %v531_v52, %v535_v53  ;;  %v619_v36 = vld [vmem:[#allocation2 + $0xe10] sm:$0xff]  ;;  %v220_v52 = vld [vmem:[#allocation2 + $0x198] sm:$0xff] }
 0x1cd   :  { %3761 = vmatprep.subr.bf16.mxu0 %v11533_v4  ;;  %v11605_v4 = vcombine.high %v523_v61, %v527_v62  ;;  %v623_v37 = vld [vmem:[#allocation2 + $0xe30] sm:$0xff]  ;;  %v224_v53 = vld [vmem:[#allocation2 + $0x1b8] sm:$0xff] }
 0x1ce   :  { %3803 = vmatpush1.bf16.msra.mxu1 %v11668_v3  ;;  %v11740_v3 = vcombine.low %v659_v56, %v663_v57  ;;  %v348_v56 = vld [vmem:[#allocation2 + $0x598] sm:$0xff] }
 0x1cf   :  { %3804 = vmatprep.subr.bf16.mxu1 %v11661_v5  ;;  %v11733_v5 = vcombine.high %v651_v0, %v655_v1  ;;  %v352_v57 = vld [vmem:[#allocation2 + $0x5b8] sm:$0xff] }
 0x1d0   :  { %3762 = vmatpush1.bf16.msra.mxu0 %v11532_v10  ;;  %v11604_v10 = vcombine.low %v523_v61, %v527_v62  ;;  %v212_v61 = vld [vmem:[#allocation2 + $0x158] sm:$0xff] }
 0x1d1   :  { %3763 = vmatprep.subr.bf16.mxu0 %v11525_v12  ;;  %v11597_v12 = vcombine.high %v515_v6, %v519_v7  ;;  %v216_v62 = vld [vmem:[#allocation2 + $0x178] sm:$0xff] }
 0x1d2   :  { %3805 = vmatpush1.bf16.msra.mxu1 %v11660_v11  ;;  %v11732_v11 = vcombine.low %v651_v0, %v655_v1  ;;  %v340_v0 = vld [vmem:[#allocation2 + $0x558] sm:$0xff] }
 0x1d3   :  { %3806 = vmatprep.subr.bf16.mxu1 %v11653_v13  ;;  %v11725_v13 = vcombine.high %v643_v8, %v647_v9  ;;  %v344_v1 = vld [vmem:[#allocation2 + $0x578] sm:$0xff] }
 0x1d4   :  { %3764 = vmatpush1.bf16.msra.mxu0 %v11524_v18  ;;  %v11596_v18 = vcombine.low %v515_v6, %v519_v7  ;;  %v204_v6 = vld [vmem:[#allocation2 + $0x118] sm:$0xff] }
 0x1d5   :  { %3765 = vmatprep.subr.bf16.mxu0 %v11517_v20  ;;  %v11589_v20 = vcombine.high %v507_v14, %v511_v15  ;;  %v208_v7 = vld [vmem:[#allocation2 + $0x138] sm:$0xff] }
 0x1d6   :  { %3807 = vmatpush1.bf16.msra.mxu1 %v11652_v19  ;;  %v11724_v19 = vcombine.low %v643_v8, %v647_v9  ;;  %v332_v8 = vld [vmem:[#allocation2 + $0x518] sm:$0xff] }
 0x1d7   :  { %3808 = vmatprep.subr.bf16.mxu1 %v11645_v22  ;;  %v11717_v22 = vcombine.high %v635_v16, %v639_v17  ;;  %v336_v9 = vld [vmem:[#allocation2 + $0x538] sm:$0xff] }
 0x1d8   :  { %3766 = vmatpush1.bf16.msra.mxu0 %v11516_v30  ;;  %v11588_v30 = vcombine.low %v507_v14, %v511_v15  ;;  %v196_v14 = vld [vmem:[#allocation2 + $0xd8] sm:$0xff] }
 0x1d9   :  { %3767 = vmatprep.subr.bf16.mxu0 %v11509_v31  ;;  %v11581_v31 = vcombine.high %v499_v26, %v503_v27  ;;  %v200_v15 = vld [vmem:[#allocation2 + $0xf8] sm:$0xff] }
 0x1da   :  { %3809 = vmatpush1.bf16.msra.mxu1 %v11644_v59  ;;  %v11716_v59 = vcombine.low %v635_v16, %v639_v17  ;;  %v324_v16 = vld [vmem:[#allocation2 + $0x4d8] sm:$0xff] }
 0x1db   :  { %3810 = vmatprep.subr.bf16.mxu1 %v11637_v32  ;;  %v11709_v32 = vcombine.high %v627_v28, %v631_v29  ;;  %v328_v17 = vld [vmem:[#allocation2 + $0x4f8] sm:$0xff] }
 0x1dc   :  { %3768 = vmatpush1.bf16.msra.mxu0 %v11508_v38  ;;  %v11580_v38 = vcombine.low %v499_v26, %v503_v27  ;;  %v316_v26 = vld [vmem:[#allocation2 + $0x498] sm:$0xff] }
 0x1dd   :  { %3769 = vmatprep.subr.bf16.mxu0 %v11629_v40  ;;  %v11573_v40 = vcombine.high %v491_v34, %v495_v35  ;;  %v320_v27 = vld [vmem:[#allocation2 + $0x4b8] sm:$0xff] }
 0x1de   :  { %3811 = vmatpush1.bf16.msra.mxu1 %v11636_v39  ;;  %v11708_v39 = vcombine.low %v627_v28, %v631_v29  ;;  %v11278_v28 = vcombine.low %v196_v14, %v200_v15  ;;  %v11406_v29 = vcombine.low %v324_v16, %v328_v17 }
 0x1df   :  { %3812 = vmatprep.subr.bf16.mxu1 %v11757_v41  ;;  %v11701_v41 = vcombine.high %v619_v36, %v623_v37 }
 0x1e0   :  { %3770 = vmatpush2.bf16.msra.mxu0 %v11628_v48  ;;  %v11572_v48 = vcombine.low %v491_v34, %v495_v35  ;;  %v308_v34 = vld [vmem:[#allocation2 + $0x458] sm:$0xff] }
 0x1e1   :  { %3771 = vmatprep.subr.bf16.mxu0 %v11621_v50  ;;  %v11311_v50 = vcombine.high %v228_v42, %v232_v43  ;;  %v312_v35 = vld [vmem:[#allocation2 + $0x478] sm:$0xff] }
 0x1e2   :  { %3813 = vmatpush2.bf16.msra.mxu1 %v11756_v49  ;;  %v11700_v49 = vcombine.low %v619_v36, %v623_v37  ;;  %v11398_v37 = vcombine.low %v316_v26, %v320_v27 }
 0x1e3   :  { %3814 = vmatprep.subr.bf16.mxu1 %v11749_v51  ;;  %v11439_v51 = vcombine.high %v356_v44, %v360_v45 }
 0x1e4   :  { %3772 = vmatpush2.bf16.msra.mxu0 %v11620_v23  ;;  %v11310_v23 = vcombine.low %v228_v42, %v232_v43  ;;  %v300_v42 = vld [vmem:[#allocation2 + $0x418] sm:$0xff] }
 0x1e5   :  { %3773 = vmatprep.subr.bf16.mxu0 %v11613_v54  ;;  %v11303_v54 = vcombine.high %v220_v52, %v224_v53  ;;  %v304_v43 = vld [vmem:[#allocation2 + $0x438] sm:$0xff] }
 0x1e6   :  { %3815 = vmatpush2.bf16.msra.mxu1 %v11748_v24  ;;  %v11438_v24 = vcombine.low %v356_v44, %v360_v45  ;;  %v11390_v45 = vcombine.low %v308_v34, %v312_v35 }
 0x1e7   :  { %3816 = vmatprep.subr.bf16.mxu1 %v11741_v55  ;;  %v11431_v55 = vcombine.high %v348_v56, %v352_v57 }
 0x1e8   :  { %3774 = vmatpush2.bf16.msra.mxu0 %v11612_v2  ;;  %v11302_v2 = vcombine.low %v220_v52, %v224_v53  ;;  %v420_v52 = vld [vmem:[#allocation2 + $0x7d8] sm:$0xff] }
 0x1e9   :  { %3775 = vmatprep.subr.bf16.mxu0 %v11605_v4  ;;  %v11295_v4 = vcombine.high %v212_v61, %v216_v62  ;;  %v424_v53 = vld [vmem:[#allocation2 + $0x7f8] sm:$0xff] }
 0x1ea   :  { %3817 = vmatpush2.bf16.msra.mxu1 %v11740_v3  ;;  %v11430_v3 = vcombine.low %v348_v56, %v352_v57  ;;  %v11382_v57 = vcombine.low %v300_v42, %v304_v43 }
 0x1eb   :  { %3818 = vmatprep.subr.bf16.mxu1 %v11733_v5  ;;  %v11423_v5 = vcombine.high %v340_v0, %v344_v1 }
 0x1ec   :  { %3776 = vmatpush2.bf16.msra.mxu0 %v11604_v10  ;;  %v11294_v10 = vcombine.low %v212_v61, %v216_v62  ;;  %v412_v61 = vld [vmem:[#allocation2 + $0x798] sm:$0xff] }
 0x1ed   :  { %3777 = vmatprep.subr.bf16.mxu0 %v11597_v12  ;;  %v11287_v12 = vcombine.high %v204_v6, %v208_v7  ;;  %v416_v62 = vld [vmem:[#allocation2 + $0x7b8] sm:$0xff] }
 0x1ee   :  { %3819 = vmatpush2.bf16.msra.mxu1 %v11732_v11  ;;  %v11422_v11 = vcombine.low %v340_v0, %v344_v1  ;;  %v11502_v1 = vcombine.low %v420_v52, %v424_v53 }
 0x1ef   :  { %3820 = vmatprep.subr.bf16.mxu1 %v11725_v13  ;;  %v11415_v13 = vcombine.high %v332_v8, %v336_v9 }
 0x1f0   :  { %3778 = vmatpush2.bf16.msra.mxu0 %v11596_v18  ;;  %v11286_v18 = vcombine.low %v204_v6, %v208_v7  ;;  %v404_v6 = vld [vmem:[#allocation2 + $0x758] sm:$0xff] }
 0x1f1   :  { %3779 = vmatprep.subr.bf16.mxu0 %v11589_v20  ;;  %v188_v20 = vld [vmem:[#allocation2 + $0x98] sm:$0xff] }
 0x1f2   :  { %3821 = vmatpush2.bf16.msra.mxu1 %v11724_v19  ;;  %v11279_v19 = vcombine.high %v196_v14, %v200_v15  ;;  %v408_v7 = vld [vmem:[#allocation2 + $0x778] sm:$0xff] }
 0x1f3   :  { %3822 = vmatprep.subr.bf16.mxu1 %v11717_v22  ;;  %v192_v22 = vld [vmem:[#allocation2 + $0xb8] sm:$0xff] }
 0x1f4   :  { %3780 = vmatpush2.bf16.msra.mxu0 %v11588_v30  ;;  %v11271_v30 = vcombine.high %v188_v20, %v192_v22  ;;  %v11270_v36 = vcombine.low %v188_v20, %v192_v22  ;;  %v396_v14 = vld [vmem:[#allocation2 + $0x718] sm:$0xff] }
 0x1f5   :  { %3781 = vmatprep.subr.bf16.mxu0 %v11581_v31  ;;  %v180_v31 = vld [vmem:[#allocation2 + $0x58] sm:$0xff] }
 0x1f6   :  { %3823 = vmatpush2.bf16.msra.mxu1 %v11716_v59  ;;  %v11399_v59 = vcombine.high %v316_v26, %v320_v27  ;;  %v400_v15 = vld [vmem:[#allocation2 + $0x738] sm:$0xff] }
 0x1f7   :  { %3824 = vmatprep.subr.bf16.mxu1 %v11709_v32  ;;  %v184_v32 = vld [vmem:[#allocation2 + $0x78] sm:$0xff]  ;;  %v11478_v27 = vcombine.low %v396_v14, %v400_v15 }
 0x1f8   :  { %3782 = vmatpush2.bf16.msra.mxu0 %v11580_v38  ;;  %v11263_v38 = vcombine.high %v180_v31, %v184_v32  ;;  %v11262_v44 = vcombine.low %v180_v31, %v184_v32  ;;  %v388_v20 = vld [vmem:[#allocation2 + $0x6d8] sm:$0xff] }
 0x1f9   :  { %3783 = vmatprep.subr.bf16.mxu0 %v11573_v40  ;;  %v172_v40 = vld [vmem:[#allocation2 + $0x18] sm:$0xff] }
 0x1fa   :  { %3825 = vmatpush2.bf16.msra.mxu1 %v11708_v39  ;;  %v11391_v39 = vcombine.high %v308_v34, %v312_v35  ;;  %v392_v22 = vld [vmem:[#allocation2 + $0x6f8] sm:$0xff] }
 0x1fb   :  { %3826 = vmatprep.subr.bf16.mxu1 %v11701_v41  ;;  %v176_v41 = vld [vmem:[#allocation2 + $0x38] sm:$0xff]  ;;  %v11470_v35 = vcombine.low %v388_v20, %v392_v22 }
 0x1fc   :  { %3784 = vmatpush2.bf16.msra.mxu0 %v11572_v48  ;;  %v11255_v48 = vcombine.high %v172_v40, %v176_v41  ;;  %v11254_v56 = vcombine.low %v172_v40, %v176_v41  ;;  %v380_v31 = vld [vmem:[#allocation2 + $0x698] sm:$0xff] }
 0x1fd   :  { %3839 = vmatprep.subr.bf16.mxu0 %v11311_v50  ;;  %v292_v50 = vld [vmem:[#allocation2 + $0x3d8] sm:$0xff] }
 0x1fe   :  { %3827 = vmatpush2.bf16.msra.mxu1 %v11700_v49  ;;  %v11383_v49 = vcombine.high %v300_v42, %v304_v43  ;;  %v384_v32 = vld [vmem:[#allocation2 + $0x6b8] sm:$0xff] }
 0x1ff   :  { %3882 = vmatprep.subr.bf16.mxu1 %v11439_v51  ;;  %3786 = vmatmul.mubr.bf16.vlgmr.msra.gmra.mxu0 %v13670_v46  ;;  %v296_v51 = vld [vmem:[#allocation2 + $0x3f8] sm:$0xff]  ;;  %v11462_v43 = vcombine.low %v380_v31, %v384_v32 }
 0x200   :  { %3840 = vmatpush1.bf16.msra.mxu0 %v11310_v23  ;;  %3871 = vmatprep.mubr.bf16.mxu0 %v13610_v58  ;;  %v11414_v58 = vcombine.low %v332_v8, %v336_v9  ;;  %v11375_v23 = vcombine.high %v292_v50, %v296_v51  ;;  %v11374_v0 = vcombine.low %v292_v50, %v296_v51  ;;  %v372_v40 = vld [vmem:[#allocation2 + $0x658] sm:$0xff] }
 0x201   :  { %3829 = vmatmul.mubr.bf16.vlgmr.msra.gmra.mxu1 %v13674_v47  ;;  %3841 = vmatprep.subr.bf16.mxu0 %v11303_v54  ;;  %v284_v54 = vld [vmem:[#allocation2 + $0x398] sm:$0xff]  ;;  %v11494_v9 = vcombine.low %v412_v61, %v416_v62 }
 0x202   :  { %3883 = vmatpush1.bf16.msra.mxu1 %v11438_v24  ;;  %3914 = vmatprep.mubr.bf16.mxu1 %v13624_v63  ;;  %v11407_v63 = vcombine.high %v324_v16, %v328_v17  ;;  %v11503_v24 = vcombine.high %v420_v52, %v424_v53  ;;  %v11486_v17 = vcombine.low %v404_v6, %v408_v7  ;;  %v376_v41 = vld [vmem:[#allocation2 + $0x678] sm:$0xff] }
 0x203   :  { %3884 = vmatprep.subr.bf16.mxu1 %v11431_v55  ;;  %v288_v55 = vld [vmem:[#allocation2 + $0x3b8] sm:$0xff]  ;;  %v11454_v53 = vcombine.low %v372_v40, %v376_v41 }
 0x204   :  { %3842 = vmatpush1.bf16.msra.mxu0 %v11302_v2  ;;  %v11367_v2 = vcombine.high %v284_v54, %v288_v55  ;;  %v11366_v8 = vcombine.low %v284_v54, %v288_v55  ;;  %v364_v50 = vld [vmem:[#allocation2 + $0x618] sm:$0xff] }
 0x205   :  { %3843 = vmatprep.subr.bf16.mxu0 %v11295_v4  ;;  %v276_v4 = vld [vmem:[#allocation2 + $0x358] sm:$0xff] }
 0x206   :  { %3885 = vmatpush1.bf16.msra.mxu1 %v11430_v3  ;;  %v11495_v3 = vcombine.high %v412_v61, %v416_v62  ;;  %v368_v51 = vld [vmem:[#allocation2 + $0x638] sm:$0xff] }
 0x207   :  { %3886 = vmatprep.subr.bf16.mxu1 %v11423_v5  ;;  %v280_v5 = vld [vmem:[#allocation2 + $0x378] sm:$0xff]  ;;  %v11446_v62 = vcombine.low %v364_v50, %v368_v51 }
 0x208   :  { %3844 = vmatpush1.bf16.msra.mxu0 %v11294_v10  ;;  %v11359_v10 = vcombine.high %v276_v4, %v280_v5  ;;  %v11358_v16 = vcombine.low %v276_v4, %v280_v5  ;;  %v612_v54 = vld [vmem:[#allocation2 + $0xdd8] sm:$0xff] }
 0x209   :  { %3845 = vmatprep.subr.bf16.mxu0 %v11287_v12  ;;  %v268_v12 = vld [vmem:[#allocation2 + $0x318] sm:$0xff] }
 0x20a   :  { %3887 = vmatpush1.bf16.msra.mxu1 %v11422_v11  ;;  %v11487_v11 = vcombine.high %v404_v6, %v408_v7  ;;  %v616_v55 = vld [vmem:[#allocation2 + $0xdf8] sm:$0xff] }
 0x20b   :  { %3888 = vmatprep.subr.bf16.mxu1 %v11415_v13  ;;  %v272_v13 = vld [vmem:[#allocation2 + $0x338] sm:$0xff]  ;;  %v11694_v7 = vcombine.low %v612_v54, %v616_v55 }
 0x20c   :  { %3846 = vmatpush1.bf16.msra.mxu0 %v11286_v18  ;;  %v11351_v18 = vcombine.high %v268_v12, %v272_v13  ;;  %v11350_v26 = vcombine.low %v268_v12, %v272_v13  ;;  %v604_v4 = vld [vmem:[#allocation2 + $0xd98] sm:$0xff] }
 0x20d   :  { %3847 = vmatprep.subr.bf16.mxu0 %v11279_v19  ;;  %v260_v19 = vld [vmem:[#allocation2 + $0x2d8] sm:$0xff] }
 0x20e   :  { %3889 = vmatpush1.bf16.msra.mxu1 %v11414_v58  ;;  %v11479_v58 = vcombine.high %v396_v14, %v400_v15  ;;  %v608_v5 = vld [vmem:[#allocation2 + $0xdb8] sm:$0xff] }
 0x20f   :  { %3890 = vmatprep.subr.bf16.mxu1 %v11407_v63  ;;  %v264_v63 = vld [vmem:[#allocation2 + $0x2f8] sm:$0xff]  ;;  %v11686_v15 = vcombine.low %v604_v4, %v608_v5 }
 0x210   :  { %3848 = vmatpush1.bf16.msra.mxu0 %v11278_v28  ;;  %v11343_v28 = vcombine.high %v260_v19, %v264_v63  ;;  %v11342_v34 = vcombine.low %v260_v19, %v264_v63  ;;  %v596_v12 = vld [vmem:[#allocation2 + $0xd58] sm:$0xff] }
 0x211   :  { %3849 = vmatprep.subr.bf16.mxu0 %v11271_v30  ;;  %v252_v30 = vld [vmem:[#allocation2 + $0x298] sm:$0xff] }
 0x212   :  { %3891 = vmatpush1.bf16.msra.mxu1 %v11406_v29  ;;  %v11471_v29 = vcombine.high %v388_v20, %v392_v22  ;;  %v600_v13 = vld [vmem:[#allocation2 + $0xd78] sm:$0xff] }
 0x213   :  { %3892 = vmatprep.subr.bf16.mxu1 %v11399_v59  ;;  %v256_v59 = vld [vmem:[#allocation2 + $0x2b8] sm:$0xff] }
 0x214   :  { %3850 = vmatpush1.bf16.msra.mxu0 %v11270_v36  ;;  %v11335_v36 = vcombine.high %v252_v30, %v256_v59  ;;  %v11334_v42 = vcombine.low %v252_v30, %v256_v59  ;;  %v588_v19 = vld [vmem:[#allocation2 + $0xd18] sm:$0xff] }
 0x215   :  { %3851 = vmatprep.subr.bf16.mxu0 %v11263_v38  ;;  %v244_v38 = vld [vmem:[#allocation2 + $0x258] sm:$0xff] }
 0x216   :  { %3893 = vmatpush1.bf16.msra.mxu1 %v11398_v37  ;;  %v11463_v37 = vcombine.high %v380_v31, %v384_v32  ;;  %v592_v63 = vld [vmem:[#allocation2 + $0xd38] sm:$0xff] }
 0x217   :  { %3894 = vmatprep.subr.bf16.mxu1 %v11391_v39  ;;  %v248_v39 = vld [vmem:[#allocation2 + $0x278] sm:$0xff]  ;;  %v11671_v22 = vcombine.high %v588_v19, %v592_v63 }
 0x218   :  { %3852 = vmatpush1.bf16.msra.mxu0 %v11262_v44  ;;  %v11327_v44 = vcombine.high %v244_v38, %v248_v39  ;;  %v11326_v52 = vcombine.low %v244_v38, %v248_v39  ;;  %v444_v31 = vld [vmem:[#allocation2 + $0x898] sm:$0xff] }
 0x219   :  { %3853 = vmatprep.subr.bf16.mxu0 %v11255_v48  ;;  %v236_v48 = vld [vmem:[#allocation2 + $0x218] sm:$0xff] }
 0x21a   :  { %3895 = vmatpush1.bf16.msra.mxu1 %v11390_v45  ;;  %v11455_v45 = vcombine.high %v372_v40, %v376_v41  ;;  %v448_v32 = vld [vmem:[#allocation2 + $0x8b8] sm:$0xff] }
 0x21b   :  { %3896 = vmatprep.subr.bf16.mxu1 %v11383_v49  ;;  %v240_v49 = vld [vmem:[#allocation2 + $0x238] sm:$0xff]  ;;  %v11527_v38 = vcombine.high %v444_v31, %v448_v32 }
 0x21c   :  { %3854 = vmatpush1.bf16.msra.mxu0 %v11254_v56  ;;  %v11319_v56 = vcombine.high %v236_v48, %v240_v49  ;;  %v11318_v61 = vcombine.low %v236_v48, %v240_v49  ;;  %v436_v40 = vld [vmem:[#allocation2 + $0x858] sm:$0xff] }
 0x21d   :  { %3855 = vmatprep.subr.bf16.mxu0 %v11375_v23  ;;  %v484_v23 = vld [vmem:[#allocation2 + $0x9d8] sm:$0xff] }
 0x21e   :  { %3897 = vmatpush1.bf16.msra.mxu1 %v11382_v57  ;;  %v11447_v57 = vcombine.high %v364_v50, %v368_v51  ;;  %v440_v41 = vld [vmem:[#allocation2 + $0x878] sm:$0xff] }
 0x21f   :  { %3898 = vmatprep.subr.bf16.mxu1 %v11503_v24  ;;  %v488_v24 = vld [vmem:[#allocation2 + $0x9f8] sm:$0xff]  ;;  %v11519_v48 = vcombine.high %v436_v40, %v440_v41 }
 0x220   :  { %3856 = vmatpush2.bf16.msra.mxu0 %v11374_v0  ;;  %v11567_v0 = vcombine.high %v484_v23, %v488_v24  ;;  %v11566_v6 = vcombine.low %v484_v23, %v488_v24  ;;  %v428_v50 = vld [vmem:[#allocation2 + $0x818] sm:$0xff] }
 0x221   :  { %3857 = vmatprep.subr.bf16.mxu0 %v11367_v2  ;;  %v476_v2 = vld [vmem:[#allocation2 + $0x998] sm:$0xff] }
 0x222   :  { %3899 = vmatpush2.bf16.msra.mxu1 %v11502_v1  ;;  %v11695_v1 = vcombine.high %v612_v54, %v616_v55  ;;  %v432_v51 = vld [vmem:[#allocation2 + $0x838] sm:$0xff] }
 0x223   :  { %3900 = vmatprep.subr.bf16.mxu1 %v11495_v3  ;;  %v480_v3 = vld [vmem:[#allocation2 + $0x9b8] sm:$0xff]  ;;  %v11511_v23 = vcombine.high %v428_v50, %v432_v51 }
 0x224   :  { %3858 = vmatpush2.bf16.msra.mxu0 %v11366_v8  ;;  %v11559_v8 = vcombine.high %v476_v2, %v480_v3  ;;  %v11558_v14 = vcombine.low %v476_v2, %v480_v3  ;;  %v548_v54 = vld [vmem:[#allocation2 + $0xbd8] sm:$0xff] }
 0x225   :  { %3859 = vmatprep.subr.bf16.mxu0 %v11359_v10  ;;  %v468_v10 = vld [vmem:[#allocation2 + $0x958] sm:$0xff] }
 0x226   :  { %3901 = vmatpush2.bf16.msra.mxu1 %v11494_v9  ;;  %v11687_v9 = vcombine.high %v604_v4, %v608_v5  ;;  %v552_v55 = vld [vmem:[#allocation2 + $0xbf8] sm:$0xff] }
 0x227   :  { %3902 = vmatprep.subr.bf16.mxu1 %v11487_v11  ;;  %v472_v11 = vld [vmem:[#allocation2 + $0x978] sm:$0xff]  ;;  %v11631_v2 = vcombine.high %v548_v54, %v552_v55 }
 0x228   :  { %3860 = vmatpush2.bf16.msra.mxu0 %v11358_v16  ;;  %v11551_v16 = vcombine.high %v468_v10, %v472_v11  ;;  %v540_v4 = vld [vmem:[#allocation2 + $0xb98] sm:$0xff] }
 0x229   :  { %3861 = vmatprep.subr.bf16.mxu0 %v11351_v18  ;;  %v460_v18 = vld [vmem:[#allocation2 + $0x918] sm:$0xff] }
 0x22a   :  { %3903 = vmatpush2.bf16.msra.mxu1 %v11486_v17  ;;  %v11679_v17 = vcombine.high %v596_v12, %v600_v13  ;;  %v544_v5 = vld [vmem:[#allocation2 + $0xbb8] sm:$0xff] }
 0x22b   :  { %3904 = vmatprep.subr.bf16.mxu1 %v11479_v58  ;;  %v464_v58 = vld [vmem:[#allocation2 + $0x938] sm:$0xff] }
 0x22c   :  { %3862 = vmatpush2.bf16.msra.mxu0 %v11350_v26  ;;  %v11543_v20 = vcombine.high %v460_v18, %v464_v58  ;;  %v452_v26 = vld [vmem:[#allocation2 + $0x8d8] sm:$0xff]  ;;  %v11542_v30 = vcombine.low %v460_v18, %v464_v58 }
 0x22d   :  { %3863 = vmatprep.subr.bf16.mxu0 %v11343_v28  ;;  %v580_v28 = vld [vmem:[#allocation2 + $0xcd8] sm:$0xff] }
 0x22e   :  { %3905 = vmatpush2.bf16.msra.mxu1 %v11478_v27  ;;  %v456_v27 = vld [vmem:[#allocation2 + $0x8f8] sm:$0xff] }
 0x22f   :  { %3906 = vmatprep.subr.bf16.mxu1 %v11471_v29  ;;  %v584_v29 = vld [vmem:[#allocation2 + $0xcf8] sm:$0xff]  ;;  %v11535_v59 = vcombine.high %v452_v26, %v456_v27 }
 0x230   :  { %3864 = vmatpush2.bf16.msra.mxu0 %v11342_v34  ;;  %v572_v34 = vld [vmem:[#allocation2 + $0xc98] sm:$0xff] }
 0x231   :  { %3865 = vmatprep.subr.bf16.mxu0 %v11335_v36  ;;  %v11534_v36 = vcombine.low %v452_v26, %v456_v27 }
 0x232   :  { %3907 = vmatpush2.bf16.msra.mxu1 %v11470_v35  ;;  %v576_v35 = vld [vmem:[#allocation2 + $0xcb8] sm:$0xff] }
 0x233   :  { %3908 = vmatprep.subr.bf16.mxu1 %v11463_v37  ;;  %v11662_v37 = vcombine.low %v580_v28, %v584_v29  ;;  %v11655_v39 = vcombine.high %v572_v34, %v576_v35 }
 0x234   :  { %3866 = vmatpush2.bf16.msra.mxu0 %v11334_v42  ;;  %v564_v42 = vld [vmem:[#allocation2 + $0xc58] sm:$0xff] }
 0x235   :  { %3867 = vmatprep.subr.bf16.mxu0 %v11327_v44  ;;  %v11526_v44 = vcombine.low %v444_v31, %v448_v32 }
 0x236   :  { %3909 = vmatpush2.bf16.msra.mxu1 %v11462_v43  ;;  %v568_v43 = vld [vmem:[#allocation2 + $0xc78] sm:$0xff] }
 0x237   :  { %3910 = vmatprep.subr.bf16.mxu1 %v11455_v45  ;;  %v11654_v45 = vcombine.low %v572_v34, %v576_v35  ;;  %v11647_v49 = vcombine.high %v564_v42, %v568_v43  ;;  %v508_v34 = vld [vmem:[#allocation2 + $0xa98] sm:$0xff] }
 0x238   :  { %3868 = vmatpush2.bf16.msra.mxu0 %v11326_v52  ;;  %v556_v52 = vld [vmem:[#allocation2 + $0xc18] sm:$0xff] }
 0x239   :  { %3869 = vmatprep.subr.bf16.mxu0 %v11319_v56  ;;  %v11518_v56 = vcombine.low %v436_v40, %v440_v41  ;;  %v512_v35 = vld [vmem:[#allocation2 + $0xab8] sm:$0xff] }
 0x23a   :  { %3911 = vmatpush2.bf16.msra.mxu1 %v11454_v53  ;;  %v560_v53 = vld [vmem:[#allocation2 + $0xc38] sm:$0xff]  ;;  %v11591_v40 = vcombine.high %v508_v34, %v512_v35 }
 0x23b   :  { %3912 = vmatprep.subr.bf16.mxu1 %v11447_v57  ;;  %v11646_v57 = vcombine.low %v564_v42, %v568_v43  ;;  %v11639_v24 = vcombine.high %v556_v52, %v560_v53  ;;  %v500_v42 = vld [vmem:[#allocation2 + $0xa58] sm:$0xff] }
 0x23c   :  { %3870 = vmatpush2.bf16.msra.mxu0 %v11318_v61  ;;  %v676_v61 = vld [vmem:[#allocation2 + $0xfd8] sm:$0xff] }
 0x23d   :  { %3925 = vmatprep.subr.bf16.mxu0 %v11567_v0  ;;  %v11510_v0 = vcombine.low %v428_v50, %v432_v51  ;;  %v504_v43 = vld [vmem:[#allocation2 + $0xa78] sm:$0xff] }
 0x23e   :  { %3913 = vmatpush2.bf16.msra.mxu1 %v11446_v62  ;;  %v680_v62 = vld [vmem:[#allocation2 + $0xff8] sm:$0xff]  ;;  %v11583_v50 = vcombine.high %v500_v42, %v504_v43 }
 0x23f   :  { %3968 = vmatprep.subr.bf16.mxu1 %v11695_v1  ;;  %3872 = vmatmul.mubr.bf16.vlgmr.msra.gmra.mxu0 %v13630_v21  ;;  %v11550_v21 = vcombine.low %v468_v10, %v472_v11  ;;  %v11638_v1 = vcombine.low %v556_v52, %v560_v53  ;;  %v11759_v3 = vcombine.high %v676_v61, %v680_v62  ;;  %v492_v52 = vld [vmem:[#allocation2 + $0xa18] sm:$0xff] }
 0x240   :  { %3926 = vmatpush1.bf16.msra.mxu0 %v11566_v6  ;;  %3957 = vmatprep.mubr.bf16.mxu0 %v13658_v60  ;;  %v11670_v60 = vcombine.low %v588_v19, %v592_v63  ;;  %v668_v6 = vld [vmem:[#allocation2 + $0xf98] sm:$0xff]  ;;  %v11623_v10 = vcombine.high %v540_v4, %v544_v5 }
 0x241   :  { %3915 = vmatmul.mubr.bf16.vlgmr.msra.gmra.mxu1 %v13644_v25  ;;  %3927 = vmatprep.subr.bf16.mxu0 %v11559_v8  ;;  %v11678_v25 = vcombine.low %v596_v12, %v600_v13  ;;  %v11630_v8 = vcombine.low %v548_v54, %v552_v55  ;;  %v532_v12 = vld [vmem:[#allocation2 + $0xb58] sm:$0xff] }
 0x242   :  { %3969 = vmatpush1.bf16.msra.mxu1 %v11694_v7  ;;  %4000 = vmatprep.mubr.bf16.mxu1 %v13663_v33  ;;  %v11663_v33 = vcombine.high %v580_v28, %v584_v29  ;;  %v672_v7 = vld [vmem:[#allocation2 + $0xfb8] sm:$0xff] }
 0x243   :  { %3970 = vmatprep.subr.bf16.mxu1 %v11687_v9  ;;  %v11758_v9 = vcombine.low %v676_v61, %v680_v62  ;;  %v11751_v11 = vcombine.high %v668_v6, %v672_v7  ;;  %v536_v13 = vld [vmem:[#allocation2 + $0xb78] sm:$0xff] }
 0x244   :  { %3928 = vmatpush1.bf16.msra.mxu0 %v11558_v14  ;;  %v660_v14 = vld [vmem:[#allocation2 + $0xf58] sm:$0xff]  ;;  %v11615_v18 = vcombine.high %v532_v12, %v536_v13 }
 0x245   :  { %3929 = vmatprep.subr.bf16.mxu0 %v11551_v16  ;;  %v11622_v16 = vcombine.low %v540_v4, %v544_v5  ;;  %v524_v19 = vld [vmem:[#allocation2 + $0xb18] sm:$0xff] }
 0x246   :  { %3971 = vmatpush1.bf16.msra.mxu1 %v11686_v15  ;;  %v664_v15 = vld [vmem:[#allocation2 + $0xf78] sm:$0xff] }
 0x247   :  { %3972 = vmatprep.subr.bf16.mxu1 %v11679_v17  ;;  %v11750_v17 = vcombine.low %v668_v6, %v672_v7  ;;  %v11743_v58 = vcombine.high %v660_v14, %v664_v15  ;;  %v528_v63 = vld [vmem:[#allocation2 + $0xb38] sm:$0xff] }
 0x248   :  { %3930 = vmatpush1.bf16.msra.mxu0 %v11550_v21  ;;  %v652_v21 = vld [vmem:[#allocation2 + $0xf18] sm:$0xff]  ;;  %v11607_v26 = vcombine.high %v524_v19, %v528_v63 }
 0x249   :  { %3931 = vmatprep.subr.bf16.mxu0 %v11543_v20  ;;  %v11614_v20 = vcombine.low %v532_v12, %v536_v13  ;;  %v516_v28 = vld [vmem:[#allocation2 + $0xad8] sm:$0xff] }
 0x24a   :  { %3973 = vmatpush1.bf16.msra.mxu1 %v11678_v25  ;;  %v656_v25 = vld [vmem:[#allocation2 + $0xf38] sm:$0xff] }
 0x24b   :  { %3974 = vmatprep.subr.bf16.mxu1 %v11671_v22  ;;  %v11742_v22 = vcombine.low %v660_v14, %v664_v15  ;;  %v11735_v27 = vcombine.high %v652_v21, %v656_v25  ;;  %v520_v29 = vld [vmem:[#allocation2 + $0xaf8] sm:$0xff] }
 0x24c   :  { %3932 = vmatpush1.bf16.msra.mxu0 %v11542_v30  ;;  %v644_v30 = vld [vmem:[#allocation2 + $0xed8] sm:$0xff]  ;;  %v11599_v31 = vcombine.high %v516_v28, %v520_v29 }
 0x24d   :  { %3933 = vmatprep.subr.bf16.mxu0 %v11535_v59  ;;  %v11606_v59 = vcombine.low %v524_v19, %v528_v63  ;;  %v496_v53 = vld [vmem:[#allocation2 + $0xa38] sm:$0xff] }
 0x24e   :  { %3975 = vmatpush1.bf16.msra.mxu1 %v11670_v60  ;;  %v648_v60 = vld [vmem:[#allocation2 + $0xef8] sm:$0xff]  ;;  %v11575_v54 = vcombine.high %v492_v52, %v496_v53  ;;  %v11574_v61 = vcombine.low %v492_v52, %v496_v53 }
 0x24f   :  { %3976 = vmatprep.subr.bf16.mxu1 %v11663_v33  ;;  %v11734_v33 = vcombine.low %v652_v21, %v656_v25  ;;  %v11727_v32 = vcombine.high %v644_v30, %v648_v60  ;;  %v4470_v5 = vld [vmem:[#allocation10 + $0x5e0] sm:$0xff] }
 0x250   :  { %3934 = vmatpush1.bf16.msra.mxu0 %v11534_v36  ;;  %v636_v36 = vld [vmem:[#allocation2 + $0xe98] sm:$0xff] }
 0x251   :  { %3935 = vmatprep.subr.bf16.mxu0 %v11527_v38  ;;  %v11598_v38 = vcombine.low %v516_v28, %v520_v29  ;;  %v4330_v6 = vld [vmem:[#allocation10 + $0x180] sm:$0xff] }
 0x252   :  { %3977 = vmatpush1.bf16.msra.mxu1 %v11662_v37  ;;  %v640_v37 = vld [vmem:[#allocation2 + $0xeb8] sm:$0xff] }
 0x253   :  { %3978 = vmatprep.subr.bf16.mxu1 %v11655_v39  ;;  %v11726_v39 = vcombine.low %v644_v30, %v648_v60  ;;  %v11719_v41 = vcombine.high %v636_v36, %v640_v37  ;;  %v4334_v7 = vld [vmem:[#allocation10 + $0x1a0] sm:$0xff] }
 0x254   :  { %3936 = vmatpush1.bf16.msra.mxu0 %v11526_v44  ;;  %v628_v44 = vld [vmem:[#allocation2 + $0xe58] sm:$0xff] }
 0x255   :  { %3937 = vmatprep.subr.bf16.mxu0 %v11519_v48  ;;  %v11590_v48 = vcombine.low %v508_v34, %v512_v35  ;;  %v4462_v12 = vld [vmem:[#allocation10 + $0x5a0] sm:$0xff] }
 0x256   :  { %3979 = vmatpush1.bf16.msra.mxu1 %v11654_v45  ;;  %v632_v45 = vld [vmem:[#allocation2 + $0xe78] sm:$0xff] }
 0x257   :  { %3980 = vmatprep.subr.bf16.mxu1 %v11647_v49  ;;  %v11718_v49 = vcombine.low %v636_v36, %v640_v37  ;;  %v11711_v51 = vcombine.high %v628_v44, %v632_v45  ;;  %v4322_v13 = vld [vmem:[#allocation10 + $0x140] sm:$0xff]  ;;  %v13704_v37 = vpop.f32.mrf.mxu1 }
 0x258   :  { %3938 = vmatpush1.bf16.msra.mxu0 %v11518_v56  ;;  %v620_v56 = vld [vmem:[#allocation2 + $0xe18] sm:$0xff] }
 0x259   :  { %3939 = vmatprep.subr.bf16.mxu0 %v11511_v23  ;;  %v11582_v23 = vcombine.low %v500_v42, %v504_v43  ;;  %v4326_v15 = vld [vmem:[#allocation10 + $0x160] sm:$0xff] }
 0x25a   :  { %3981 = vmatpush1.bf16.msra.mxu1 %v11646_v57  ;;  %v624_v57 = vld [vmem:[#allocation2 + $0xe38] sm:$0xff] }
 0x25b   :  { %3982 = vmatprep.subr.bf16.mxu1 %v11639_v24  ;;  %v11710_v24 = vcombine.low %v628_v44, %v632_v45  ;;  %v11703_v55 = vcombine.high %v620_v56, %v624_v57  ;;  %v11702_v62 = vcombine.low %v620_v56, %v624_v57  ;;  %v4314_v19 = vld [vmem:[#allocation10 + $0x100] sm:$0xff]  ;;  %v3402_v45 = vpop.f32.mrf.mxu1 }
 0x25c   :  { %3940 = vmatpush1.bf16.msra.mxu0 %v11510_v0  ;;  %v4338_v0 = vld [vmem:[#allocation10 + $0x1c0] sm:$0xff] }
 0x25d   :  { %3941 = vmatprep.subr.bf16.mxu0 %v11631_v2  ;;  %v4466_v2 = vld [vmem:[#allocation10 + $0x5c0] sm:$0xff] }
 0x25e   :  { %3983 = vmatpush1.bf16.msra.mxu1 %v11638_v1  ;;  %v4342_v1 = vld [vmem:[#allocation10 + $0x1e0] sm:$0xff] }
 0x25f   :  { %3984 = vmatprep.subr.bf16.mxu1 %v11759_v3  ;;  %v11816_v3 = vcombine.low %v4338_v0, %v4342_v1  ;;  %v11817_v4 = vcombine.high %v4338_v0, %v4342_v1  ;;  %v4318_v63 = vld [vmem:[#allocation10 + $0x120] sm:$0xff] }
 0x260   :  { %3942 = vmatpush2.bf16.msra.mxu0 %v11630_v8  ;;  %v11944_v8 = vcombine.low %v4466_v2, %v4470_v5  ;;  %v4442_v21 = vld [vmem:[#allocation10 + $0x500] sm:$0xff] }
 0x261   :  { %3943 = vmatprep.subr.bf16.mxu0 %v11623_v10  ;;  %v11809_v10 = vcombine.high %v4330_v6, %v4334_v7  ;;  %v4446_v25 = vld [vmem:[#allocation10 + $0x520] sm:$0xff] }
 0x262   :  { %3985 = vmatpush2.bf16.msra.mxu1 %v11758_v9  ;;  %v11945_v9 = vcombine.high %v4466_v2, %v4470_v5  ;;  %v4306_v28 = vld [vmem:[#allocation10 + $0xc0] sm:$0xff] }
 0x263   :  { %3986 = vmatprep.subr.bf16.mxu1 %v11751_v11  ;;  %v4458_v11 = vld [vmem:[#allocation10 + $0x580] sm:$0xff] }
 0x264   :  { %3944 = vmatpush2.bf16.msra.mxu0 %v11622_v16  ;;  %v11937_v14 = vcombine.high %v4458_v11, %v4462_v12  ;;  %v4454_v16 = vld [vmem:[#allocation10 + $0x560] sm:$0xff] }
 0x265   :  { %3945 = vmatprep.subr.bf16.mxu0 %v11615_v18  ;;  %v11801_v18 = vcombine.high %v4322_v13, %v4326_v15  ;;  %v4310_v29 = vld [vmem:[#allocation10 + $0xe0] sm:$0xff] }
 0x266   :  { %3987 = vmatpush2.bf16.msra.mxu1 %v11750_v17  ;;  %v11936_v17 = vcombine.low %v4458_v11, %v4462_v12  ;;  %v4434_v30 = vld [vmem:[#allocation10 + $0x4c0] sm:$0xff] }
 0x267   :  { %3988 = vmatprep.subr.bf16.mxu1 %v11743_v58  ;;  %v4438_v60 = vld [vmem:[#allocation10 + $0x4e0] sm:$0xff] }
 0x268   :  { %3946 = vmatpush2.bf16.msra.mxu0 %v11614_v20  ;;  %v11800_v20 = vcombine.low %v4322_v13, %v4326_v15  ;;  %v11913_v34 = vcombine.high %v4434_v30, %v4438_v60  ;;  %v4298_v35 = vld [vmem:[#allocation10 + $0x80] sm:$0xff]  ;;  %v11912_v42 = vcombine.low %v4434_v30, %v4438_v60  ;;  %v683_v15 = vlaneseq }
 0x269   :  { %3947 = vmatprep.subr.bf16.mxu0 %v11607_v26  ;;  %v11793_v26 = vcombine.high %v4314_v19, %v4318_v63  ;;  %v4302_v36 = vld [vmem:[#allocation10 + $0xa0] sm:$0xff] }
 0x26a   :  { %3989 = vmatpush2.bf16.msra.mxu1 %v11742_v22  ;;  %v11777_v43 = vcombine.high %v4298_v35, %v4302_v36 }
 0x26b   :  { %3990 = vmatprep.subr.bf16.mxu1 %v11735_v27  ;;  %v11921_v27 = vcombine.high %v4442_v21, %v4446_v25 }
 0x26c   :  { %3948 = vmatpush2.bf16.msra.mxu0 %v11606_v59  ;;  %v11792_v59 = vcombine.low %v4314_v19, %v4318_v63  ;;  %v13747_v63 = vld [vmem:[#allocation5] sm:$0xff] }
 0x26d   :  { %3949 = vmatprep.subr.bf16.mxu0 %v11599_v31  ;;  %v11920_v31 = vcombine.low %v4442_v21, %v4446_v25 }
 0x26e   :  { %3991 = vmatpush2.bf16.msra.mxu1 %v11734_v33  ;;  %v13702_v33 = vpop.f32.mrf.mxu0 }
 0x26f   :  { %3992 = vmatprep.subr.bf16.mxu1 %v11727_v32  ;;  %v11785_v32 = vcombine.high %v4306_v28, %v4310_v29 }
 0x270   :  { %3950 = vmatpush2.bf16.msra.mxu0 %v11598_v38  ;;  %v4426_v38 = vld [vmem:[#allocation10 + $0x480] sm:$0xff] }
 0x271   :  { %3951 = vmatprep.subr.bf16.mxu0 %v11591_v40  ;;  %v11784_v40 = vcombine.low %v4306_v28, %v4310_v29 }
 0x272   :  { %3993 = vmatpush2.bf16.msra.mxu1 %v11726_v39  ;;  %v4430_v39 = vld [vmem:[#allocation10 + $0x4a0] sm:$0xff] }
 0x273   :  { %3994 = vmatprep.subr.bf16.mxu1 %v11719_v41  ;;  %v3359_v41 = vpop.f32.mrf.mxu0  ;;  %v11905_v44 = vcombine.high %v4426_v38, %v4430_v39 }
 0x274   :  { %3952 = vmatpush2.bf16.msra.mxu0 %v11590_v48  ;;  %v11776_v48 = vcombine.low %v4298_v35, %v4302_v36 }
 0x275   :  { %3953 = vmatprep.subr.bf16.mxu0 %v11583_v50  ;;  %v11904_v50 = vcombine.low %v4426_v38, %v4430_v39 }
 0x276   :  { %3995 = vmatpush2.bf16.msra.mxu1 %v11718_v49  ;;  %v3361_v49 = vpop.f32.mrf.mxu0 }
 0x277   :  { %3996 = vmatprep.subr.bf16.mxu1 %v11711_v51  ;;  %v13706_v51 = vpop.f32.mrf.mxu1 }
 0x278   :  { %3954 = vmatpush2.bf16.msra.mxu0 %v11582_v23  ;;  %v3363_v52 = vpop.f32.mrf.mxu0 }
 0x279   :  { %3955 = vmatprep.subr.bf16.mxu0 %v11575_v54  ;;  %v13708_v53 = vpop.f32.mrf.mxu1 }
 0x27a   :  { %3997 = vmatpush2.bf16.msra.mxu1 %v11710_v24  ;;  %v3443_v56 = vpop.f32.mrf.mxu0 }
 0x27b   :  { %3998 = vmatprep.subr.bf16.mxu1 %v11703_v55  ;;  %v13710_v57 = vpop.f32.mrf.mxu1 }
 0x27c   :  { %3956 = vmatpush2.bf16.msra.mxu0 %v11574_v61  ;;  %v3445_v23 = vpop.f32.mrf.mxu0 }
 0x27d   :  { %7396 = vmatprep.subr.bf16.mxu0 %v11817_v4  ;;  %v13712_v24 = vpop.f32.mrf.mxu1 }
 0x27e   :  { %3999 = vmatpush2.bf16.msra.mxu1 %v11702_v62  ;;  %v13714_v54 = vpop.f32.mrf.mxu0 }
 0x27f   :  { %3958 = vmatmul.mubr.bf16.vlgmr.msra.gmra.mxu0 %v13670_v46  ;;  %v4450_v46 = vld [vmem:[#allocation10 + $0x540] sm:$0xff]  ;;  %7439 = vmatprep.subr.bf16.mxu1 %v11945_v9  ;;  %v13716_v55 = vpop.f32.mrf.mxu1 }
 0x280   :  { %7397 = vmatpush1.bf16.msra.mxu0 %v11816_v3  ;;  %v11929_v58 = vcombine.high %v4450_v46, %v4454_v16  ;;  %v11928_v22 = vcombine.low %v4450_v46, %v4454_v16  ;;  %v13718_v61 = vpop.f32.mrf.mxu0 }
 0x281   :  { %4001 = vmatmul.mubr.bf16.vlgmr.msra.gmra.mxu1 %v13674_v47  ;;  %v11808_v47 = vcombine.low %v4330_v6, %v4334_v7  ;;  %7398 = vmatprep.subr.bf16.mxu0 %v11809_v10  ;;  %v13720_v62 = vpop.f32.mrf.mxu1 }
 0x282   :  { %7440 = vmatpush1.bf16.msra.mxu1 %v11944_v8  ;;  %v3529_v0 = vpop.f32.mrf.mxu0 }
 0x283   :  { %7441 = vmatprep.subr.bf16.mxu1 %v11937_v14  ;;  %v3572_v1 = vpop.f32.mrf.mxu1 }
 0x284   :  { %7399 = vmatpush1.bf16.msra.mxu0 %v11808_v47  ;;  %v3531_v2 = vpop.f32.mrf.mxu0 }
 0x285   :  { %7400 = vmatprep.subr.bf16.mxu0 %v11801_v18  ;;  %v13722_v3 = vpop.f32.mrf.mxu1 }
 0x286   :  { %7442 = vmatpush1.bf16.msra.mxu1 %v11936_v17  ;;  %v3533_v4 = vpop.f32.mrf.mxu0  ;;  %v13740_v17 = vshrl.u32 %v683_v15, 7 }
 0x287   :  { %7443 = vmatprep.subr.bf16.mxu1 %v11929_v58  ;;  %v3576_v5 = vpop.f32.mrf.mxu1 }
 0x288   :  { %7401 = vmatpush1.bf16.msra.mxu0 %v11800_v20  ;;  %v3535_v6 = vpop.f32.mrf.mxu0  ;;  %v13745_v19 = vsub.s32 1, %v13740_v17  ;;  %v13750_v25 = vsub.s32 0, %v13740_v17  ;;  %v13774_v38 = vsub.s32 4, %v13740_v17 }
 0x289   :  { %7402 = vmatprep.subr.bf16.mxu0 %v11793_v26  ;;  %v13724_v7 = vpop.f32.mrf.mxu1  ;;  %v13757_v26 = vsub.s32 2, %v13740_v17 }
 0x28a   :  { %7444 = vmatpush1.bf16.msra.mxu1 %v11928_v22  ;;  %v3615_v8 = vpop.f32.mrf.mxu0  ;;  %14508 = vst [vmem:[#allocation27_spill] sm:$0xff] %v13745_v19  ;;  %14509 = vst [vmem:[#allocation28_spill] sm:$0xff] %v13750_v25  ;;  %v690_v22 = vrot.slane %v13747_v63, %v13745_v19  ;;  %v686_v28 = vrot.slane %v13747_v63, %v13750_v25 }
 0x28b   :  { %7445 = vmatprep.subr.bf16.mxu1 %v11921_v27  ;;  %v13726_v9 = vpop.f32.mrf.mxu1  ;;  %14510 = vst [vmem:[#allocation29_spill] sm:$0xff] %v13757_v26  ;;  %14512 = vst [vmem:[#allocation31_spill] sm:$0xff] %v13774_v38 }
 0x28c   :  { %7403 = vmatpush1.bf16.msra.mxu0 %v11792_v59  ;;  %v13728_v10 = vpop.f32.mrf.mxu0  ;;  %v3360_v60 = vadd.f32 %v3359_v41, %v690_v22  ;;  %v694_v59 = vrot.slane %v13747_v63, %v13757_v26  ;;  %v3362_v39 = vadd.f32 %v3361_v49, %v686_v28 }
 0x28d   :  { %7404 = vmatprep.subr.bf16.mxu0 %v11785_v32  ;;  %v13730_v11 = vpop.f32.mrf.mxu1 }
 0x28e   :  { %7446 = vmatpush1.bf16.msra.mxu1 %v11920_v31  ;;  %v3619_v12 = vpop.f32.mrf.mxu0  ;;  %v13766_v31 = vsub.s32 3, %v13740_v17  ;;  %v3403_v36 = vadd.f32 %v3402_v45, %v3360_v60  ;;  %v13784_v45 = vsub.s32 5, %v13740_v17  ;;  %v3405_v49 = vadd.f32 %v13706_v51, %v3362_v39 }
 0x28f   :  { %7447 = vmatprep.subr.bf16.mxu1 %v11913_v34  ;;  %v13732_v13 = vpop.f32.mrf.mxu1  ;;  %v3358_v34 = vadd.f32 %v13702_v33, %v686_v28  ;;  %v702_v33 = vrot.slane %v13747_v63, %v13774_v38  ;;  %v13824_v39 = vsub.s32 7, %v13740_v17 }
 0x290   :  { %7405 = vmatpush1.bf16.msra.mxu0 %v11784_v40  ;;  %v13734_v14 = vpop.f32.mrf.mxu0  ;;  %14511 = vst [vmem:[#allocation30_spill] sm:$0xff] %v13766_v31  ;;  %v3530_v40 = vadd.f32 %v3529_v0, %v694_v59  ;;  %v698_v41 = vrot.slane %v13747_v63, %v13766_v31  ;;  %14513 = vst [vmem:[#allocation32_spill] sm:$0xff] %v13784_v45  ;;  %v706_v51 = vrot.slane %v13747_v63, %v13784_v45 }
 0x291   :  { %7406 = vmatprep.subr.bf16.mxu0 %v11777_v43  ;;  %v13736_v46 = vpop.f32.mrf.mxu1  ;;  %v3364_v43 = vadd.f32 %v3363_v52, %v690_v22  ;;  %14515 = vst [vmem:[#allocation34_spill] sm:$0xff] %v13824_v39 }
 0x292   :  { %7448 = vmatpush1.bf16.msra.mxu1 %v11912_v42  ;;  %v3701_v16 = vpop.f32.mrf.mxu0  ;;  %v3573_v28 = vadd.f32 %v3572_v1, %v3530_v40  ;;  %v3532_v60 = vadd.f32 %v3531_v2, %v698_v41 }
 0x293   :  { %7449 = vmatprep.subr.bf16.mxu1 %v11905_v44  ;;  %v13738_v47 = vpop.f32.mrf.mxu1  ;;  %v3446_v44 = vadd.f32 %v3445_v23, %v3403_v36  ;;  %v3407_v25 = vadd.f32 %v13708_v53, %v3364_v43  ;;  %v3702_v36 = vadd.f32 %v3701_v16, %v702_v33 }
 0x294   :  { %7407 = vmatpush1.bf16.msra.mxu0 %v11776_v48  ;;  %v3703_v18 = vpop.f32.mrf.mxu0  ;;  %v3401_v48 = vadd.f32 %v13704_v37, %v3358_v34  ;;  %v3448_v37 = vadd.f32 %v13714_v54, %v3405_v49  ;;  %v3536_v34 = vadd.f32 %v3535_v6, %v698_v41  ;;  %v3575_v53 = vadd.f32 %v13722_v3, %v3532_v60 }
 0x295   :  { %v13742_v58 = vpop.f32.mrf.mxu1  ;;  %v13789_v52 = vadd.f32 %v13712_v24, %v3446_v44 }
 0x296   :  { %7450 = vmatpush1.bf16.msra.mxu1 %v11904_v50  ;;  %v3705_v21 = vpop.f32.mrf.mxu0  ;;  %v3534_v50 = vadd.f32 %v3533_v4, %v694_v59  ;;  %v3444_v0 = vadd.f32 %v3443_v56, %v3401_v48  ;;  %v3616_v4 = vadd.f32 %v3615_v8, %v3573_v28  ;;  %v3450_v59 = vadd.f32 %v13718_v61, %v3407_v25 }
 0x297   :  { %v13752_v20 = vpop.f32.mrf.mxu1  ;;  %v4033_v54 = vmul.f32 %v13789_v52, %v13789_v52  ;;  %v13802_v8 = vadd.f32 %v13716_v55, %v3448_v37  ;;  %v3618_v6 = vadd.f32 %v13728_v10, %v3575_v53  ;;  %v3745_v25 = vadd.f32 %v13738_v47, %v3702_v36 }
 0x298   :  { %v3707_v27 = vpop.f32.mrf.mxu0  ;;  %v3577_v23 = vadd.f32 %v3576_v5, %v3534_v50  ;;  %v13796_v56 = vadd.f32 %v13710_v57, %v3444_v0  ;;  %v3706_v5 = vadd.f32 %v3705_v21, %v702_v33  ;;  %v13805_v61 = vadd.f32 %v13726_v9, %v3616_v4 }
 0x299   :  { %v13761_v29 = vpop.f32.mrf.mxu1  ;;  %v13809_v57 = vsub.s32 6, %v13740_v17  ;;  %v13812_v3 = vadd.f32 %v13720_v62, %v3450_v59  ;;  %v3704_v21 = vadd.f32 %v3703_v18, %v706_v51  ;;  %v3708_v41 = vadd.f32 %v3707_v27, %v706_v51 }
 0x29a   :  { %v3620_v1 = vadd.f32 %v3619_v12, %v3577_v23  ;;  %v3579_v12 = vadd.f32 %v13724_v7, %v3536_v34  ;;  %v4032_v55 = vmul.f32 %v13796_v56, %v13796_v56  ;;  %v4011_v9 = vadd.f32 %v13789_v52, %v13796_v56 }
 0x29b   :  { %14514 = vst [vmem:[#allocation33_spill] sm:$0xff] %v13809_v57  ;;  %v3749_v7 = vadd.f32 %v13752_v20, %v3706_v5  ;;  %v4034_v43 = vmul.f32 %v13805_v61, %v13805_v61  ;;  %v13831_v44 = vadd.f32 %v13730_v11, %v3618_v6  ;;  %v4040_v17 = vmul.f32 %v13802_v8, %v13802_v8 }
 0x29c   :  { %v13821_v10 = vadd.f32 %v13732_v13, %v3620_v1  ;;  %v3622_v62 = vadd.f32 %v13734_v14, %v3579_v12  ;;  %v4048_v18 = vadd.f32 %v4033_v54, %v4032_v55  ;;  %v710_v13 = vrot.slane %v13747_v63, %v13809_v57 }
 0x29d   :  { %v4041_v14 = vmul.f32 %v13812_v3, %v13812_v3  ;;  %v3747_v20 = vadd.f32 %v13742_v58, %v3704_v21  ;;  %v4012_v50 = vadd.f32 %v4011_v9, %v13805_v61  ;;  %v714_v33 = vrot.slane %v13747_v63, %v13824_v39 }
 0x29e   :  { %v4042_v11 = vmul.f32 %v13821_v10, %v13821_v10  ;;  %v13848_v0 = vadd.f32 %v13736_v46, %v3622_v62  ;;  %v3751_v28 = vadd.f32 %v13761_v29, %v3708_v41  ;;  %v4049_v60 = vadd.f32 %v4048_v18, %v4034_v43 }
 0x29f   :  { %v4035_v37 = vmul.f32 %v13831_v44, %v13831_v44  ;;  %v4057_v59 = vadd.f32 %v4041_v14, %v4040_v17  ;;  %v4013_v36 = vadd.f32 %v4012_v50, %v13831_v44 }
 0x2bf   :  { %v3787_v30 = vpop.f32.mrf.mxu0 }
 0x2c0   :  { %v3788_v47 = vadd.f32 %v3787_v30, %v3745_v25  ;;  %v4020_v30 = vadd.f32 %v13812_v3, %v13802_v8 }
 0x2c1   :  { %v13768_v32 = vpop.f32.mrf.mxu1  ;;  %v13771_v35 = vpop.f32.mrf.mxu0 }
 0x2c2   :  { %v13852_v58 = vadd.f32 %v13768_v32, %v3788_v47  ;;  %v4021_v63 = vadd.f32 %v4020_v30, %v13821_v10  ;;  %v4058_v32 = vadd.f32 %v4057_v59, %v4042_v11 }
 0x2c3   :  { %v13778_v42 = vpop.f32.mrf.mxu1  ;;  %v3791_v15 = vpop.f32.mrf.mxu0 }
 0x2c4   :  { %v3792_v27 = vadd.f32 %v3791_v15, %v3749_v7  ;;  %v3790_v15 = vadd.f32 %v13771_v35, %v3747_v20  ;;  %v4043_v35 = vmul.f32 %v13848_v0, %v13848_v0  ;;  %v4036_v53 = vmul.f32 %v13852_v58, %v13852_v58 }
 0x2c5   :  { %v3834_v26 = vpop.f32.mrf.mxu1  ;;  %v3793_v22 = vpop.f32.mrf.mxu0  ;;  %v4014_v54 = vadd.f32 %v4013_v36, %v13852_v58  ;;  %v4022_v6 = vadd.f32 %v4021_v63, %v13848_v0 }
 0x2c6   :  { %v13858_v34 = vadd.f32 %v3834_v26, %v3792_v27  ;;  %v3794_v46 = vadd.f32 %v3793_v22, %v3751_v28  ;;  %v13866_v1 = vadd.f32 %v13778_v42, %v3790_v15  ;;  %v4059_v42 = vadd.f32 %v4058_v32, %v4043_v35 }
 0x2c7   :  { %v3836_v24 = vpop.f32.mrf.mxu1 }
 0x2c8   :  { %v4044_v12 = vmul.f32 %v13858_v34, %v13858_v34  ;;  %v13872_v25 = vadd.f32 %v3836_v24, %v3794_v46  ;;  %v4037_v7 = vmul.f32 %v13866_v1, %v13866_v1  ;;  %v4015_v24 = vadd.f32 %v4014_v54, %v13866_v1 }
 0x2ca   :  { %v4060_v14 = vadd.f32 %v4059_v42, %v4044_v12  ;;  %v4286_v42 = vld [vmem:[#allocation10 + $0x20] sm:$0xff] }
 0x2ff   :  { %v3873_v2 = vpop.f32.mrf.mxu0 }
 0x300   :  { %v3874_v23 = vadd.f32 %v3873_v2, %v710_v13  ;;  %v4050_v2 = vadd.f32 %v4049_v60, %v4035_v37 }
 0x301   :  { %v3916_v16 = vpop.f32.mrf.mxu1  ;;  %v3875_v40 = vpop.f32.mrf.mxu0 }
 0x302   :  { %v3876_v29 = vadd.f32 %v3875_v40, %v714_v33  ;;  %v3917_v26 = vadd.f32 %v3916_v16, %v3874_v23  ;;  %v4023_v16 = vadd.f32 %v4022_v6, %v13858_v34  ;;  %v4051_v47 = vadd.f32 %v4050_v2, %v4036_v53  ;;  %v4418_v6 = vld [vmem:[#allocation10 + $0x440] sm:$0xff] }
 0x303   :  { %v3918_v48 = vpop.f32.mrf.mxu1  ;;  %v3877_v49 = vpop.f32.mrf.mxu0 }
 0x304   :  { %v3878_v5 = vadd.f32 %v3877_v49, %v710_v13  ;;  %v3919_v9 = vadd.f32 %v3918_v48, %v3876_v29  ;;  %v4045_v48 = vmul.f32 %v13872_v25, %v13872_v25  ;;  %v4024_v28 = vadd.f32 %v4023_v16, %v13872_v25 }
 0x305   :  { %v3920_v4 = vpop.f32.mrf.mxu1  ;;  %v3879_v51 = vpop.f32.mrf.mxu0  ;;  %v4052_v60 = vadd.f32 %v4051_v47, %v4037_v7  ;;  %v4410_v7 = vld [vmem:[#allocation10 + $0x400] sm:$0xff] }
 0x306   :  { %v3880_v21 = vadd.f32 %v3879_v51, %v714_v33  ;;  %v3921_v18 = vadd.f32 %v3920_v4, %v3878_v5  ;;  %v4061_v32 = vadd.f32 %v4060_v14, %v4045_v48  ;;  %v4290_v5 = vld [vmem:[#allocation10 + $0x40] sm:$0xff] }
 0x307   :  { %v3922_v22 = vpop.f32.mrf.mxu1  ;;  %v4530_v14 = vld [vmem:[#allocation10 + $0x7c0] sm:$0xff] }
 0x308   :  { %v3923_v20 = vadd.f32 %v3922_v22, %v3880_v21  ;;  %v4294_v22 = vld [vmem:[#allocation10 + $0x60] sm:$0xff] }
 0x309   :  { %v11769_v12 = vcombine.high %v4290_v5, %v4294_v22  ;;  %v4422_v21 = vld [vmem:[#allocation10 + $0x460] sm:$0xff] }
 0x30b   :  { %7408 = vmatprep.subr.bf16.mxu0 %v11769_v12 }
 0x33f   :  { %v3959_v55 = vpop.f32.mrf.mxu0 }
 0x340   :  { %v3960_v40 = vadd.f32 %v3959_v55, %v3917_v26  ;;  %v11768_v55 = vcombine.low %v4290_v5, %v4294_v22  ;;  %v4506_v22 = vld [vmem:[#allocation10 + $0x700] sm:$0xff] }
 0x341   :  { %v4002_v62 = vpop.f32.mrf.mxu1  ;;  %v3961_v41 = vpop.f32.mrf.mxu0 }
 0x342   :  { %v13877_v43 = vadd.f32 %v4002_v62, %v3960_v40  ;;  %v3962_v13 = vadd.f32 %v3961_v41, %v3919_v9  ;;  %v11896_v9 = vcombine.low %v4418_v6, %v4422_v21  ;;  %v11897_v40 = vcombine.high %v4418_v6, %v4422_v21  ;;  %7409 = vmatpush1.bf16.msra.mxu0 %v11768_v55  ;;  %v4282_v62 = vld [vmem:[#allocation10] sm:$0xff] }
 0x343   :  { %v4004_v17 = vpop.f32.mrf.mxu1  ;;  %v3963_v27 = vpop.f32.mrf.mxu0  ;;  %v11761_v16 = vcombine.high %v4282_v62, %v4286_v42  ;;  %v4414_v41 = vld [vmem:[#allocation10 + $0x420] sm:$0xff]  ;;  %v11760_v47 = vcombine.low %v4282_v62, %v4286_v42 }
 0x344   :  { %14516 = vst [vmem:[#allocation35_spill] sm:$0xff] %v13877_v43  ;;  %v13882_v30 = vadd.f32 %v4004_v17, %v3962_v13  ;;  %v3964_v50 = vadd.f32 %v3963_v27, %v3921_v18  ;;  %v4016_v33 = vadd.f32 %v4015_v24, %v13877_v43  ;;  %v4038_v49 = vmul.f32 %v13877_v43, %v13877_v43  ;;  %v4402_v17 = vld [vmem:[#allocation10 + $0x3c0] sm:$0xff] }
 0x345   :  { %v4006_v11 = vpop.f32.mrf.mxu1  ;;  %v3965_v15 = vpop.f32.mrf.mxu0  ;;  %7451 = vmatprep.subr.bf16.mxu1 %v11897_v40  ;;  %v11888_v18 = vcombine.low %v4410_v7, %v4414_v41  ;;  %v11889_v13 = vcombine.high %v4410_v7, %v4414_v41  ;;  %7410 = vmatprep.subr.bf16.mxu0 %v11761_v16  ;;  %v4406_v24 = vld [vmem:[#allocation10 + $0x3e0] sm:$0xff] }
 0x346   :  { %v13888_v37 = vadd.f32 %v4006_v11, %v3964_v50  ;;  %v3966_v23 = vadd.f32 %v3965_v15, %v3923_v20  ;;  %v4017_v4 = vadd.f32 %v4016_v33, %v13882_v30  ;;  %v4039_v59 = vmul.f32 %v13882_v30, %v13882_v30  ;;  %7452 = vmatpush1.bf16.msra.mxu1 %v11896_v9  ;;  %v4534_v20 = vld [vmem:[#allocation10 + $0x7e0] sm:$0xff] }
 0x347   :  { %v4008_v63 = vpop.f32.mrf.mxu1  ;;  %v4053_v46 = vadd.f32 %v4052_v60, %v4038_v49  ;;  %7453 = vmatprep.subr.bf16.mxu1 %v11889_v13  ;;  %7411 = vmatpush1.bf16.msra.mxu0 %v11760_v47  ;;  %v11881_v48 = vcombine.high %v4402_v17, %v4406_v24  ;;  %v11880_v27 = vcombine.low %v4402_v17, %v4406_v24  ;;  %v4394_v33 = vld [vmem:[#allocation10 + $0x380] sm:$0xff] }
 0x348   :  { %14517 = vst [vmem:[#allocation36_spill] sm:$0xff] %v13888_v37  ;;  %v4046_v36 = vmul.f32 %v13888_v37, %v13888_v37  ;;  %v13895_v29 = vadd.f32 %v4008_v63, %v3966_v23  ;;  %4018 = vadd.xlane.f32.xlu0 %v4017_v4  ;;  %v4025_v51 = vadd.f32 %v4024_v28, %v13888_v37  ;;  %v4398_v49 = vld [vmem:[#allocation10 + $0x3a0] sm:$0xff] }
 0x349   :  { %v4054_v35 = vadd.f32 %v4053_v46, %v4039_v59  ;;  %v12008_v50 = vcombine.low %v4530_v14, %v4534_v20  ;;  %v12009_v11 = vcombine.high %v4530_v14, %v4534_v20  ;;  %7412 = vmatprep.subr.bf16.mxu0 %v11881_v48  ;;  %v4522_v28 = vld [vmem:[#allocation10 + $0x780] sm:$0xff]  ;;  %v11873_v15 = vcombine.high %v4394_v33, %v4398_v49 }
 0x34a   :  { %v4026_v53 = vadd.f32 %v4025_v51, %v13895_v29  ;;  %v4047_v2 = vmul.f32 %v13895_v29, %v13895_v29  ;;  %v4062_v54 = vadd.f32 %v4061_v32, %v4046_v36  ;;  %7454 = vmatpush1.bf16.msra.mxu1 %v11888_v18  ;;  %v4526_v60 = vld [vmem:[#allocation10 + $0x7a0] sm:$0xff]  ;;  %v11872_v23 = vcombine.low %v4394_v33, %v4398_v49 }
 0x34b   :  { %4055 = vadd.xlane.f32.xlu1 %v4054_v35  ;;  %7455 = vmatprep.subr.bf16.mxu1 %v12009_v11  ;;  %v12000_v4 = vcombine.low %v4522_v28, %v4526_v60  ;;  %v12001_v59 = vcombine.high %v4522_v28, %v4526_v60  ;;  %v4386_v63 = vld [vmem:[#allocation10 + $0x340] sm:$0xff] }
 0x34c   :  { %4027 = vadd.xlane.f32.xlu0 %v4026_v53  ;;  %v4063_v26 = vadd.f32 %v4062_v54, %v4047_v2  ;;  %7413 = vmatpush2.bf16.msra.mxu0 %v11880_v27  ;;  %v4390_v46 = vld [vmem:[#allocation10 + $0x360] sm:$0xff] }
 0x34d   :  { %7414 = vmatprep.subr.bf16.mxu0 %v11873_v15  ;;  %v4514_v36 = vld [vmem:[#allocation10 + $0x740] sm:$0xff]  ;;  %v11864_v51 = vcombine.low %v4386_v63, %v4390_v46  ;;  %v11865_v32 = vcombine.high %v4386_v63, %v4390_v46 }
 0x34e   :  { %7456 = vmatpush2.bf16.msra.mxu1 %v12008_v50  ;;  %v4518_v35 = vld [vmem:[#allocation10 + $0x760] sm:$0xff] }
 0x34f   :  { %4064 = vadd.xlane.f32.xlu1 %v4063_v26  ;;  %7457 = vmatprep.subr.bf16.mxu1 %v12001_v59  ;;  %v4378_v53 = vld [vmem:[#allocation10 + $0x300] sm:$0xff]  ;;  %v11992_v54 = vcombine.low %v4514_v36, %v4518_v35  ;;  %v11993_v26 = vcombine.high %v4514_v36, %v4518_v35 }
 0x350   :  { %7415 = vmatpush2.bf16.msra.mxu0 %v11872_v23  ;;  %v4382_v2 = vld [vmem:[#allocation10 + $0x320] sm:$0xff] }
 0x351   :  { %v11857_v5 = vcombine.high %v4378_v53, %v4382_v2  ;;  %v4510_v6 = vld [vmem:[#allocation10 + $0x720] sm:$0xff]  ;;  %7416 = vmatprep.subr.bf16.mxu0 %v11865_v32  ;;  %v11856_v62 = vcombine.low %v4378_v53, %v4382_v2 }
 0x352   :  { %7458 = vmatpush2.bf16.msra.mxu1 %v12000_v4  ;;  %v11985_v12 = vcombine.high %v4506_v22, %v4510_v6  ;;  %v4370_v21 = vld [vmem:[#allocation10 + $0x2c0] sm:$0xff]  ;;  %v11984_v42 = vcombine.low %v4506_v22, %v4510_v6 }
 0x353   :  { %v4374_v55 = vld [vmem:[#allocation10 + $0x2e0] sm:$0xff]  ;;  %7459 = vmatprep.subr.bf16.mxu1 %v11993_v26 }
 0x354   :  { %v4498_v9 = vld [vmem:[#allocation10 + $0x6c0] sm:$0xff]  ;;  %7417 = vmatpush2.bf16.msra.mxu0 %v11864_v51  ;;  %v11849_v7 = vcombine.high %v4370_v21, %v4374_v55  ;;  %v11848_v17 = vcombine.low %v4370_v21, %v4374_v55 }
 0x355   :  { %v4502_v40 = vld [vmem:[#allocation10 + $0x6e0] sm:$0xff]  ;;  %7418 = vmatprep.subr.bf16.mxu0 %v11857_v5 }
 0x356   :  { %7460 = vmatpush2.bf16.msra.mxu1 %v11992_v54  ;;  %v11977_v16 = vcombine.high %v4498_v9, %v4502_v40  ;;  %v4362_v41 = vld [vmem:[#allocation10 + $0x280] sm:$0xff]  ;;  %v11976_v24 = vcombine.low %v4498_v9, %v4502_v40 }
 0x357   :  { %7461 = vmatprep.subr.bf16.mxu1 %v11985_v12  ;;  %v4366_v47 = vld [vmem:[#allocation10 + $0x2a0] sm:$0xff] }
 0x358   :  { %v4490_v18 = vld [vmem:[#allocation10 + $0x680] sm:$0xff]  ;;  %7419 = vmatpush2.bf16.msra.mxu0 %v11856_v62  ;;  %v11841_v14 = vcombine.high %v4362_v41, %v4366_v47  ;;  %v11840_v33 = vcombine.low %v4362_v41, %v4366_v47 }
 0x359   :  { %v4494_v13 = vld [vmem:[#allocation10 + $0x6a0] sm:$0xff]  ;;  %7420 = vmatprep.subr.bf16.mxu0 %v11849_v7 }
 0x35a   :  { %7462 = vmatpush2.bf16.msra.mxu1 %v11984_v42  ;;  %v11969_v48 = vcombine.high %v4490_v18, %v4494_v13  ;;  %v4354_v20 = vld [vmem:[#allocation10 + $0x240] sm:$0xff]  ;;  %v11968_v49 = vcombine.low %v4490_v18, %v4494_v13 }
 0x35b   :  { %7463 = vmatprep.subr.bf16.mxu1 %v11977_v16  ;;  %v4358_v27 = vld [vmem:[#allocation10 + $0x260] sm:$0xff] }
 0x35c   :  { %v4482_v50 = vld [vmem:[#allocation10 + $0x640] sm:$0xff]  ;;  %7421 = vmatpush2.bf16.msra.mxu0 %v11848_v17  ;;  %v11833_v28 = vcombine.high %v4354_v20, %v4358_v27  ;;  %v11832_v63 = vcombine.low %v4354_v20, %v4358_v27  ;;  %v4078_v20 = vld [vmem:[#allocation7] sm:$0xff]  ;;  %v4136_v27 = vld [vmem:[#allocation8] sm:$0xff] }
 0x35d   :  { %v4486_v11 = vld [vmem:[#allocation10 + $0x660] sm:$0xff]  ;;  %7422 = vmatprep.subr.bf16.mxu0 %v11841_v14 }
 0x35e   :  { %7464 = vmatpush2.bf16.msra.mxu1 %v11976_v24  ;;  %v11961_v15 = vcombine.high %v4482_v50, %v4486_v11  ;;  %v4346_v60 = vld [vmem:[#allocation10 + $0x200] sm:$0xff]  ;;  %v11960_v46 = vcombine.low %v4482_v50, %v4486_v11  ;;  %v4087_v50 = vrot.slane %v4078_v20, %v13745_v19 }
 0x35f   :  { %7465 = vmatprep.subr.bf16.mxu1 %v11969_v48  ;;  %v4350_v23 = vld [vmem:[#allocation10 + $0x220] sm:$0xff] }
 0x360   :  { %v4474_v4 = vld [vmem:[#allocation10 + $0x600] sm:$0xff]  ;;  %7423 = vmatpush2.bf16.msra.mxu0 %v11840_v33  ;;  %v11825_v36 = vcombine.high %v4346_v60, %v4350_v23  ;;  %v11824_v32 = vcombine.low %v4346_v60, %v4350_v23  ;;  %v13929_v33 = vrot.slane %v4136_v27, %v13745_v19  ;;  %v14519_v60 = vld [vmem:[#allocation29_spill] sm:$0xff] }
 0x361   :  { %v4478_v59 = vld [vmem:[#allocation10 + $0x620] sm:$0xff]  ;;  %7424 = vmatprep.subr.bf16.mxu0 %v11833_v28  ;;  %v4091_v23 = vrot.slane %v4078_v20, %v14519_v60 }
 0x362   :  { %7466 = vmatpush2.bf16.msra.mxu1 %v11968_v49  ;;  %v11953_v51 = vcombine.high %v4474_v4, %v4478_v59  ;;  %v11952_v35 = vcombine.low %v4474_v4, %v4478_v59  ;;  %v13901_v53 = vld [vmem:[#allocation10 + $0x9c0] sm:$0xff]  ;;  %v4095_v49 = vrot.slane %v4078_v20, %v13766_v31 }
 0x363   :  { %7467 = vmatprep.subr.bf16.mxu1 %v11961_v15  ;;  %v13903_v2 = vld [vmem:[#allocation10 + $0x9e0] sm:$0xff] }
 0x364   :  { %7425 = vmatpush2.bf16.msra.mxu0 %v11832_v63  ;;  %v13905_v54 = vld [vmem:[#allocation10 + $0xdc0] sm:$0xff]  ;;  %v12073_v26 = vcombine.high %v13901_v53, %v13903_v2 }
 0x365   :  { %7426 = vmatprep.subr.bf16.mxu0 %v11825_v36  ;;  %v13909_v5 = vld [vmem:[#allocation10 + $0xde0] sm:$0xff] }
 0x366   :  { %7468 = vmatpush2.bf16.msra.mxu1 %v11960_v46  ;;  %v12201_v12 = vcombine.high %v13905_v54, %v13909_v5  ;;  %v13926_v11 = vld [vmem:[#allocation10 + $0x980] sm:$0xff]  ;;  %v13941_v46 = vrot.slane %v4136_v27, %v13766_v31 }
 0x367   :  { %7469 = vmatprep.subr.bf16.mxu1 %v11953_v51  ;;  %v14518_v28 = vld [vmem:[#allocation28_spill] sm:$0xff]  ;;  %v13947_v51 = vrot.slane %v4136_v27, %v14519_v60 }
 0x368   :  { %7427 = vmatpush2.bf16.msra.mxu0 %v11824_v32  ;;  %v4083_v15 = vrot.slane %v4078_v20, %v14518_v28  ;;  %v13934_v4 = vld [vmem:[#allocation10 + $0x9a0] sm:$0xff]  ;;  %v13944_v36 = vrot.slane %v4136_v27, %v14518_v28  ;;  %v13950_v32 = vrot.slane %v4078_v20, %v13784_v45 }
 0x369   :  { %7482 = vmatprep.subr.bf16.mxu0 %v12073_v26  ;;  %v13936_v59 = vld [vmem:[#allocation10 + $0xd80] sm:$0xff] }
 0x36a   :  { %7470 = vmatpush2.bf16.msra.mxu1 %v11952_v35  ;;  %v13938_v63 = vld [vmem:[#allocation10 + $0xda0] sm:$0xff] }
 0x36b   :  { %7525 = vmatprep.subr.bf16.mxu1 %v12201_v12  ;;  %v13952_v35 = vld [vmem:[#allocation10 + $0x940] sm:$0xff] }
 0x36c   :  { %v13954_v26 = vld [vmem:[#allocation10 + $0x960] sm:$0xff] }
 0x36d   :  { %v13956_v12 = vld [vmem:[#allocation10 + $0xd40] sm:$0xff] }
 0x36e   :  { %14520 = vst [vmem:[#allocation37_spill] sm:$0xff] %v13956_v12 }
 0x3d1   :  { %v4019_v21 = vpop.xlane.xlu0 %4018 }
 0x3d2   :  { %v13917_v55 = vmul.f32 0.0009765625, %v4019_v21  ;;  %v13959_v21 = vrot.slane %v4136_v27, %v13784_v45 }
 0x3d4   :  { %v4056_v9 = vpop.xlane.xlu1 %4055  ;;  %v4068_v40 = vmul.f32 %v13917_v55, %v13917_v55 }
 0x3d5   :  { %v4066_v62 = vmul.f32 0.0009765625, %v4056_v9  ;;  %v4028_v42 = vpop.xlane.xlu0 %4027  ;;  %v13962_v9 = vrot.slane %v4078_v20, %v13824_v39 }
 0x3d6   :  { %v13921_v7 = vmul.f32 0.0009765625, %v4028_v42  ;;  %v13968_v42 = vld [vmem:[#allocation10 + $0x920] sm:$0xff] }
 0x3d7   :  { %v4070_v16 = vsub.f32 %v4066_v62, %v4068_v40  ;;  %v13964_v40 = vld [vmem:[#allocation10 + $0xd60] sm:$0xff]  ;;  %14523 = vst [vmem:[#allocation40_spill] sm:$0xff] %v13968_v42 }
 0x3d8   :  { %v4065_v41 = vpop.xlane.xlu1 %4064  ;;  %v4069_v47 = vmul.f32 %v13921_v7, %v13921_v7  ;;  %14521 = vst [vmem:[#allocation38_spill] sm:$0xff] %v13964_v40  ;;  %v13966_v62 = vld [vmem:[#allocation10 + $0x900] sm:$0xff] }
 0x3d9   :  { %v4072_v18 = vmax.f32 %v4070_v16, 0.0  ;;  %v4067_v13 = vmul.f32 0.0009765625, %v4065_v41  ;;  %14522 = vst [vmem:[#allocation39_spill] sm:$0xff] %v13966_v62  ;;  %v13971_v16 = vrot.slane %v4078_v20, %v13774_v38  ;;  %v13974_v41 = vrot.slane %v4078_v20, %v13809_v57 }
 0x3db   :  { %v4074_v17 = vadd.f32 1e-05, %v4072_v18  ;;  %v4071_v24 = vsub.f32 %v4067_v13, %v4069_v47  ;;  %v13977_v47 = vrot.slane %v4136_v27, %v13824_v39  ;;  %v13982_v13 = vrot.slane %v4136_v27, %v13774_v38 }
 0x3dd   :  { %13249 = vrsqrt.f32 %v4074_v17  ;;  %v4073_v14 = vmax.f32 %v4071_v24, 0.0  ;;  %v13985_v17 = vrot.slane %v4136_v27, %v13809_v57 }
 0x3df   :  { %v4075_v48 = vadd.f32 1e-05, %v4073_v14  ;;  %14524 = vst [vmem:[#allocation41_spill] sm:$0xff] %v13985_v17 }
 0x3e1   :  { %13251 = vrsqrt.f32 %v4075_v48 }
 0x3ea   :  { %v13250_v6 = vpop.eup %13249 }
 0x3eb   :  { %v4121_v14 = vmul.f32 %v13250_v6, %v4087_v50  ;;  %v4123_v39 = vmul.f32 %v13250_v6, %v4095_v49  ;;  %v4120_v57 = vmul.f32 %v13250_v6, %v4083_v15  ;;  %v4122_v48 = vmul.f32 %v13250_v6, %v4091_v23 }
 0x3ec   :  { %v4125_v45 = vmul.f32 %v13250_v6, %v13950_v32  ;;  %v14005_v20 = vmul.f32 %v13250_v6, %v13962_v9  ;;  %v14008_v18 = vmul.f32 %v13250_v6, %v13971_v16  ;;  %v14011_v27 = vmul.f32 %v13250_v6, %v13974_v41 }
 0x3ed   :  { %v4138_v22 = vmul.f32 %v4121_v14, %v13917_v55  ;;  %v4211_v38 = vmul.f32 %v4121_v14, %v13789_v52  ;;  %v4140_v24 = vmul.f32 %v4123_v39, %v13917_v55  ;;  %v4213_v31 = vmul.f32 %v4123_v39, %v13831_v44 }
 0x3ee   :  { %v14017_v60 = vpop.eup %13251  ;;  %v4137_v28 = vmul.f32 %v4120_v57, %v13917_v55  ;;  %v4210_v19 = vmul.f32 %v4120_v57, %v13796_v56  ;;  %v4139_v62 = vmul.f32 %v4122_v48, %v13917_v55  ;;  %v4212_v42 = vmul.f32 %v4122_v48, %v13805_v61 }
 0x3ef   :  { %v4129_v6 = vmul.f32 %v14017_v60, %v4087_v50  ;;  %v4195_v37 = vsub.f32 %v13929_v33, %v4138_v22  ;;  %v4131_v52 = vmul.f32 %v14017_v60, %v4095_v49  ;;  %v4197_v14 = vsub.f32 %v13941_v46, %v4140_v24 }
 0x3f0   :  { %v4128_v39 = vmul.f32 %v14017_v60, %v4083_v15  ;;  %v4194_v44 = vsub.f32 %v13944_v36, %v4137_v28  ;;  %v4130_v40 = vmul.f32 %v14017_v60, %v4091_v23  ;;  %v4196_v56 = vsub.f32 %v13947_v51, %v4139_v62 }
 0x3f1   :  { %v4146_v57 = vmul.f32 %v4129_v6, %v13921_v7  ;;  %v4219_v61 = vmul.f32 %v4129_v6, %v13812_v3  ;;  %v4227_v48 = vadd.f32 %v4211_v38, %v4195_v37  ;;  %v4148_v50 = vmul.f32 %v4131_v52, %v13921_v7 }
 0x3f2   :  { %v4221_v22 = vmul.f32 %v4131_v52, %v13848_v0  ;;  %v4229_v49 = vadd.f32 %v4213_v31, %v4197_v14  ;;  %v4145_v24 = vmul.f32 %v4128_v39, %v13921_v7  ;;  %v4218_v15 = vmul.f32 %v4128_v39, %v13802_v8 }
 0x3f3   :  { %v4203_v28 = vsub.f32 %v13929_v33, %v4146_v57  ;;  %v4243_v12 = vmul.f32 0.01, %v4227_v48  ;;  %v4205_v23 = vsub.f32 %v13941_v46, %v4148_v50  ;;  %v4226_v62 = vadd.f32 %v4210_v19, %v4194_v44 }
 0x3f4   :  { %v4245_v43 = vmul.f32 0.01, %v4229_v49  ;;  %v4202_v17 = vsub.f32 %v13944_v36, %v4145_v24  ;;  %v4147_v38 = vmul.f32 %v4130_v40, %v13921_v7  ;;  %v4220_v3 = vmul.f32 %v4130_v40, %v13821_v10 }
 0x3f5   :  { %v4235_v37 = vadd.f32 %v4219_v61, %v4203_v28  ;;  %v4259_v0 = vmax.f32 %v4227_v48, %v4243_v12  ;;  %v4237_v31 = vadd.f32 %v4221_v22, %v4205_v23  ;;  %v4242_v6 = vmul.f32 0.01, %v4226_v62 }
 0x3f6   :  { %v4261_v52 = vmax.f32 %v4229_v49, %v4245_v43  ;;  %v4234_v14 = vadd.f32 %v4218_v15, %v4202_v17  ;;  %v4204_v8 = vsub.f32 %v13947_v51, %v4147_v38  ;;  %v4228_v33 = vadd.f32 %v4212_v42, %v4196_v56 }
 0x3f7   :  { %v4251_v39 = vmul.f32 0.01, %v4235_v37  ;;  %v4253_v57 = vmul.f32 0.01, %v4237_v31  ;;  %v4258_v46 = vmax.f32 %v4226_v62, %v4242_v6  ;;  %v4133_v19 = vmul.f32 %v14017_v60, %v13950_v32 }
 0x3f8   :  { %v4250_v36 = vmul.f32 0.01, %v4234_v14  ;;  %v4236_v44 = vadd.f32 %v4220_v3, %v4204_v8  ;;  %v4244_v50 = vmul.f32 0.01, %v4228_v33  ;;  %v4142_v10 = vmul.f32 %v4125_v45, %v13917_v55 }
 0x3f9   :  { %v4267_v40 = vmax.f32 %v4235_v37, %v4251_v39  ;;  %v4269_v12 = vmax.f32 %v4237_v31, %v4253_v57  ;;  %v4150_v61 = vmul.f32 %v4133_v19, %v13921_v7  ;;  %v4215_v43 = vmul.f32 %v4125_v45, %v13866_v1  ;;  %v4698_v39 = vld [vmem:[#allocation10 + $0xd00] sm:$0xff] }
 0x3fa   :  { %v4266_v17 = vmax.f32 %v4234_v14, %v4250_v36  ;;  %v4252_v51 = vmul.f32 0.01, %v4236_v44  ;;  %v4260_v42 = vmax.f32 %v4228_v33, %v4244_v50  ;;  %v4199_v56 = vsub.f32 %v13959_v21, %v4142_v10  ;;  %v4702_v57 = vld [vmem:[#allocation10 + $0xd20] sm:$0xff] }
 0x3fb   :  { %v14049_v48 = vpack.c.bf16 %v4267_v40, %v4259_v0  ;;  %v14051_v22 = vpack.c.bf16 %v4269_v12, %v4261_v52  ;;  %v4207_v32 = vsub.f32 %v13959_v21, %v4150_v61  ;;  %v4223_v49 = vmul.f32 %v4133_v19, %v13872_v25  ;;  %v4566_v61 = vld [vmem:[#allocation10 + $0x8e0] sm:$0xff] }
 0x3fc   :  { %v14055_v24 = vpack.c.bf16 %v4266_v17, %v4258_v46  ;;  %v4268_v15 = vmax.f32 %v4236_v44, %v4252_v51  ;;  %v4231_v28 = vadd.f32 %v4215_v43, %v4199_v56  ;;  %v4135_v45 = vmul.f32 %v14017_v60, %v13962_v9 }
 0x3fd   :  { %7428 = vmatprep.mubr.bf16.mxu0 %v14049_v48  ;;  %7471 = vmatprep.mubr.bf16.mxu1 %v14051_v22  ;;  %v4239_v1 = vadd.f32 %v4223_v49, %v4207_v32  ;;  %v4144_v23 = vmul.f32 %v14005_v20, %v13917_v55  ;;  %v4217_v21 = vmul.f32 %v14005_v20, %v13882_v30 }
 0x3fe   :  { %7429 = vmatmul.mubr.bf16.vlgmr.msra.gmra.mxu0 %v14055_v24  ;;  %v14066_v25 = vpack.c.bf16 %v4268_v15, %v4260_v42  ;;  %v4247_v62 = vmul.f32 0.01, %v4231_v28  ;;  %v4152_v38 = vmul.f32 %v4135_v45, %v13921_v7  ;;  %v4225_v9 = vmul.f32 %v4135_v45, %v13895_v29  ;;  %v14534_v42 = vld [vmem:[#allocation37_spill] sm:$0xff] }
 0x3ff   :  { %v14525_v3 = vcombine.low %v13901_v53, %v13903_v2  ;;  %v4255_v37 = vmul.f32 0.01, %v4239_v1  ;;  %v4201_v0 = vsub.f32 %v13977_v47, %v4144_v23  ;;  %v4132_v31 = vmul.f32 %v14017_v60, %v13971_v16  ;;  %v4694_v23 = vld [vmem:[#allocation10 + $0xce0] sm:$0xff] }
 0x400   :  { %v4141_v30 = vmul.f32 %v14008_v18, %v13917_v55  ;;  %7472 = vmatmul.mubr.bf16.vlgmr.msra.gmra.mxu1 %v14066_v25  ;;  %v4263_v20 = vmax.f32 %v4231_v28, %v4247_v62  ;;  %v4209_v6 = vsub.f32 %v13977_v47, %v4152_v38  ;;  %v14526_v29 = vcombine.high %v13926_v11, %v13934_v4 }
 0x401   :  { %7483 = vmatpush1.bf16.msra.mxu0 %v14525_v3  ;;  %v4214_v53 = vmul.f32 %v14008_v18, %v13852_v58  ;;  %v14527_v2 = vcombine.low %v13905_v54, %v13909_v5  ;;  %v4271_v16 = vmax.f32 %v4239_v1, %v4255_v37  ;;  %v4233_v52 = vadd.f32 %v4217_v21, %v4201_v0  ;;  %v4690_v1 = vld [vmem:[#allocation10 + $0xcc0] sm:$0xff] }
 0x402   :  { %7484 = vmatprep.subr.bf16.mxu0 %v14526_v29  ;;  %v4149_v14 = vmul.f32 %v4132_v31, %v13921_v7  ;;  %v4198_v8 = vsub.f32 %v13982_v13, %v4141_v30  ;;  %v4241_v33 = vadd.f32 %v4225_v9, %v4209_v6  ;;  %v14528_v47 = vcombine.high %v13936_v59, %v13938_v63 }
 0x403   :  { %7526 = vmatpush1.bf16.msra.mxu1 %v14527_v2  ;;  %v4222_v46 = vmul.f32 %v4132_v31, %v13858_v34  ;;  %v4134_v58 = vmul.f32 %v14017_v60, %v13974_v41  ;;  %v4143_v54 = vmul.f32 %v14011_v27, %v13917_v55  ;;  %v14098_v5 = vpack.c.bf16 %v4271_v16, %v4263_v20  ;;  %v14531_v41 = vld [vmem:[#allocation41_spill] sm:$0xff]  ;;  %v14532_v55 = vld [vmem:[#allocation35_spill] sm:$0xff] }
 0x404   :  { %7527 = vmatprep.subr.bf16.mxu1 %v14528_v47  ;;  %v4249_v18 = vmul.f32 0.01, %v4233_v52  ;;  %v14529_v19 = vcombine.low %v13926_v11, %v13934_v4  ;;  %v4206_v36 = vsub.f32 %v13982_v13, %v4149_v14  ;;  %v4230_v44 = vadd.f32 %v4214_v53, %v4198_v8  ;;  %v4562_v13 = vld [vmem:[#allocation10 + $0x8c0] sm:$0xff] }
 0x405   :  { %v4257_v50 = vmul.f32 0.01, %v4241_v33  ;;  %v14530_v34 = vcombine.high %v13952_v35, %v13954_v26  ;;  %v4151_v60 = vmul.f32 %v4134_v58, %v13921_v7  ;;  %v4200_v10 = vsub.f32 %v14531_v41, %v4143_v54  ;;  %7514 = vmatprep.mubr.bf16.mxu0 %v14098_v5  ;;  %v14535_v7 = vld [vmem:[#allocation38_spill] sm:$0xff]  ;;  %v4558_v31 = vld [vmem:[#allocation10 + $0x8a0] sm:$0xff] }
 0x406   :  { %7485 = vmatpush1.bf16.msra.mxu0 %v14529_v19  ;;  %v4216_v40 = vmul.f32 %v14011_v27, %v14532_v55  ;;  %v4265_v12 = vmax.f32 %v4233_v52, %v4249_v18  ;;  %v14533_v11 = vcombine.low %v13936_v59, %v13938_v63  ;;  %v12177_v4 = vcombine.high %v4698_v39, %v4702_v57  ;;  %v14537_v27 = vld [vmem:[#allocation36_spill] sm:$0xff]  ;;  %v14540_v63 = vld [vmem:[#allocation39_spill] sm:$0xff] }
 0x407   :  { %7486 = vmatprep.subr.bf16.mxu0 %v14530_v34  ;;  %v4238_v43 = vadd.f32 %v4222_v46, %v4206_v36  ;;  %v4246_v17 = vmul.f32 0.01, %v4230_v44  ;;  %v4273_v51 = vmax.f32 %v4241_v33, %v4257_v50  ;;  %v14536_v56 = vcombine.high %v14534_v42, %v14535_v7  ;;  %v14539_v59 = vld [vmem:[#allocation40_spill] sm:$0xff] }
 0x408   :  { %7528 = vmatpush1.bf16.msra.mxu1 %v14533_v11  ;;  %v4208_v32 = vsub.f32 %v14531_v41, %v4151_v60  ;;  %v4224_v49 = vmul.f32 %v4134_v58, %v14537_v27  ;;  %v4232_v15 = vadd.f32 %v4216_v40, %v4200_v10  ;;  %v14538_v28 = vcombine.low %v13952_v35, %v13954_v26  ;;  %v4554_v26 = vld [vmem:[#allocation10 + $0x880] sm:$0xff] }
 0x409   :  { %7529 = vmatprep.subr.bf16.mxu1 %v14536_v56  ;;  %v12048_v45 = vcombine.low %v14540_v63, %v14539_v59  ;;  %v4254_v21 = vmul.f32 0.01, %v4238_v43  ;;  %v14125_v62 = vpack.c.bf16 %v4273_v51, %v4265_v12  ;;  %v14541_v38 = vcombine.high %v14540_v63, %v14539_v59  ;;  %v4682_v2 = vld [vmem:[#allocation10 + $0xc80] sm:$0xff] }
 0x40a   :  { %7487 = vmatpush1.bf16.msra.mxu0 %v14538_v28  ;;  %v12041_v9 = vcombine.high %v4562_v13, %v4566_v61  ;;  %v4240_v3 = vadd.f32 %v4224_v49, %v4208_v32  ;;  %v4248_v37 = vmul.f32 0.01, %v4232_v15  ;;  %v14542_v0 = vcombine.low %v14534_v42, %v14535_v7  ;;  %v4686_v16 = vld [vmem:[#allocation10 + $0xca0] sm:$0xff] }
 0x40b   :  { %7488 = vmatprep.subr.bf16.mxu0 %v14541_v38  ;;  %v12176_v35 = vcombine.low %v4698_v39, %v4702_v57  ;;  %v4262_v30 = vmax.f32 %v4230_v44, %v4246_v17  ;;  %v4270_v20 = vmax.f32 %v4238_v43, %v4254_v21  ;;  %7557 = vmatprep.mubr.bf16.mxu1 %v14125_v62  ;;  %v4546_v39 = vld [vmem:[#allocation10 + $0x840] sm:$0xff] }
 0x40c   :  { %7530 = vmatpush1.bf16.msra.mxu1 %v14542_v0  ;;  %v12169_v6 = vcombine.high %v4690_v1, %v4694_v23  ;;  %v4256_v29 = vmul.f32 0.01, %v4240_v3  ;;  %v12040_v53 = vcombine.low %v4562_v13, %v4566_v61  ;;  %v12033_v14 = vcombine.high %v4554_v26, %v4558_v31  ;;  %v4550_v57 = vld [vmem:[#allocation10 + $0x860] sm:$0xff] }
 0x40d   :  { %7531 = vmatprep.subr.bf16.mxu1 %v12177_v4  ;;  %v14134_v52 = vpack.c.bf16 %v4270_v20, %v4262_v30  ;;  %v4264_v8 = vmax.f32 %v4232_v15, %v4248_v37  ;;  %v12168_v47 = vcombine.low %v4690_v1, %v4694_v23  ;;  %v12161_v46 = vcombine.high %v4682_v2, %v4686_v16  ;;  %v4674_v18 = vld [vmem:[#allocation10 + $0xc40] sm:$0xff] }
 0x40e   :  { %7489 = vmatpush1.bf16.msra.mxu0 %v12048_v45  ;;  %v4272_v33 = vmax.f32 %v4240_v3, %v4256_v29  ;;  %v12032_v54 = vcombine.low %v4554_v26, %v4558_v31  ;;  %v4678_v19 = vld [vmem:[#allocation10 + $0xc60] sm:$0xff]  ;;  %v12025_v36 = vcombine.high %v4546_v39, %v4550_v57  ;;  %v12160_v44 = vcombine.low %v4682_v2, %v4686_v16 }
 0x40f   :  { %7490 = vmatprep.subr.bf16.mxu0 %v12041_v9  ;;  %v4538_v50 = vld [vmem:[#allocation10 + $0x800] sm:$0xff]  ;;  %v12153_v60 = vcombine.high %v4674_v18, %v4678_v19  ;;  %v12024_v41 = vcombine.low %v4546_v39, %v4550_v57  ;;  %v12152_v12 = vcombine.low %v4674_v18, %v4678_v19 }
 0x410   :  { %7532 = vmatpush1.bf16.msra.mxu1 %v12176_v35  ;;  %v14136_v58 = vpack.c.bf16 %v4272_v33, %v4264_v8  ;;  %v4542_v34 = vld [vmem:[#allocation10 + $0x820] sm:$0xff] }
 0x411   :  { %7533 = vmatprep.subr.bf16.mxu1 %v12169_v6  ;;  %v4666_v10 = vld [vmem:[#allocation10 + $0xc00] sm:$0xff]  ;;  %v12017_v40 = vcombine.high %v4538_v50, %v4542_v34  ;;  %v12016_v61 = vcombine.low %v4538_v50, %v4542_v34 }
 0x412   :  { %7491 = vmatpush1.bf16.msra.mxu0 %v12040_v53  ;;  %v4670_v55 = vld [vmem:[#allocation10 + $0xc20] sm:$0xff] }
 0x413   :  { %7492 = vmatprep.subr.bf16.mxu0 %v12033_v14  ;;  %v4658_v11 = vld [vmem:[#allocation10 + $0xbc0] sm:$0xff]  ;;  %v12145_v13 = vcombine.high %v4666_v10, %v4670_v55  ;;  %v12144_v42 = vcombine.low %v4666_v10, %v4670_v55 }
 0x414   :  { %7534 = vmatpush1.bf16.msra.mxu1 %v12168_v47  ;;  %v4662_v4 = vld [vmem:[#allocation10 + $0xbe0] sm:$0xff] }
 0x415   :  { %7535 = vmatprep.subr.bf16.mxu1 %v12161_v46  ;;  %v4786_v43 = vld [vmem:[#allocation10 + $0xfc0] sm:$0xff]  ;;  %v12137_v51 = vcombine.high %v4658_v11, %v4662_v4  ;;  %v12136_v27 = vcombine.low %v4658_v11, %v4662_v4 }
 0x416   :  { %7493 = vmatpush1.bf16.msra.mxu0 %v12032_v54  ;;  %v4790_v17 = vld [vmem:[#allocation10 + $0xfe0] sm:$0xff] }
 0x417   :  { %7494 = vmatprep.subr.bf16.mxu0 %v12025_v36  ;;  %v4650_v7 = vld [vmem:[#allocation10 + $0xb80] sm:$0xff]  ;;  %v12265_v32 = vcombine.high %v4786_v43, %v4790_v17  ;;  %v12264_v59 = vcombine.low %v4786_v43, %v4790_v17 }
 0x418   :  { %7536 = vmatpush1.bf16.msra.mxu1 %v12160_v44  ;;  %v4654_v56 = vld [vmem:[#allocation10 + $0xba0] sm:$0xff] }
 0x419   :  { %7537 = vmatprep.subr.bf16.mxu1 %v12153_v60  ;;  %v4778_v49 = vld [vmem:[#allocation10 + $0xf80] sm:$0xff]  ;;  %v12129_v28 = vcombine.high %v4650_v7, %v4654_v56  ;;  %v12128_v23 = vcombine.low %v4650_v7, %v4654_v56  ;;  %v4339_v7 = vld [vmem:[#allocation10 + $0x1c8] sm:$0xff] }
 0x41a   :  { %7495 = vmatpush1.bf16.msra.mxu0 %v12024_v41  ;;  %v4782_v15 = vld [vmem:[#allocation10 + $0xfa0] sm:$0xff]  ;;  %v4343_v56 = vld [vmem:[#allocation10 + $0x1e8] sm:$0xff] }
 0x41b   :  { %7496 = vmatprep.subr.bf16.mxu0 %v12017_v40  ;;  %v4642_v63 = vld [vmem:[#allocation10 + $0xb40] sm:$0xff]  ;;  %v12257_v1 = vcombine.high %v4778_v49, %v4782_v15  ;;  %v12256_v3 = vcombine.low %v4778_v49, %v4782_v15  ;;  %v4467_v49 = vld [vmem:[#allocation10 + $0x5c8] sm:$0xff] }
 0x41c   :  { %7538 = vmatpush1.bf16.msra.mxu1 %v12152_v12  ;;  %v4646_v45 = vld [vmem:[#allocation10 + $0xb60] sm:$0xff]  ;;  %v4471_v15 = vld [vmem:[#allocation10 + $0x5e8] sm:$0xff] }
 0x41d   :  { %7539 = vmatprep.subr.bf16.mxu1 %v12145_v13  ;;  %v4770_v21 = vld [vmem:[#allocation10 + $0xf40] sm:$0xff]  ;;  %v12121_v9 = vcombine.high %v4642_v63, %v4646_v45  ;;  %v12120_v26 = vcombine.low %v4642_v63, %v4646_v45  ;;  %v4331_v63 = vld [vmem:[#allocation10 + $0x188] sm:$0xff] }
 0x41e   :  { %7497 = vmatpush1.bf16.msra.mxu0 %v12016_v61  ;;  %v4774_v38 = vld [vmem:[#allocation10 + $0xf60] sm:$0xff]  ;;  %v4335_v45 = vld [vmem:[#allocation10 + $0x1a8] sm:$0xff] }
 0x41f   :  { %7498 = vmatprep.subr.bf16.mxu0 %v12137_v51  ;;  %v4634_v37 = vld [vmem:[#allocation10 + $0xb00] sm:$0xff]  ;;  %v12249_v35 = vcombine.high %v4770_v21, %v4774_v38  ;;  %v12248_v6 = vcombine.low %v4770_v21, %v4774_v38  ;;  %v4459_v21 = vld [vmem:[#allocation10 + $0x588] sm:$0xff] }
 0x420   :  { %7540 = vmatpush1.bf16.msra.mxu1 %v12144_v42  ;;  %v4638_v0 = vld [vmem:[#allocation10 + $0xb20] sm:$0xff]  ;;  %v4463_v38 = vld [vmem:[#allocation10 + $0x5a8] sm:$0xff] }
 0x421   :  { %7541 = vmatprep.subr.bf16.mxu1 %v12265_v32  ;;  %v4762_v31 = vld [vmem:[#allocation10 + $0xf00] sm:$0xff]  ;;  %v12113_v20 = vcombine.high %v4634_v37, %v4638_v0  ;;  %v12112_v16 = vcombine.low %v4634_v37, %v4638_v0  ;;  %v4323_v37 = vld [vmem:[#allocation10 + $0x148] sm:$0xff] }
 0x422   :  { %7499 = vmatpush2.bf16.msra.mxu0 %v12136_v27  ;;  %v4766_v30 = vld [vmem:[#allocation10 + $0xf20] sm:$0xff]  ;;  %v4327_v0 = vld [vmem:[#allocation10 + $0x168] sm:$0xff] }
 0x423   :  { %7500 = vmatprep.subr.bf16.mxu0 %v12129_v28  ;;  %v4626_v29 = vld [vmem:[#allocation10 + $0xac0] sm:$0xff]  ;;  %v12241_v2 = vcombine.high %v4762_v31, %v4766_v30  ;;  %v12240_v47 = vcombine.low %v4762_v31, %v4766_v30  ;;  %v11819_v28 = vcombine.high %v4339_v7, %v4343_v56  ;;  %v4451_v31 = vld [vmem:[#allocation10 + $0x548] sm:$0xff] }
 0x424   :  { %7542 = vmatpush2.bf16.msra.mxu1 %v12264_v59  ;;  %v4630_v53 = vld [vmem:[#allocation10 + $0xae0] sm:$0xff]  ;;  %v4455_v30 = vld [vmem:[#allocation10 + $0x568] sm:$0xff] }
 0x425   :  { %7543 = vmatprep.subr.bf16.mxu1 %v12257_v1  ;;  %v4754_v14 = vld [vmem:[#allocation10 + $0xec0] sm:$0xff]  ;;  %v12105_v33 = vcombine.high %v4626_v29, %v4630_v53  ;;  %v12104_v54 = vcombine.low %v4626_v29, %v4630_v53  ;;  %v11947_v1 = vcombine.high %v4467_v49, %v4471_v15  ;;  %v4315_v29 = vld [vmem:[#allocation10 + $0x108] sm:$0xff] }
 0x426   :  { %7501 = vmatpush2.bf16.msra.mxu0 %v12128_v23  ;;  %v4758_v8 = vld [vmem:[#allocation10 + $0xee0] sm:$0xff]  ;;  %v11818_v23 = vcombine.low %v4339_v7, %v4343_v56  ;;  %v4319_v53 = vld [vmem:[#allocation10 + $0x128] sm:$0xff] }
 0x427   :  { %7502 = vmatprep.subr.bf16.mxu0 %v12121_v9  ;;  %v4618_v39 = vld [vmem:[#allocation10 + $0xa80] sm:$0xff]  ;;  %v12233_v46 = vcombine.high %v4754_v14, %v4758_v8  ;;  %v12232_v44 = vcombine.low %v4754_v14, %v4758_v8  ;;  %v11811_v9 = vcombine.high %v4331_v63, %v4335_v45  ;;  %v4443_v14 = vld [vmem:[#allocation10 + $0x508] sm:$0xff] }
 0x428   :  { %7544 = vmatpush2.bf16.msra.mxu1 %v12256_v3  ;;  %v4622_v57 = vld [vmem:[#allocation10 + $0xaa0] sm:$0xff]  ;;  %v11946_v3 = vcombine.low %v4467_v49, %v4471_v15  ;;  %v4447_v8 = vld [vmem:[#allocation10 + $0x528] sm:$0xff] }
 0x429   :  { %7545 = vmatprep.subr.bf16.mxu1 %v12249_v35  ;;  %v4746_v18 = vld [vmem:[#allocation10 + $0xe80] sm:$0xff]  ;;  %v12097_v36 = vcombine.high %v4618_v39, %v4622_v57  ;;  %v12096_v41 = vcombine.low %v4618_v39, %v4622_v57  ;;  %v11939_v35 = vcombine.high %v4459_v21, %v4463_v38  ;;  %v4307_v39 = vld [vmem:[#allocation10 + $0xc8] sm:$0xff] }
 0x42a   :  { %7503 = vmatpush2.bf16.msra.mxu0 %v12120_v26  ;;  %v4750_v19 = vld [vmem:[#allocation10 + $0xea0] sm:$0xff]  ;;  %v11810_v26 = vcombine.low %v4331_v63, %v4335_v45  ;;  %v4311_v57 = vld [vmem:[#allocation10 + $0xe8] sm:$0xff] }
 0x42b   :  { %7504 = vmatprep.subr.bf16.mxu0 %v12113_v20  ;;  %v4610_v50 = vld [vmem:[#allocation10 + $0xa40] sm:$0xff]  ;;  %v12225_v60 = vcombine.high %v4746_v18, %v4750_v19  ;;  %v12224_v12 = vcombine.low %v4746_v18, %v4750_v19  ;;  %v11803_v20 = vcombine.high %v4323_v37, %v4327_v0  ;;  %v4435_v18 = vld [vmem:[#allocation10 + $0x4c8] sm:$0xff] }
 0x42c   :  { %7546 = vmatpush2.bf16.msra.mxu1 %v12248_v6  ;;  %v4614_v34 = vld [vmem:[#allocation10 + $0xa60] sm:$0xff]  ;;  %v11938_v6 = vcombine.low %v4459_v21, %v4463_v38  ;;  %v4439_v19 = vld [vmem:[#allocation10 + $0x4e8] sm:$0xff] }
 0x42d   :  { %7547 = vmatprep.subr.bf16.mxu1 %v12241_v2  ;;  %v4738_v10 = vld [vmem:[#allocation10 + $0xe40] sm:$0xff]  ;;  %v12089_v40 = vcombine.high %v4610_v50, %v4614_v34  ;;  %v12088_v61 = vcombine.low %v4610_v50, %v4614_v34  ;;  %v11931_v2 = vcombine.high %v4451_v31, %v4455_v30  ;;  %v4299_v50 = vld [vmem:[#allocation10 + $0x88] sm:$0xff] }
 0x42e   :  { %7505 = vmatpush2.bf16.msra.mxu0 %v12112_v16  ;;  %v4742_v55 = vld [vmem:[#allocation10 + $0xe60] sm:$0xff]  ;;  %v11802_v16 = vcombine.low %v4323_v37, %v4327_v0  ;;  %v4303_v34 = vld [vmem:[#allocation10 + $0xa8] sm:$0xff] }
 0x42f   :  { %7506 = vmatprep.subr.bf16.mxu0 %v12105_v33  ;;  %v4602_v11 = vld [vmem:[#allocation10 + $0xa00] sm:$0xff]  ;;  %v12217_v13 = vcombine.high %v4738_v10, %v4742_v55  ;;  %v12216_v42 = vcombine.low %v4738_v10, %v4742_v55  ;;  %v11795_v33 = vcombine.high %v4315_v29, %v4319_v53  ;;  %v4427_v10 = vld [vmem:[#allocation10 + $0x488] sm:$0xff] }
 0x430   :  { %7548 = vmatpush2.bf16.msra.mxu1 %v12240_v47  ;;  %v4606_v4 = vld [vmem:[#allocation10 + $0xa20] sm:$0xff]  ;;  %v11930_v47 = vcombine.low %v4451_v31, %v4455_v30  ;;  %v4431_v55 = vld [vmem:[#allocation10 + $0x4a8] sm:$0xff] }
 0x431   :  { %7549 = vmatprep.subr.bf16.mxu1 %v12233_v46  ;;  %v4730_v43 = vld [vmem:[#allocation10 + $0xe00] sm:$0xff]  ;;  %v12081_v51 = vcombine.high %v4602_v11, %v4606_v4  ;;  %v12080_v27 = vcombine.low %v4602_v11, %v4606_v4  ;;  %v11923_v46 = vcombine.high %v4443_v14, %v4447_v8  ;;  %v4291_v11 = vld [vmem:[#allocation10 + $0x48] sm:$0xff] }
 0x432   :  { %7507 = vmatpush2.bf16.msra.mxu0 %v12104_v54  ;;  %v4734_v17 = vld [vmem:[#allocation10 + $0xe20] sm:$0xff]  ;;  %v11794_v54 = vcombine.low %v4315_v29, %v4319_v53  ;;  %v4295_v4 = vld [vmem:[#allocation10 + $0x68] sm:$0xff] }
 0x433   :  { %7508 = vmatprep.subr.bf16.mxu0 %v12097_v36  ;;  %v12209_v32 = vcombine.high %v4730_v43, %v4734_v17  ;;  %v12208_v59 = vcombine.low %v4730_v43, %v4734_v17  ;;  %v11787_v36 = vcombine.high %v4307_v39, %v4311_v57  ;;  %v4419_v43 = vld [vmem:[#allocation10 + $0x448] sm:$0xff] }
 0x434   :  { %7550 = vmatpush2.bf16.msra.mxu1 %v12232_v44  ;;  %v11922_v44 = vcombine.low %v4443_v14, %v4447_v8  ;;  %v4423_v17 = vld [vmem:[#allocation10 + $0x468] sm:$0xff] }
 0x435   :  { %7551 = vmatprep.subr.bf16.mxu1 %v12225_v60  ;;  %v11915_v60 = vcombine.high %v4435_v18, %v4439_v19  ;;  %v4283_v7 = vld [vmem:[#allocation10 + $0x8] sm:$0xff] }
 0x436   :  { %7509 = vmatpush2.bf16.msra.mxu0 %v12096_v41  ;;  %v11786_v41 = vcombine.low %v4307_v39, %v4311_v57  ;;  %v4287_v56 = vld [vmem:[#allocation10 + $0x28] sm:$0xff] }
 0x437   :  { %7510 = vmatprep.subr.bf16.mxu0 %v12089_v40  ;;  %v11779_v40 = vcombine.high %v4299_v50, %v4303_v34  ;;  %v4411_v49 = vld [vmem:[#allocation10 + $0x408] sm:$0xff] }
 0x438   :  { %7552 = vmatpush2.bf16.msra.mxu1 %v12224_v12  ;;  %v11914_v12 = vcombine.low %v4435_v18, %v4439_v19  ;;  %v4415_v15 = vld [vmem:[#allocation10 + $0x428] sm:$0xff] }
 0x439   :  { %7553 = vmatprep.subr.bf16.mxu1 %v12217_v13  ;;  %v11907_v13 = vcombine.high %v4427_v10, %v4431_v55  ;;  %v4403_v63 = vld [vmem:[#allocation10 + $0x3c8] sm:$0xff] }
 0x43a   :  { %7511 = vmatpush2.bf16.msra.mxu0 %v12088_v61  ;;  %v11778_v61 = vcombine.low %v4299_v50, %v4303_v34  ;;  %v4407_v45 = vld [vmem:[#allocation10 + $0x3e8] sm:$0xff] }
 0x43b   :  { %7512 = vmatprep.subr.bf16.mxu0 %v12081_v51  ;;  %v11771_v51 = vcombine.high %v4291_v11, %v4295_v4  ;;  %v4531_v21 = vld [vmem:[#allocation10 + $0x7c8] sm:$0xff] }
 0x43c   :  { %7554 = vmatpush2.bf16.msra.mxu1 %v12216_v42  ;;  %v11906_v42 = vcombine.low %v4427_v10, %v4431_v55  ;;  %v4535_v38 = vld [vmem:[#allocation10 + $0x7e8] sm:$0xff] }
 0x43d   :  { %7555 = vmatprep.subr.bf16.mxu1 %v12209_v32  ;;  %v11899_v32 = vcombine.high %v4419_v43, %v4423_v17  ;;  %v4395_v37 = vld [vmem:[#allocation10 + $0x388] sm:$0xff] }
 0x43e   :  { %7513 = vmatpush2.bf16.msra.mxu0 %v12080_v27  ;;  %v11770_v27 = vcombine.low %v4291_v11, %v4295_v4  ;;  %v4399_v0 = vld [vmem:[#allocation10 + $0x3a8] sm:$0xff] }
 0x43f   :  { %7568 = vmatprep.subr.bf16.mxu0 %v11819_v28  ;;  %v11763_v28 = vcombine.high %v4283_v7, %v4287_v56  ;;  %v4523_v31 = vld [vmem:[#allocation10 + $0x788] sm:$0xff] }
 0x440   :  { %7556 = vmatpush2.bf16.msra.mxu1 %v12208_v59  ;;  %v11898_v59 = vcombine.low %v4419_v43, %v4423_v17  ;;  %v4527_v30 = vld [vmem:[#allocation10 + $0x7a8] sm:$0xff] }
 0x441   :  { %7515 = vmatmul.mubr.bf16.vlgmr.msra.gmra.mxu0 %v14134_v52  ;;  %7611 = vmatprep.subr.bf16.mxu1 %v11947_v1  ;;  %v11891_v1 = vcombine.high %v4411_v49, %v4415_v15  ;;  %v4387_v29 = vld [vmem:[#allocation10 + $0x348] sm:$0xff] }
 0x442   :  { %7569 = vmatpush1.bf16.msra.mxu0 %v11818_v23  ;;  %7600 = vmatprep.mubr.bf16.mxu0 %v14049_v48  ;;  %v11762_v23 = vcombine.low %v4283_v7, %v4287_v56  ;;  %v4391_v53 = vld [vmem:[#allocation10 + $0x368] sm:$0xff] }
 0x443   :  { %7558 = vmatmul.mubr.bf16.vlgmr.msra.gmra.mxu1 %v14136_v58  ;;  %7570 = vmatprep.subr.bf16.mxu0 %v11811_v9  ;;  %v11883_v9 = vcombine.high %v4403_v63, %v4407_v45  ;;  %v4515_v14 = vld [vmem:[#allocation10 + $0x748] sm:$0xff] }
 0x444   :  { %7612 = vmatpush1.bf16.msra.mxu1 %v11946_v3  ;;  %7643 = vmatprep.mubr.bf16.mxu1 %v14051_v22  ;;  %v11890_v3 = vcombine.low %v4411_v49, %v4415_v15  ;;  %v4519_v8 = vld [vmem:[#allocation10 + $0x768] sm:$0xff] }
 0x445   :  { %7613 = vmatprep.subr.bf16.mxu1 %v11939_v35  ;;  %v12011_v35 = vcombine.high %v4531_v21, %v4535_v38  ;;  %v4379_v39 = vld [vmem:[#allocation10 + $0x308] sm:$0xff] }
 0x446   :  { %7571 = vmatpush1.bf16.msra.mxu0 %v11810_v26  ;;  %v11882_v26 = vcombine.low %v4403_v63, %v4407_v45  ;;  %v4383_v57 = vld [vmem:[#allocation10 + $0x328] sm:$0xff] }
 0x447   :  { %7572 = vmatprep.subr.bf16.mxu0 %v11803_v20  ;;  %v11875_v20 = vcombine.high %v4395_v37, %v4399_v0  ;;  %v4507_v18 = vld [vmem:[#allocation10 + $0x708] sm:$0xff] }
 0x448   :  { %7614 = vmatpush1.bf16.msra.mxu1 %v11938_v6  ;;  %v12010_v6 = vcombine.low %v4531_v21, %v4535_v38  ;;  %v4511_v19 = vld [vmem:[#allocation10 + $0x728] sm:$0xff] }
 0x449   :  { %7615 = vmatprep.subr.bf16.mxu1 %v11931_v2  ;;  %v12003_v2 = vcombine.high %v4523_v31, %v4527_v30  ;;  %v4371_v50 = vld [vmem:[#allocation10 + $0x2c8] sm:$0xff] }
 0x44a   :  { %7573 = vmatpush1.bf16.msra.mxu0 %v11802_v16  ;;  %v11874_v16 = vcombine.low %v4395_v37, %v4399_v0  ;;  %v4375_v34 = vld [vmem:[#allocation10 + $0x2e8] sm:$0xff] }
 0x44b   :  { %7574 = vmatprep.subr.bf16.mxu0 %v11795_v33  ;;  %v11867_v33 = vcombine.high %v4387_v29, %v4391_v53  ;;  %v4499_v10 = vld [vmem:[#allocation10 + $0x6c8] sm:$0xff] }
 0x44c   :  { %7616 = vmatpush1.bf16.msra.mxu1 %v11930_v47  ;;  %v12002_v47 = vcombine.low %v4523_v31, %v4527_v30  ;;  %v4503_v55 = vld [vmem:[#allocation10 + $0x6e8] sm:$0xff] }
 0x44d   :  { %7617 = vmatprep.subr.bf16.mxu1 %v11923_v46  ;;  %v11995_v46 = vcombine.high %v4515_v14, %v4519_v8  ;;  %v4363_v11 = vld [vmem:[#allocation10 + $0x288] sm:$0xff] }
 0x44e   :  { %7575 = vmatpush1.bf16.msra.mxu0 %v11794_v54  ;;  %v11866_v54 = vcombine.low %v4387_v29, %v4391_v53  ;;  %v4367_v4 = vld [vmem:[#allocation10 + $0x2a8] sm:$0xff] }
 0x44f   :  { %7576 = vmatprep.subr.bf16.mxu0 %v11787_v36  ;;  %v11859_v36 = vcombine.high %v4379_v39, %v4383_v57  ;;  %v4491_v43 = vld [vmem:[#allocation10 + $0x688] sm:$0xff] }
 0x450   :  { %7618 = vmatpush1.bf16.msra.mxu1 %v11922_v44  ;;  %v11994_v44 = vcombine.low %v4515_v14, %v4519_v8  ;;  %v4495_v17 = vld [vmem:[#allocation10 + $0x6a8] sm:$0xff] }
 0x451   :  { %7619 = vmatprep.subr.bf16.mxu1 %v11915_v60  ;;  %v11987_v60 = vcombine.high %v4507_v18, %v4511_v19  ;;  %v4355_v7 = vld [vmem:[#allocation10 + $0x248] sm:$0xff] }
 0x452   :  { %7577 = vmatpush1.bf16.msra.mxu0 %v11786_v41  ;;  %v11858_v41 = vcombine.low %v4379_v39, %v4383_v57  ;;  %v4359_v56 = vld [vmem:[#allocation10 + $0x268] sm:$0xff] }
 0x453   :  { %7578 = vmatprep.subr.bf16.mxu0 %v11779_v40  ;;  %v11851_v40 = vcombine.high %v4371_v50, %v4375_v34  ;;  %v4483_v49 = vld [vmem:[#allocation10 + $0x648] sm:$0xff] }
 0x454   :  { %7620 = vmatpush1.bf16.msra.mxu1 %v11914_v12  ;;  %v11986_v12 = vcombine.low %v4507_v18, %v4511_v19  ;;  %v4487_v15 = vld [vmem:[#allocation10 + $0x668] sm:$0xff] }
 0x455   :  { %7621 = vmatprep.subr.bf16.mxu1 %v11907_v13  ;;  %v11979_v13 = vcombine.high %v4499_v10, %v4503_v55  ;;  %v4347_v63 = vld [vmem:[#allocation10 + $0x208] sm:$0xff] }
 0x456   :  { %7579 = vmatpush1.bf16.msra.mxu0 %v11778_v61  ;;  %v11850_v61 = vcombine.low %v4371_v50, %v4375_v34  ;;  %v4351_v45 = vld [vmem:[#allocation10 + $0x228] sm:$0xff] }
 0x457   :  { %7580 = vmatprep.subr.bf16.mxu0 %v11771_v51  ;;  %v11843_v51 = vcombine.high %v4363_v11, %v4367_v4  ;;  %v4475_v21 = vld [vmem:[#allocation10 + $0x608] sm:$0xff] }
 0x458   :  { %7622 = vmatpush1.bf16.msra.mxu1 %v11906_v42  ;;  %v11978_v42 = vcombine.low %v4499_v10, %v4503_v55  ;;  %v4479_v38 = vld [vmem:[#allocation10 + $0x628] sm:$0xff] }
 0x459   :  { %7623 = vmatprep.subr.bf16.mxu1 %v11899_v32  ;;  %v11971_v32 = vcombine.high %v4491_v43, %v4495_v17  ;;  %v4595_v37 = vld [vmem:[#allocation10 + $0x9c8] sm:$0xff] }
 0x45a   :  { %7581 = vmatpush1.bf16.msra.mxu0 %v11770_v27  ;;  %v11842_v27 = vcombine.low %v4363_v11, %v4367_v4  ;;  %v4599_v0 = vld [vmem:[#allocation10 + $0x9e8] sm:$0xff] }
 0x45b   :  { %7582 = vmatprep.subr.bf16.mxu0 %v11763_v28  ;;  %v11835_v28 = vcombine.high %v4355_v7, %v4359_v56  ;;  %v4723_v31 = vld [vmem:[#allocation10 + $0xdc8] sm:$0xff] }
 0x45c   :  { %7624 = vmatpush1.bf16.msra.mxu1 %v11898_v59  ;;  %v11970_v59 = vcombine.low %v4491_v43, %v4495_v17  ;;  %v4727_v30 = vld [vmem:[#allocation10 + $0xde8] sm:$0xff] }
 0x45d   :  { %7625 = vmatprep.subr.bf16.mxu1 %v11891_v1  ;;  %v11963_v1 = vcombine.high %v4483_v49, %v4487_v15  ;;  %v4587_v29 = vld [vmem:[#allocation10 + $0x988] sm:$0xff] }
 0x45e   :  { %7583 = vmatpush1.bf16.msra.mxu0 %v11762_v23  ;;  %v11834_v23 = vcombine.low %v4355_v7, %v4359_v56  ;;  %v4591_v53 = vld [vmem:[#allocation10 + $0x9a8] sm:$0xff] }
 0x45f   :  { %7584 = vmatprep.subr.bf16.mxu0 %v11883_v9  ;;  %v11827_v9 = vcombine.high %v4347_v63, %v4351_v45  ;;  %v4715_v14 = vld [vmem:[#allocation10 + $0xd88] sm:$0xff] }
 0x460   :  { %7626 = vmatpush1.bf16.msra.mxu1 %v11890_v3  ;;  %v11962_v3 = vcombine.low %v4483_v49, %v4487_v15  ;;  %v4719_v8 = vld [vmem:[#allocation10 + $0xda8] sm:$0xff] }
 0x461   :  { %7627 = vmatprep.subr.bf16.mxu1 %v12011_v35  ;;  %v11955_v35 = vcombine.high %v4475_v21, %v4479_v38  ;;  %v4579_v39 = vld [vmem:[#allocation10 + $0x948] sm:$0xff] }
 0x462   :  { %7585 = vmatpush2.bf16.msra.mxu0 %v11882_v26  ;;  %v11826_v26 = vcombine.low %v4347_v63, %v4351_v45  ;;  %v4583_v57 = vld [vmem:[#allocation10 + $0x968] sm:$0xff] }
 0x463   :  { %7586 = vmatprep.subr.bf16.mxu0 %v11875_v20  ;;  %v12075_v20 = vcombine.high %v4595_v37, %v4599_v0  ;;  %v4707_v18 = vld [vmem:[#allocation10 + $0xd48] sm:$0xff] }
 0x464   :  { %7628 = vmatpush2.bf16.msra.mxu1 %v12010_v6  ;;  %v11954_v6 = vcombine.low %v4475_v21, %v4479_v38  ;;  %v4711_v19 = vld [vmem:[#allocation10 + $0xd68] sm:$0xff] }
 0x465   :  { %7629 = vmatprep.subr.bf16.mxu1 %v12003_v2  ;;  %v12203_v2 = vcombine.high %v4723_v31, %v4727_v30  ;;  %v4571_v50 = vld [vmem:[#allocation10 + $0x908] sm:$0xff] }
 0x466   :  { %7587 = vmatpush2.bf16.msra.mxu0 %v11874_v16  ;;  %v12074_v16 = vcombine.low %v4595_v37, %v4599_v0  ;;  %v4575_v34 = vld [vmem:[#allocation10 + $0x928] sm:$0xff] }
 0x467   :  { %7588 = vmatprep.subr.bf16.mxu0 %v11867_v33  ;;  %v12067_v33 = vcombine.high %v4587_v29, %v4591_v53  ;;  %v4699_v10 = vld [vmem:[#allocation10 + $0xd08] sm:$0xff] }
 0x468   :  { %7630 = vmatpush2.bf16.msra.mxu1 %v12002_v47  ;;  %v12202_v47 = vcombine.low %v4723_v31, %v4727_v30  ;;  %v4703_v55 = vld [vmem:[#allocation10 + $0xd28] sm:$0xff] }
 0x469   :  { %7631 = vmatprep.subr.bf16.mxu1 %v11995_v46  ;;  %v12195_v46 = vcombine.high %v4715_v14, %v4719_v8  ;;  %v4563_v11 = vld [vmem:[#allocation10 + $0x8c8] sm:$0xff] }
 0x46a   :  { %7589 = vmatpush2.bf16.msra.mxu0 %v11866_v54  ;;  %v12066_v54 = vcombine.low %v4587_v29, %v4591_v53  ;;  %v4567_v4 = vld [vmem:[#allocation10 + $0x8e8] sm:$0xff] }
 0x46b   :  { %7590 = vmatprep.subr.bf16.mxu0 %v11859_v36  ;;  %v12059_v36 = vcombine.high %v4579_v39, %v4583_v57  ;;  %v4691_v43 = vld [vmem:[#allocation10 + $0xcc8] sm:$0xff] }
 0x46c   :  { %7632 = vmatpush2.bf16.msra.mxu1 %v11994_v44  ;;  %v12194_v44 = vcombine.low %v4715_v14, %v4719_v8  ;;  %v4695_v17 = vld [vmem:[#allocation10 + $0xce8] sm:$0xff] }
 0x46d   :  { %7633 = vmatprep.subr.bf16.mxu1 %v11987_v60  ;;  %v12187_v60 = vcombine.high %v4707_v18, %v4711_v19  ;;  %v4555_v7 = vld [vmem:[#allocation10 + $0x888] sm:$0xff] }
 0x46e   :  { %7591 = vmatpush2.bf16.msra.mxu0 %v11858_v41  ;;  %v12058_v41 = vcombine.low %v4579_v39, %v4583_v57  ;;  %v4559_v56 = vld [vmem:[#allocation10 + $0x8a8] sm:$0xff] }
 0x46f   :  { %7592 = vmatprep.subr.bf16.mxu0 %v11851_v40  ;;  %v12051_v40 = vcombine.high %v4571_v50, %v4575_v34  ;;  %v4683_v49 = vld [vmem:[#allocation10 + $0xc88] sm:$0xff] }
 0x470   :  { %7634 = vmatpush2.bf16.msra.mxu1 %v11986_v12  ;;  %v12186_v12 = vcombine.low %v4707_v18, %v4711_v19  ;;  %v4687_v15 = vld [vmem:[#allocation10 + $0xca8] sm:$0xff] }
 0x471   :  { %7635 = vmatprep.subr.bf16.mxu1 %v11979_v13  ;;  %v12179_v13 = vcombine.high %v4699_v10, %v4703_v55  ;;  %v4547_v63 = vld [vmem:[#allocation10 + $0x848] sm:$0xff] }
 0x472   :  { %7593 = vmatpush2.bf16.msra.mxu0 %v11850_v61  ;;  %v12050_v61 = vcombine.low %v4571_v50, %v4575_v34  ;;  %v4551_v45 = vld [vmem:[#allocation10 + $0x868] sm:$0xff] }
 0x473   :  { %7594 = vmatprep.subr.bf16.mxu0 %v11843_v51  ;;  %v12043_v51 = vcombine.high %v4563_v11, %v4567_v4  ;;  %v4675_v21 = vld [vmem:[#allocation10 + $0xc48] sm:$0xff] }
 0x474   :  { %7636 = vmatpush2.bf16.msra.mxu1 %v11978_v42  ;;  %v12178_v42 = vcombine.low %v4699_v10, %v4703_v55  ;;  %v4679_v38 = vld [vmem:[#allocation10 + $0xc68] sm:$0xff] }
 0x475   :  { %7637 = vmatprep.subr.bf16.mxu1 %v11971_v32  ;;  %v12171_v32 = vcombine.high %v4691_v43, %v4695_v17  ;;  %v4539_v37 = vld [vmem:[#allocation10 + $0x808] sm:$0xff] }
 0x476   :  { %7595 = vmatpush2.bf16.msra.mxu0 %v11842_v27  ;;  %v12042_v27 = vcombine.low %v4563_v11, %v4567_v4  ;;  %v4543_v0 = vld [vmem:[#allocation10 + $0x828] sm:$0xff] }
 0x477   :  { %7596 = vmatprep.subr.bf16.mxu0 %v11835_v28  ;;  %v12035_v28 = vcombine.high %v4555_v7, %v4559_v56  ;;  %v4667_v31 = vld [vmem:[#allocation10 + $0xc08] sm:$0xff] }
 0x478   :  { %7638 = vmatpush2.bf16.msra.mxu1 %v11970_v59  ;;  %v12170_v59 = vcombine.low %v4691_v43, %v4695_v17  ;;  %v4671_v30 = vld [vmem:[#allocation10 + $0xc28] sm:$0xff] }
 0x479   :  { %7639 = vmatprep.subr.bf16.mxu1 %v11963_v1  ;;  %v12163_v1 = vcombine.high %v4683_v49, %v4687_v15  ;;  %v4659_v29 = vld [vmem:[#allocation10 + $0xbc8] sm:$0xff] }
 0x47a   :  { %7597 = vmatpush2.bf16.msra.mxu0 %v11834_v23  ;;  %v12034_v23 = vcombine.low %v4555_v7, %v4559_v56  ;;  %v4663_v53 = vld [vmem:[#allocation10 + $0xbe8] sm:$0xff] }
 0x47b   :  { %7598 = vmatprep.subr.bf16.mxu0 %v11827_v9  ;;  %v12027_v9 = vcombine.high %v4547_v63, %v4551_v45  ;;  %v4787_v14 = vld [vmem:[#allocation10 + $0xfc8] sm:$0xff] }
 0x47c   :  { %7640 = vmatpush2.bf16.msra.mxu1 %v11962_v3  ;;  %v12162_v3 = vcombine.low %v4683_v49, %v4687_v15  ;;  %v4791_v8 = vld [vmem:[#allocation10 + $0xfe8] sm:$0xff] }
 0x47d   :  { %7641 = vmatprep.subr.bf16.mxu1 %v11955_v35  ;;  %v12155_v35 = vcombine.high %v4675_v21, %v4679_v38  ;;  %v4651_v39 = vld [vmem:[#allocation10 + $0xb88] sm:$0xff] }
 0x47e   :  { %7599 = vmatpush2.bf16.msra.mxu0 %v11826_v26  ;;  %v12026_v26 = vcombine.low %v4547_v63, %v4551_v45  ;;  %v4655_v57 = vld [vmem:[#allocation10 + $0xba8] sm:$0xff] }
 0x47f   :  { %7654 = vmatprep.subr.bf16.mxu0 %v12075_v20  ;;  %v12019_v20 = vcombine.high %v4539_v37, %v4543_v0  ;;  %v4779_v18 = vld [vmem:[#allocation10 + $0xf88] sm:$0xff] }
 0x480   :  { %7642 = vmatpush2.bf16.msra.mxu1 %v11954_v6  ;;  %v12154_v6 = vcombine.low %v4675_v21, %v4679_v38  ;;  %v4783_v19 = vld [vmem:[#allocation10 + $0xfa8] sm:$0xff] }
 0x481   :  { %7601 = vmatmul.mubr.bf16.vlgmr.msra.gmra.mxu0 %v14055_v24  ;;  %7697 = vmatprep.subr.bf16.mxu1 %v12203_v2  ;;  %v12147_v2 = vcombine.high %v4667_v31, %v4671_v30  ;;  %v4643_v50 = vld [vmem:[#allocation10 + $0xb48] sm:$0xff] }
 0x482   :  { %7655 = vmatpush1.bf16.msra.mxu0 %v12074_v16  ;;  %7686 = vmatprep.mubr.bf16.mxu0 %v14098_v5  ;;  %v12018_v16 = vcombine.low %v4539_v37, %v4543_v0  ;;  %v4647_v34 = vld [vmem:[#allocation10 + $0xb68] sm:$0xff] }
 0x483   :  { %7644 = vmatmul.mubr.bf16.vlgmr.msra.gmra.mxu1 %v14066_v25  ;;  %7656 = vmatprep.subr.bf16.mxu0 %v12067_v33  ;;  %v12139_v33 = vcombine.high %v4659_v29, %v4663_v53  ;;  %v4771_v10 = vld [vmem:[#allocation10 + $0xf48] sm:$0xff] }
 0x484   :  { %7698 = vmatpush1.bf16.msra.mxu1 %v12202_v47  ;;  %7729 = vmatprep.mubr.bf16.mxu1 %v14125_v62  ;;  %v12146_v47 = vcombine.low %v4667_v31, %v4671_v30  ;;  %v4775_v55 = vld [vmem:[#allocation10 + $0xf68] sm:$0xff] }
 0x485   :  { %7699 = vmatprep.subr.bf16.mxu1 %v12195_v46  ;;  %v12267_v46 = vcombine.high %v4787_v14, %v4791_v8  ;;  %v4635_v11 = vld [vmem:[#allocation10 + $0xb08] sm:$0xff] }
 0x486   :  { %7657 = vmatpush1.bf16.msra.mxu0 %v12066_v54  ;;  %v12138_v54 = vcombine.low %v4659_v29, %v4663_v53  ;;  %v4639_v4 = vld [vmem:[#allocation10 + $0xb28] sm:$0xff] }
 0x487   :  { %7658 = vmatprep.subr.bf16.mxu0 %v12059_v36  ;;  %v12131_v36 = vcombine.high %v4651_v39, %v4655_v57  ;;  %v4763_v43 = vld [vmem:[#allocation10 + $0xf08] sm:$0xff] }
 0x488   :  { %7700 = vmatpush1.bf16.msra.mxu1 %v12194_v44  ;;  %v12266_v44 = vcombine.low %v4787_v14, %v4791_v8  ;;  %v4767_v17 = vld [vmem:[#allocation10 + $0xf28] sm:$0xff] }
 0x489   :  { %7701 = vmatprep.subr.bf16.mxu1 %v12187_v60  ;;  %v12259_v60 = vcombine.high %v4779_v18, %v4783_v19  ;;  %v4627_v7 = vld [vmem:[#allocation10 + $0xac8] sm:$0xff] }
 0x48a   :  { %7659 = vmatpush1.bf16.msra.mxu0 %v12058_v41  ;;  %v12130_v41 = vcombine.low %v4651_v39, %v4655_v57  ;;  %v4631_v56 = vld [vmem:[#allocation10 + $0xae8] sm:$0xff]  ;;  %v4340_v39 = vld [vmem:[#allocation10 + $0x1d0] sm:$0xff] }
 0x48b   :  { %7660 = vmatprep.subr.bf16.mxu0 %v12051_v40  ;;  %v12123_v40 = vcombine.high %v4643_v50, %v4647_v34  ;;  %v4755_v49 = vld [vmem:[#allocation10 + $0xec8] sm:$0xff]  ;;  %v4344_v57 = vld [vmem:[#allocation10 + $0x1f0] sm:$0xff] }
 0x48c   :  { %7702 = vmatpush1.bf16.msra.mxu1 %v12186_v12  ;;  %v12258_v12 = vcombine.low %v4779_v18, %v4783_v19  ;;  %v4759_v15 = vld [vmem:[#allocation10 + $0xee8] sm:$0xff]  ;;  %v4468_v18 = vld [vmem:[#allocation10 + $0x5d0] sm:$0xff] }
 0x48d   :  { %7703 = vmatprep.subr.bf16.mxu1 %v12179_v13  ;;  %v12251_v13 = vcombine.high %v4771_v10, %v4775_v55  ;;  %v4619_v63 = vld [vmem:[#allocation10 + $0xa88] sm:$0xff]  ;;  %v4472_v19 = vld [vmem:[#allocation10 + $0x5f0] sm:$0xff] }
 0x48e   :  { %7661 = vmatpush1.bf16.msra.mxu0 %v12050_v61  ;;  %v12122_v61 = vcombine.low %v4643_v50, %v4647_v34  ;;  %v4623_v45 = vld [vmem:[#allocation10 + $0xaa8] sm:$0xff]  ;;  %v4332_v50 = vld [vmem:[#allocation10 + $0x190] sm:$0xff] }
 0x48f   :  { %7662 = vmatprep.subr.bf16.mxu0 %v12043_v51  ;;  %v12115_v51 = vcombine.high %v4635_v11, %v4639_v4  ;;  %v4747_v21 = vld [vmem:[#allocation10 + $0xe88] sm:$0xff]  ;;  %v4336_v34 = vld [vmem:[#allocation10 + $0x1b0] sm:$0xff] }
 0x490   :  { %7704 = vmatpush1.bf16.msra.mxu1 %v12178_v42  ;;  %v12250_v42 = vcombine.low %v4771_v10, %v4775_v55  ;;  %v4751_v38 = vld [vmem:[#allocation10 + $0xea8] sm:$0xff]  ;;  %v4460_v10 = vld [vmem:[#allocation10 + $0x590] sm:$0xff] }
 0x491   :  { %7705 = vmatprep.subr.bf16.mxu1 %v12171_v32  ;;  %v12243_v32 = vcombine.high %v4763_v43, %v4767_v17  ;;  %v4611_v37 = vld [vmem:[#allocation10 + $0xa48] sm:$0xff]  ;;  %v4464_v55 = vld [vmem:[#allocation10 + $0x5b0] sm:$0xff] }
 0x492   :  { %7663 = vmatpush1.bf16.msra.mxu0 %v12042_v27  ;;  %v12114_v27 = vcombine.low %v4635_v11, %v4639_v4  ;;  %v4615_v0 = vld [vmem:[#allocation10 + $0xa68] sm:$0xff]  ;;  %v4324_v11 = vld [vmem:[#allocation10 + $0x150] sm:$0xff] }
 0x493   :  { %7664 = vmatprep.subr.bf16.mxu0 %v12035_v28  ;;  %v12107_v28 = vcombine.high %v4627_v7, %v4631_v56  ;;  %v4739_v31 = vld [vmem:[#allocation10 + $0xe48] sm:$0xff]  ;;  %v4328_v4 = vld [vmem:[#allocation10 + $0x170] sm:$0xff] }
 0x494   :  { %7706 = vmatpush1.bf16.msra.mxu1 %v12170_v59  ;;  %v12242_v59 = vcombine.low %v4763_v43, %v4767_v17  ;;  %v4743_v30 = vld [vmem:[#allocation10 + $0xe68] sm:$0xff]  ;;  %v4452_v43 = vld [vmem:[#allocation10 + $0x550] sm:$0xff] }
 0x495   :  { %7707 = vmatprep.subr.bf16.mxu1 %v12163_v1  ;;  %v12235_v1 = vcombine.high %v4755_v49, %v4759_v15  ;;  %v4603_v29 = vld [vmem:[#allocation10 + $0xa08] sm:$0xff]  ;;  %v4456_v17 = vld [vmem:[#allocation10 + $0x570] sm:$0xff] }
 0x496   :  { %7665 = vmatpush1.bf16.msra.mxu0 %v12034_v23  ;;  %v12106_v23 = vcombine.low %v4627_v7, %v4631_v56  ;;  %v4607_v53 = vld [vmem:[#allocation10 + $0xa28] sm:$0xff]  ;;  %v4316_v7 = vld [vmem:[#allocation10 + $0x110] sm:$0xff] }
 0x497   :  { %7666 = vmatprep.subr.bf16.mxu0 %v12027_v9  ;;  %v12099_v9 = vcombine.high %v4619_v63, %v4623_v45  ;;  %v4731_v14 = vld [vmem:[#allocation10 + $0xe08] sm:$0xff]  ;;  %v4320_v56 = vld [vmem:[#allocation10 + $0x130] sm:$0xff] }
 0x498   :  { %7708 = vmatpush1.bf16.msra.mxu1 %v12162_v3  ;;  %v12234_v3 = vcombine.low %v4755_v49, %v4759_v15  ;;  %v4735_v8 = vld [vmem:[#allocation10 + $0xe28] sm:$0xff]  ;;  %v4444_v49 = vld [vmem:[#allocation10 + $0x510] sm:$0xff] }
 0x499   :  { %7709 = vmatprep.subr.bf16.mxu1 %v12155_v35  ;;  %v12227_v35 = vcombine.high %v4747_v21, %v4751_v38  ;;  %v4448_v15 = vld [vmem:[#allocation10 + $0x530] sm:$0xff] }
 0x49a   :  { %7667 = vmatpush1.bf16.msra.mxu0 %v12026_v26  ;;  %v12098_v26 = vcombine.low %v4619_v63, %v4623_v45  ;;  %v4308_v63 = vld [vmem:[#allocation10 + $0xd0] sm:$0xff] }
 0x49b   :  { %7668 = vmatprep.subr.bf16.mxu0 %v12019_v20  ;;  %v12091_v20 = vcombine.high %v4611_v37, %v4615_v0  ;;  %v4312_v45 = vld [vmem:[#allocation10 + $0xf0] sm:$0xff] }
 0x49c   :  { %7710 = vmatpush1.bf16.msra.mxu1 %v12154_v6  ;;  %v12226_v6 = vcombine.low %v4747_v21, %v4751_v38  ;;  %v4436_v21 = vld [vmem:[#allocation10 + $0x4d0] sm:$0xff] }
 0x49d   :  { %7711 = vmatprep.subr.bf16.mxu1 %v12147_v2  ;;  %v12219_v2 = vcombine.high %v4739_v31, %v4743_v30  ;;  %v4440_v38 = vld [vmem:[#allocation10 + $0x4f0] sm:$0xff] }
 0x49e   :  { %7669 = vmatpush1.bf16.msra.mxu0 %v12018_v16  ;;  %v12090_v16 = vcombine.low %v4611_v37, %v4615_v0  ;;  %v4300_v37 = vld [vmem:[#allocation10 + $0x90] sm:$0xff] }
 0x49f   :  { %7670 = vmatprep.subr.bf16.mxu0 %v12139_v33  ;;  %v12083_v33 = vcombine.high %v4603_v29, %v4607_v53  ;;  %v4304_v0 = vld [vmem:[#allocation10 + $0xb0] sm:$0xff] }
 0x4a0   :  { %7712 = vmatpush1.bf16.msra.mxu1 %v12146_v47  ;;  %v12218_v47 = vcombine.low %v4739_v31, %v4743_v30  ;;  %v4428_v31 = vld [vmem:[#allocation10 + $0x490] sm:$0xff] }
 0x4a1   :  { %7713 = vmatprep.subr.bf16.mxu1 %v12267_v46  ;;  %v12211_v46 = vcombine.high %v4731_v14, %v4735_v8  ;;  %v4432_v30 = vld [vmem:[#allocation10 + $0x4b0] sm:$0xff] }
 0x4a2   :  { %7671 = vmatpush2.bf16.msra.mxu0 %v12138_v54  ;;  %v12082_v54 = vcombine.low %v4603_v29, %v4607_v53  ;;  %v4292_v29 = vld [vmem:[#allocation10 + $0x50] sm:$0xff] }
 0x4a3   :  { %7672 = vmatprep.subr.bf16.mxu0 %v12131_v36  ;;  %v11821_v36 = vcombine.high %v4340_v39, %v4344_v57  ;;  %v4296_v53 = vld [vmem:[#allocation10 + $0x70] sm:$0xff] }
 0x4a4   :  { %7714 = vmatpush2.bf16.msra.mxu1 %v12266_v44  ;;  %v12210_v44 = vcombine.low %v4731_v14, %v4735_v8  ;;  %v4420_v14 = vld [vmem:[#allocation10 + $0x450] sm:$0xff] }
 0x4a5   :  { %7715 = vmatprep.subr.bf16.mxu1 %v12259_v60  ;;  %v11949_v60 = vcombine.high %v4468_v18, %v4472_v19  ;;  %v4424_v8 = vld [vmem:[#allocation10 + $0x470] sm:$0xff] }
 0x4a6   :  { %7673 = vmatpush2.bf16.msra.mxu0 %v12130_v41  ;;  %v11820_v41 = vcombine.low %v4340_v39, %v4344_v57  ;;  %v4284_v39 = vld [vmem:[#allocation10 + $0x10] sm:$0xff] }
 0x4a7   :  { %7674 = vmatprep.subr.bf16.mxu0 %v12123_v40  ;;  %v11813_v40 = vcombine.high %v4332_v50, %v4336_v34  ;;  %v4288_v57 = vld [vmem:[#allocation10 + $0x30] sm:$0xff] }
 0x4a8   :  { %7716 = vmatpush2.bf16.msra.mxu1 %v12258_v12  ;;  %v11948_v12 = vcombine.low %v4468_v18, %v4472_v19  ;;  %v4412_v18 = vld [vmem:[#allocation10 + $0x410] sm:$0xff] }
 0x4a9   :  { %7717 = vmatprep.subr.bf16.mxu1 %v12251_v13  ;;  %v11941_v13 = vcombine.high %v4460_v10, %v4464_v55  ;;  %v4416_v19 = vld [vmem:[#allocation10 + $0x430] sm:$0xff] }
 0x4aa   :  { %7675 = vmatpush2.bf16.msra.mxu0 %v12122_v61  ;;  %v11812_v61 = vcombine.low %v4332_v50, %v4336_v34  ;;  %v4404_v50 = vld [vmem:[#allocation10 + $0x3d0] sm:$0xff] }
 0x4ab   :  { %7676 = vmatprep.subr.bf16.mxu0 %v12115_v51  ;;  %v11805_v51 = vcombine.high %v4324_v11, %v4328_v4  ;;  %v4408_v34 = vld [vmem:[#allocation10 + $0x3f0] sm:$0xff] }
 0x4ac   :  { %7718 = vmatpush2.bf16.msra.mxu1 %v12250_v42  ;;  %v11940_v42 = vcombine.low %v4460_v10, %v4464_v55  ;;  %v4532_v10 = vld [vmem:[#allocation10 + $0x7d0] sm:$0xff] }
 0x4ad   :  { %7719 = vmatprep.subr.bf16.mxu1 %v12243_v32  ;;  %v11933_v32 = vcombine.high %v4452_v43, %v4456_v17  ;;  %v4536_v55 = vld [vmem:[#allocation10 + $0x7f0] sm:$0xff] }
 0x4ae   :  { %7677 = vmatpush2.bf16.msra.mxu0 %v12114_v27  ;;  %v11804_v27 = vcombine.low %v4324_v11, %v4328_v4  ;;  %v4396_v11 = vld [vmem:[#allocation10 + $0x390] sm:$0xff] }
 0x4af   :  { %7678 = vmatprep.subr.bf16.mxu0 %v12107_v28  ;;  %v11797_v28 = vcombine.high %v4316_v7, %v4320_v56  ;;  %v4400_v4 = vld [vmem:[#allocation10 + $0x3b0] sm:$0xff] }
 0x4b0   :  { %7720 = vmatpush2.bf16.msra.mxu1 %v12242_v59  ;;  %v11932_v59 = vcombine.low %v4452_v43, %v4456_v17  ;;  %v4524_v43 = vld [vmem:[#allocation10 + $0x790] sm:$0xff] }
 0x4b1   :  { %7721 = vmatprep.subr.bf16.mxu1 %v12235_v1  ;;  %v11925_v1 = vcombine.high %v4444_v49, %v4448_v15  ;;  %v4528_v17 = vld [vmem:[#allocation10 + $0x7b0] sm:$0xff] }
 0x4b2   :  { %7679 = vmatpush2.bf16.msra.mxu0 %v12106_v23  ;;  %v11796_v23 = vcombine.low %v4316_v7, %v4320_v56  ;;  %v4388_v7 = vld [vmem:[#allocation10 + $0x350] sm:$0xff] }
 0x4b3   :  { %7680 = vmatprep.subr.bf16.mxu0 %v12099_v9  ;;  %v11789_v9 = vcombine.high %v4308_v63, %v4312_v45  ;;  %v4392_v56 = vld [vmem:[#allocation10 + $0x370] sm:$0xff] }
 0x4b4   :  { %7722 = vmatpush2.bf16.msra.mxu1 %v12234_v3  ;;  %v11924_v3 = vcombine.low %v4444_v49, %v4448_v15  ;;  %v4516_v49 = vld [vmem:[#allocation10 + $0x750] sm:$0xff] }
 0x4b5   :  { %7723 = vmatprep.subr.bf16.mxu1 %v12227_v35  ;;  %v11917_v35 = vcombine.high %v4436_v21, %v4440_v38  ;;  %v4520_v15 = vld [vmem:[#allocation10 + $0x770] sm:$0xff] }
 0x4b6   :  { %7681 = vmatpush2.bf16.msra.mxu0 %v12098_v26  ;;  %v11788_v26 = vcombine.low %v4308_v63, %v4312_v45  ;;  %v4380_v63 = vld [vmem:[#allocation10 + $0x310] sm:$0xff] }
 0x4b7   :  { %7682 = vmatprep.subr.bf16.mxu0 %v12091_v20  ;;  %v11781_v20 = vcombine.high %v4300_v37, %v4304_v0  ;;  %v4384_v45 = vld [vmem:[#allocation10 + $0x330] sm:$0xff] }
 0x4b8   :  { %7724 = vmatpush2.bf16.msra.mxu1 %v12226_v6  ;;  %v11916_v6 = vcombine.low %v4436_v21, %v4440_v38  ;;  %v4508_v21 = vld [vmem:[#allocation10 + $0x710] sm:$0xff] }
 0x4b9   :  { %7725 = vmatprep.subr.bf16.mxu1 %v12219_v2  ;;  %v11909_v2 = vcombine.high %v4428_v31, %v4432_v30  ;;  %v4512_v38 = vld [vmem:[#allocation10 + $0x730] sm:$0xff] }
 0x4ba   :  { %7683 = vmatpush2.bf16.msra.mxu0 %v12090_v16  ;;  %v11780_v16 = vcombine.low %v4300_v37, %v4304_v0  ;;  %v4372_v37 = vld [vmem:[#allocation10 + $0x2d0] sm:$0xff] }
 0x4bb   :  { %7684 = vmatprep.subr.bf16.mxu0 %v12083_v33  ;;  %v11773_v33 = vcombine.high %v4292_v29, %v4296_v53  ;;  %v4376_v0 = vld [vmem:[#allocation10 + $0x2f0] sm:$0xff] }
 0x4bc   :  { %7726 = vmatpush2.bf16.msra.mxu1 %v12218_v47  ;;  %v11908_v47 = vcombine.low %v4428_v31, %v4432_v30  ;;  %v4500_v31 = vld [vmem:[#allocation10 + $0x6d0] sm:$0xff] }
 0x4bd   :  { %7727 = vmatprep.subr.bf16.mxu1 %v12211_v46  ;;  %v11901_v46 = vcombine.high %v4420_v14, %v4424_v8  ;;  %v4504_v30 = vld [vmem:[#allocation10 + $0x6f0] sm:$0xff] }
 0x4be   :  { %7685 = vmatpush2.bf16.msra.mxu0 %v12082_v54  ;;  %v11772_v54 = vcombine.low %v4292_v29, %v4296_v53  ;;  %v4364_v29 = vld [vmem:[#allocation10 + $0x290] sm:$0xff] }
 0x4bf   :  { %7740 = vmatprep.subr.bf16.mxu0 %v11821_v36  ;;  %v11765_v36 = vcombine.high %v4284_v39, %v4288_v57  ;;  %v4368_v53 = vld [vmem:[#allocation10 + $0x2b0] sm:$0xff] }
 0x4c0   :  { %7728 = vmatpush2.bf16.msra.mxu1 %v12210_v44  ;;  %v11900_v44 = vcombine.low %v4420_v14, %v4424_v8  ;;  %v4492_v14 = vld [vmem:[#allocation10 + $0x690] sm:$0xff] }
 0x4c1   :  { %7687 = vmatmul.mubr.bf16.vlgmr.msra.gmra.mxu0 %v14134_v52  ;;  %7783 = vmatprep.subr.bf16.mxu1 %v11949_v60  ;;  %v11893_v60 = vcombine.high %v4412_v18, %v4416_v19  ;;  %v4496_v8 = vld [vmem:[#allocation10 + $0x6b0] sm:$0xff] }
 0x4c2   :  { %7741 = vmatpush1.bf16.msra.mxu0 %v11820_v41  ;;  %7772 = vmatprep.mubr.bf16.mxu0 %v14049_v48  ;;  %v11764_v41 = vcombine.low %v4284_v39, %v4288_v57  ;;  %v4356_v39 = vld [vmem:[#allocation10 + $0x250] sm:$0xff] }
 0x4c3   :  { %7730 = vmatmul.mubr.bf16.vlgmr.msra.gmra.mxu1 %v14136_v58  ;;  %7742 = vmatprep.subr.bf16.mxu0 %v11813_v40  ;;  %v11885_v40 = vcombine.high %v4404_v50, %v4408_v34  ;;  %v4360_v57 = vld [vmem:[#allocation10 + $0x270] sm:$0xff] }
 0x4c4   :  { %7784 = vmatpush1.bf16.msra.mxu1 %v11948_v12  ;;  %7815 = vmatprep.mubr.bf16.mxu1 %v14051_v22  ;;  %v11892_v12 = vcombine.low %v4412_v18, %v4416_v19  ;;  %v4484_v18 = vld [vmem:[#allocation10 + $0x650] sm:$0xff] }
 0x4c5   :  { %7785 = vmatprep.subr.bf16.mxu1 %v11941_v13  ;;  %v12013_v13 = vcombine.high %v4532_v10, %v4536_v55  ;;  %v4488_v19 = vld [vmem:[#allocation10 + $0x670] sm:$0xff] }
 0x4c6   :  { %7743 = vmatpush1.bf16.msra.mxu0 %v11812_v61  ;;  %v11884_v61 = vcombine.low %v4404_v50, %v4408_v34  ;;  %v4348_v50 = vld [vmem:[#allocation10 + $0x210] sm:$0xff] }
 0x4c7   :  { %7744 = vmatprep.subr.bf16.mxu0 %v11805_v51  ;;  %v11877_v51 = vcombine.high %v4396_v11, %v4400_v4  ;;  %v4352_v34 = vld [vmem:[#allocation10 + $0x230] sm:$0xff] }
 0x4c8   :  { %7786 = vmatpush1.bf16.msra.mxu1 %v11940_v42  ;;  %v12012_v42 = vcombine.low %v4532_v10, %v4536_v55  ;;  %v4476_v10 = vld [vmem:[#allocation10 + $0x610] sm:$0xff] }
 0x4c9   :  { %7787 = vmatprep.subr.bf16.mxu1 %v11933_v32  ;;  %v12005_v32 = vcombine.high %v4524_v43, %v4528_v17  ;;  %v4480_v55 = vld [vmem:[#allocation10 + $0x630] sm:$0xff] }
 0x4ca   :  { %7745 = vmatpush1.bf16.msra.mxu0 %v11804_v27  ;;  %v11876_v27 = vcombine.low %v4396_v11, %v4400_v4  ;;  %v4596_v11 = vld [vmem:[#allocation10 + $0x9d0] sm:$0xff] }
 0x4cb   :  { %7746 = vmatprep.subr.bf16.mxu0 %v11797_v28  ;;  %v11869_v28 = vcombine.high %v4388_v7, %v4392_v56  ;;  %v4600_v4 = vld [vmem:[#allocation10 + $0x9f0] sm:$0xff] }
 0x4cc   :  { %7788 = vmatpush1.bf16.msra.mxu1 %v11932_v59  ;;  %v12004_v59 = vcombine.low %v4524_v43, %v4528_v17  ;;  %v4724_v43 = vld [vmem:[#allocation10 + $0xdd0] sm:$0xff] }
 0x4cd   :  { %7789 = vmatprep.subr.bf16.mxu1 %v11925_v1  ;;  %v11997_v1 = vcombine.high %v4516_v49, %v4520_v15  ;;  %v4728_v17 = vld [vmem:[#allocation10 + $0xdf0] sm:$0xff] }
 0x4ce   :  { %7747 = vmatpush1.bf16.msra.mxu0 %v11796_v23  ;;  %v11868_v23 = vcombine.low %v4388_v7, %v4392_v56  ;;  %v4588_v7 = vld [vmem:[#allocation10 + $0x990] sm:$0xff] }
 0x4cf   :  { %7748 = vmatprep.subr.bf16.mxu0 %v11789_v9  ;;  %v11861_v9 = vcombine.high %v4380_v63, %v4384_v45  ;;  %v4592_v56 = vld [vmem:[#allocation10 + $0x9b0] sm:$0xff] }
 0x4d0   :  { %7790 = vmatpush1.bf16.msra.mxu1 %v11924_v3  ;;  %v11996_v3 = vcombine.low %v4516_v49, %v4520_v15  ;;  %v4716_v49 = vld [vmem:[#allocation10 + $0xd90] sm:$0xff] }
 0x4d1   :  { %7791 = vmatprep.subr.bf16.mxu1 %v11917_v35  ;;  %v11989_v35 = vcombine.high %v4508_v21, %v4512_v38  ;;  %v4720_v15 = vld [vmem:[#allocation10 + $0xdb0] sm:$0xff] }
 0x4d2   :  { %7749 = vmatpush1.bf16.msra.mxu0 %v11788_v26  ;;  %v11860_v26 = vcombine.low %v4380_v63, %v4384_v45  ;;  %v4580_v63 = vld [vmem:[#allocation10 + $0x950] sm:$0xff] }
 0x4d3   :  { %7750 = vmatprep.subr.bf16.mxu0 %v11781_v20  ;;  %v11853_v20 = vcombine.high %v4372_v37, %v4376_v0  ;;  %v4584_v45 = vld [vmem:[#allocation10 + $0x970] sm:$0xff] }
 0x4d4   :  { %7792 = vmatpush1.bf16.msra.mxu1 %v11916_v6  ;;  %v11988_v6 = vcombine.low %v4508_v21, %v4512_v38  ;;  %v4708_v21 = vld [vmem:[#allocation10 + $0xd50] sm:$0xff] }
 0x4d5   :  { %7793 = vmatprep.subr.bf16.mxu1 %v11909_v2  ;;  %v11981_v2 = vcombine.high %v4500_v31, %v4504_v30  ;;  %v4712_v38 = vld [vmem:[#allocation10 + $0xd70] sm:$0xff] }
 0x4d6   :  { %7751 = vmatpush1.bf16.msra.mxu0 %v11780_v16  ;;  %v11852_v16 = vcombine.low %v4372_v37, %v4376_v0  ;;  %v4572_v37 = vld [vmem:[#allocation10 + $0x910] sm:$0xff] }
 0x4d7   :  { %7752 = vmatprep.subr.bf16.mxu0 %v11773_v33  ;;  %v11845_v33 = vcombine.high %v4364_v29, %v4368_v53  ;;  %v4576_v0 = vld [vmem:[#allocation10 + $0x930] sm:$0xff] }
 0x4d8   :  { %7794 = vmatpush1.bf16.msra.mxu1 %v11908_v47  ;;  %v11980_v47 = vcombine.low %v4500_v31, %v4504_v30  ;;  %v4700_v31 = vld [vmem:[#allocation10 + $0xd10] sm:$0xff] }
 0x4d9   :  { %7795 = vmatprep.subr.bf16.mxu1 %v11901_v46  ;;  %v11973_v46 = vcombine.high %v4492_v14, %v4496_v8  ;;  %v4704_v30 = vld [vmem:[#allocation10 + $0xd30] sm:$0xff] }
 0x4da   :  { %7753 = vmatpush1.bf16.msra.mxu0 %v11772_v54  ;;  %v11844_v54 = vcombine.low %v4364_v29, %v4368_v53  ;;  %v4564_v29 = vld [vmem:[#allocation10 + $0x8d0] sm:$0xff] }
 0x4db   :  { %7754 = vmatprep.subr.bf16.mxu0 %v11765_v36  ;;  %v11837_v36 = vcombine.high %v4356_v39, %v4360_v57  ;;  %v4568_v53 = vld [vmem:[#allocation10 + $0x8f0] sm:$0xff] }
 0x4dc   :  { %7796 = vmatpush1.bf16.msra.mxu1 %v11900_v44  ;;  %v11972_v44 = vcombine.low %v4492_v14, %v4496_v8  ;;  %v4692_v14 = vld [vmem:[#allocation10 + $0xcd0] sm:$0xff] }
 0x4dd   :  { %7797 = vmatprep.subr.bf16.mxu1 %v11893_v60  ;;  %v11965_v60 = vcombine.high %v4484_v18, %v4488_v19  ;;  %v4696_v8 = vld [vmem:[#allocation10 + $0xcf0] sm:$0xff] }
 0x4de   :  { %7755 = vmatpush1.bf16.msra.mxu0 %v11764_v41  ;;  %v11836_v41 = vcombine.low %v4356_v39, %v4360_v57  ;;  %v4556_v39 = vld [vmem:[#allocation10 + $0x890] sm:$0xff] }
 0x4df   :  { %7756 = vmatprep.subr.bf16.mxu0 %v11885_v40  ;;  %v11829_v40 = vcombine.high %v4348_v50, %v4352_v34  ;;  %v4560_v57 = vld [vmem:[#allocation10 + $0x8b0] sm:$0xff] }
 0x4e0   :  { %7798 = vmatpush1.bf16.msra.mxu1 %v11892_v12  ;;  %v11964_v12 = vcombine.low %v4484_v18, %v4488_v19  ;;  %v4684_v18 = vld [vmem:[#allocation10 + $0xc90] sm:$0xff] }
 0x4e1   :  { %7799 = vmatprep.subr.bf16.mxu1 %v12013_v13  ;;  %v11957_v13 = vcombine.high %v4476_v10, %v4480_v55  ;;  %v4688_v19 = vld [vmem:[#allocation10 + $0xcb0] sm:$0xff] }
 0x4e2   :  { %7757 = vmatpush2.bf16.msra.mxu0 %v11884_v61  ;;  %v11828_v61 = vcombine.low %v4348_v50, %v4352_v34  ;;  %v4548_v50 = vld [vmem:[#allocation10 + $0x850] sm:$0xff] }
 0x4e3   :  { %7758 = vmatprep.subr.bf16.mxu0 %v11877_v51  ;;  %v12077_v51 = vcombine.high %v4596_v11, %v4600_v4  ;;  %v4552_v34 = vld [vmem:[#allocation10 + $0x870] sm:$0xff] }
 0x4e4   :  { %7800 = vmatpush2.bf16.msra.mxu1 %v12012_v42  ;;  %v11956_v42 = vcombine.low %v4476_v10, %v4480_v55  ;;  %v4676_v10 = vld [vmem:[#allocation10 + $0xc50] sm:$0xff] }
 0x4e5   :  { %7801 = vmatprep.subr.bf16.mxu1 %v12005_v32  ;;  %v12205_v32 = vcombine.high %v4724_v43, %v4728_v17  ;;  %v4680_v55 = vld [vmem:[#allocation10 + $0xc70] sm:$0xff] }
 0x4e6   :  { %7759 = vmatpush2.bf16.msra.mxu0 %v11876_v27  ;;  %v12076_v27 = vcombine.low %v4596_v11, %v4600_v4  ;;  %v4540_v11 = vld [vmem:[#allocation10 + $0x810] sm:$0xff] }
 0x4e7   :  { %7760 = vmatprep.subr.bf16.mxu0 %v11869_v28  ;;  %v12069_v28 = vcombine.high %v4588_v7, %v4592_v56  ;;  %v4544_v4 = vld [vmem:[#allocation10 + $0x830] sm:$0xff] }
 0x4e8   :  { %7802 = vmatpush2.bf16.msra.mxu1 %v12004_v59  ;;  %v12204_v59 = vcombine.low %v4724_v43, %v4728_v17  ;;  %v4668_v43 = vld [vmem:[#allocation10 + $0xc10] sm:$0xff] }
 0x4e9   :  { %7803 = vmatprep.subr.bf16.mxu1 %v11997_v1  ;;  %v12197_v1 = vcombine.high %v4716_v49, %v4720_v15  ;;  %v4672_v17 = vld [vmem:[#allocation10 + $0xc30] sm:$0xff] }
 0x4ea   :  { %7761 = vmatpush2.bf16.msra.mxu0 %v11868_v23  ;;  %v12068_v23 = vcombine.low %v4588_v7, %v4592_v56  ;;  %v4660_v7 = vld [vmem:[#allocation10 + $0xbd0] sm:$0xff] }
 0x4eb   :  { %7762 = vmatprep.subr.bf16.mxu0 %v11861_v9  ;;  %v12061_v9 = vcombine.high %v4580_v63, %v4584_v45  ;;  %v4664_v56 = vld [vmem:[#allocation10 + $0xbf0] sm:$0xff] }
 0x4ec   :  { %7804 = vmatpush2.bf16.msra.mxu1 %v11996_v3  ;;  %v12196_v3 = vcombine.low %v4716_v49, %v4720_v15  ;;  %v4788_v49 = vld [vmem:[#allocation10 + $0xfd0] sm:$0xff] }
 0x4ed   :  { %7805 = vmatprep.subr.bf16.mxu1 %v11989_v35  ;;  %v12189_v35 = vcombine.high %v4708_v21, %v4712_v38  ;;  %v4792_v15 = vld [vmem:[#allocation10 + $0xff0] sm:$0xff] }
 0x4ee   :  { %7763 = vmatpush2.bf16.msra.mxu0 %v11860_v26  ;;  %v12060_v26 = vcombine.low %v4580_v63, %v4584_v45  ;;  %v4652_v63 = vld [vmem:[#allocation10 + $0xb90] sm:$0xff] }
 0x4ef   :  { %7764 = vmatprep.subr.bf16.mxu0 %v11853_v20  ;;  %v12053_v20 = vcombine.high %v4572_v37, %v4576_v0  ;;  %v4656_v45 = vld [vmem:[#allocation10 + $0xbb0] sm:$0xff] }
 0x4f0   :  { %7806 = vmatpush2.bf16.msra.mxu1 %v11988_v6  ;;  %v12188_v6 = vcombine.low %v4708_v21, %v4712_v38  ;;  %v4780_v21 = vld [vmem:[#allocation10 + $0xf90] sm:$0xff] }
 0x4f1   :  { %7807 = vmatprep.subr.bf16.mxu1 %v11981_v2  ;;  %v12181_v2 = vcombine.high %v4700_v31, %v4704_v30  ;;  %v4784_v38 = vld [vmem:[#allocation10 + $0xfb0] sm:$0xff] }
 0x4f2   :  { %7765 = vmatpush2.bf16.msra.mxu0 %v11852_v16  ;;  %v12052_v16 = vcombine.low %v4572_v37, %v4576_v0  ;;  %v4644_v37 = vld [vmem:[#allocation10 + $0xb50] sm:$0xff] }
 0x4f3   :  { %7766 = vmatprep.subr.bf16.mxu0 %v11845_v33  ;;  %v12045_v33 = vcombine.high %v4564_v29, %v4568_v53  ;;  %v4648_v0 = vld [vmem:[#allocation10 + $0xb70] sm:$0xff] }
 0x4f4   :  { %7808 = vmatpush2.bf16.msra.mxu1 %v11980_v47  ;;  %v12180_v47 = vcombine.low %v4700_v31, %v4704_v30  ;;  %v4772_v31 = vld [vmem:[#allocation10 + $0xf50] sm:$0xff] }
 0x4f5   :  { %7809 = vmatprep.subr.bf16.mxu1 %v11973_v46  ;;  %v12173_v46 = vcombine.high %v4692_v14, %v4696_v8  ;;  %v4776_v30 = vld [vmem:[#allocation10 + $0xf70] sm:$0xff] }
 0x4f6   :  { %7767 = vmatpush2.bf16.msra.mxu0 %v11844_v54  ;;  %v12044_v54 = vcombine.low %v4564_v29, %v4568_v53  ;;  %v4636_v29 = vld [vmem:[#allocation10 + $0xb10] sm:$0xff] }
 0x4f7   :  { %7768 = vmatprep.subr.bf16.mxu0 %v11837_v36  ;;  %v12037_v36 = vcombine.high %v4556_v39, %v4560_v57  ;;  %v4640_v53 = vld [vmem:[#allocation10 + $0xb30] sm:$0xff] }
 0x4f8   :  { %7810 = vmatpush2.bf16.msra.mxu1 %v11972_v44  ;;  %v12172_v44 = vcombine.low %v4692_v14, %v4696_v8  ;;  %v4764_v14 = vld [vmem:[#allocation10 + $0xf10] sm:$0xff] }
 0x4f9   :  { %7811 = vmatprep.subr.bf16.mxu1 %v11965_v60  ;;  %v12165_v60 = vcombine.high %v4684_v18, %v4688_v19  ;;  %v4768_v8 = vld [vmem:[#allocation10 + $0xf30] sm:$0xff] }
 0x4fa   :  { %7769 = vmatpush2.bf16.msra.mxu0 %v11836_v41  ;;  %v12036_v41 = vcombine.low %v4556_v39, %v4560_v57  ;;  %v4628_v39 = vld [vmem:[#allocation10 + $0xad0] sm:$0xff] }
 0x4fb   :  { %7770 = vmatprep.subr.bf16.mxu0 %v11829_v40  ;;  %v12029_v40 = vcombine.high %v4548_v50, %v4552_v34  ;;  %v4632_v57 = vld [vmem:[#allocation10 + $0xaf0] sm:$0xff] }
 0x4fc   :  { %7812 = vmatpush2.bf16.msra.mxu1 %v11964_v12  ;;  %v12164_v12 = vcombine.low %v4684_v18, %v4688_v19  ;;  %v4756_v18 = vld [vmem:[#allocation10 + $0xed0] sm:$0xff] }
 0x4fd   :  { %7813 = vmatprep.subr.bf16.mxu1 %v11957_v13  ;;  %v12157_v13 = vcombine.high %v4676_v10, %v4680_v55  ;;  %v4760_v19 = vld [vmem:[#allocation10 + $0xef0] sm:$0xff] }
 0x4fe   :  { %7771 = vmatpush2.bf16.msra.mxu0 %v11828_v61  ;;  %v12028_v61 = vcombine.low %v4548_v50, %v4552_v34  ;;  %v4620_v50 = vld [vmem:[#allocation10 + $0xa90] sm:$0xff] }
 0x4ff   :  { %7826 = vmatprep.subr.bf16.mxu0 %v12077_v51  ;;  %v12021_v51 = vcombine.high %v4540_v11, %v4544_v4  ;;  %v4624_v34 = vld [vmem:[#allocation10 + $0xab0] sm:$0xff] }
 0x500   :  { %7814 = vmatpush2.bf16.msra.mxu1 %v11956_v42  ;;  %v12156_v42 = vcombine.low %v4676_v10, %v4680_v55  ;;  %v4748_v10 = vld [vmem:[#allocation10 + $0xe90] sm:$0xff] }
 0x501   :  { %7773 = vmatmul.mubr.bf16.vlgmr.msra.gmra.mxu0 %v14055_v24  ;;  %7869 = vmatprep.subr.bf16.mxu1 %v12205_v32  ;;  %v12149_v32 = vcombine.high %v4668_v43, %v4672_v17  ;;  %v4752_v55 = vld [vmem:[#allocation10 + $0xeb0] sm:$0xff] }
 0x502   :  { %7827 = vmatpush1.bf16.msra.mxu0 %v12076_v27  ;;  %7858 = vmatprep.mubr.bf16.mxu0 %v14098_v5  ;;  %v12020_v27 = vcombine.low %v4540_v11, %v4544_v4  ;;  %v4612_v11 = vld [vmem:[#allocation10 + $0xa50] sm:$0xff] }
 0x503   :  { %7816 = vmatmul.mubr.bf16.vlgmr.msra.gmra.mxu1 %v14066_v25  ;;  %7828 = vmatprep.subr.bf16.mxu0 %v12069_v28  ;;  %v12141_v28 = vcombine.high %v4660_v7, %v4664_v56  ;;  %v4616_v4 = vld [vmem:[#allocation10 + $0xa70] sm:$0xff] }
 0x504   :  { %7870 = vmatpush1.bf16.msra.mxu1 %v12204_v59  ;;  %7901 = vmatprep.mubr.bf16.mxu1 %v14125_v62  ;;  %v12148_v59 = vcombine.low %v4668_v43, %v4672_v17  ;;  %v4740_v43 = vld [vmem:[#allocation10 + $0xe50] sm:$0xff] }
 0x505   :  { %7871 = vmatprep.subr.bf16.mxu1 %v12197_v1  ;;  %v12269_v1 = vcombine.high %v4788_v49, %v4792_v15  ;;  %v4744_v17 = vld [vmem:[#allocation10 + $0xe70] sm:$0xff] }
 0x506   :  { %7829 = vmatpush1.bf16.msra.mxu0 %v12068_v23  ;;  %v12140_v23 = vcombine.low %v4660_v7, %v4664_v56  ;;  %v4604_v7 = vld [vmem:[#allocation10 + $0xa10] sm:$0xff] }
 0x507   :  { %7830 = vmatprep.subr.bf16.mxu0 %v12061_v9  ;;  %v12133_v9 = vcombine.high %v4652_v63, %v4656_v45  ;;  %v4608_v56 = vld [vmem:[#allocation10 + $0xa30] sm:$0xff] }
 0x508   :  { %7872 = vmatpush1.bf16.msra.mxu1 %v12196_v3  ;;  %v12268_v3 = vcombine.low %v4788_v49, %v4792_v15  ;;  %v4732_v49 = vld [vmem:[#allocation10 + $0xe10] sm:$0xff] }
 0x509   :  { %7873 = vmatprep.subr.bf16.mxu1 %v12189_v35  ;;  %v12261_v35 = vcombine.high %v4780_v21, %v4784_v38  ;;  %v4736_v15 = vld [vmem:[#allocation10 + $0xe30] sm:$0xff] }
 0x50a   :  { %7831 = vmatpush1.bf16.msra.mxu0 %v12060_v26  ;;  %v12132_v26 = vcombine.low %v4652_v63, %v4656_v45  ;;  %v4341_v63 = vld [vmem:[#allocation10 + $0x1d8] sm:$0xff] }
 0x50b   :  { %7832 = vmatprep.subr.bf16.mxu0 %v12053_v20  ;;  %v12125_v20 = vcombine.high %v4644_v37, %v4648_v0  ;;  %v4345_v45 = vld [vmem:[#allocation10 + $0x1f8] sm:$0xff] }
 0x50c   :  { %7874 = vmatpush1.bf16.msra.mxu1 %v12188_v6  ;;  %v12260_v6 = vcombine.low %v4780_v21, %v4784_v38  ;;  %v4469_v21 = vld [vmem:[#allocation10 + $0x5d8] sm:$0xff] }
 0x50d   :  { %7875 = vmatprep.subr.bf16.mxu1 %v12181_v2  ;;  %v12253_v2 = vcombine.high %v4772_v31, %v4776_v30  ;;  %v4473_v38 = vld [vmem:[#allocation10 + $0x5f8] sm:$0xff] }
 0x50e   :  { %7833 = vmatpush1.bf16.msra.mxu0 %v12052_v16  ;;  %v12124_v16 = vcombine.low %v4644_v37, %v4648_v0  ;;  %v4333_v37 = vld [vmem:[#allocation10 + $0x198] sm:$0xff] }
 0x50f   :  { %7834 = vmatprep.subr.bf16.mxu0 %v12045_v33  ;;  %v12117_v33 = vcombine.high %v4636_v29, %v4640_v53  ;;  %v4337_v0 = vld [vmem:[#allocation10 + $0x1b8] sm:$0xff] }
 0x510   :  { %7876 = vmatpush1.bf16.msra.mxu1 %v12180_v47  ;;  %v12252_v47 = vcombine.low %v4772_v31, %v4776_v30  ;;  %v4461_v31 = vld [vmem:[#allocation10 + $0x598] sm:$0xff] }
 0x511   :  { %7877 = vmatprep.subr.bf16.mxu1 %v12173_v46  ;;  %v12245_v46 = vcombine.high %v4764_v14, %v4768_v8  ;;  %v4465_v30 = vld [vmem:[#allocation10 + $0x5b8] sm:$0xff] }
 0x512   :  { %7835 = vmatpush1.bf16.msra.mxu0 %v12044_v54  ;;  %v12116_v54 = vcombine.low %v4636_v29, %v4640_v53  ;;  %v4325_v29 = vld [vmem:[#allocation10 + $0x158] sm:$0xff] }
 0x513   :  { %7836 = vmatprep.subr.bf16.mxu0 %v12037_v36  ;;  %v12109_v36 = vcombine.high %v4628_v39, %v4632_v57  ;;  %v4329_v53 = vld [vmem:[#allocation10 + $0x178] sm:$0xff] }
 0x514   :  { %7878 = vmatpush1.bf16.msra.mxu1 %v12172_v44  ;;  %v12244_v44 = vcombine.low %v4764_v14, %v4768_v8  ;;  %v4453_v14 = vld [vmem:[#allocation10 + $0x558] sm:$0xff] }
 0x515   :  { %7879 = vmatprep.subr.bf16.mxu1 %v12165_v60  ;;  %v12237_v60 = vcombine.high %v4756_v18, %v4760_v19  ;;  %v4457_v8 = vld [vmem:[#allocation10 + $0x578] sm:$0xff] }
 0x516   :  { %7837 = vmatpush1.bf16.msra.mxu0 %v12036_v41  ;;  %v12108_v41 = vcombine.low %v4628_v39, %v4632_v57  ;;  %v4317_v39 = vld [vmem:[#allocation10 + $0x118] sm:$0xff] }
 0x517   :  { %7838 = vmatprep.subr.bf16.mxu0 %v12029_v40  ;;  %v12101_v40 = vcombine.high %v4620_v50, %v4624_v34  ;;  %v4321_v57 = vld [vmem:[#allocation10 + $0x138] sm:$0xff] }
 0x518   :  { %7880 = vmatpush1.bf16.msra.mxu1 %v12164_v12  ;;  %v12236_v12 = vcombine.low %v4756_v18, %v4760_v19  ;;  %v4445_v18 = vld [vmem:[#allocation10 + $0x518] sm:$0xff] }
 0x519   :  { %7881 = vmatprep.subr.bf16.mxu1 %v12157_v13  ;;  %v12229_v13 = vcombine.high %v4748_v10, %v4752_v55  ;;  %v4449_v19 = vld [vmem:[#allocation10 + $0x538] sm:$0xff] }
 0x51a   :  { %7839 = vmatpush1.bf16.msra.mxu0 %v12028_v61  ;;  %v12100_v61 = vcombine.low %v4620_v50, %v4624_v34  ;;  %v4313_v50 = vld [vmem:[#allocation10 + $0xf8] sm:$0xff]  ;;  %v11927_v34 = vcombine.high %v4445_v18, %v4449_v19 }
 0x51b   :  { %7840 = vmatprep.subr.bf16.mxu0 %v12021_v51  ;;  %v12093_v51 = vcombine.high %v4612_v11, %v4616_v4 }
 0x51c   :  { %7882 = vmatpush1.bf16.msra.mxu1 %v12156_v42  ;;  %v12228_v42 = vcombine.low %v4748_v10, %v4752_v55  ;;  %v11926_v55 = vcombine.low %v4445_v18, %v4449_v19 }
 0x51d   :  { %7883 = vmatprep.subr.bf16.mxu1 %v12149_v32  ;;  %v12221_v32 = vcombine.high %v4740_v43, %v4744_v17 }
 0x51e   :  { %7841 = vmatpush1.bf16.msra.mxu0 %v12020_v27  ;;  %v12092_v27 = vcombine.low %v4612_v11, %v4616_v4 }
 0x51f   :  { %7842 = vmatprep.subr.bf16.mxu0 %v12141_v28  ;;  %v12085_v28 = vcombine.high %v4604_v7, %v4608_v56 }
 0x520   :  { %7884 = vmatpush1.bf16.msra.mxu1 %v12148_v59  ;;  %v12220_v59 = vcombine.low %v4740_v43, %v4744_v17 }
 0x521   :  { %7885 = vmatprep.subr.bf16.mxu1 %v12269_v1  ;;  %v12213_v1 = vcombine.high %v4732_v49, %v4736_v15 }
 0x522   :  { %7843 = vmatpush2.bf16.msra.mxu0 %v12140_v23  ;;  %v12084_v23 = vcombine.low %v4604_v7, %v4608_v56 }
 0x523   :  { %7844 = vmatprep.subr.bf16.mxu0 %v12133_v9  ;;  %v11823_v9 = vcombine.high %v4341_v63, %v4345_v45 }
 0x524   :  { %7886 = vmatpush2.bf16.msra.mxu1 %v12268_v3  ;;  %v12212_v3 = vcombine.low %v4732_v49, %v4736_v15 }
 0x525   :  { %7887 = vmatprep.subr.bf16.mxu1 %v12261_v35  ;;  %v11951_v35 = vcombine.high %v4469_v21, %v4473_v38 }
 0x526   :  { %7845 = vmatpush2.bf16.msra.mxu0 %v12132_v26  ;;  %v11822_v26 = vcombine.low %v4341_v63, %v4345_v45 }
 0x527   :  { %7846 = vmatprep.subr.bf16.mxu0 %v12125_v20  ;;  %v11815_v20 = vcombine.high %v4333_v37, %v4337_v0 }
 0x528   :  { %7888 = vmatpush2.bf16.msra.mxu1 %v12260_v6  ;;  %v11950_v6 = vcombine.low %v4469_v21, %v4473_v38 }
 0x529   :  { %7889 = vmatprep.subr.bf16.mxu1 %v12253_v2  ;;  %v11943_v2 = vcombine.high %v4461_v31, %v4465_v30 }
 0x52a   :  { %7847 = vmatpush2.bf16.msra.mxu0 %v12124_v16  ;;  %v11814_v16 = vcombine.low %v4333_v37, %v4337_v0 }
 0x52b   :  { %7848 = vmatprep.subr.bf16.mxu0 %v12117_v33  ;;  %v11807_v33 = vcombine.high %v4325_v29, %v4329_v53 }
 0x52c   :  { %7890 = vmatpush2.bf16.msra.mxu1 %v12252_v47  ;;  %v11942_v47 = vcombine.low %v4461_v31, %v4465_v30 }
 0x52d   :  { %7891 = vmatprep.subr.bf16.mxu1 %v12245_v46  ;;  %v11935_v46 = vcombine.high %v4453_v14, %v4457_v8 }
 0x52e   :  { %7849 = vmatpush2.bf16.msra.mxu0 %v12116_v54  ;;  %v11806_v54 = vcombine.low %v4325_v29, %v4329_v53 }
 0x52f   :  { %7850 = vmatprep.subr.bf16.mxu0 %v12109_v36  ;;  %v11934_v36 = vcombine.low %v4453_v14, %v4457_v8 }
 0x530   :  { %7892 = vmatpush2.bf16.msra.mxu1 %v12244_v44  ;;  %v4309_v44 = vld [vmem:[#allocation10 + $0xd8] sm:$0xff] }
 0x531   :  { %7893 = vmatprep.subr.bf16.mxu1 %v12237_v60  ;;  %v11798_v60 = vcombine.low %v4317_v39, %v4321_v57  ;;  %v11791_v10 = vcombine.high %v4309_v44, %v4313_v50  ;;  %v11790_v4 = vcombine.low %v4309_v44, %v4313_v50 }
 0x532   :  { %7851 = vmatpush2.bf16.msra.mxu0 %v12108_v41  ;;  %v4441_v41 = vld [vmem:[#allocation10 + $0x4f8] sm:$0xff] }
 0x533   :  { %7852 = vmatprep.subr.bf16.mxu0 %v12101_v40  ;;  %v4301_v40 = vld [vmem:[#allocation10 + $0x98] sm:$0xff] }
 0x534   :  { %7894 = vmatpush2.bf16.msra.mxu1 %v12236_v12  ;;  %v4305_v12 = vld [vmem:[#allocation10 + $0xb8] sm:$0xff] }
 0x535   :  { %7895 = vmatprep.subr.bf16.mxu1 %v12229_v13  ;;  %v4429_v13 = vld [vmem:[#allocation10 + $0x498] sm:$0xff]  ;;  %v11783_v43 = vcombine.high %v4301_v40, %v4305_v12  ;;  %v11782_v56 = vcombine.low %v4301_v40, %v4305_v12 }
 0x536   :  { %7853 = vmatpush2.bf16.msra.mxu0 %v12100_v61  ;;  %v4433_v61 = vld [vmem:[#allocation10 + $0x4b8] sm:$0xff] }
 0x537   :  { %7854 = vmatprep.subr.bf16.mxu0 %v12093_v51  ;;  %v4293_v51 = vld [vmem:[#allocation10 + $0x58] sm:$0xff]  ;;  %v11911_v7 = vcombine.high %v4429_v13, %v4433_v61  ;;  %v11910_v15 = vcombine.low %v4429_v13, %v4433_v61 }
 0x538   :  { %7896 = vmatpush2.bf16.msra.mxu1 %v12228_v42  ;;  %v4297_v42 = vld [vmem:[#allocation10 + $0x78] sm:$0xff] }
 0x539   :  { %7897 = vmatprep.subr.bf16.mxu1 %v12221_v32  ;;  %v4421_v32 = vld [vmem:[#allocation10 + $0x458] sm:$0xff]  ;;  %v11775_v49 = vcombine.high %v4293_v51, %v4297_v42  ;;  %v11774_v45 = vcombine.low %v4293_v51, %v4297_v42 }
 0x53a   :  { %7855 = vmatpush2.bf16.msra.mxu0 %v12092_v27  ;;  %v4425_v27 = vld [vmem:[#allocation10 + $0x478] sm:$0xff] }
 0x53b   :  { %7856 = vmatprep.subr.bf16.mxu0 %v12085_v28  ;;  %v4285_v28 = vld [vmem:[#allocation10 + $0x18] sm:$0xff]  ;;  %v11903_v63 = vcombine.high %v4421_v32, %v4425_v27  ;;  %v11902_v38 = vcombine.low %v4421_v32, %v4425_v27 }
 0x53c   :  { %7898 = vmatpush2.bf16.msra.mxu1 %v12220_v59  ;;  %v4289_v59 = vld [vmem:[#allocation10 + $0x38] sm:$0xff] }
 0x53d   :  { %7899 = vmatprep.subr.bf16.mxu1 %v12213_v1  ;;  %v4413_v1 = vld [vmem:[#allocation10 + $0x418] sm:$0xff]  ;;  %v11767_v21 = vcombine.high %v4285_v28, %v4289_v59  ;;  %v11766_v0 = vcombine.low %v4285_v28, %v4289_v59 }
 0x53e   :  { %7857 = vmatpush2.bf16.msra.mxu0 %v12084_v23  ;;  %v4417_v23 = vld [vmem:[#allocation10 + $0x438] sm:$0xff] }
 0x53f   :  { %7912 = vmatprep.subr.bf16.mxu0 %v11823_v9  ;;  %v4405_v9 = vld [vmem:[#allocation10 + $0x3d8] sm:$0xff]  ;;  %v11895_v37 = vcombine.high %v4413_v1, %v4417_v23  ;;  %v11894_v30 = vcombine.low %v4413_v1, %v4417_v23 }
 0x540   :  { %7900 = vmatpush2.bf16.msra.mxu1 %v12212_v3  ;;  %v4409_v3 = vld [vmem:[#allocation10 + $0x3f8] sm:$0xff] }
 0x541   :  { %7859 = vmatmul.mubr.bf16.vlgmr.msra.gmra.mxu0 %v14134_v52  ;;  %7955 = vmatprep.subr.bf16.mxu1 %v11951_v35  ;;  %v4533_v35 = vld [vmem:[#allocation10 + $0x7d8] sm:$0xff]  ;;  %v11887_v31 = vcombine.high %v4405_v9, %v4409_v3  ;;  %v11886_v53 = vcombine.low %v4405_v9, %v4409_v3 }
 0x542   :  { %7913 = vmatpush1.bf16.msra.mxu0 %v11822_v26  ;;  %7944 = vmatprep.mubr.bf16.mxu0 %v14049_v48  ;;  %v11799_v48 = vcombine.high %v4317_v39, %v4321_v57  ;;  %v4537_v26 = vld [vmem:[#allocation10 + $0x7f8] sm:$0xff] }
 0x543   :  { %7902 = vmatmul.mubr.bf16.vlgmr.msra.gmra.mxu1 %v14136_v58  ;;  %7914 = vmatprep.subr.bf16.mxu0 %v11815_v20  ;;  %v4397_v20 = vld [vmem:[#allocation10 + $0x398] sm:$0xff]  ;;  %v12015_v29 = vcombine.high %v4533_v35, %v4537_v26  ;;  %v12014_v8 = vcombine.low %v4533_v35, %v4537_v26 }
 0x544   :  { %7956 = vmatpush1.bf16.msra.mxu1 %v11950_v6  ;;  %7987 = vmatprep.mubr.bf16.mxu1 %v14051_v22  ;;  %v4437_v22 = vld [vmem:[#allocation10 + $0x4d8] sm:$0xff] }
 0x545   :  { %7957 = vmatprep.subr.bf16.mxu1 %v11943_v2  ;;  %v11919_v11 = vcombine.high %v4437_v22, %v4441_v41  ;;  %v11918_v17 = vcombine.low %v4437_v22, %v4441_v41  ;;  %v4401_v6 = vld [vmem:[#allocation10 + $0x3b8] sm:$0xff] }
 0x546   :  { %7915 = vmatpush1.bf16.msra.mxu0 %v11814_v16  ;;  %v4525_v2 = vld [vmem:[#allocation10 + $0x798] sm:$0xff]  ;;  %v11879_v14 = vcombine.high %v4397_v20, %v4401_v6  ;;  %v11878_v57 = vcombine.low %v4397_v20, %v4401_v6 }
 0x547   :  { %7916 = vmatprep.subr.bf16.mxu0 %v11807_v33  ;;  %v4529_v16 = vld [vmem:[#allocation10 + $0x7b8] sm:$0xff] }
 0x548   :  { %7958 = vmatpush1.bf16.msra.mxu1 %v11942_v47  ;;  %v4389_v33 = vld [vmem:[#allocation10 + $0x358] sm:$0xff]  ;;  %v12007_v39 = vcombine.high %v4525_v2, %v4529_v16  ;;  %v12006_v19 = vcombine.low %v4525_v2, %v4529_v16 }
 0x549   :  { %7959 = vmatprep.subr.bf16.mxu1 %v11935_v46  ;;  %v4393_v47 = vld [vmem:[#allocation10 + $0x378] sm:$0xff] }
 0x54a   :  { %7917 = vmatpush1.bf16.msra.mxu0 %v11806_v54  ;;  %v4517_v46 = vld [vmem:[#allocation10 + $0x758] sm:$0xff]  ;;  %v11871_v18 = vcombine.high %v4389_v33, %v4393_v47  ;;  %v11870_v50 = vcombine.low %v4389_v33, %v4393_v47 }
 0x54b   :  { %7918 = vmatprep.subr.bf16.mxu0 %v11799_v48  ;;  %v4521_v54 = vld [vmem:[#allocation10 + $0x778] sm:$0xff] }
 0x54c   :  { %7960 = vmatpush1.bf16.msra.mxu1 %v11934_v36  ;;  %v4381_v48 = vld [vmem:[#allocation10 + $0x318] sm:$0xff]  ;;  %v11999_v44 = vcombine.high %v4517_v46, %v4521_v54  ;;  %v11998_v41 = vcombine.low %v4517_v46, %v4521_v54 }
 0x54d   :  { %7961 = vmatprep.subr.bf16.mxu1 %v11927_v34  ;;  %v4385_v36 = vld [vmem:[#allocation10 + $0x338] sm:$0xff] }
 0x54e   :  { %7919 = vmatpush1.bf16.msra.mxu0 %v11798_v60  ;;  %v4509_v34 = vld [vmem:[#allocation10 + $0x718] sm:$0xff]  ;;  %v11863_v22 = vcombine.high %v4381_v48, %v4385_v36  ;;  %v11862_v12 = vcombine.low %v4381_v48, %v4385_v36 }
 0x54f   :  { %7920 = vmatprep.subr.bf16.mxu0 %v11791_v10  ;;  %v4513_v60 = vld [vmem:[#allocation10 + $0x738] sm:$0xff] }
 0x550   :  { %7962 = vmatpush1.bf16.msra.mxu1 %v11926_v55  ;;  %v4373_v10 = vld [vmem:[#allocation10 + $0x2d8] sm:$0xff]  ;;  %v11991_v40 = vcombine.high %v4509_v34, %v4513_v60  ;;  %v11990_v61 = vcombine.low %v4509_v34, %v4513_v60 }
 0x551   :  { %7963 = vmatprep.subr.bf16.mxu1 %v11919_v11  ;;  %v4377_v55 = vld [vmem:[#allocation10 + $0x2f8] sm:$0xff] }
 0x552   :  { %7921 = vmatpush1.bf16.msra.mxu0 %v11790_v4  ;;  %v4501_v11 = vld [vmem:[#allocation10 + $0x6d8] sm:$0xff]  ;;  %v11855_v13 = vcombine.high %v4373_v10, %v4377_v55  ;;  %v11854_v42 = vcombine.low %v4373_v10, %v4377_v55 }
 0x553   :  { %7922 = vmatprep.subr.bf16.mxu0 %v11783_v43  ;;  %v4505_v4 = vld [vmem:[#allocation10 + $0x6f8] sm:$0xff] }
 0x554   :  { %7964 = vmatpush1.bf16.msra.mxu1 %v11918_v17  ;;  %v4365_v43 = vld [vmem:[#allocation10 + $0x298] sm:$0xff]  ;;  %v11983_v51 = vcombine.high %v4501_v11, %v4505_v4  ;;  %v11982_v27 = vcombine.low %v4501_v11, %v4505_v4 }
 0x555   :  { %7965 = vmatprep.subr.bf16.mxu1 %v11911_v7  ;;  %v4369_v17 = vld [vmem:[#allocation10 + $0x2b8] sm:$0xff] }
 0x556   :  { %7923 = vmatpush1.bf16.msra.mxu0 %v11782_v56  ;;  %v4493_v7 = vld [vmem:[#allocation10 + $0x698] sm:$0xff]  ;;  %v11847_v32 = vcombine.high %v4365_v43, %v4369_v17  ;;  %v11846_v59 = vcombine.low %v4365_v43, %v4369_v17 }
 0x557   :  { %7924 = vmatprep.subr.bf16.mxu0 %v11775_v49  ;;  %v4497_v56 = vld [vmem:[#allocation10 + $0x6b8] sm:$0xff] }
 0x558   :  { %7966 = vmatpush1.bf16.msra.mxu1 %v11910_v15  ;;  %v4357_v49 = vld [vmem:[#allocation10 + $0x258] sm:$0xff]  ;;  %v11975_v28 = vcombine.high %v4493_v7, %v4497_v56  ;;  %v11974_v23 = vcombine.low %v4493_v7, %v4497_v56 }
 0x559   :  { %7967 = vmatprep.subr.bf16.mxu1 %v11903_v63  ;;  %v4361_v15 = vld [vmem:[#allocation10 + $0x278] sm:$0xff] }
 0x55a   :  { %7925 = vmatpush1.bf16.msra.mxu0 %v11774_v45  ;;  %v4485_v63 = vld [vmem:[#allocation10 + $0x658] sm:$0xff]  ;;  %v11839_v1 = vcombine.high %v4357_v49, %v4361_v15  ;;  %v11838_v3 = vcombine.low %v4357_v49, %v4361_v15 }
 0x55b   :  { %7926 = vmatprep.subr.bf16.mxu0 %v11767_v21  ;;  %v4489_v45 = vld [vmem:[#allocation10 + $0x678] sm:$0xff] }
 0x55c   :  { %7968 = vmatpush1.bf16.msra.mxu1 %v11902_v38  ;;  %v4349_v21 = vld [vmem:[#allocation10 + $0x218] sm:$0xff]  ;;  %v11967_v9 = vcombine.high %v4485_v63, %v4489_v45  ;;  %v11966_v26 = vcombine.low %v4485_v63, %v4489_v45 }
 0x55d   :  { %7969 = vmatprep.subr.bf16.mxu1 %v11895_v37  ;;  %v4353_v38 = vld [vmem:[#allocation10 + $0x238] sm:$0xff] }
 0x55e   :  { %7927 = vmatpush1.bf16.msra.mxu0 %v11766_v0  ;;  %v4477_v37 = vld [vmem:[#allocation10 + $0x618] sm:$0xff]  ;;  %v11831_v35 = vcombine.high %v4349_v21, %v4353_v38  ;;  %v11830_v6 = vcombine.low %v4349_v21, %v4353_v38 }
 0x55f   :  { %7928 = vmatprep.subr.bf16.mxu0 %v11887_v31  ;;  %v4481_v0 = vld [vmem:[#allocation10 + $0x638] sm:$0xff] }
 0x560   :  { %7970 = vmatpush1.bf16.msra.mxu1 %v11894_v30  ;;  %v4597_v31 = vld [vmem:[#allocation10 + $0x9d8] sm:$0xff]  ;;  %v11959_v20 = vcombine.high %v4477_v37, %v4481_v0  ;;  %v11958_v16 = vcombine.low %v4477_v37, %v4481_v0 }
 0x561   :  { %7971 = vmatprep.subr.bf16.mxu1 %v12015_v29  ;;  %v4601_v30 = vld [vmem:[#allocation10 + $0x9f8] sm:$0xff] }
 0x562   :  { %7929 = vmatpush2.bf16.msra.mxu0 %v11886_v53  ;;  %v4725_v29 = vld [vmem:[#allocation10 + $0xdd8] sm:$0xff]  ;;  %v12079_v2 = vcombine.high %v4597_v31, %v4601_v30  ;;  %v12078_v47 = vcombine.low %v4597_v31, %v4601_v30 }
 0x563   :  { %7930 = vmatprep.subr.bf16.mxu0 %v11879_v14  ;;  %v4729_v53 = vld [vmem:[#allocation10 + $0xdf8] sm:$0xff] }
 0x564   :  { %7972 = vmatpush2.bf16.msra.mxu1 %v12014_v8  ;;  %v4589_v14 = vld [vmem:[#allocation10 + $0x998] sm:$0xff]  ;;  %v12207_v33 = vcombine.high %v4725_v29, %v4729_v53  ;;  %v12206_v54 = vcombine.low %v4725_v29, %v4729_v53 }
 0x565   :  { %7973 = vmatprep.subr.bf16.mxu1 %v12007_v39  ;;  %v4593_v8 = vld [vmem:[#allocation10 + $0x9b8] sm:$0xff] }
 0x566   :  { %7931 = vmatpush2.bf16.msra.mxu0 %v11878_v57  ;;  %v4717_v39 = vld [vmem:[#allocation10 + $0xd98] sm:$0xff]  ;;  %v12071_v46 = vcombine.high %v4589_v14, %v4593_v8  ;;  %v12070_v36 = vcombine.low %v4589_v14, %v4593_v8 }
 0x567   :  { %7932 = vmatprep.subr.bf16.mxu0 %v11871_v18  ;;  %v4721_v57 = vld [vmem:[#allocation10 + $0xdb8] sm:$0xff] }
 0x568   :  { %7974 = vmatpush2.bf16.msra.mxu1 %v12006_v19  ;;  %v4581_v18 = vld [vmem:[#allocation10 + $0x958] sm:$0xff]  ;;  %v12199_v48 = vcombine.high %v4717_v39, %v4721_v57  ;;  %v12198_v60 = vcombine.low %v4717_v39, %v4721_v57 }
 0x569   :  { %7975 = vmatprep.subr.bf16.mxu1 %v11999_v44  ;;  %v4585_v19 = vld [vmem:[#allocation10 + $0x978] sm:$0xff] }
 0x56a   :  { %7933 = vmatpush2.bf16.msra.mxu0 %v11870_v50  ;;  %v4709_v44 = vld [vmem:[#allocation10 + $0xd58] sm:$0xff]  ;;  %v12063_v34 = vcombine.high %v4581_v18, %v4585_v19  ;;  %v12062_v10 = vcombine.low %v4581_v18, %v4585_v19 }
 0x56b   :  { %7934 = vmatprep.subr.bf16.mxu0 %v11863_v22  ;;  %v4713_v50 = vld [vmem:[#allocation10 + $0xd78] sm:$0xff] }
 0x56c   :  { %7976 = vmatpush2.bf16.msra.mxu1 %v11998_v41  ;;  %v4573_v22 = vld [vmem:[#allocation10 + $0x918] sm:$0xff] }
 0x56d   :  { %7977 = vmatprep.subr.bf16.mxu1 %v11991_v40  ;;  %v4577_v41 = vld [vmem:[#allocation10 + $0x938] sm:$0xff] }
 0x56e   :  { %7935 = vmatpush2.bf16.msra.mxu0 %v11862_v12  ;;  %v4701_v55 = vld [vmem:[#allocation10 + $0xd18] sm:$0xff]  ;;  %v12190_v12 = vcombine.low %v4709_v44, %v4713_v50 }
 0x56f   :  { %7936 = vmatprep.subr.bf16.mxu0 %v11855_v13  ;;  %v4705_v40 = vld [vmem:[#allocation10 + $0xd38] sm:$0xff]  ;;  %v12054_v13 = vcombine.low %v4573_v22, %v4577_v41 }
 0x570   :  { %7978 = vmatpush2.bf16.msra.mxu1 %v11990_v61  ;;  %v4565_v11 = vld [vmem:[#allocation10 + $0x8d8] sm:$0xff]  ;;  %v12183_v4 = vcombine.high %v4701_v55, %v4705_v40  ;;  %v12182_v17 = vcombine.low %v4701_v55, %v4705_v40 }
 0x571   :  { %7979 = vmatprep.subr.bf16.mxu1 %v11983_v51  ;;  %v4697_v61 = vld [vmem:[#allocation10 + $0xcf8] sm:$0xff] }
 0x572   :  { %7937 = vmatpush2.bf16.msra.mxu0 %v11854_v42  ;;  %v4557_v51 = vld [vmem:[#allocation10 + $0x898] sm:$0xff] }
 0x573   :  { %7938 = vmatprep.subr.bf16.mxu0 %v11847_v32  ;;  %v4561_v42 = vld [vmem:[#allocation10 + $0x8b8] sm:$0xff] }
 0x574   :  { %7980 = vmatpush2.bf16.msra.mxu1 %v11982_v27  ;;  %v4685_v32 = vld [vmem:[#allocation10 + $0xc98] sm:$0xff]  ;;  %v12039_v49 = vcombine.high %v4557_v51, %v4561_v42  ;;  %v12038_v45 = vcombine.low %v4557_v51, %v4561_v42 }
 0x575   :  { %7981 = vmatprep.subr.bf16.mxu1 %v11975_v28  ;;  %v4689_v27 = vld [vmem:[#allocation10 + $0xcb8] sm:$0xff] }
 0x576   :  { %7939 = vmatpush2.bf16.msra.mxu0 %v11846_v59  ;;  %v4549_v28 = vld [vmem:[#allocation10 + $0x858] sm:$0xff]  ;;  %v12167_v63 = vcombine.high %v4685_v32, %v4689_v27  ;;  %v12166_v38 = vcombine.low %v4685_v32, %v4689_v27 }
 0x577   :  { %7940 = vmatprep.subr.bf16.mxu0 %v11839_v1  ;;  %v4553_v59 = vld [vmem:[#allocation10 + $0x878] sm:$0xff] }
 0x578   :  { %7982 = vmatpush2.bf16.msra.mxu1 %v11974_v23  ;;  %v4677_v1 = vld [vmem:[#allocation10 + $0xc58] sm:$0xff]  ;;  %v12031_v21 = vcombine.high %v4549_v28, %v4553_v59  ;;  %v12030_v0 = vcombine.low %v4549_v28, %v4553_v59 }
 0x579   :  { %7983 = vmatprep.subr.bf16.mxu1 %v11967_v9  ;;  %v4681_v23 = vld [vmem:[#allocation10 + $0xc78] sm:$0xff] }
 0x57a   :  { %7941 = vmatpush2.bf16.msra.mxu0 %v11838_v3  ;;  %v4541_v9 = vld [vmem:[#allocation10 + $0x818] sm:$0xff]  ;;  %v12159_v37 = vcombine.high %v4677_v1, %v4681_v23  ;;  %v12158_v30 = vcombine.low %v4677_v1, %v4681_v23 }
 0x57b   :  { %7942 = vmatprep.subr.bf16.mxu0 %v11831_v35  ;;  %v4545_v3 = vld [vmem:[#allocation10 + $0x838] sm:$0xff] }
 0x57c   :  { %7984 = vmatpush2.bf16.msra.mxu1 %v11966_v26  ;;  %v4669_v35 = vld [vmem:[#allocation10 + $0xc18] sm:$0xff]  ;;  %v12023_v31 = vcombine.high %v4541_v9, %v4545_v3  ;;  %v12022_v53 = vcombine.low %v4541_v9, %v4545_v3 }
 0x57d   :  { %7985 = vmatprep.subr.bf16.mxu1 %v11959_v20  ;;  %v4673_v26 = vld [vmem:[#allocation10 + $0xc38] sm:$0xff] }
 0x57e   :  { %7943 = vmatpush2.bf16.msra.mxu0 %v11830_v6  ;;  %v4661_v20 = vld [vmem:[#allocation10 + $0xbd8] sm:$0xff]  ;;  %v12151_v29 = vcombine.high %v4669_v35, %v4673_v26  ;;  %v12150_v8 = vcombine.low %v4669_v35, %v4673_v26 }
 0x57f   :  { %7998 = vmatprep.subr.bf16.mxu0 %v12079_v2  ;;  %v4665_v6 = vld [vmem:[#allocation10 + $0xbf8] sm:$0xff] }
 0x580   :  { %7986 = vmatpush2.bf16.msra.mxu1 %v11958_v16  ;;  %v4789_v2 = vld [vmem:[#allocation10 + $0xfd8] sm:$0xff]  ;;  %v12143_v14 = vcombine.high %v4661_v20, %v4665_v6  ;;  %v12142_v57 = vcombine.low %v4661_v20, %v4665_v6 }
 0x581   :  { %7945 = vmatmul.mubr.bf16.vlgmr.msra.gmra.mxu0 %v14055_v24  ;;  %8041 = vmatprep.subr.bf16.mxu1 %v12207_v33  ;;  %v12191_v24 = vcombine.high %v4709_v44, %v4713_v50  ;;  %v4793_v16 = vld [vmem:[#allocation10 + $0xff8] sm:$0xff] }
 0x582   :  { %7999 = vmatpush1.bf16.msra.mxu0 %v12078_v47  ;;  %8030 = vmatprep.mubr.bf16.mxu0 %v14098_v5  ;;  %v12055_v5 = vcombine.high %v4573_v22, %v4577_v41  ;;  %v4653_v33 = vld [vmem:[#allocation10 + $0xb98] sm:$0xff]  ;;  %v12271_v39 = vcombine.high %v4789_v2, %v4793_v16  ;;  %v12270_v19 = vcombine.low %v4789_v2, %v4793_v16  ;;  %v12673_v16 = vld [vmem:[#allocation16 + $0x150] ss:$24 sps:$4 sm:$0xff]  }
 0x583   :  { %7988 = vmatmul.mubr.bf16.vlgmr.msra.gmra.mxu1 %v14066_v25  ;;  %8000 = vmatprep.subr.bf16.mxu0 %v12071_v46  ;;  %v4569_v25 = vld [vmem:[#allocation10 + $0x8f8] sm:$0xff] }
 0x584   :  { %8042 = vmatpush1.bf16.msra.mxu1 %v12206_v54  ;;  %8073 = vmatprep.mubr.bf16.mxu1 %v14125_v62  ;;  %v4693_v62 = vld [vmem:[#allocation10 + $0xcd8] sm:$0xff]  ;;  %v12047_v43 = vcombine.high %v4565_v11, %v4569_v25  ;;  %v12046_v56 = vcombine.low %v4565_v11, %v4569_v25 }
 0x585   :  { %8043 = vmatprep.subr.bf16.mxu1 %v12199_v48  ;;  %v12175_v7 = vcombine.high %v4693_v62, %v4697_v61  ;;  %v12174_v15 = vcombine.low %v4693_v62, %v4697_v61  ;;  %v4657_v47 = vld [vmem:[#allocation10 + $0xbb8] sm:$0xff] }
 0x586   :  { %8001 = vmatpush1.bf16.msra.mxu0 %v12070_v36  ;;  %v4781_v46 = vld [vmem:[#allocation10 + $0xf98] sm:$0xff]  ;;  %v12135_v18 = vcombine.high %v4653_v33, %v4657_v47  ;;  %v12134_v50 = vcombine.low %v4653_v33, %v4657_v47  ;;  %v12678_v33 = vld [vmem:[#allocation16 + $0x454] ss:$24 sps:$4 sm:$0xff]  }
 0x587   :  { %8002 = vmatprep.subr.bf16.mxu0 %v12063_v34  ;;  %v4785_v54 = vld [vmem:[#allocation10 + $0xfb8] sm:$0xff] }
 0x588   :  { %8044 = vmatpush1.bf16.msra.mxu1 %v12198_v60  ;;  %v4645_v48 = vld [vmem:[#allocation10 + $0xb58] sm:$0xff]  ;;  %v12263_v44 = vcombine.high %v4781_v46, %v4785_v54  ;;  %v12262_v41 = vcombine.low %v4781_v46, %v4785_v54  ;;  %v12687_v54 = vld [vmem:[#allocation16 + $0xf4] ss:$24 sps:$4 sm:$0xff]  }
 0x589   :  { %8045 = vmatprep.subr.bf16.mxu1 %v12191_v24  ;;  %v4649_v36 = vld [vmem:[#allocation10 + $0xb78] sm:$0xff] }
 0x58a   :  { %8003 = vmatpush1.bf16.msra.mxu0 %v12062_v10  ;;  %v4773_v34 = vld [vmem:[#allocation10 + $0xf58] sm:$0xff]  ;;  %v12127_v22 = vcombine.high %v4645_v48, %v4649_v36  ;;  %v12126_v40 = vcombine.low %v4645_v48, %v4649_v36 }
 0x58b   :  { %8004 = vmatprep.subr.bf16.mxu0 %v12055_v5  ;;  %v4777_v60 = vld [vmem:[#allocation10 + $0xf78] sm:$0xff] }
 0x58c   :  { %8046 = vmatpush1.bf16.msra.mxu1 %v12190_v12  ;;  %v4637_v24 = vld [vmem:[#allocation10 + $0xb18] sm:$0xff]  ;;  %v12255_v55 = vcombine.high %v4773_v34, %v4777_v60  ;;  %v12254_v25 = vcombine.low %v4773_v34, %v4777_v60  ;;  %v12699_v34 = vld [vmem:[#allocation16 + $0x94] ss:$24 sps:$4 sm:$0xff]  }
 0x58d   :  { %8047 = vmatprep.subr.bf16.mxu1 %v12183_v4  ;;  %v4641_v10 = vld [vmem:[#allocation10 + $0xb38] sm:$0xff]  ;;  %v12702_v60 = vld [vmem:[#allocation16 + $0x394] ss:$24 sps:$4 sm:$0xff]  }
 0x58e   :  { %8005 = vmatpush1.bf16.msra.mxu0 %v12054_v13  ;;  %v4765_v5 = vld [vmem:[#allocation10 + $0xf18] sm:$0xff]  ;;  %v12119_v11 = vcombine.high %v4637_v24, %v4641_v10  ;;  %v12118_v61 = vcombine.low %v4637_v24, %v4641_v10  ;;  %v12700_v10 = vld [vmem:[#allocation16 + $0x390] ss:$24 sps:$4 sm:$0xff]  }
 0x58f   :  { %8006 = vmatprep.subr.bf16.mxu0 %v12047_v43  ;;  %v4769_v12 = vld [vmem:[#allocation10 + $0xf38] sm:$0xff] }
 0x590   :  { %8048 = vmatpush1.bf16.msra.mxu1 %v12182_v17  ;;  %v4629_v4 = vld [vmem:[#allocation10 + $0xad8] sm:$0xff]  ;;  %v12247_v62 = vcombine.high %v4765_v5, %v4769_v12  ;;  %v12246_v42 = vcombine.low %v4765_v5, %v4769_v12 }
 0x591   :  { %8049 = vmatprep.subr.bf16.mxu1 %v12175_v7  ;;  %v4633_v13 = vld [vmem:[#allocation10 + $0xaf8] sm:$0xff] }
 0x592   :  { %8007 = vmatpush1.bf16.msra.mxu0 %v12046_v56  ;;  %v4757_v43 = vld [vmem:[#allocation10 + $0xed8] sm:$0xff]  ;;  %v12111_v51 = vcombine.high %v4629_v4, %v4633_v13  ;;  %v12110_v27 = vcombine.low %v4629_v4, %v4633_v13 }
 0x593   :  { %8008 = vmatprep.subr.bf16.mxu0 %v12039_v49  ;;  %v4761_v17 = vld [vmem:[#allocation10 + $0xef8] sm:$0xff] }
 0x594   :  { %8050 = vmatpush1.bf16.msra.mxu1 %v12174_v15  ;;  %v4621_v7 = vld [vmem:[#allocation10 + $0xa98] sm:$0xff]  ;;  %v12239_v32 = vcombine.high %v4757_v43, %v4761_v17  ;;  %v12238_v59 = vcombine.low %v4757_v43, %v4761_v17 }
 0x595   :  { %8051 = vmatprep.subr.bf16.mxu1 %v12167_v63  ;;  %v4625_v56 = vld [vmem:[#allocation10 + $0xab8] sm:$0xff] }
 0x596   :  { %8009 = vmatpush1.bf16.msra.mxu0 %v12038_v45  ;;  %v4749_v49 = vld [vmem:[#allocation10 + $0xe98] sm:$0xff]  ;;  %v12103_v28 = vcombine.high %v4621_v7, %v4625_v56  ;;  %v12102_v23 = vcombine.low %v4621_v7, %v4625_v56 }
 0x597   :  { %8010 = vmatprep.subr.bf16.mxu0 %v12031_v21  ;;  %v4753_v15 = vld [vmem:[#allocation10 + $0xeb8] sm:$0xff] }
 0x598   :  { %8052 = vmatpush1.bf16.msra.mxu1 %v12166_v38  ;;  %v4613_v63 = vld [vmem:[#allocation10 + $0xa58] sm:$0xff]  ;;  %v12231_v1 = vcombine.high %v4749_v49, %v4753_v15  ;;  %v12230_v3 = vcombine.low %v4749_v49, %v4753_v15 }
 0x599   :  { %8053 = vmatprep.subr.bf16.mxu1 %v12159_v37  ;;  %v4617_v45 = vld [vmem:[#allocation10 + $0xa78] sm:$0xff] }
 0x59a   :  { %8011 = vmatpush1.bf16.msra.mxu0 %v12030_v0  ;;  %v4741_v21 = vld [vmem:[#allocation10 + $0xe58] sm:$0xff]  ;;  %v12095_v9 = vcombine.high %v4613_v63, %v4617_v45  ;;  %v12094_v26 = vcombine.low %v4613_v63, %v4617_v45 }
 0x59b   :  { %8012 = vmatprep.subr.bf16.mxu0 %v12023_v31  ;;  %v4745_v38 = vld [vmem:[#allocation10 + $0xe78] sm:$0xff] }
 0x59c   :  { %8054 = vmatpush1.bf16.msra.mxu1 %v12158_v30  ;;  %v4605_v37 = vld [vmem:[#allocation10 + $0xa18] sm:$0xff]  ;;  %v12223_v35 = vcombine.high %v4741_v21, %v4745_v38  ;;  %v12222_v6 = vcombine.low %v4741_v21, %v4745_v38 }
 0x59d   :  { %8055 = vmatprep.subr.bf16.mxu1 %v12151_v29  ;;  %v4609_v0 = vld [vmem:[#allocation10 + $0xa38] sm:$0xff] }
 0x59e   :  { %8013 = vmatpush1.bf16.msra.mxu0 %v12022_v53  ;;  %v4733_v31 = vld [vmem:[#allocation10 + $0xe18] sm:$0xff]  ;;  %v12087_v20 = vcombine.high %v4605_v37, %v4609_v0  ;;  %v12086_v53 = vcombine.low %v4605_v37, %v4609_v0 }
 0x59f   :  { %8014 = vmatprep.subr.bf16.mxu0 %v12143_v14  ;;  %v4737_v30 = vld [vmem:[#allocation10 + $0xe38] sm:$0xff]  ;;  %v12675_v14 = vld [vmem:[#allocation16 + $0x154] ss:$24 sps:$4 sm:$0xff]  }
 0x5a0   :  { %8056 = vmatpush1.bf16.msra.mxu1 %v12150_v8  ;;  %v12215_v29 = vcombine.high %v4733_v31, %v4737_v30  ;;  %v12214_v2 = vcombine.low %v4733_v31, %v4737_v30  ;;  %v12676_v8 = vld [vmem:[#allocation16 + $0x450] ss:$24 sps:$4 sm:$0xff]   ;;  %v12681_v47 = vld [vmem:[#allocation16 + $0x124] ss:$24 sps:$4 sm:$0xff]   ;;  %v12682_v46 = vld [vmem:[#allocation16 + $0x420] ss:$24 sps:$4 sm:$0xff]  }
 0x5a1   :  { %8057 = vmatprep.subr.bf16.mxu1 %v12271_v39  ;;  %v12684_v39 = vld [vmem:[#allocation16 + $0x424] ss:$24 sps:$4 sm:$0xff]   ;;  %v12691_v36 = vld [vmem:[#allocation16 + $0xc0] ss:$24 sps:$4 sm:$0xff]   ;;  %v14180_v31 = vld [vmem:[#allocation11] sm:$0xff] }
 0x5a2   :  { %8015 = vmatpush2.bf16.msra.mxu0 %v12142_v57  ;;  %v12679_v57 = vld [vmem:[#allocation16 + $0x120] ss:$24 sps:$4 sm:$0xff]   ;;  %v12696_v48 = vld [vmem:[#allocation16 + $0x3c4] ss:$24 sps:$4 sm:$0xff]  }
 0x5a3   :  { %8016 = vmatprep.subr.bf16.mxu0 %v12135_v18  ;;  %v12690_v18 = vld [vmem:[#allocation16 + $0x3f4] ss:$24 sps:$4 sm:$0xff]  }
 0x5a4   :  { %8058 = vmatpush2.bf16.msra.mxu1 %v12270_v19  ;;  %v12693_v19 = vld [vmem:[#allocation16 + $0xc4] ss:$24 sps:$4 sm:$0xff]  }
 0x5a5   :  { %8059 = vmatprep.subr.bf16.mxu1 %v12263_v44  ;;  %v7430_v44 = vpop.f32.mrf.mxu0 }
 0x5a6   :  { %8017 = vmatpush2.bf16.msra.mxu0 %v12134_v50  ;;  %v12694_v50 = vld [vmem:[#allocation16 + $0x3c0] ss:$24 sps:$4 sm:$0xff]  }
 0x5a7   :  { %8018 = vmatprep.subr.bf16.mxu0 %v12127_v22  ;;  %v7473_v22 = vpop.f32.mrf.mxu1  ;;  %v7432_v24 = vpop.f32.mrf.mxu0 }
 0x5a8   :  { %8060 = vmatpush2.bf16.msra.mxu1 %v12262_v41  ;;  %v12697_v41 = vld [vmem:[#allocation16 + $0x90] ss:$24 sps:$4 sm:$0xff]  }
 0x5a9   :  { %8061 = vmatprep.subr.bf16.mxu1 %v12255_v55  ;;  %v7475_v55 = vpop.f32.mrf.mxu1 }
 0x5aa   :  { %8019 = vmatpush2.bf16.msra.mxu0 %v12126_v40  ;;  %v7434_v40 = vpop.f32.mrf.mxu0 }
 0x5ab   :  { %8020 = vmatprep.subr.bf16.mxu0 %v12119_v11  ;;  %v7477_v5 = vpop.f32.mrf.mxu1 }
 0x5ac   :  { %8062 = vmatpush2.bf16.msra.mxu1 %v12254_v25  ;;  %v7436_v12 = vpop.f32.mrf.mxu0 }
 0x5ad   :  { %8063 = vmatprep.subr.bf16.mxu1 %v12247_v62  ;;  %v7479_v25 = vpop.f32.mrf.mxu1 }
 0x5ae   :  { %8021 = vmatpush2.bf16.msra.mxu0 %v12118_v61  ;;  %v7516_v11 = vpop.f32.mrf.mxu0 }
 0x5af   :  { %8022 = vmatprep.subr.bf16.mxu0 %v12111_v51  ;;  %v14164_v4 = vpop.f32.mrf.mxu1 }
 0x5b0   :  { %8064 = vmatpush2.bf16.msra.mxu1 %v12246_v42  ;;  %v7518_v13 = vpop.f32.mrf.mxu0 }
 0x5b1   :  { %8065 = vmatprep.subr.bf16.mxu1 %v12239_v32  ;;  %v7561_v62 = vpop.f32.mrf.mxu1 }
 0x5b2   :  { %8023 = vmatpush2.bf16.msra.mxu0 %v12110_v27  ;;  %v7520_v61 = vpop.f32.mrf.mxu0 }
 0x5b3   :  { %8024 = vmatprep.subr.bf16.mxu0 %v12103_v28  ;;  %v14166_v43 = vpop.f32.mrf.mxu1 }
 0x5b4   :  { %8066 = vmatpush2.bf16.msra.mxu1 %v12238_v59  ;;  %v7522_v17 = vpop.f32.mrf.mxu0 }
 0x5b5   :  { %8067 = vmatprep.subr.bf16.mxu1 %v12231_v1  ;;  %v14168_v42 = vpop.f32.mrf.mxu1 }
 0x5b6   :  { %8025 = vmatpush2.bf16.msra.mxu0 %v12102_v23  ;;  %v7602_v51 = vpop.f32.mrf.mxu0 }
 0x5b7   :  { %8026 = vmatprep.subr.bf16.mxu0 %v12095_v9  ;;  %v7645_v7 = vpop.f32.mrf.mxu1 }
 0x5b8   :  { %8068 = vmatpush2.bf16.msra.mxu1 %v12230_v3  ;;  %v7604_v56 = vpop.f32.mrf.mxu0 }
 0x5b9   :  { %8069 = vmatprep.subr.bf16.mxu1 %v12223_v35  ;;  %v7647_v32 = vpop.f32.mrf.mxu1 }
 0x5ba   :  { %8027 = vmatpush2.bf16.msra.mxu0 %v12094_v26  ;;  %v7606_v27 = vpop.f32.mrf.mxu0 }
 0x5bb   :  { %8028 = vmatprep.subr.bf16.mxu0 %v12087_v20  ;;  %v7649_v49 = vpop.f32.mrf.mxu1  ;;  %v14543_v20 = vld [vmem:[#allocation27_spill] sm:$0xff] }
 0x5bc   :  { %8070 = vmatpush2.bf16.msra.mxu1 %v12222_v6  ;;  %v7608_v15 = vpop.f32.mrf.mxu0  ;;  %v4803_v6 = vrot.slane %v14180_v31, %v14543_v20 }
 0x5bd   :  { %8071 = vmatprep.subr.bf16.mxu1 %v12215_v29  ;;  %v7651_v59 = vpop.f32.mrf.mxu1 }
 0x5be   :  { %8029 = vmatpush2.bf16.msra.mxu0 %v12086_v53  ;;  %v7688_v28 = vpop.f32.mrf.mxu0  ;;  %v14544_v53 = vld [vmem:[#allocation28_spill] sm:$0xff] }
 0x5bf   :  { %10690 = vmatprep.subr.bf16.mxu0 %v12675_v14  ;;  %v7731_v63 = vpop.f32.mrf.mxu1 }
 0x5c0   :  { %8072 = vmatpush2.bf16.msra.mxu1 %v12214_v2  ;;  %v7690_v45 = vpop.f32.mrf.mxu0  ;;  %v4799_v2 = vrot.slane %v14180_v31, %v14544_v53 }
 0x5c1   :  { %8031 = vmatmul.mubr.bf16.vlgmr.msra.gmra.mxu0 %v14134_v52  ;;  %10733 = vmatprep.subr.bf16.mxu1 %v12678_v33  ;;  %v12685_v52 = vld [vmem:[#allocation16 + $0xf0] ss:$24 sps:$4 sm:$0xff]   ;;  %v14170_v1 = vpop.f32.mrf.mxu1  ;;  %v14545_v33 = vld [vmem:[#allocation29_spill] sm:$0xff] }
 0x5c2   :  { %10691 = vmatpush1.bf16.msra.mxu0 %v12673_v16  ;;  %v7692_v23 = vpop.f32.mrf.mxu0 }
 0x5c3   :  { %8074 = vmatmul.mubr.bf16.vlgmr.msra.gmra.mxu1 %v14136_v58  ;;  %10692 = vmatprep.subr.bf16.mxu0 %v12681_v47  ;;  %v12688_v58 = vld [vmem:[#allocation16 + $0x3f0] ss:$24 sps:$4 sm:$0xff]   ;;  %v14172_v21 = vpop.f32.mrf.mxu1  ;;  %v4807_v47 = vrot.slane %v14180_v31, %v14545_v33 }
 0x5c4   :  { %10734 = vmatpush1.bf16.msra.mxu1 %v12676_v8  ;;  %v14174_v38 = vpop.f32.mrf.mxu0  ;;  %v7433_v8 = vadd.f32 %v7432_v24, %v4803_v6  ;;  %v14547_v24 = vld [vmem:[#allocation31_spill] sm:$0xff] }
 0x5c5   :  { %10735 = vmatprep.subr.bf16.mxu1 %v12684_v39  ;;  %v14176_v3 = vpop.f32.mrf.mxu1 }
 0x5c6   :  { %10693 = vmatpush1.bf16.msra.mxu0 %v12679_v57  ;;  %v7774_v9 = vpop.f32.mrf.mxu0  ;;  %v7431_v57 = vadd.f32 %v7430_v44, %v4799_v2 }
 0x5c7   :  { %10694 = vmatprep.subr.bf16.mxu0 %v12687_v54  ;;  %v7817_v37 = vpop.f32.mrf.mxu1  ;;  %v7476_v54 = vadd.f32 %v7475_v55, %v7433_v8 }
 0x5c8   :  { %10736 = vmatpush1.bf16.msra.mxu1 %v12682_v46  ;;  %v7776_v0 = vpop.f32.mrf.mxu0 }
 0x5c9   :  { %10737 = vmatprep.subr.bf16.mxu1 %v12690_v18  ;;  %v14178_v35 = vpop.f32.mrf.mxu1  ;;  %v7435_v18 = vadd.f32 %v7434_v40, %v4799_v2 }
 0x5ca   :  { %10695 = vmatpush1.bf16.msra.mxu0 %v12685_v52  ;;  %v7778_v26 = vpop.f32.mrf.mxu0  ;;  %v7603_v52 = vadd.f32 %v7602_v51, %v4807_v47 }
 0x5cb   :  { %10696 = vmatprep.subr.bf16.mxu0 %v12693_v19  ;;  %v7821_v30 = vpop.f32.mrf.mxu1  ;;  %v7478_v33 = vadd.f32 %v7477_v5, %v7435_v18 }
 0x5cc   :  { %10738 = vmatpush1.bf16.msra.mxu1 %v12688_v58  ;;  %v7780_v29 = vpop.f32.mrf.mxu0  ;;  %v14546_v58 = vld [vmem:[#allocation30_spill] sm:$0xff]  ;;  %v7646_v53 = vadd.f32 %v7645_v7, %v7603_v52 }
 0x5cd   :  { %10739 = vmatprep.subr.bf16.mxu1 %v12696_v48  ;;  %v14186_v14 = vpop.f32.mrf.mxu1  ;;  %v4811_v19 = vrot.slane %v14180_v31, %v14546_v58  ;;  %v7437_v48 = vadd.f32 %v7436_v12, %v4803_v6  ;;  %v7521_v2 = vadd.f32 %v7520_v61, %v7478_v33 }
 0x5ce   :  { %10697 = vmatpush1.bf16.msra.mxu0 %v12691_v36  ;;  %v7689_v12 = vadd.f32 %v7688_v28, %v7646_v53 }
 0x5cf   :  { %10698 = vmatprep.subr.bf16.mxu0 %v12699_v34  ;;  %v7519_v34 = vadd.f32 %v7518_v13, %v7476_v54  ;;  %v7605_v20 = vadd.f32 %v7604_v56, %v4811_v19  ;;  %v7480_v55 = vadd.f32 %v7479_v25, %v7437_v48  ;;  %v14210_v61 = vadd.f32 %v14166_v43, %v7521_v2 }
 0x5d0   :  { %10740 = vmatpush1.bf16.msra.mxu1 %v12694_v50  ;;  %v7474_v50 = vadd.f32 %v7473_v22, %v7431_v57  ;;  %v7609_v22 = vadd.f32 %v7608_v15, %v4811_v19 }
 0x5d1   :  { %10741 = vmatprep.subr.bf16.mxu1 %v12702_v60  ;;  %v7607_v60 = vadd.f32 %v7606_v27, %v4807_v47  ;;  %v14200_v51 = vadd.f32 %v7561_v62, %v7519_v34  ;;  %v7523_v58 = vadd.f32 %v7522_v17, %v7480_v55  ;;  %v14548_v27 = vld [vmem:[#allocation32_spill] sm:$0xff]  ;;  %v7648_v5 = vadd.f32 %v7647_v32, %v7605_v20 }
 0x5d2   :  { %10699 = vmatpush1.bf16.msra.mxu0 %v12697_v41  ;;  %v7517_v44 = vadd.f32 %v7516_v11, %v7474_v50  ;;  %v4819_v47 = vrot.slane %v14180_v31, %v14548_v27  ;;  %v14212_v17 = vadd.f32 %v7731_v63, %v7689_v12  ;;  %v7652_v28 = vadd.f32 %v7651_v59, %v7609_v22 }
 0x5d3   :  { %v7650_v8 = vadd.f32 %v7649_v49, %v7607_v60  ;;  %v8105_v62 = vmul.f32 %v14200_v51, %v14200_v51  ;;  %v7691_v49 = vadd.f32 %v7690_v45, %v7648_v5  ;;  %v14215_v15 = vadd.f32 %v14168_v42, %v7523_v58  ;;  %v14550_v58 = vld [vmem:[#allocation34_spill] sm:$0xff] }
 0x5d4   :  { %10742 = vmatpush1.bf16.msra.mxu1 %v12700_v10  ;;  %v4815_v10 = vrot.slane %v14180_v31, %v14547_v24  ;;  %v14205_v57 = vadd.f32 %v14164_v4, %v7517_v44  ;;  %v7695_v63 = vadd.f32 %v14174_v38, %v7652_v28  ;;  %v7781_v53 = vadd.f32 %v7780_v29, %v4819_v47 }
 0x5d5   :  { %v7693_v11 = vadd.f32 %v7692_v23, %v7650_v8  ;;  %v8106_v59 = vmul.f32 %v14212_v17, %v14212_v17  ;;  %v8113_v18 = vmul.f32 %v14215_v15, %v14215_v15  ;;  %v4827_v19 = vrot.slane %v14180_v31, %v14550_v58 }
 0x5d6   :  { %v7775_v13 = vadd.f32 %v7774_v9, %v4815_v10  ;;  %v7779_v25 = vadd.f32 %v7778_v26, %v4815_v10  ;;  %v7777_v9 = vadd.f32 %v7776_v0, %v4819_v47  ;;  %v8104_v23 = vmul.f32 %v14205_v57, %v14205_v57  ;;  %v14549_v0 = vld [vmem:[#allocation33_spill] sm:$0xff] }
 0x5d7   :  { %v8084_v26 = vadd.f32 %v14200_v51, %v14205_v57  ;;  %v14222_v20 = vadd.f32 %v14172_v21, %v7693_v11  ;;  %v4823_v54 = vrot.slane %v14180_v31, %v14549_v0  ;;  %v8112_v21 = vmul.f32 %v14210_v61, %v14210_v61 }
 0x5d8   :  { %v7818_v4 = vadd.f32 %v7817_v37, %v7775_v13  ;;  %v7822_v45 = vadd.f32 %v7821_v30, %v7779_v25  ;;  %v8120_v33 = vadd.f32 %v8105_v62, %v8104_v23  ;;  %v14228_v37 = vadd.f32 %v14170_v1, %v7691_v49 }
 0x5d9   :  { %v7820_v38 = vadd.f32 %v14178_v35, %v7777_v9  ;;  %v8085_v52 = vadd.f32 %v8084_v26, %v14212_v17  ;;  %v8114_v1 = vmul.f32 %v14222_v20, %v14222_v20  ;;  %v14245_v50 = vadd.f32 %v14176_v3, %v7695_v63 }
 0x5da   :  { %v7824_v34 = vadd.f32 %v14186_v14, %v7781_v53  ;;  %v8107_v10 = vmul.f32 %v14228_v37, %v14228_v37  ;;  %v8129_v55 = vadd.f32 %v8113_v18, %v8112_v21 }
 0x5db   :  { %v8086_v12 = vadd.f32 %v8085_v52, %v14228_v37 }
 0x601   :  { %v7860_v16 = vpop.f32.mrf.mxu0 }
 0x602   :  { %v7861_v42 = vadd.f32 %v7860_v16, %v7818_v4  ;;  %v8093_v16 = vadd.f32 %v14215_v15, %v14210_v61 }
 0x603   :  { %v14190_v39 = vpop.f32.mrf.mxu1  ;;  %v14192_v46 = vpop.f32.mrf.mxu0 }
 0x604   :  { %v14249_v35 = vadd.f32 %v14190_v39, %v7861_v42  ;;  %v7863_v60 = vadd.f32 %v14192_v46, %v7820_v38  ;;  %v8094_v2 = vadd.f32 %v8093_v16, %v14222_v20  ;;  %v8130_v39 = vadd.f32 %v8129_v55, %v8114_v1 }
 0x605   :  { %v14196_v36 = vpop.f32.mrf.mxu1  ;;  %v7864_v41 = vpop.f32.mrf.mxu0  ;;  %v8115_v46 = vmul.f32 %v14245_v50, %v14245_v50 }
 0x606   :  { %v7865_v30 = vadd.f32 %v7864_v41, %v7822_v45  ;;  %v8121_v41 = vadd.f32 %v8120_v33, %v8106_v59  ;;  %v8108_v13 = vmul.f32 %v14249_v35, %v14249_v35  ;;  %v14263_v47 = vadd.f32 %v14196_v36, %v7863_v60 }
 0x607   :  { %v7907_v40 = vpop.f32.mrf.mxu1  ;;  %v7866_v6 = vpop.f32.mrf.mxu0  ;;  %v8131_v26 = vadd.f32 %v8130_v39, %v8115_v46 }
 0x608   :  { %v14255_v31 = vadd.f32 %v7907_v40, %v7865_v30  ;;  %v7867_v8 = vadd.f32 %v7866_v6, %v7824_v34  ;;  %v8122_v5 = vadd.f32 %v8121_v41, %v8107_v10  ;;  %v8087_v40 = vadd.f32 %v8086_v12, %v14249_v35 }
 0x609   :  { %v7909_v56 = vpop.f32.mrf.mxu1 }
 0x60a   :  { %v8116_v25 = vmul.f32 %v14255_v31, %v14255_v31  ;;  %v14269_v62 = vadd.f32 %v7909_v56, %v7867_v8  ;;  %v8123_v36 = vadd.f32 %v8122_v5, %v8108_v13  ;;  %v8088_v53 = vadd.f32 %v8087_v40, %v14263_v47  ;;  %v12703_v40 = vld [vmem:[#allocation16 + $0x60] ss:$24 sps:$4 sm:$0xff]  }
 0x60c   :  { %v8132_v59 = vadd.f32 %v8131_v26, %v8116_v25  ;;  %v12709_v25 = vld [vmem:[#allocation16 + $0x30] ss:$24 sps:$4 sm:$0xff]   ;;  %v12718_v26 = vld [vmem:[#allocation16 + $0x300] ss:$24 sps:$4 sm:$0xff]  }
 0x641   :  { %v7946_v7 = vpop.f32.mrf.mxu0 }
 0x642   :  { %v7947_v44 = vadd.f32 %v7946_v7, %v4823_v54  ;;  %v8095_v7 = vadd.f32 %v8094_v2, %v14245_v50 }
 0x643   :  { %v7989_v32 = vpop.f32.mrf.mxu1  ;;  %v7948_v43 = vpop.f32.mrf.mxu0 }
 0x644   :  { %v7949_v14 = vadd.f32 %v7948_v43, %v4827_v19  ;;  %v7990_v11 = vadd.f32 %v7989_v32, %v7947_v44  ;;  %v8109_v43 = vmul.f32 %v14263_v47, %v14263_v47  ;;  %v8096_v32 = vadd.f32 %v8095_v7, %v14255_v31  ;;  %v12708_v7 = vld [vmem:[#allocation16 + $0x364] ss:$24 sps:$4 sm:$0xff]  }
 0x645   :  { %v7991_v29 = vpop.f32.mrf.mxu1  ;;  %v7950_v48 = vpop.f32.mrf.mxu0  ;;  %10743 = vmatprep.subr.bf16.mxu1 %v12708_v7 }
 0x646   :  { %v7951_v6 = vadd.f32 %v7950_v48, %v4823_v54  ;;  %v7992_v9 = vadd.f32 %v7991_v29, %v7949_v14  ;;  %v8117_v54 = vmul.f32 %v14269_v62, %v14269_v62  ;;  %v8097_v1 = vadd.f32 %v8096_v32, %v14269_v62  ;;  %v12726_v32 = vld [vmem:[#allocation16 + $0x5d4] ss:$24 sps:$4 sm:$0xff]  }
 0x647   :  { %v7993_v3 = vpop.f32.mrf.mxu1  ;;  %v7952_v22 = vpop.f32.mrf.mxu0  ;;  %v8124_v34 = vadd.f32 %v8123_v36, %v8109_v43  ;;  %v12720_v36 = vld [vmem:[#allocation16 + $0x304] ss:$24 sps:$4 sm:$0xff]   ;;  %v12723_v43 = vld [vmem:[#allocation16 + $0x2d4] ss:$24 sps:$4 sm:$0xff]  }
 0x648   :  { %v7953_v49 = vadd.f32 %v7952_v22, %v4827_v19  ;;  %v7994_v42 = vadd.f32 %v7993_v3, %v7951_v6  ;;  %v8133_v14 = vadd.f32 %v8132_v59, %v8117_v54  ;;  %v12706_v6 = vld [vmem:[#allocation16 + $0x360] ss:$24 sps:$4 sm:$0xff]   ;;  %v12735_v54 = vld [vmem:[#allocation16 + $0x274] ss:$24 sps:$4 sm:$0xff]  }
 0x649   :  { %v7995_v28 = vpop.f32.mrf.mxu1  ;;  %10744 = vmatpush1.bf16.msra.mxu1 %v12706_v6  ;;  %v12730_v59 = vld [vmem:[#allocation16 + $0x5a0] ss:$24 sps:$4 sm:$0xff]  }
 0x64a   :  { %v7996_v21 = vadd.f32 %v7995_v28, %v7953_v49  ;;  %v12711_v49 = vld [vmem:[#allocation16 + $0x34] ss:$24 sps:$4 sm:$0xff]   ;;  %v12712_v28 = vld [vmem:[#allocation16 + $0x330] ss:$24 sps:$4 sm:$0xff]  }
 0x681   :  { %v8032_v4 = vpop.f32.mrf.mxu0 }
 0x682   :  { %v8033_v23 = vadd.f32 %v8032_v4, %v7990_v11  ;;  %v12705_v11 = vld [vmem:[#allocation16 + $0x64] ss:$24 sps:$4 sm:$0xff]   ;;  %v12714_v4 = vld [vmem:[#allocation16 + $0x334] ss:$24 sps:$4 sm:$0xff]  }
 0x683   :  { %v8075_v63 = vpop.f32.mrf.mxu1  ;;  %v8034_v45 = vpop.f32.mrf.mxu0  ;;  %10700 = vmatprep.subr.bf16.mxu0 %v12705_v11  ;;  %10745 = vmatprep.subr.bf16.mxu1 %v12714_v4  ;;  %v12774_v11 = vld [vmem:[#allocation16 + $0xa54] ss:$24 sps:$4 sm:$0xff]  }
 0x684   :  { %v14275_v33 = vadd.f32 %v8075_v63, %v8033_v23  ;;  %v8035_v56 = vadd.f32 %v8034_v45, %v7992_v9  ;;  %10701 = vmatpush1.bf16.msra.mxu0 %v12703_v40  ;;  %10746 = vmatpush1.bf16.msra.mxu1 %v12712_v28  ;;  %v12715_v9 = vld [vmem:[#allocation16] ss:$24 sps:$4 sm:$0xff]   ;;  %v12717_v23 = vld [vmem:[#allocation16 + $0x4] ss:$24 sps:$4 sm:$0xff]   ;;  %v12721_v63 = vld [vmem:[#allocation16 + $0x2d0] ss:$24 sps:$4 sm:$0xff]  }
 0x685   :  { %v8077_v18 = vpop.f32.mrf.mxu1  ;;  %v8036_v38 = vpop.f32.mrf.mxu0  ;;  %10702 = vmatprep.subr.bf16.mxu0 %v12711_v49  ;;  %10747 = vmatprep.subr.bf16.mxu1 %v12720_v36  ;;  %v12724_v45 = vld [vmem:[#allocation16 + $0x5d0] ss:$24 sps:$4 sm:$0xff]   ;;  %v12771_v40 = vld [vmem:[#allocation16 + $0x754] ss:$24 sps:$4 sm:$0xff]  }
 0x686   :  { %v8110_v30 = vmul.f32 %v14275_v33, %v14275_v33  ;;  %v14281_v29 = vadd.f32 %v8077_v18, %v8035_v56  ;;  %v8037_v16 = vadd.f32 %v8036_v38, %v7994_v42  ;;  %v8089_v52 = vadd.f32 %v8088_v53, %v14275_v33  ;;  %v12729_v53 = vld [vmem:[#allocation16 + $0x2a4] ss:$24 sps:$4 sm:$0xff]   ;;  %v12727_v56 = vld [vmem:[#allocation16 + $0x2a0] ss:$24 sps:$4 sm:$0xff]   ;;  %v12733_v18 = vld [vmem:[#allocation16 + $0x270] ss:$24 sps:$4 sm:$0xff]  }
 0x687   :  { %v8079_v19 = vpop.f32.mrf.mxu1  ;;  %v8038_v48 = vpop.f32.mrf.mxu0  ;;  %v12732_v42 = vld [vmem:[#allocation16 + $0x5a4] ss:$24 sps:$4 sm:$0xff]   ;;  %v12736_v38 = vld [vmem:[#allocation16 + $0x570] ss:$24 sps:$4 sm:$0xff]  }
 0x688   :  { %v14285_v60 = vadd.f32 %v8079_v19, %v8037_v16  ;;  %v8039_v41 = vadd.f32 %v8038_v48, %v7996_v21  ;;  %v8090_v10 = vadd.f32 %v8089_v52, %v14281_v29  ;;  %v8111_v44 = vmul.f32 %v14281_v29, %v14281_v29  ;;  %10703 = vmatpush1.bf16.msra.mxu0 %v12709_v25  ;;  %v12738_v21 = vld [vmem:[#allocation16 + $0x574] ss:$24 sps:$4 sm:$0xff]   ;;  %v12744_v16 = vld [vmem:[#allocation16 + $0x544] ss:$24 sps:$4 sm:$0xff]   ;;  %v12739_v52 = vld [vmem:[#allocation16 + $0x240] ss:$24 sps:$4 sm:$0xff]  }
 0x689   :  { %v8081_v55 = vpop.f32.mrf.mxu1  ;;  %v8125_v2 = vadd.f32 %v8124_v34, %v8110_v30  ;;  %10704 = vmatprep.subr.bf16.mxu0 %v12717_v23  ;;  %10748 = vmatpush1.bf16.msra.mxu1 %v12718_v26  ;;  %v12741_v30 = vld [vmem:[#allocation16 + $0x244] ss:$24 sps:$4 sm:$0xff]   ;;  %v12747_v19 = vld [vmem:[#allocation16 + $0x214] ss:$24 sps:$4 sm:$0xff]   ;;  %v12745_v34 = vld [vmem:[#allocation16 + $0x210] ss:$24 sps:$4 sm:$0xff]  }
 0x68a   :  { %v8118_v8 = vmul.f32 %v14285_v60, %v14285_v60  ;;  %v14292_v3 = vadd.f32 %v8081_v55, %v8039_v41  ;;  %8091 = vadd.xlane.f32.xlu0 %v8090_v10  ;;  %v8098_v12 = vadd.f32 %v8097_v1, %v14285_v60  ;;  %10749 = vmatprep.subr.bf16.mxu1 %v12726_v32  ;;  %v12742_v1 = vld [vmem:[#allocation16 + $0x540] ss:$24 sps:$4 sm:$0xff]   ;;  %v12750_v48 = vld [vmem:[#allocation16 + $0x514] ss:$24 sps:$4 sm:$0xff]   ;;  %v12748_v41 = vld [vmem:[#allocation16 + $0x510] ss:$24 sps:$4 sm:$0xff]  }
 0x68b   :  { %v8126_v39 = vadd.f32 %v8125_v2, %v8111_v44  ;;  %v12753_v10 = vld [vmem:[#allocation16 + $0x1e4] ss:$24 sps:$4 sm:$0xff]   ;;  %v12751_v55 = vld [vmem:[#allocation16 + $0x1e0] ss:$24 sps:$4 sm:$0xff]  }
 0x68c   :  { %v8099_v22 = vadd.f32 %v8098_v12, %v14292_v3  ;;  %v8119_v46 = vmul.f32 %v14292_v3, %v14292_v3  ;;  %v8134_v13 = vadd.f32 %v8133_v14, %v8118_v8  ;;  %10705 = vmatpush1.bf16.msra.mxu0 %v12715_v9  ;;  %v12756_v44 = vld [vmem:[#allocation16 + $0x4e4] ss:$24 sps:$4 sm:$0xff]   ;;  %v12754_v2 = vld [vmem:[#allocation16 + $0x4e0] ss:$24 sps:$4 sm:$0xff]   ;;  %v12759_v8 = vld [vmem:[#allocation16 + $0x1b4] ss:$24 sps:$4 sm:$0xff]  }
 0x68d   :  { %10706 = vmatprep.subr.bf16.mxu0 %v12723_v43  ;;  %10750 = vmatpush2.bf16.msra.mxu1 %v12724_v45  ;;  %v12762_v12 = vld [vmem:[#allocation16 + $0x4b4] ss:$24 sps:$4 sm:$0xff]   ;;  %v12757_v14 = vld [vmem:[#allocation16 + $0x1b0] ss:$24 sps:$4 sm:$0xff]  }
 0x68e   :  { %8100 = vadd.xlane.f32.xlu1 %v8099_v22  ;;  %8127 = vadd.xlane.f32.xlu0 %v8126_v39  ;;  %v8135_v5 = vadd.f32 %v8134_v13, %v8119_v46  ;;  %v12760_v22 = vld [vmem:[#allocation16 + $0x4b0] ss:$24 sps:$4 sm:$0xff]   ;;  %v12765_v39 = vld [vmem:[#allocation16 + $0x184] ss:$24 sps:$4 sm:$0xff]   ;;  %v12763_v13 = vld [vmem:[#allocation16 + $0x180] ss:$24 sps:$4 sm:$0xff]  }
 0x68f   :  { %10751 = vmatprep.subr.bf16.mxu1 %v12732_v42  ;;  %v12768_v46 = vld [vmem:[#allocation16 + $0x484] ss:$24 sps:$4 sm:$0xff]  }
 0x690   :  { %10707 = vmatpush2.bf16.msra.mxu0 %v12721_v63 }
 0x691   :  { %10708 = vmatprep.subr.bf16.mxu0 %v12729_v53  ;;  %10752 = vmatpush2.bf16.msra.mxu1 %v12730_v59  ;;  %v8208_v59 = vld [vmem:[#allocation14] sm:$0xff] }
 0x692   :  { %8136 = vadd.xlane.f32.xlu1 %v8135_v5  ;;  %10753 = vmatprep.subr.bf16.mxu1 %v12738_v21  ;;  %v12766_v5 = vld [vmem:[#allocation16 + $0x480] ss:$24 sps:$4 sm:$0xff]  }
 0x694   :  { %10709 = vmatpush2.bf16.msra.mxu0 %v12727_v56  ;;  %v8150_v56 = vld [vmem:[#allocation13] sm:$0xff] }
 0x695   :  { %10710 = vmatprep.subr.bf16.mxu0 %v12735_v54  ;;  %10754 = vmatpush2.bf16.msra.mxu1 %v12736_v38  ;;  %v14551_v54 = vld [vmem:[#allocation27_spill] sm:$0xff] }
 0x696   :  { %10755 = vmatprep.subr.bf16.mxu1 %v12744_v16  ;;  %v8159_v21 = vrot.slane %v8150_v56, %v14551_v54 }
 0x698   :  { %10711 = vmatpush2.bf16.msra.mxu0 %v12733_v18  ;;  %v14552_v18 = vld [vmem:[#allocation30_spill] sm:$0xff] }
 0x699   :  { %10712 = vmatprep.subr.bf16.mxu0 %v12741_v30  ;;  %10756 = vmatpush2.bf16.msra.mxu1 %v12742_v1  ;;  %v8167_v38 = vrot.slane %v8150_v56, %v14552_v18  ;;  %v14553_v30 = vld [vmem:[#allocation28_spill] sm:$0xff] }
 0x69a   :  { %10757 = vmatprep.subr.bf16.mxu1 %v12750_v48  ;;  %v8155_v16 = vrot.slane %v8150_v56, %v14553_v30  ;;  %v14314_v48 = vrot.slane %v8150_v56, %v14550_v58 }
 0x69c   :  { %10713 = vmatpush2.bf16.msra.mxu0 %v12739_v52  ;;  %v14554_v52 = vld [vmem:[#allocation29_spill] sm:$0xff] }
 0x69d   :  { %10714 = vmatprep.subr.bf16.mxu0 %v12747_v19  ;;  %10758 = vmatpush2.bf16.msra.mxu1 %v12748_v41  ;;  %v8163_v1 = vrot.slane %v8150_v56, %v14554_v52  ;;  %v14311_v19 = vrot.slane %v8150_v56, %v14548_v27  ;;  %v14320_v41 = vrot.slane %v8150_v56, %v14549_v0 }
 0x69e   :  { %10759 = vmatprep.subr.bf16.mxu1 %v12756_v44  ;;  %v8241_v44 = vrot.slane %v8208_v59, %v14552_v18 }
 0x6a0   :  { %10715 = vmatpush2.bf16.msra.mxu0 %v12745_v34  ;;  %v14317_v34 = vrot.slane %v8150_v56, %v14547_v24 }
 0x6a1   :  { %10716 = vmatprep.subr.bf16.mxu0 %v12753_v10  ;;  %10760 = vmatpush2.bf16.msra.mxu1 %v12754_v2  ;;  %v8233_v10 = vrot.slane %v8208_v59, %v14551_v54  ;;  %v8237_v2 = vrot.slane %v8208_v59, %v14554_v52 }
 0x6a2   :  { %10761 = vmatprep.subr.bf16.mxu1 %v12762_v12  ;;  %v14327_v12 = vrot.slane %v8208_v59, %v14548_v27 }
 0x6a4   :  { %10717 = vmatpush2.bf16.msra.mxu0 %v12751_v55  ;;  %v8229_v55 = vrot.slane %v8208_v59, %v14553_v30 }
 0x6a5   :  { %10718 = vmatprep.subr.bf16.mxu0 %v12759_v8  ;;  %10762 = vmatpush2.bf16.msra.mxu1 %v12760_v22  ;;  %v14333_v22 = vrot.slane %v8208_v59, %v14547_v24 }
 0x6a6   :  { %10763 = vmatprep.subr.bf16.mxu1 %v12768_v46 }
 0x6a8   :  { %10719 = vmatpush2.bf16.msra.mxu0 %v12757_v14  ;;  %v14330_v14 = vrot.slane %v8208_v59, %v14550_v58 }
 0x6a9   :  { %10720 = vmatprep.subr.bf16.mxu0 %v12765_v39  ;;  %10764 = vmatpush2.bf16.msra.mxu1 %v12766_v5  ;;  %v14336_v39 = vrot.slane %v8208_v59, %v14549_v0 }
 0x6aa   :  { %10819 = vmatprep.subr.bf16.mxu1 %v12774_v11 }
 0x6ac   :  { %10721 = vmatpush2.bf16.msra.mxu0 %v12763_v13 }
 0x6ad   :  { %10776 = vmatprep.subr.bf16.mxu0 %v12771_v40 }
 0x713   :  { %v8092_v6 = vpop.xlane.xlu0 %8091 }
 0x714   :  { %v14298_v7 = vmul.f32 0.0009765625, %v8092_v6 }
 0x716   :  { %v8140_v4 = vmul.f32 %v14298_v7, %v14298_v7 }
 0x717   :  { %v8101_v25 = vpop.xlane.xlu1 %8100  ;;  %v8128_v49 = vpop.xlane.xlu0 %8127 }
 0x718   :  { %v14300_v28 = vmul.f32 0.0009765625, %v8101_v25  ;;  %v8138_v9 = vmul.f32 0.0009765625, %v8128_v49 }
 0x71a   :  { %v8142_v23 = vsub.f32 %v8138_v9, %v8140_v4  ;;  %v8141_v43 = vmul.f32 %v14300_v28, %v14300_v28 }
 0x71b   :  { %v8137_v26 = vpop.xlane.xlu1 %8136 }
 0x71c   :  { %v8144_v36 = vmax.f32 %v8142_v23, 0.0  ;;  %v8139_v32 = vmul.f32 0.0009765625, %v8137_v26 }
 0x71e   :  { %v8146_v63 = vadd.f32 1e-05, %v8144_v36  ;;  %v8143_v45 = vsub.f32 %v8139_v32, %v8141_v43 }
 0x720   :  { %13253 = vrsqrt.f32 %v8146_v63  ;;  %v8145_v53 = vmax.f32 %v8143_v45, 0.0 }
 0x722   :  { %v8147_v42 = vadd.f32 1e-05, %v8145_v53 }
 0x724   :  { %13255 = vrsqrt.f32 %v8147_v42 }
 0x72d   :  { %v13254_v8 = vpop.eup %13253 }
 0x72e   :  { %v8193_v46 = vmul.f32 %v13254_v8, %v8159_v21  ;;  %v8195_v13 = vmul.f32 %v13254_v8, %v8167_v38  ;;  %v8192_v5 = vmul.f32 %v13254_v8, %v8155_v16  ;;  %v8194_v40 = vmul.f32 %v13254_v8, %v8163_v1 }
 0x72f   :  { %v8197_v11 = vmul.f32 %v13254_v8, %v14311_v19  ;;  %v14340_v6 = vmul.f32 %v13254_v8, %v14314_v48  ;;  %v14343_v25 = vmul.f32 %v13254_v8, %v14317_v34  ;;  %v14346_v58 = vmul.f32 %v13254_v8, %v14320_v41 }
 0x730   :  { %v8210_v49 = vmul.f32 %v8193_v46, %v14298_v7  ;;  %v8283_v0 = vmul.f32 %v8193_v46, %v14200_v51  ;;  %v8212_v4 = vmul.f32 %v8195_v13, %v14298_v7  ;;  %v8285_v9 = vmul.f32 %v8195_v13, %v14228_v37 }
 0x731   :  { %v14352_v23 = vpop.eup %13255  ;;  %v8209_v26 = vmul.f32 %v8192_v5, %v14298_v7  ;;  %v8282_v36 = vmul.f32 %v8192_v5, %v14205_v57  ;;  %v8211_v43 = vmul.f32 %v8194_v40, %v14298_v7  ;;  %v8284_v32 = vmul.f32 %v8194_v40, %v14212_v17 }
 0x732   :  { %v8201_v63 = vmul.f32 %v14352_v23, %v8159_v21  ;;  %v8267_v45 = vsub.f32 %v8233_v10, %v8210_v49  ;;  %v8203_v53 = vmul.f32 %v14352_v23, %v8167_v38  ;;  %v8269_v51 = vsub.f32 %v8241_v44, %v8212_v4 }
 0x733   :  { %v8200_v42 = vmul.f32 %v14352_v23, %v8155_v16  ;;  %v8266_v56 = vsub.f32 %v8229_v55, %v8209_v26  ;;  %v8202_v37 = vmul.f32 %v14352_v23, %v8163_v1  ;;  %v8268_v59 = vsub.f32 %v8237_v2, %v8211_v43 }
 0x734   :  { %v8218_v8 = vmul.f32 %v8201_v63, %v14300_v28  ;;  %v8291_v57 = vmul.f32 %v8201_v63, %v14215_v15  ;;  %v8299_v46 = vadd.f32 %v8283_v0, %v8267_v45  ;;  %v8220_v13 = vmul.f32 %v8203_v53, %v14300_v28 }
 0x735   :  { %v8293_v17 = vmul.f32 %v8203_v53, %v14245_v50  ;;  %v8301_v21 = vadd.f32 %v8285_v9, %v8269_v51  ;;  %v8217_v5 = vmul.f32 %v8200_v42, %v14300_v28  ;;  %v8290_v38 = vmul.f32 %v8200_v42, %v14210_v61 }
 0x736   :  { %v8275_v40 = vsub.f32 %v8233_v10, %v8218_v8  ;;  %v8315_v16 = vmul.f32 0.01, %v8299_v46  ;;  %v8277_v49 = vsub.f32 %v8241_v44, %v8220_v13  ;;  %v8298_v4 = vadd.f32 %v8282_v36, %v8266_v56 }
 0x737   :  { %v8317_v1 = vmul.f32 0.01, %v8301_v21  ;;  %v8274_v26 = vsub.f32 %v8229_v55, %v8217_v5  ;;  %v8219_v43 = vmul.f32 %v8202_v37, %v14300_v28  ;;  %v8292_v15 = vmul.f32 %v8202_v37, %v14222_v20 }
 0x738   :  { %v8307_v0 = vadd.f32 %v8291_v57, %v8275_v40  ;;  %v8331_v63 = vmax.f32 %v8299_v46, %v8315_v16  ;;  %v8309_v45 = vadd.f32 %v8293_v17, %v8277_v49  ;;  %v8314_v27 = vmul.f32 0.01, %v8298_v4  ;;  %v12772_v40 = vld [vmem:[#allocation16 + $0xa50] ss:$24 sps:$4 sm:$0xff]  }
 0x739   :  { %v8333_v50 = vmax.f32 %v8301_v21, %v8317_v1  ;;  %v8306_v9 = vadd.f32 %v8290_v38, %v8274_v26  ;;  %v8276_v53 = vsub.f32 %v8237_v2, %v8219_v43  ;;  %v8300_v51 = vadd.f32 %v8284_v32, %v8268_v59  ;;  %v12780_v26 = vld [vmem:[#allocation16 + $0xa24] ss:$24 sps:$4 sm:$0xff]  }
 0x73a   :  { %v8323_v24 = vmul.f32 0.01, %v8307_v0  ;;  %v8325_v61 = vmul.f32 0.01, %v8309_v45  ;;  %v8330_v10 = vmax.f32 %v8298_v4, %v8314_v27  ;;  %v8205_v44 = vmul.f32 %v14352_v23, %v14311_v19  ;;  %v12769_v19 = vld [vmem:[#allocation16 + $0x750] ss:$24 sps:$4 sm:$0xff]  }
 0x73b   :  { %v8322_v36 = vmul.f32 0.01, %v8306_v9  ;;  %v8308_v55 = vadd.f32 %v8292_v15, %v8276_v53  ;;  %v8316_v42 = vmul.f32 0.01, %v8300_v51  ;;  %v8214_v56 = vmul.f32 %v8197_v11, %v14298_v7 }
 0x73c   :  { %v8339_v20 = vmax.f32 %v8307_v0, %v8323_v24  ;;  %v8341_v37 = vmax.f32 %v8309_v45, %v8325_v61  ;;  %v8222_v8 = vmul.f32 %v8205_v44, %v14300_v28  ;;  %v8287_v57 = vmul.f32 %v8197_v11, %v14263_v47  ;;  %v12777_v11 = vld [vmem:[#allocation16 + $0x724] ss:$24 sps:$4 sm:$0xff]   ;;  %v12775_v0 = vld [vmem:[#allocation16 + $0x720] ss:$24 sps:$4 sm:$0xff]  }
 0x73d   :  { %v8338_v46 = vmax.f32 %v8306_v9, %v8322_v36  ;;  %v8324_v2 = vmul.f32 0.01, %v8308_v55  ;;  %v8332_v32 = vmax.f32 %v8300_v51, %v8316_v42  ;;  %v8271_v59 = vsub.f32 %v14327_v12, %v8214_v56  ;;  %v12778_v51 = vld [vmem:[#allocation16 + $0xa20] ss:$24 sps:$4 sm:$0xff]   ;;  %v12781_v42 = vld [vmem:[#allocation16 + $0x6f0] ss:$24 sps:$4 sm:$0xff]  }
 0x73e   :  { %v14376_v27 = vpack.c.bf16 %v8339_v20, %v8331_v63  ;;  %v14378_v13 = vpack.c.bf16 %v8341_v37, %v8333_v50  ;;  %v8279_v17 = vsub.f32 %v14327_v12, %v8222_v8  ;;  %v8295_v21 = vmul.f32 %v8205_v44, %v14269_v62  ;;  %v12783_v50 = vld [vmem:[#allocation16 + $0x6f4] ss:$24 sps:$4 sm:$0xff]   ;;  %v12789_v8 = vld [vmem:[#allocation16 + $0x6c4] ss:$24 sps:$4 sm:$0xff]  }
 0x73f   :  { %v14382_v24 = vpack.c.bf16 %v8338_v46, %v8330_v10  ;;  %v8340_v5 = vmax.f32 %v8308_v55, %v8324_v2  ;;  %v8303_v38 = vadd.f32 %v8287_v57, %v8271_v59  ;;  %v8207_v47 = vmul.f32 %v14352_v23, %v14314_v48  ;;  %v12786_v44 = vld [vmem:[#allocation16 + $0x9f4] ss:$24 sps:$4 sm:$0xff]  }
 0x740   :  { %10722 = vmatprep.mubr.bf16.mxu0 %v14376_v27  ;;  %10765 = vmatprep.mubr.bf16.mxu1 %v14378_v13  ;;  %v8311_v16 = vadd.f32 %v8295_v21, %v8279_v17  ;;  %v8216_v49 = vmul.f32 %v14340_v6, %v14298_v7  ;;  %v8289_v62 = vmul.f32 %v14340_v6, %v14281_v29  ;;  %v12787_v17 = vld [vmem:[#allocation16 + $0x6c0] ss:$24 sps:$4 sm:$0xff]  }
 0x741   :  { %10723 = vmatmul.mubr.bf16.vlgmr.msra.gmra.mxu0 %v14382_v24  ;;  %v14393_v12 = vpack.c.bf16 %v8340_v5, %v8332_v32  ;;  %v8319_v4 = vmul.f32 0.01, %v8303_v38  ;;  %v8224_v48 = vmul.f32 %v8207_v47, %v14300_v28  ;;  %v8297_v1 = vmul.f32 %v8207_v47, %v14292_v3  ;;  %v12790_v47 = vld [vmem:[#allocation16 + $0x9c0] ss:$24 sps:$4 sm:$0xff]  }
 0x742   :  { %10777 = vmatpush1.bf16.msra.mxu0 %v12769_v19  ;;  %v8327_v43 = vmul.f32 0.01, %v8311_v16  ;;  %v8273_v15 = vsub.f32 %v14330_v14, %v8216_v49  ;;  %v8204_v63 = vmul.f32 %v14352_v23, %v14317_v34  ;;  %v8213_v29 = vmul.f32 %v14343_v25, %v14298_v7 }
 0x743   :  { %10766 = vmatmul.mubr.bf16.vlgmr.msra.gmra.mxu1 %v14393_v12  ;;  %v8335_v6 = vmax.f32 %v8303_v38, %v8319_v4  ;;  %v8281_v45 = vsub.f32 %v14330_v14, %v8224_v48  ;;  %10778 = vmatprep.subr.bf16.mxu0 %v12777_v11  ;;  %v8286_v3 = vmul.f32 %v14343_v25, %v14249_v35 }
 0x744   :  { %10820 = vmatpush1.bf16.msra.mxu1 %v12772_v40  ;;  %v8343_v9 = vmax.f32 %v8311_v16, %v8327_v43  ;;  %v8305_v53 = vadd.f32 %v8289_v62, %v8273_v15  ;;  %v8221_v61 = vmul.f32 %v8204_v63, %v14300_v28  ;;  %v8270_v34 = vsub.f32 %v14333_v22, %v8213_v29  ;;  %v12801_v62 = vld [vmem:[#allocation16 + $0x664] ss:$24 sps:$4 sm:$0xff]   ;;  %v12799_v15 = vld [vmem:[#allocation16 + $0x660] ss:$24 sps:$4 sm:$0xff]   ;;  %v12810_v29 = vld [vmem:[#allocation16 + $0x934] ss:$24 sps:$4 sm:$0xff]  }
 0x745   :  { %v8313_v10 = vadd.f32 %v8297_v1, %v8281_v45  ;;  %10821 = vmatprep.subr.bf16.mxu1 %v12780_v26  ;;  %v8294_v36 = vmul.f32 %v8204_v63, %v14255_v31  ;;  %v8206_v14 = vmul.f32 %v14352_v23, %v14320_v41  ;;  %v8215_v55 = vmul.f32 %v14346_v58, %v14298_v7  ;;  %v12784_v23 = vld [vmem:[#allocation16 + $0x9f0] ss:$24 sps:$4 sm:$0xff]   ;;  %v12804_v26 = vld [vmem:[#allocation16 + $0x964] ss:$24 sps:$4 sm:$0xff]   ;;  %v12802_v63 = vld [vmem:[#allocation16 + $0x960] ss:$24 sps:$4 sm:$0xff]  }
 0x746   :  { %v14413_v35 = vpack.c.bf16 %v8343_v9, %v8335_v6  ;;  %v8321_v25 = vmul.f32 0.01, %v8305_v53  ;;  %10779 = vmatpush1.bf16.msra.mxu0 %v12775_v0  ;;  %v8278_v56 = vsub.f32 %v14333_v22, %v8221_v61  ;;  %v8302_v20 = vadd.f32 %v8286_v3, %v8270_v34  ;;  %v12792_v22 = vld [vmem:[#allocation16 + $0x9c4] ss:$24 sps:$4 sm:$0xff]   ;;  %v12796_v1 = vld [vmem:[#allocation16 + $0x990] ss:$24 sps:$4 sm:$0xff]  }
 0x747   :  { %v8329_v37 = vmul.f32 0.01, %v8313_v10  ;;  %10780 = vmatprep.subr.bf16.mxu0 %v12783_v50  ;;  %v8223_v57 = vmul.f32 %v8206_v14, %v14300_v28  ;;  %v8272_v31 = vsub.f32 %v14336_v39, %v8215_v55  ;;  %v8288_v41 = vmul.f32 %v14346_v58, %v14275_v33  ;;  %v12795_v33 = vld [vmem:[#allocation16 + $0x694] ss:$24 sps:$4 sm:$0xff]   ;;  %v12805_v6 = vld [vmem:[#allocation16 + $0x630] ss:$24 sps:$4 sm:$0xff]  }
 0x748   :  { %10808 = vmatprep.mubr.bf16.mxu0 %v14413_v35  ;;  %v8337_v7 = vmax.f32 %v8305_v53, %v8321_v25  ;;  %10822 = vmatpush1.bf16.msra.mxu1 %v12778_v51  ;;  %v8310_v46 = vadd.f32 %v8294_v36, %v8278_v56  ;;  %v8318_v2 = vmul.f32 0.01, %v8302_v20  ;;  %v8296_v19 = vmul.f32 %v8206_v14, %v14285_v60  ;;  %v12793_v60 = vld [vmem:[#allocation16 + $0x690] ss:$24 sps:$4 sm:$0xff]   ;;  %v12807_v0 = vld [vmem:[#allocation16 + $0x634] ss:$24 sps:$4 sm:$0xff]  }
 0x749   :  { %v8345_v32 = vmax.f32 %v8313_v10, %v8329_v37  ;;  %10823 = vmatprep.subr.bf16.mxu1 %v12786_v44  ;;  %v8280_v59 = vsub.f32 %v14336_v39, %v8223_v57  ;;  %v8304_v28 = vadd.f32 %v8288_v41, %v8272_v31  ;;  %v12798_v39 = vld [vmem:[#allocation16 + $0x994] ss:$24 sps:$4 sm:$0xff]   ;;  %v12813_v45 = vld [vmem:[#allocation16 + $0x604] ss:$24 sps:$4 sm:$0xff]   ;;  %v12808_v50 = vld [vmem:[#allocation16 + $0x930] ss:$24 sps:$4 sm:$0xff]  }
 0x74a   :  { %10781 = vmatpush1.bf16.msra.mxu0 %v12781_v42  ;;  %v8326_v21 = vmul.f32 0.01, %v8310_v46  ;;  %v8334_v11 = vmax.f32 %v8302_v20, %v8318_v2  ;;  %v12816_v3 = vld [vmem:[#allocation16 + $0x904] ss:$24 sps:$4 sm:$0xff]   ;;  %v12811_v9 = vld [vmem:[#allocation16 + $0x600] ss:$24 sps:$4 sm:$0xff]  }
 0x74b   :  { %v14423_v5 = vpack.c.bf16 %v8345_v32, %v8337_v7  ;;  %10782 = vmatprep.subr.bf16.mxu0 %v12789_v8  ;;  %v8312_v58 = vadd.f32 %v8296_v19, %v8280_v59  ;;  %v8320_v38 = vmul.f32 0.01, %v8304_v28  ;;  %v12819_v53 = vld [vmem:[#allocation16 + $0x8d4] ss:$24 sps:$4 sm:$0xff]   ;;  %v12814_v51 = vld [vmem:[#allocation16 + $0x900] ss:$24 sps:$4 sm:$0xff]  }
 0x74c   :  { %10824 = vmatpush1.bf16.msra.mxu1 %v12784_v23  ;;  %v8342_v40 = vmax.f32 %v8310_v46, %v8326_v21  ;;  %v12822_v61 = vld [vmem:[#allocation16 + $0xbd4] ss:$24 sps:$4 sm:$0xff]   ;;  %v12817_v34 = vld [vmem:[#allocation16 + $0x8d0] ss:$24 sps:$4 sm:$0xff]   ;;  %v12825_v10 = vld [vmem:[#allocation16 + $0x8a4] ss:$24 sps:$4 sm:$0xff]  }
 0x74d   :  { %10851 = vmatprep.mubr.bf16.mxu1 %v14423_v5  ;;  %10825 = vmatprep.subr.bf16.mxu1 %v12792_v22  ;;  %v8328_v16 = vmul.f32 0.01, %v8312_v58  ;;  %v8336_v4 = vmax.f32 %v8304_v28, %v8320_v38  ;;  %v12820_v44 = vld [vmem:[#allocation16 + $0xbd0] ss:$24 sps:$4 sm:$0xff]   ;;  %v12828_v36 = vld [vmem:[#allocation16 + $0xba4] ss:$24 sps:$4 sm:$0xff]  }
 0x74e   :  { %10783 = vmatpush1.bf16.msra.mxu0 %v12787_v17  ;;  %v14426_v49 = vpack.c.bf16 %v8342_v40, %v8334_v11  ;;  %v12823_v14 = vld [vmem:[#allocation16 + $0x8a0] ss:$24 sps:$4 sm:$0xff]   ;;  %v12831_v55 = vld [vmem:[#allocation16 + $0x874] ss:$24 sps:$4 sm:$0xff]   ;;  %v12829_v56 = vld [vmem:[#allocation16 + $0x870] ss:$24 sps:$4 sm:$0xff]  }
 0x74f   :  { %10784 = vmatprep.subr.bf16.mxu0 %v12795_v33  ;;  %v8344_v48 = vmax.f32 %v8312_v58, %v8328_v16  ;;  %v12826_v25 = vld [vmem:[#allocation16 + $0xba0] ss:$24 sps:$4 sm:$0xff]   ;;  %v12834_v42 = vld [vmem:[#allocation16 + $0xb74] ss:$24 sps:$4 sm:$0xff]   ;;  %v12837_v20 = vld [vmem:[#allocation16 + $0x844] ss:$24 sps:$4 sm:$0xff]  }
 0x750   :  { %10826 = vmatpush1.bf16.msra.mxu1 %v12790_v47  ;;  %v12832_v37 = vld [vmem:[#allocation16 + $0xb70] ss:$24 sps:$4 sm:$0xff]   ;;  %v12840_v8 = vld [vmem:[#allocation16 + $0xb44] ss:$24 sps:$4 sm:$0xff]   ;;  %v12835_v57 = vld [vmem:[#allocation16 + $0x840] ss:$24 sps:$4 sm:$0xff]  }
 0x751   :  { %10827 = vmatprep.subr.bf16.mxu1 %v12798_v39  ;;  %v14428_v43 = vpack.c.bf16 %v8344_v48, %v8336_v4  ;;  %v12843_v31 = vld [vmem:[#allocation16 + $0x814] ss:$24 sps:$4 sm:$0xff]   ;;  %v12838_v41 = vld [vmem:[#allocation16 + $0xb40] ss:$24 sps:$4 sm:$0xff]   ;;  %v12841_v23 = vld [vmem:[#allocation16 + $0x810] ss:$24 sps:$4 sm:$0xff]  }
 0x752   :  { %10785 = vmatpush1.bf16.msra.mxu0 %v12793_v60  ;;  %v12846_v7 = vld [vmem:[#allocation16 + $0xb14] ss:$24 sps:$4 sm:$0xff]   ;;  %v12849_v46 = vld [vmem:[#allocation16 + $0x7e4] ss:$24 sps:$4 sm:$0xff]   ;;  %v12844_v2 = vld [vmem:[#allocation16 + $0xb10] ss:$24 sps:$4 sm:$0xff]  }
 0x753   :  { %10786 = vmatprep.subr.bf16.mxu0 %v12801_v62  ;;  %v12852_v32 = vld [vmem:[#allocation16 + $0xae4] ss:$24 sps:$4 sm:$0xff]   ;;  %v12847_v22 = vld [vmem:[#allocation16 + $0x7e0] ss:$24 sps:$4 sm:$0xff]   ;;  %v12855_v59 = vld [vmem:[#allocation16 + $0x7b4] ss:$24 sps:$4 sm:$0xff]  }
 0x754   :  { %10828 = vmatpush1.bf16.msra.mxu1 %v12796_v1  ;;  %v12850_v19 = vld [vmem:[#allocation16 + $0xae0] ss:$24 sps:$4 sm:$0xff]   ;;  %v12858_v28 = vld [vmem:[#allocation16 + $0xab4] ss:$24 sps:$4 sm:$0xff]   ;;  %v12853_v17 = vld [vmem:[#allocation16 + $0x7b0] ss:$24 sps:$4 sm:$0xff]  }
 0x755   :  { %10829 = vmatprep.subr.bf16.mxu1 %v12804_v26  ;;  %v12861_v21 = vld [vmem:[#allocation16 + $0x784] ss:$24 sps:$4 sm:$0xff]   ;;  %v12856_v33 = vld [vmem:[#allocation16 + $0xab0] ss:$24 sps:$4 sm:$0xff]   ;;  %v12859_v38 = vld [vmem:[#allocation16 + $0x780] ss:$24 sps:$4 sm:$0xff]  }
 0x756   :  { %10787 = vmatpush1.bf16.msra.mxu0 %v12799_v15  ;;  %v12864_v58 = vld [vmem:[#allocation16 + $0xa84] ss:$24 sps:$4 sm:$0xff]   ;;  %v12862_v11 = vld [vmem:[#allocation16 + $0xa80] ss:$24 sps:$4 sm:$0xff]  }
 0x757   :  { %10788 = vmatprep.subr.bf16.mxu0 %v12807_v0  ;;  %v12867_v47 = vld [vmem:[#allocation16 + $0x15c] ss:$24 sps:$4 sm:$0xff]   ;;  %v12865_v39 = vld [vmem:[#allocation16 + $0x158] ss:$24 sps:$4 sm:$0xff]   ;;  %v12873_v16 = vld [vmem:[#allocation16 + $0x12c] ss:$24 sps:$4 sm:$0xff]  }
 0x758   :  { %10830 = vmatpush1.bf16.msra.mxu1 %v12802_v63  ;;  %v12870_v40 = vld [vmem:[#allocation16 + $0x45c] ss:$24 sps:$4 sm:$0xff]   ;;  %v12868_v60 = vld [vmem:[#allocation16 + $0x458] ss:$24 sps:$4 sm:$0xff]   ;;  %v12876_v62 = vld [vmem:[#allocation16 + $0x42c] ss:$24 sps:$4 sm:$0xff]  }
 0x759   :  { %10831 = vmatprep.subr.bf16.mxu1 %v12810_v29  ;;  %v12871_v4 = vld [vmem:[#allocation16 + $0x128] ss:$24 sps:$4 sm:$0xff]   ;;  %v12879_v48 = vld [vmem:[#allocation16 + $0xfc] ss:$24 sps:$4 sm:$0xff]   ;;  %v12877_v15 = vld [vmem:[#allocation16 + $0xf8] ss:$24 sps:$4 sm:$0xff]  }
 0x75a   :  { %10789 = vmatpush1.bf16.msra.mxu0 %v12805_v6  ;;  %v12874_v1 = vld [vmem:[#allocation16 + $0x428] ss:$24 sps:$4 sm:$0xff]   ;;  %v12882_v26 = vld [vmem:[#allocation16 + $0x3fc] ss:$24 sps:$4 sm:$0xff]   ;;  %v12885_v0 = vld [vmem:[#allocation16 + $0xcc] ss:$24 sps:$4 sm:$0xff]  }
 0x75b   :  { %10790 = vmatprep.subr.bf16.mxu0 %v12813_v45  ;;  %v12880_v63 = vld [vmem:[#allocation16 + $0x3f8] ss:$24 sps:$4 sm:$0xff]   ;;  %v12888_v29 = vld [vmem:[#allocation16 + $0x3cc] ss:$24 sps:$4 sm:$0xff]   ;;  %v12883_v6 = vld [vmem:[#allocation16 + $0xc8] ss:$24 sps:$4 sm:$0xff]  }
 0x75c   :  { %10832 = vmatpush1.bf16.msra.mxu1 %v12808_v50  ;;  %v12891_v45 = vld [vmem:[#allocation16 + $0x9c] ss:$24 sps:$4 sm:$0xff]   ;;  %v12886_v50 = vld [vmem:[#allocation16 + $0x3c8] ss:$24 sps:$4 sm:$0xff]  }
 0x75d   :  { %10833 = vmatprep.subr.bf16.mxu1 %v12816_v3  ;;  %v12894_v3 = vld [vmem:[#allocation16 + $0x39c] ss:$24 sps:$4 sm:$0xff]  }
 0x75e   :  { %10791 = vmatpush1.bf16.msra.mxu0 %v12811_v9  ;;  %v12889_v9 = vld [vmem:[#allocation16 + $0x98] ss:$24 sps:$4 sm:$0xff]  }
 0x75f   :  { %10792 = vmatprep.subr.bf16.mxu0 %v12819_v53  ;;  %v12897_v53 = vld [vmem:[#allocation16 + $0x6c] ss:$24 sps:$4 sm:$0xff]  }
 0x760   :  { %10834 = vmatpush1.bf16.msra.mxu1 %v12814_v51  ;;  %v12892_v51 = vld [vmem:[#allocation16 + $0x398] ss:$24 sps:$4 sm:$0xff]  }
 0x761   :  { %10835 = vmatprep.subr.bf16.mxu1 %v12822_v61  ;;  %v12900_v61 = vld [vmem:[#allocation16 + $0x36c] ss:$24 sps:$4 sm:$0xff]  }
 0x762   :  { %10793 = vmatpush2.bf16.msra.mxu0 %v12817_v34  ;;  %v12895_v34 = vld [vmem:[#allocation16 + $0x68] ss:$24 sps:$4 sm:$0xff]  }
 0x763   :  { %10794 = vmatprep.subr.bf16.mxu0 %v12825_v10  ;;  %v12903_v10 = vld [vmem:[#allocation16 + $0x3c] ss:$24 sps:$4 sm:$0xff]  }
 0x764   :  { %10836 = vmatpush2.bf16.msra.mxu1 %v12820_v44  ;;  %v12898_v44 = vld [vmem:[#allocation16 + $0x368] ss:$24 sps:$4 sm:$0xff]  }
 0x765   :  { %10837 = vmatprep.subr.bf16.mxu1 %v12828_v36  ;;  %v12906_v36 = vld [vmem:[#allocation16 + $0x33c] ss:$24 sps:$4 sm:$0xff]  }
 0x766   :  { %10795 = vmatpush2.bf16.msra.mxu0 %v12823_v14  ;;  %v12901_v14 = vld [vmem:[#allocation16 + $0x38] ss:$24 sps:$4 sm:$0xff]  }
 0x767   :  { %10796 = vmatprep.subr.bf16.mxu0 %v12831_v55  ;;  %v12909_v55 = vld [vmem:[#allocation16 + $0xc] ss:$24 sps:$4 sm:$0xff]  }
 0x768   :  { %10838 = vmatpush2.bf16.msra.mxu1 %v12826_v25  ;;  %v12904_v25 = vld [vmem:[#allocation16 + $0x338] ss:$24 sps:$4 sm:$0xff]  }
 0x769   :  { %10839 = vmatprep.subr.bf16.mxu1 %v12834_v42  ;;  %v12912_v42 = vld [vmem:[#allocation16 + $0x30c] ss:$24 sps:$4 sm:$0xff]  }
 0x76a   :  { %10797 = vmatpush2.bf16.msra.mxu0 %v12829_v56  ;;  %v12907_v56 = vld [vmem:[#allocation16 + $0x8] ss:$24 sps:$4 sm:$0xff]  }
 0x76b   :  { %10798 = vmatprep.subr.bf16.mxu0 %v12837_v20  ;;  %v12915_v20 = vld [vmem:[#allocation16 + $0x2dc] ss:$24 sps:$4 sm:$0xff]  }
 0x76c   :  { %10840 = vmatpush2.bf16.msra.mxu1 %v12832_v37  ;;  %v12910_v37 = vld [vmem:[#allocation16 + $0x308] ss:$24 sps:$4 sm:$0xff]  }
 0x76d   :  { %10841 = vmatprep.subr.bf16.mxu1 %v12840_v8  ;;  %v12918_v8 = vld [vmem:[#allocation16 + $0x5dc] ss:$24 sps:$4 sm:$0xff]  }
 0x76e   :  { %10799 = vmatpush2.bf16.msra.mxu0 %v12835_v57  ;;  %v12913_v57 = vld [vmem:[#allocation16 + $0x2d8] ss:$24 sps:$4 sm:$0xff]  }
 0x76f   :  { %10800 = vmatprep.subr.bf16.mxu0 %v12843_v31  ;;  %v12921_v31 = vld [vmem:[#allocation16 + $0x2ac] ss:$24 sps:$4 sm:$0xff]  }
 0x770   :  { %10842 = vmatpush2.bf16.msra.mxu1 %v12838_v41  ;;  %v12916_v41 = vld [vmem:[#allocation16 + $0x5d8] ss:$24 sps:$4 sm:$0xff]  }
 0x771   :  { %10843 = vmatprep.subr.bf16.mxu1 %v12846_v7  ;;  %v12924_v7 = vld [vmem:[#allocation16 + $0x5ac] ss:$24 sps:$4 sm:$0xff]  }
 0x772   :  { %10801 = vmatpush2.bf16.msra.mxu0 %v12841_v23  ;;  %v12919_v23 = vld [vmem:[#allocation16 + $0x2a8] ss:$24 sps:$4 sm:$0xff]  }
 0x773   :  { %10802 = vmatprep.subr.bf16.mxu0 %v12849_v46  ;;  %v12927_v46 = vld [vmem:[#allocation16 + $0x27c] ss:$24 sps:$4 sm:$0xff]  }
 0x774   :  { %10844 = vmatpush2.bf16.msra.mxu1 %v12844_v2  ;;  %v12922_v2 = vld [vmem:[#allocation16 + $0x5a8] ss:$24 sps:$4 sm:$0xff]  }
 0x775   :  { %10845 = vmatprep.subr.bf16.mxu1 %v12852_v32  ;;  %v12930_v32 = vld [vmem:[#allocation16 + $0x57c] ss:$24 sps:$4 sm:$0xff]  }
 0x776   :  { %10803 = vmatpush2.bf16.msra.mxu0 %v12847_v22  ;;  %v12925_v22 = vld [vmem:[#allocation16 + $0x278] ss:$24 sps:$4 sm:$0xff]  }
 0x777   :  { %10804 = vmatprep.subr.bf16.mxu0 %v12855_v59  ;;  %v12933_v59 = vld [vmem:[#allocation16 + $0x24c] ss:$24 sps:$4 sm:$0xff]  }
 0x778   :  { %10846 = vmatpush2.bf16.msra.mxu1 %v12850_v19  ;;  %v12928_v19 = vld [vmem:[#allocation16 + $0x578] ss:$24 sps:$4 sm:$0xff]  }
 0x779   :  { %10847 = vmatprep.subr.bf16.mxu1 %v12858_v28  ;;  %v12936_v28 = vld [vmem:[#allocation16 + $0x54c] ss:$24 sps:$4 sm:$0xff]  }
 0x77a   :  { %10805 = vmatpush2.bf16.msra.mxu0 %v12853_v17  ;;  %v12931_v17 = vld [vmem:[#allocation16 + $0x248] ss:$24 sps:$4 sm:$0xff]  }
 0x77b   :  { %10806 = vmatprep.subr.bf16.mxu0 %v12861_v21  ;;  %v12939_v21 = vld [vmem:[#allocation16 + $0x21c] ss:$24 sps:$4 sm:$0xff]  }
 0x77c   :  { %10848 = vmatpush2.bf16.msra.mxu1 %v12856_v33  ;;  %v12934_v33 = vld [vmem:[#allocation16 + $0x548] ss:$24 sps:$4 sm:$0xff]  }
 0x77d   :  { %10849 = vmatprep.subr.bf16.mxu1 %v12864_v58  ;;  %v12942_v58 = vld [vmem:[#allocation16 + $0x51c] ss:$24 sps:$4 sm:$0xff]  }
 0x77e   :  { %10807 = vmatpush2.bf16.msra.mxu0 %v12859_v38  ;;  %v12937_v38 = vld [vmem:[#allocation16 + $0x218] ss:$24 sps:$4 sm:$0xff]  }
 0x77f   :  { %10862 = vmatprep.subr.bf16.mxu0 %v12867_v47  ;;  %v12945_v47 = vld [vmem:[#allocation16 + $0x1ec] ss:$24 sps:$4 sm:$0xff]  }
 0x780   :  { %10850 = vmatpush2.bf16.msra.mxu1 %v12862_v11  ;;  %v12940_v11 = vld [vmem:[#allocation16 + $0x518] ss:$24 sps:$4 sm:$0xff]  }
 0x781   :  { %10809 = vmatmul.mubr.bf16.vlgmr.msra.gmra.mxu0 %v14426_v49  ;;  %10905 = vmatprep.subr.bf16.mxu1 %v12870_v40  ;;  %v12948_v40 = vld [vmem:[#allocation16 + $0x4ec] ss:$24 sps:$4 sm:$0xff]  }
 0x782   :  { %10863 = vmatpush1.bf16.msra.mxu0 %v12865_v39  ;;  %10894 = vmatprep.mubr.bf16.mxu0 %v14376_v27  ;;  %v12943_v39 = vld [vmem:[#allocation16 + $0x1e8] ss:$24 sps:$4 sm:$0xff]  }
 0x783   :  { %10852 = vmatmul.mubr.bf16.vlgmr.msra.gmra.mxu1 %v14428_v43  ;;  %10864 = vmatprep.subr.bf16.mxu0 %v12873_v16  ;;  %v12951_v16 = vld [vmem:[#allocation16 + $0x1bc] ss:$24 sps:$4 sm:$0xff]  }
 0x784   :  { %10906 = vmatpush1.bf16.msra.mxu1 %v12868_v60  ;;  %10937 = vmatprep.mubr.bf16.mxu1 %v14378_v13  ;;  %v12946_v60 = vld [vmem:[#allocation16 + $0x4e8] ss:$24 sps:$4 sm:$0xff]  }
 0x785   :  { %10907 = vmatprep.subr.bf16.mxu1 %v12876_v62  ;;  %v12954_v62 = vld [vmem:[#allocation16 + $0x4bc] ss:$24 sps:$4 sm:$0xff]  }
 0x786   :  { %10865 = vmatpush1.bf16.msra.mxu0 %v12871_v4  ;;  %v12949_v4 = vld [vmem:[#allocation16 + $0x1b8] ss:$24 sps:$4 sm:$0xff]  }
 0x787   :  { %10866 = vmatprep.subr.bf16.mxu0 %v12879_v48  ;;  %v12957_v48 = vld [vmem:[#allocation16 + $0x18c] ss:$24 sps:$4 sm:$0xff]  }
 0x788   :  { %10908 = vmatpush1.bf16.msra.mxu1 %v12874_v1  ;;  %v12952_v1 = vld [vmem:[#allocation16 + $0x4b8] ss:$24 sps:$4 sm:$0xff]  }
 0x789   :  { %10909 = vmatprep.subr.bf16.mxu1 %v12882_v26  ;;  %v12960_v26 = vld [vmem:[#allocation16 + $0x48c] ss:$24 sps:$4 sm:$0xff]  }
 0x78a   :  { %10867 = vmatpush1.bf16.msra.mxu0 %v12877_v15  ;;  %v12955_v15 = vld [vmem:[#allocation16 + $0x188] ss:$24 sps:$4 sm:$0xff]  }
 0x78b   :  { %10868 = vmatprep.subr.bf16.mxu0 %v12885_v0  ;;  %v12963_v0 = vld [vmem:[#allocation16 + $0x75c] ss:$24 sps:$4 sm:$0xff]  }
 0x78c   :  { %10910 = vmatpush1.bf16.msra.mxu1 %v12880_v63  ;;  %v12958_v63 = vld [vmem:[#allocation16 + $0x488] ss:$24 sps:$4 sm:$0xff]  }
 0x78d   :  { %10911 = vmatprep.subr.bf16.mxu1 %v12888_v29  ;;  %v12966_v29 = vld [vmem:[#allocation16 + $0xa5c] ss:$24 sps:$4 sm:$0xff]  }
 0x78e   :  { %10869 = vmatpush1.bf16.msra.mxu0 %v12883_v6  ;;  %v12961_v6 = vld [vmem:[#allocation16 + $0x758] ss:$24 sps:$4 sm:$0xff]  }
 0x78f   :  { %10870 = vmatprep.subr.bf16.mxu0 %v12891_v45  ;;  %v12969_v45 = vld [vmem:[#allocation16 + $0x72c] ss:$24 sps:$4 sm:$0xff]  }
 0x790   :  { %10912 = vmatpush1.bf16.msra.mxu1 %v12886_v50  ;;  %v12964_v50 = vld [vmem:[#allocation16 + $0xa58] ss:$24 sps:$4 sm:$0xff]  }
 0x791   :  { %10913 = vmatprep.subr.bf16.mxu1 %v12894_v3  ;;  %v12972_v3 = vld [vmem:[#allocation16 + $0xa2c] ss:$24 sps:$4 sm:$0xff]  }
 0x792   :  { %10871 = vmatpush1.bf16.msra.mxu0 %v12889_v9  ;;  %v12967_v9 = vld [vmem:[#allocation16 + $0x728] ss:$24 sps:$4 sm:$0xff]  }
 0x793   :  { %10872 = vmatprep.subr.bf16.mxu0 %v12897_v53  ;;  %v12975_v53 = vld [vmem:[#allocation16 + $0x6fc] ss:$24 sps:$4 sm:$0xff]  }
 0x794   :  { %10914 = vmatpush1.bf16.msra.mxu1 %v12892_v51  ;;  %v12970_v51 = vld [vmem:[#allocation16 + $0xa28] ss:$24 sps:$4 sm:$0xff]  }
 0x795   :  { %10915 = vmatprep.subr.bf16.mxu1 %v12900_v61  ;;  %v12978_v61 = vld [vmem:[#allocation16 + $0x9fc] ss:$24 sps:$4 sm:$0xff]  }
 0x796   :  { %10873 = vmatpush1.bf16.msra.mxu0 %v12895_v34  ;;  %v12973_v34 = vld [vmem:[#allocation16 + $0x6f8] ss:$24 sps:$4 sm:$0xff]  }
 0x797   :  { %10874 = vmatprep.subr.bf16.mxu0 %v12903_v10  ;;  %v12981_v10 = vld [vmem:[#allocation16 + $0x6cc] ss:$24 sps:$4 sm:$0xff]  }
 0x798   :  { %10916 = vmatpush1.bf16.msra.mxu1 %v12898_v44  ;;  %v12976_v44 = vld [vmem:[#allocation16 + $0x9f8] ss:$24 sps:$4 sm:$0xff]  }
 0x799   :  { %10917 = vmatprep.subr.bf16.mxu1 %v12906_v36  ;;  %v12984_v36 = vld [vmem:[#allocation16 + $0x9cc] ss:$24 sps:$4 sm:$0xff]  }
 0x79a   :  { %10875 = vmatpush1.bf16.msra.mxu0 %v12901_v14  ;;  %v12979_v14 = vld [vmem:[#allocation16 + $0x6c8] ss:$24 sps:$4 sm:$0xff]  }
 0x79b   :  { %10876 = vmatprep.subr.bf16.mxu0 %v12909_v55  ;;  %v12987_v55 = vld [vmem:[#allocation16 + $0x69c] ss:$24 sps:$4 sm:$0xff]  }
 0x79c   :  { %10918 = vmatpush1.bf16.msra.mxu1 %v12904_v25  ;;  %v12982_v25 = vld [vmem:[#allocation16 + $0x9c8] ss:$24 sps:$4 sm:$0xff]  }
 0x79d   :  { %10919 = vmatprep.subr.bf16.mxu1 %v12912_v42  ;;  %v12990_v42 = vld [vmem:[#allocation16 + $0x99c] ss:$24 sps:$4 sm:$0xff]  }
 0x79e   :  { %10877 = vmatpush1.bf16.msra.mxu0 %v12907_v56  ;;  %v12985_v56 = vld [vmem:[#allocation16 + $0x698] ss:$24 sps:$4 sm:$0xff]  }
 0x79f   :  { %10878 = vmatprep.subr.bf16.mxu0 %v12915_v20  ;;  %v12993_v20 = vld [vmem:[#allocation16 + $0x66c] ss:$24 sps:$4 sm:$0xff]  }
 0x7a0   :  { %10920 = vmatpush1.bf16.msra.mxu1 %v12910_v37  ;;  %v12988_v37 = vld [vmem:[#allocation16 + $0x998] ss:$24 sps:$4 sm:$0xff]  }
 0x7a1   :  { %10921 = vmatprep.subr.bf16.mxu1 %v12918_v8  ;;  %v12996_v8 = vld [vmem:[#allocation16 + $0x96c] ss:$24 sps:$4 sm:$0xff]  }
 0x7a2   :  { %10879 = vmatpush2.bf16.msra.mxu0 %v12913_v57  ;;  %v12991_v57 = vld [vmem:[#allocation16 + $0x668] ss:$24 sps:$4 sm:$0xff]  }
 0x7a3   :  { %10880 = vmatprep.subr.bf16.mxu0 %v12921_v31  ;;  %v12999_v31 = vld [vmem:[#allocation16 + $0x63c] ss:$24 sps:$4 sm:$0xff]  }
 0x7a4   :  { %10922 = vmatpush2.bf16.msra.mxu1 %v12916_v41  ;;  %v12994_v41 = vld [vmem:[#allocation16 + $0x968] ss:$24 sps:$4 sm:$0xff]  }
 0x7a5   :  { %10923 = vmatprep.subr.bf16.mxu1 %v12924_v7  ;;  %v13002_v7 = vld [vmem:[#allocation16 + $0x93c] ss:$24 sps:$4 sm:$0xff]  }
 0x7a6   :  { %10881 = vmatpush2.bf16.msra.mxu0 %v12919_v23  ;;  %v12997_v23 = vld [vmem:[#allocation16 + $0x638] ss:$24 sps:$4 sm:$0xff]  }
 0x7a7   :  { %10882 = vmatprep.subr.bf16.mxu0 %v12927_v46  ;;  %v13005_v46 = vld [vmem:[#allocation16 + $0x60c] ss:$24 sps:$4 sm:$0xff]  }
 0x7a8   :  { %10924 = vmatpush2.bf16.msra.mxu1 %v12922_v2  ;;  %v13000_v2 = vld [vmem:[#allocation16 + $0x938] ss:$24 sps:$4 sm:$0xff]  }
 0x7a9   :  { %10925 = vmatprep.subr.bf16.mxu1 %v12930_v32  ;;  %v13008_v32 = vld [vmem:[#allocation16 + $0x90c] ss:$24 sps:$4 sm:$0xff]  }
 0x7aa   :  { %10883 = vmatpush2.bf16.msra.mxu0 %v12925_v22  ;;  %v13003_v22 = vld [vmem:[#allocation16 + $0x608] ss:$24 sps:$4 sm:$0xff]  }
 0x7ab   :  { %10884 = vmatprep.subr.bf16.mxu0 %v12933_v59  ;;  %v13011_v59 = vld [vmem:[#allocation16 + $0x8dc] ss:$24 sps:$4 sm:$0xff]  }
 0x7ac   :  { %10926 = vmatpush2.bf16.msra.mxu1 %v12928_v19  ;;  %v13006_v19 = vld [vmem:[#allocation16 + $0x908] ss:$24 sps:$4 sm:$0xff]  }
 0x7ad   :  { %10927 = vmatprep.subr.bf16.mxu1 %v12936_v28  ;;  %v13014_v28 = vld [vmem:[#allocation16 + $0xbdc] ss:$24 sps:$4 sm:$0xff]  }
 0x7ae   :  { %10885 = vmatpush2.bf16.msra.mxu0 %v12931_v17  ;;  %v13009_v17 = vld [vmem:[#allocation16 + $0x8d8] ss:$24 sps:$4 sm:$0xff]  }
 0x7af   :  { %10886 = vmatprep.subr.bf16.mxu0 %v12939_v21  ;;  %v13017_v21 = vld [vmem:[#allocation16 + $0x8ac] ss:$24 sps:$4 sm:$0xff]  }
 0x7b0   :  { %10928 = vmatpush2.bf16.msra.mxu1 %v12934_v33  ;;  %v13012_v33 = vld [vmem:[#allocation16 + $0xbd8] ss:$24 sps:$4 sm:$0xff]  }
 0x7b1   :  { %10929 = vmatprep.subr.bf16.mxu1 %v12942_v58  ;;  %v13020_v58 = vld [vmem:[#allocation16 + $0xbac] ss:$24 sps:$4 sm:$0xff]  }
 0x7b2   :  { %10887 = vmatpush2.bf16.msra.mxu0 %v12937_v38  ;;  %v13015_v38 = vld [vmem:[#allocation16 + $0x8a8] ss:$24 sps:$4 sm:$0xff]  }
 0x7b3   :  { %10888 = vmatprep.subr.bf16.mxu0 %v12945_v47  ;;  %v13023_v47 = vld [vmem:[#allocation16 + $0x87c] ss:$24 sps:$4 sm:$0xff]  }
 0x7b4   :  { %10930 = vmatpush2.bf16.msra.mxu1 %v12940_v11  ;;  %v13018_v11 = vld [vmem:[#allocation16 + $0xba8] ss:$24 sps:$4 sm:$0xff]  }
 0x7b5   :  { %10931 = vmatprep.subr.bf16.mxu1 %v12948_v40  ;;  %v13026_v40 = vld [vmem:[#allocation16 + $0xb7c] ss:$24 sps:$4 sm:$0xff]  }
 0x7b6   :  { %10889 = vmatpush2.bf16.msra.mxu0 %v12943_v39  ;;  %v13021_v39 = vld [vmem:[#allocation16 + $0x878] ss:$24 sps:$4 sm:$0xff]  }
 0x7b7   :  { %10890 = vmatprep.subr.bf16.mxu0 %v12951_v16  ;;  %v13029_v16 = vld [vmem:[#allocation16 + $0x84c] ss:$24 sps:$4 sm:$0xff]  }
 0x7b8   :  { %10932 = vmatpush2.bf16.msra.mxu1 %v12946_v60  ;;  %v13024_v60 = vld [vmem:[#allocation16 + $0xb78] ss:$24 sps:$4 sm:$0xff]  }
 0x7b9   :  { %10933 = vmatprep.subr.bf16.mxu1 %v12954_v62  ;;  %v13032_v62 = vld [vmem:[#allocation16 + $0xb4c] ss:$24 sps:$4 sm:$0xff]  }
 0x7ba   :  { %10891 = vmatpush2.bf16.msra.mxu0 %v12949_v4  ;;  %v13027_v4 = vld [vmem:[#allocation16 + $0x848] ss:$24 sps:$4 sm:$0xff]  }
 0x7bb   :  { %10892 = vmatprep.subr.bf16.mxu0 %v12957_v48  ;;  %v13035_v48 = vld [vmem:[#allocation16 + $0x81c] ss:$24 sps:$4 sm:$0xff]  }
 0x7bc   :  { %10934 = vmatpush2.bf16.msra.mxu1 %v12952_v1  ;;  %v13030_v1 = vld [vmem:[#allocation16 + $0xb48] ss:$24 sps:$4 sm:$0xff]  }
 0x7bd   :  { %10935 = vmatprep.subr.bf16.mxu1 %v12960_v26  ;;  %v13038_v26 = vld [vmem:[#allocation16 + $0xb1c] ss:$24 sps:$4 sm:$0xff]  }
 0x7be   :  { %10893 = vmatpush2.bf16.msra.mxu0 %v12955_v15  ;;  %v13033_v15 = vld [vmem:[#allocation16 + $0x818] ss:$24 sps:$4 sm:$0xff]  }
 0x7bf   :  { %10948 = vmatprep.subr.bf16.mxu0 %v12963_v0  ;;  %v13041_v0 = vld [vmem:[#allocation16 + $0x7ec] ss:$24 sps:$4 sm:$0xff]  }
 0x7c0   :  { %10936 = vmatpush2.bf16.msra.mxu1 %v12958_v63  ;;  %v13036_v63 = vld [vmem:[#allocation16 + $0xb18] ss:$24 sps:$4 sm:$0xff]  }
 0x7c1   :  { %10895 = vmatmul.mubr.bf16.vlgmr.msra.gmra.mxu0 %v14382_v24  ;;  %10991 = vmatprep.subr.bf16.mxu1 %v12966_v29  ;;  %v13044_v29 = vld [vmem:[#allocation16 + $0xaec] ss:$24 sps:$4 sm:$0xff]  }
 0x7c2   :  { %10949 = vmatpush1.bf16.msra.mxu0 %v12961_v6  ;;  %10980 = vmatprep.mubr.bf16.mxu0 %v14413_v35  ;;  %v13039_v6 = vld [vmem:[#allocation16 + $0x7e8] ss:$24 sps:$4 sm:$0xff]  }
 0x7c3   :  { %10938 = vmatmul.mubr.bf16.vlgmr.msra.gmra.mxu1 %v14393_v12  ;;  %10950 = vmatprep.subr.bf16.mxu0 %v12969_v45  ;;  %v13047_v45 = vld [vmem:[#allocation16 + $0x7bc] ss:$24 sps:$4 sm:$0xff]  }
 0x7c4   :  { %10992 = vmatpush1.bf16.msra.mxu1 %v12964_v50  ;;  %11023 = vmatprep.mubr.bf16.mxu1 %v14423_v5  ;;  %v13042_v50 = vld [vmem:[#allocation16 + $0xae8] ss:$24 sps:$4 sm:$0xff]  }
 0x7c5   :  { %10993 = vmatprep.subr.bf16.mxu1 %v12972_v3  ;;  %v13050_v3 = vld [vmem:[#allocation16 + $0xabc] ss:$24 sps:$4 sm:$0xff]  }
 0x7c6   :  { %10951 = vmatpush1.bf16.msra.mxu0 %v12967_v9  ;;  %v13045_v9 = vld [vmem:[#allocation16 + $0x7b8] ss:$24 sps:$4 sm:$0xff]  }
 0x7c7   :  { %10952 = vmatprep.subr.bf16.mxu0 %v12975_v53  ;;  %v13053_v53 = vld [vmem:[#allocation16 + $0x78c] ss:$24 sps:$4 sm:$0xff]  }
 0x7c8   :  { %10994 = vmatpush1.bf16.msra.mxu1 %v12970_v51  ;;  %v13048_v51 = vld [vmem:[#allocation16 + $0xab8] ss:$24 sps:$4 sm:$0xff]  }
 0x7c9   :  { %10995 = vmatprep.subr.bf16.mxu1 %v12978_v61  ;;  %v13056_v61 = vld [vmem:[#allocation16 + $0xa8c] ss:$24 sps:$4 sm:$0xff]  }
 0x7ca   :  { %10953 = vmatpush1.bf16.msra.mxu0 %v12973_v34  ;;  %v13051_v34 = vld [vmem:[#allocation16 + $0x788] ss:$24 sps:$4 sm:$0xff]  }
 0x7cb   :  { %10954 = vmatprep.subr.bf16.mxu0 %v12981_v10  ;;  %v13059_v10 = vld [vmem:[#allocation16 + $0x164] ss:$24 sps:$4 sm:$0xff]  }
 0x7cc   :  { %10996 = vmatpush1.bf16.msra.mxu1 %v12976_v44  ;;  %v13054_v44 = vld [vmem:[#allocation16 + $0xa88] ss:$24 sps:$4 sm:$0xff]  }
 0x7cd   :  { %10997 = vmatprep.subr.bf16.mxu1 %v12984_v36  ;;  %v13062_v36 = vld [vmem:[#allocation16 + $0x464] ss:$24 sps:$4 sm:$0xff]  }
 0x7ce   :  { %10955 = vmatpush1.bf16.msra.mxu0 %v12979_v14  ;;  %v13057_v14 = vld [vmem:[#allocation16 + $0x160] ss:$24 sps:$4 sm:$0xff]  }
 0x7cf   :  { %10956 = vmatprep.subr.bf16.mxu0 %v12987_v55  ;;  %v13065_v55 = vld [vmem:[#allocation16 + $0x134] ss:$24 sps:$4 sm:$0xff]  }
 0x7d0   :  { %10998 = vmatpush1.bf16.msra.mxu1 %v12982_v25  ;;  %v13060_v25 = vld [vmem:[#allocation16 + $0x460] ss:$24 sps:$4 sm:$0xff]  }
 0x7d1   :  { %10999 = vmatprep.subr.bf16.mxu1 %v12990_v42  ;;  %v13068_v42 = vld [vmem:[#allocation16 + $0x434] ss:$24 sps:$4 sm:$0xff]  }
 0x7d2   :  { %10957 = vmatpush1.bf16.msra.mxu0 %v12985_v56  ;;  %v13063_v56 = vld [vmem:[#allocation16 + $0x130] ss:$24 sps:$4 sm:$0xff]  }
 0x7d3   :  { %10958 = vmatprep.subr.bf16.mxu0 %v12993_v20  ;;  %v13071_v20 = vld [vmem:[#allocation16 + $0x104] ss:$24 sps:$4 sm:$0xff]  }
 0x7d4   :  { %11000 = vmatpush1.bf16.msra.mxu1 %v12988_v37  ;;  %v13066_v37 = vld [vmem:[#allocation16 + $0x430] ss:$24 sps:$4 sm:$0xff]  }
 0x7d5   :  { %11001 = vmatprep.subr.bf16.mxu1 %v12996_v8  ;;  %v13074_v8 = vld [vmem:[#allocation16 + $0x404] ss:$24 sps:$4 sm:$0xff]  }
 0x7d6   :  { %10959 = vmatpush1.bf16.msra.mxu0 %v12991_v57  ;;  %v13069_v57 = vld [vmem:[#allocation16 + $0x100] ss:$24 sps:$4 sm:$0xff]  }
 0x7d7   :  { %10960 = vmatprep.subr.bf16.mxu0 %v12999_v31  ;;  %v13077_v31 = vld [vmem:[#allocation16 + $0xd4] ss:$24 sps:$4 sm:$0xff]  }
 0x7d8   :  { %11002 = vmatpush1.bf16.msra.mxu1 %v12994_v41  ;;  %v13072_v41 = vld [vmem:[#allocation16 + $0x400] ss:$24 sps:$4 sm:$0xff]  }
 0x7d9   :  { %11003 = vmatprep.subr.bf16.mxu1 %v13002_v7  ;;  %v13080_v7 = vld [vmem:[#allocation16 + $0x3d4] ss:$24 sps:$4 sm:$0xff]  }
 0x7da   :  { %10961 = vmatpush1.bf16.msra.mxu0 %v12997_v23  ;;  %v13083_v23 = vld [vmem:[#allocation16 + $0xa4] ss:$24 sps:$4 sm:$0xff]  }
 0x7db   :  { %10962 = vmatprep.subr.bf16.mxu0 %v13005_v46  ;;  %v13078_v46 = vld [vmem:[#allocation16 + $0x3d0] ss:$24 sps:$4 sm:$0xff]  }
 0x7dc   :  { %11004 = vmatpush1.bf16.msra.mxu1 %v13000_v2  ;;  %v13086_v2 = vld [vmem:[#allocation16 + $0x3a4] ss:$24 sps:$4 sm:$0xff]  }
 0x7dd   :  { %11005 = vmatprep.subr.bf16.mxu1 %v13008_v32  ;;  %v13089_v32 = vld [vmem:[#allocation16 + $0x74] ss:$24 sps:$4 sm:$0xff]  }
 0x7de   :  { %10963 = vmatpush1.bf16.msra.mxu0 %v13003_v22  ;;  %v13084_v22 = vld [vmem:[#allocation16 + $0x3a0] ss:$24 sps:$4 sm:$0xff]  }
 0x7df   :  { %10964 = vmatprep.subr.bf16.mxu0 %v13011_v59  ;;  %v13092_v59 = vld [vmem:[#allocation16 + $0x374] ss:$24 sps:$4 sm:$0xff]  }
 0x7e0   :  { %11006 = vmatpush1.bf16.msra.mxu1 %v13006_v19  ;;  %v13087_v19 = vld [vmem:[#allocation16 + $0x70] ss:$24 sps:$4 sm:$0xff]  }
 0x7e1   :  { %11007 = vmatprep.subr.bf16.mxu1 %v13014_v28  ;;  %v13095_v28 = vld [vmem:[#allocation16 + $0x44] ss:$24 sps:$4 sm:$0xff]  }
 0x7e2   :  { %10965 = vmatpush2.bf16.msra.mxu0 %v13009_v17  ;;  %v13090_v17 = vld [vmem:[#allocation16 + $0x370] ss:$24 sps:$4 sm:$0xff]  }
 0x7e3   :  { %10966 = vmatprep.subr.bf16.mxu0 %v13017_v21  ;;  %v13098_v21 = vld [vmem:[#allocation16 + $0x344] ss:$24 sps:$4 sm:$0xff]  }
 0x7e4   :  { %11008 = vmatpush2.bf16.msra.mxu1 %v13012_v33  ;;  %v13093_v33 = vld [vmem:[#allocation16 + $0x40] ss:$24 sps:$4 sm:$0xff]  }
 0x7e5   :  { %11009 = vmatprep.subr.bf16.mxu1 %v13020_v58  ;;  %v13101_v58 = vld [vmem:[#allocation16 + $0x14] ss:$24 sps:$4 sm:$0xff]  }
 0x7e6   :  { %10967 = vmatpush2.bf16.msra.mxu0 %v13015_v38  ;;  %v13096_v38 = vld [vmem:[#allocation16 + $0x340] ss:$24 sps:$4 sm:$0xff]  }
 0x7e7   :  { %10968 = vmatprep.subr.bf16.mxu0 %v13023_v47  ;;  %v13104_v47 = vld [vmem:[#allocation16 + $0x314] ss:$24 sps:$4 sm:$0xff]  }
 0x7e8   :  { %11010 = vmatpush2.bf16.msra.mxu1 %v13018_v11  ;;  %v13099_v11 = vld [vmem:[#allocation16 + $0x10] ss:$24 sps:$4 sm:$0xff]  }
 0x7e9   :  { %11011 = vmatprep.subr.bf16.mxu1 %v13026_v40  ;;  %v13107_v40 = vld [vmem:[#allocation16 + $0x2e4] ss:$24 sps:$4 sm:$0xff]  }
 0x7ea   :  { %10969 = vmatpush2.bf16.msra.mxu0 %v13021_v39  ;;  %v13102_v39 = vld [vmem:[#allocation16 + $0x310] ss:$24 sps:$4 sm:$0xff]  }
 0x7eb   :  { %10970 = vmatprep.subr.bf16.mxu0 %v13029_v16  ;;  %v13110_v16 = vld [vmem:[#allocation16 + $0x5e4] ss:$24 sps:$4 sm:$0xff]  }
 0x7ec   :  { %11012 = vmatpush2.bf16.msra.mxu1 %v13024_v60  ;;  %v13105_v60 = vld [vmem:[#allocation16 + $0x2e0] ss:$24 sps:$4 sm:$0xff]  }
 0x7ed   :  { %11013 = vmatprep.subr.bf16.mxu1 %v13032_v62  ;;  %v13113_v62 = vld [vmem:[#allocation16 + $0x2b4] ss:$24 sps:$4 sm:$0xff]  }
 0x7ee   :  { %10971 = vmatpush2.bf16.msra.mxu0 %v13027_v4  ;;  %v13108_v4 = vld [vmem:[#allocation16 + $0x5e0] ss:$24 sps:$4 sm:$0xff]  }
 0x7ef   :  { %10972 = vmatprep.subr.bf16.mxu0 %v13035_v48  ;;  %v13116_v48 = vld [vmem:[#allocation16 + $0x5b4] ss:$24 sps:$4 sm:$0xff]  }
 0x7f0   :  { %11014 = vmatpush2.bf16.msra.mxu1 %v13030_v1  ;;  %v13111_v1 = vld [vmem:[#allocation16 + $0x2b0] ss:$24 sps:$4 sm:$0xff]  }
 0x7f1   :  { %11015 = vmatprep.subr.bf16.mxu1 %v13038_v26  ;;  %v13119_v26 = vld [vmem:[#allocation16 + $0x284] ss:$24 sps:$4 sm:$0xff]  }
 0x7f2   :  { %10973 = vmatpush2.bf16.msra.mxu0 %v13033_v15  ;;  %v13114_v15 = vld [vmem:[#allocation16 + $0x5b0] ss:$24 sps:$4 sm:$0xff]  }
 0x7f3   :  { %10974 = vmatprep.subr.bf16.mxu0 %v13041_v0  ;;  %v13122_v0 = vld [vmem:[#allocation16 + $0x584] ss:$24 sps:$4 sm:$0xff]  }
 0x7f4   :  { %11016 = vmatpush2.bf16.msra.mxu1 %v13036_v63  ;;  %v13117_v63 = vld [vmem:[#allocation16 + $0x280] ss:$24 sps:$4 sm:$0xff]  }
 0x7f5   :  { %11017 = vmatprep.subr.bf16.mxu1 %v13044_v29  ;;  %v13125_v29 = vld [vmem:[#allocation16 + $0x254] ss:$24 sps:$4 sm:$0xff]  }
 0x7f6   :  { %10975 = vmatpush2.bf16.msra.mxu0 %v13039_v6  ;;  %v13120_v6 = vld [vmem:[#allocation16 + $0x580] ss:$24 sps:$4 sm:$0xff]  }
 0x7f7   :  { %10976 = vmatprep.subr.bf16.mxu0 %v13047_v45  ;;  %v13128_v45 = vld [vmem:[#allocation16 + $0x554] ss:$24 sps:$4 sm:$0xff]  }
 0x7f8   :  { %11018 = vmatpush2.bf16.msra.mxu1 %v13042_v50  ;;  %v13123_v50 = vld [vmem:[#allocation16 + $0x250] ss:$24 sps:$4 sm:$0xff]  }
 0x7f9   :  { %11019 = vmatprep.subr.bf16.mxu1 %v13050_v3  ;;  %v13131_v3 = vld [vmem:[#allocation16 + $0x224] ss:$24 sps:$4 sm:$0xff]  }
 0x7fa   :  { %10977 = vmatpush2.bf16.msra.mxu0 %v13045_v9  ;;  %v13126_v9 = vld [vmem:[#allocation16 + $0x550] ss:$24 sps:$4 sm:$0xff]  }
 0x7fb   :  { %10978 = vmatprep.subr.bf16.mxu0 %v13053_v53  ;;  %v13134_v53 = vld [vmem:[#allocation16 + $0x524] ss:$24 sps:$4 sm:$0xff]  }
 0x7fc   :  { %11020 = vmatpush2.bf16.msra.mxu1 %v13048_v51  ;;  %v13129_v51 = vld [vmem:[#allocation16 + $0x220] ss:$24 sps:$4 sm:$0xff]  }
 0x7fd   :  { %11021 = vmatprep.subr.bf16.mxu1 %v13056_v61  ;;  %v13137_v61 = vld [vmem:[#allocation16 + $0x1f4] ss:$24 sps:$4 sm:$0xff]  }
 0x7fe   :  { %10979 = vmatpush2.bf16.msra.mxu0 %v13051_v34  ;;  %v13132_v34 = vld [vmem:[#allocation16 + $0x520] ss:$24 sps:$4 sm:$0xff]  }
 0x7ff   :  { %11034 = vmatprep.subr.bf16.mxu0 %v13059_v10  ;;  %v13140_v10 = vld [vmem:[#allocation16 + $0x4f4] ss:$24 sps:$4 sm:$0xff]  }
 0x800   :  { %11022 = vmatpush2.bf16.msra.mxu1 %v13054_v44  ;;  %v13135_v44 = vld [vmem:[#allocation16 + $0x1f0] ss:$24 sps:$4 sm:$0xff]  }
 0x801   :  { %10981 = vmatmul.mubr.bf16.vlgmr.msra.gmra.mxu0 %v14426_v49  ;;  %11077 = vmatprep.subr.bf16.mxu1 %v13062_v36  ;;  %v10724_v36 = vpop.f32.mrf.mxu0 }
 0x802   :  { %11035 = vmatpush1.bf16.msra.mxu0 %v13057_v14  ;;  %11066 = vmatprep.mubr.bf16.mxu0 %v14376_v27  ;;  %v13075_v27 = vld [vmem:[#allocation16 + $0xd0] ss:$24 sps:$4 sm:$0xff]   ;;  %v13143_v14 = vld [vmem:[#allocation16 + $0x1c4] ss:$24 sps:$4 sm:$0xff]  }
 0x803   :  { %11024 = vmatmul.mubr.bf16.vlgmr.msra.gmra.mxu1 %v14428_v43  ;;  %11036 = vmatprep.subr.bf16.mxu0 %v13065_v55  ;;  %v13138_v55 = vld [vmem:[#allocation16 + $0x4f0] ss:$24 sps:$4 sm:$0xff]  }
 0x804   :  { %11078 = vmatpush1.bf16.msra.mxu1 %v13060_v25  ;;  %11109 = vmatprep.mubr.bf16.mxu1 %v14378_v13  ;;  %v13081_v13 = vld [vmem:[#allocation16 + $0xa0] ss:$24 sps:$4 sm:$0xff]  }
 0x805   :  { %11079 = vmatprep.subr.bf16.mxu1 %v13068_v42  ;;  %v14442_v25 = vld [vmem:[#allocation17] sm:$0x3f]  ;;  %v10767_v42 = vpop.f32.mrf.mxu1 }
 0x806   :  { %11037 = vmatpush1.bf16.msra.mxu0 %v13063_v56  ;;  %v13146_v56 = vld [vmem:[#allocation16 + $0x4c4] ss:$24 sps:$4 sm:$0xff]  }
 0x807   :  { %11038 = vmatprep.subr.bf16.mxu0 %v13071_v20  ;;  %v13141_v20 = vld [vmem:[#allocation16 + $0x1c0] ss:$24 sps:$4 sm:$0xff]  }
 0x808   :  { %11080 = vmatpush1.bf16.msra.mxu1 %v13066_v37  ;;  %v10726_v37 = vpop.f32.mrf.mxu0 }
 0x809   :  { %11081 = vmatprep.subr.bf16.mxu1 %v13074_v8  ;;  %v13149_v8 = vld [vmem:[#allocation16 + $0x194] ss:$24 sps:$4 sm:$0xff]  }
 0x80a   :  { %11039 = vmatpush1.bf16.msra.mxu0 %v13069_v57  ;;  %v8743_v57 = vrot.slane %v14442_v25, %v14553_v30 }
 0x80b   :  { %11040 = vmatprep.subr.bf16.mxu0 %v13077_v31  ;;  %v13144_v31 = vld [vmem:[#allocation16 + $0x4c0] ss:$24 sps:$4 sm:$0xff]  }
 0x80c   :  { %11082 = vmatpush1.bf16.msra.mxu1 %v13072_v41  ;;  %v10769_v41 = vpop.f32.mrf.mxu1 }
 0x80d   :  { %11083 = vmatprep.subr.bf16.mxu1 %v13080_v7  ;;  %v13152_v7 = vld [vmem:[#allocation16 + $0x494] ss:$24 sps:$4 sm:$0xff]  }
 0x80e   :  { %11041 = vmatpush1.bf16.msra.mxu0 %v13075_v27  ;;  %v8747_v27 = vrot.slane %v14442_v25, %v14551_v54  ;;  %v13156_v54 = vld [vmem:[#allocation16 + $0xa60] ss:$24 sps:$4 sm:$0xff]  }
 0x80f   :  { %11042 = vmatprep.subr.bf16.mxu0 %v13083_v23  ;;  %v13147_v23 = vld [vmem:[#allocation16 + $0x190] ss:$24 sps:$4 sm:$0xff]  }
 0x810   :  { %11084 = vmatpush1.bf16.msra.mxu1 %v13078_v46  ;;  %v10728_v46 = vpop.f32.mrf.mxu0  ;;  %v10727_v30 = vadd.f32 %v10726_v37, %v8747_v27  ;;  %v13183_v37 = vld [vmem:[#allocation16 + $0x670] ss:$24 sps:$4 sm:$0xff]  }
 0x811   :  { %11085 = vmatprep.subr.bf16.mxu1 %v13086_v2  ;;  %v13155_v2 = vld [vmem:[#allocation16 + $0x764] ss:$24 sps:$4 sm:$0xff]  }
 0x812   :  { %11043 = vmatpush1.bf16.msra.mxu0 %v13081_v13  ;;  %v10725_v13 = vadd.f32 %v10724_v36, %v8743_v57  ;;  %v13174_v36 = vld [vmem:[#allocation16 + $0x9d0] ss:$24 sps:$4 sm:$0xff]  }
 0x813   :  { %11044 = vmatprep.subr.bf16.mxu0 %v13089_v32  ;;  %v13150_v32 = vld [vmem:[#allocation16 + $0x490] ss:$24 sps:$4 sm:$0xff]  }
 0x814   :  { %11086 = vmatpush1.bf16.msra.mxu1 %v13084_v22  ;;  %v10771_v22 = vpop.f32.mrf.mxu1 }
 0x815   :  { %11087 = vmatprep.subr.bf16.mxu1 %v13092_v59  ;;  %v13158_v59 = vld [vmem:[#allocation16 + $0xa64] ss:$24 sps:$4 sm:$0xff]  }
 0x816   :  { %11045 = vmatpush1.bf16.msra.mxu0 %v13087_v19  ;;  %v13153_v19 = vld [vmem:[#allocation16 + $0x760] ss:$24 sps:$4 sm:$0xff]  }
 0x817   :  { %11046 = vmatprep.subr.bf16.mxu0 %v13095_v28  ;;  %v10730_v28 = vpop.f32.mrf.mxu0 }
 0x818   :  { %11088 = vmatpush1.bf16.msra.mxu1 %v13090_v17  ;;  %v13161_v17 = vld [vmem:[#allocation16 + $0x734] ss:$24 sps:$4 sm:$0xff]  }
 0x819   :  { %11089 = vmatprep.subr.bf16.mxu1 %v13098_v21  ;;  %v10768_v21 = vadd.f32 %v10767_v42, %v10725_v13  ;;  %v13185_v42 = vld [vmem:[#allocation16 + $0x674] ss:$24 sps:$4 sm:$0xff]   ;;  %v13198_v13 = vld [vmem:[#allocation16 + $0x910] ss:$24 sps:$4 sm:$0xff]  }
 0x81a   :  { %11047 = vmatpush1.bf16.msra.mxu0 %v13093_v33  ;;  %v10729_v33 = vadd.f32 %v10728_v46, %v8743_v57  ;;  %v13186_v57 = vld [vmem:[#allocation16 + $0x970] ss:$24 sps:$4 sm:$0xff]  }
 0x81b   :  { %11048 = vmatprep.subr.bf16.mxu0 %v13101_v58  ;;  %v10773_v58 = vpop.f32.mrf.mxu1  ;;  %v13195_v46 = vld [vmem:[#allocation16 + $0x610] ss:$24 sps:$4 sm:$0xff]  }
 0x81c   :  { %11090 = vmatpush1.bf16.msra.mxu1 %v13096_v38 }
 0x81d   :  { %11091 = vmatprep.subr.bf16.mxu1 %v13104_v47  ;;  %v13164_v47 = vld [vmem:[#allocation16 + $0xa34] ss:$24 sps:$4 sm:$0xff]  }
 0x81e   :  { %11049 = vmatpush1.bf16.msra.mxu0 %v13099_v11  ;;  %v10770_v11 = vadd.f32 %v10769_v41, %v10727_v30  ;;  %v13189_v41 = vld [vmem:[#allocation16 + $0x640] ss:$24 sps:$4 sm:$0xff]  }
 0x81f   :  { %11050 = vmatprep.subr.bf16.mxu0 %v13107_v40  ;;  %v10731_v40 = vadd.f32 %v10730_v28, %v8747_v27  ;;  %v13192_v27 = vld [vmem:[#allocation16 + $0x940] ss:$24 sps:$4 sm:$0xff]   ;;  %v13207_v28 = vld [vmem:[#allocation16 + $0x8b0] ss:$24 sps:$4 sm:$0xff]  }
 0x820   :  { %11092 = vmatpush1.bf16.msra.mxu1 %v13102_v39  ;;  %v13204_v30 = vld [vmem:[#allocation16 + $0xbe0] ss:$24 sps:$4 sm:$0xff]  }
 0x821   :  { %11093 = vmatprep.subr.bf16.mxu1 %v13110_v16  ;;  %v13159_v16 = vld [vmem:[#allocation16 + $0x730] ss:$24 sps:$4 sm:$0xff]  }
 0x822   :  { %11051 = vmatpush2.bf16.msra.mxu0 %v13105_v60 }
 0x823   :  { %11052 = vmatprep.subr.bf16.mxu0 %v13113_v62 }
 0x824   :  { %11094 = vmatpush2.bf16.msra.mxu1 %v13108_v4  ;;  %v13167_v4 = vld [vmem:[#allocation16 + $0x704] ss:$24 sps:$4 sm:$0xff]  }
 0x825   :  { %11095 = vmatprep.subr.bf16.mxu1 %v13116_v48  ;;  %v10772_v48 = vadd.f32 %v10771_v22, %v10729_v33  ;;  %v13201_v22 = vld [vmem:[#allocation16 + $0x8e0] ss:$24 sps:$4 sm:$0xff]   ;;  %v13218_v33 = vld [vmem:[#allocation16 + $0xb84] ss:$24 sps:$4 sm:$0xff]  }
 0x826   :  { %11053 = vmatpush2.bf16.msra.mxu0 %v13111_v1 }
 0x827   :  { %11054 = vmatprep.subr.bf16.mxu0 %v13119_v26  ;;  %v13162_v26 = vld [vmem:[#allocation16 + $0xa30] ss:$24 sps:$4 sm:$0xff]  }
 0x828   :  { %11096 = vmatpush2.bf16.msra.mxu1 %v13114_v15 }
 0x829   :  { %11097 = vmatprep.subr.bf16.mxu1 %v13122_v0 }
 0x82a   :  { %11055 = vmatpush2.bf16.msra.mxu0 %v13117_v63  ;;  %v13170_v63 = vld [vmem:[#allocation16 + $0xa04] ss:$24 sps:$4 sm:$0xff]  }
 0x82b   :  { %11056 = vmatprep.subr.bf16.mxu0 %v13125_v29  ;;  %v10774_v29 = vadd.f32 %v10773_v58, %v10731_v40  ;;  %v13221_v58 = vld [vmem:[#allocation16 + $0x854] ss:$24 sps:$4 sm:$0xff]   ;;  %v13227_v40 = vld [vmem:[#allocation16 + $0x824] ss:$24 sps:$4 sm:$0xff]  }
 0x82c   :  { %11098 = vmatpush2.bf16.msra.mxu1 %v13120_v6 }
 0x82d   :  { %11099 = vmatprep.subr.bf16.mxu1 %v13128_v45 }
 0x82e   :  { %11057 = vmatpush2.bf16.msra.mxu0 %v13123_v50 }
 0x82f   :  { %11058 = vmatprep.subr.bf16.mxu0 %v13131_v3  ;;  %v13173_v3 = vld [vmem:[#allocation16 + $0x6d4] ss:$24 sps:$4 sm:$0xff]  }
 0x830   :  { %11100 = vmatpush2.bf16.msra.mxu1 %v13126_v9 }
 0x831   :  { %11101 = vmatprep.subr.bf16.mxu1 %v13134_v53  ;;  %v13168_v53 = vld [vmem:[#allocation16 + $0xa00] ss:$24 sps:$4 sm:$0xff]  }
 0x832   :  { %11059 = vmatpush2.bf16.msra.mxu0 %v13129_v51 }
 0x833   :  { %11060 = vmatprep.subr.bf16.mxu0 %v13137_v61  ;;  %v13176_v61 = vld [vmem:[#allocation16 + $0x9d4] ss:$24 sps:$4 sm:$0xff]  }
 0x834   :  { %11102 = vmatpush2.bf16.msra.mxu1 %v13132_v34 }
 0x835   :  { %11103 = vmatprep.subr.bf16.mxu1 %v13140_v10  ;;  %v13171_v10 = vld [vmem:[#allocation16 + $0x6d0] ss:$24 sps:$4 sm:$0xff]  }
 0x836   :  { %11061 = vmatpush2.bf16.msra.mxu0 %v13135_v44  ;;  %v13179_v44 = vld [vmem:[#allocation16 + $0x6a4] ss:$24 sps:$4 sm:$0xff]  }
 0x837   :  { %11062 = vmatprep.subr.bf16.mxu0 %v13143_v14  ;;  %v13182_v14 = vld [vmem:[#allocation16 + $0x9a4] ss:$24 sps:$4 sm:$0xff]  }
 0x838   :  { %11104 = vmatpush2.bf16.msra.mxu1 %v13138_v55  ;;  %v13177_v55 = vld [vmem:[#allocation16 + $0x6a0] ss:$24 sps:$4 sm:$0xff]  }
 0x839   :  { %11105 = vmatprep.subr.bf16.mxu1 %v13146_v56  ;;  %v13180_v56 = vld [vmem:[#allocation16 + $0x9a0] ss:$24 sps:$4 sm:$0xff]  }
 0x83a   :  { %11063 = vmatpush2.bf16.msra.mxu0 %v13141_v20  ;;  %v13188_v20 = vld [vmem:[#allocation16 + $0x974] ss:$24 sps:$4 sm:$0xff]  }
 0x83b   :  { %11064 = vmatprep.subr.bf16.mxu0 %v13149_v8  ;;  %v13191_v8 = vld [vmem:[#allocation16 + $0x644] ss:$24 sps:$4 sm:$0xff]  }
 0x83c   :  { %11106 = vmatpush2.bf16.msra.mxu1 %v13144_v31  ;;  %v13194_v31 = vld [vmem:[#allocation16 + $0x944] ss:$24 sps:$4 sm:$0xff]  }
 0x83d   :  { %11107 = vmatprep.subr.bf16.mxu1 %v13152_v7  ;;  %v13197_v7 = vld [vmem:[#allocation16 + $0x614] ss:$24 sps:$4 sm:$0xff]  }
 0x83e   :  { %11065 = vmatpush2.bf16.msra.mxu0 %v13147_v23  ;;  %v13200_v23 = vld [vmem:[#allocation16 + $0x914] ss:$24 sps:$4 sm:$0xff]  }
 0x83f   :  { %11120 = vmatprep.subr.bf16.mxu0 %v13155_v2  ;;  %v13203_v2 = vld [vmem:[#allocation16 + $0x8e4] ss:$24 sps:$4 sm:$0xff]  }
 0x840   :  { %11108 = vmatpush2.bf16.msra.mxu1 %v13150_v32  ;;  %v13206_v32 = vld [vmem:[#allocation16 + $0xbe4] ss:$24 sps:$4 sm:$0xff]  }
 0x841   :  { %v10810_v38 = vpop.f32.mrf.mxu0  ;;  %11067 = vmatmul.mubr.bf16.vlgmr.msra.gmra.mxu0 %v14382_v24  ;;  %11163 = vmatprep.subr.bf16.mxu1 %v13158_v59  ;;  %v13209_v59 = vld [vmem:[#allocation16 + $0x8b4] ss:$24 sps:$4 sm:$0xff]  }
 0x842   :  { %v10811_v39 = vadd.f32 %v10810_v38, %v10768_v21  ;;  %11121 = vmatpush1.bf16.msra.mxu0 %v13153_v19  ;;  %11152 = vmatprep.mubr.bf16.mxu0 %v14413_v35  ;;  %v13212_v19 = vld [vmem:[#allocation16 + $0xbb4] ss:$24 sps:$4 sm:$0xff]   ;;  %v13210_v21 = vld [vmem:[#allocation16 + $0xbb0] ss:$24 sps:$4 sm:$0xff]   ;;  %v13216_v38 = vld [vmem:[#allocation16 + $0xb80] ss:$24 sps:$4 sm:$0xff]  }
 0x843   :  { %v10853_v60 = vpop.f32.mrf.mxu1  ;;  %11110 = vmatmul.mubr.bf16.vlgmr.msra.gmra.mxu1 %v14393_v12  ;;  %v10812_v62 = vpop.f32.mrf.mxu0  ;;  %11122 = vmatprep.subr.bf16.mxu0 %v13161_v17  ;;  %v13165_v12 = vld [vmem:[#allocation16 + $0x700] ss:$24 sps:$4 sm:$0xff]   ;;  %v13215_v17 = vld [vmem:[#allocation16 + $0x884] ss:$24 sps:$4 sm:$0xff]  }
 0x844   :  { %v10854_v1 = vadd.f32 %v10853_v60, %v10811_v39  ;;  %11164 = vmatpush1.bf16.msra.mxu1 %v13156_v54  ;;  %11195 = vmatprep.mubr.bf16.mxu1 %v14423_v5  ;;  %v10813_v24 = vadd.f32 %v10812_v62, %v10770_v11  ;;  %v13213_v54 = vld [vmem:[#allocation16 + $0x880] ss:$24 sps:$4 sm:$0xff]   ;;  %v13219_v11 = vld [vmem:[#allocation16 + $0x850] ss:$24 sps:$4 sm:$0xff]   ;;  %v13233_v62 = vld [vmem:[#allocation16 + $0x7f4] ss:$24 sps:$4 sm:$0xff]  }
 0x845   :  { %v10855_v15 = vpop.f32.mrf.mxu1  ;;  %v10814_v0 = vpop.f32.mrf.mxu0  ;;  %11165 = vmatprep.subr.bf16.mxu1 %v13164_v47  ;;  %v13224_v47 = vld [vmem:[#allocation16 + $0xb54] ss:$24 sps:$4 sm:$0xff]   ;;  %v13222_v39 = vld [vmem:[#allocation16 + $0xb50] ss:$24 sps:$4 sm:$0xff]   ;;  %v13225_v60 = vld [vmem:[#allocation16 + $0x820] ss:$24 sps:$4 sm:$0xff]  }
 0x846   :  { %11206 = vst [vmem:[#allocation19] sm:$0xff] %v10854_v1  ;;  %v10856_v35 = vadd.f32 %v10855_v15, %v10813_v24  ;;  %v10815_v6 = vadd.f32 %v10814_v0, %v10772_v48  ;;  %11123 = vmatpush1.bf16.msra.mxu0 %v13159_v16  ;;  %v13230_v16 = vld [vmem:[#allocation16 + $0xb24] ss:$24 sps:$4 sm:$0xff]   ;;  %v13236_v48 = vld [vmem:[#allocation16 + $0xaf4] ss:$24 sps:$4 sm:$0xff]  }
 0x847   :  { %v10857_v45 = vpop.f32.mrf.mxu1  ;;  %v10816_v50 = vpop.f32.mrf.mxu0  ;;  %11124 = vmatprep.subr.bf16.mxu0 %v13167_v4  ;;  %v13228_v4 = vld [vmem:[#allocation16 + $0xb20] ss:$24 sps:$4 sm:$0xff]   ;;  %v13231_v1 = vld [vmem:[#allocation16 + $0x7f0] ss:$24 sps:$4 sm:$0xff]   ;;  %v13239_v24 = vld [vmem:[#allocation16 + $0x7c4] ss:$24 sps:$4 sm:$0xff]  }
 0x848   :  { %11207 = vst [vmem:[#allocation19 + $0x8] sm:$0xff] %v10856_v35  ;;  %v10858_v9 = vadd.f32 %v10857_v45, %v10815_v6  ;;  %11166 = vmatpush1.bf16.msra.mxu1 %v13162_v26  ;;  %v10817_v5 = vadd.f32 %v10816_v50, %v10774_v29  ;;  %v13234_v26 = vld [vmem:[#allocation16 + $0xaf0] ss:$24 sps:$4 sm:$0xff]   ;;  %v13242_v15 = vld [vmem:[#allocation16 + $0xac4] ss:$24 sps:$4 sm:$0xff]  }
 0x849   :  { %v10859_v51 = vpop.f32.mrf.mxu1  ;;  %11167 = vmatprep.subr.bf16.mxu1 %v13170_v63  ;;  %v13237_v0 = vld [vmem:[#allocation16 + $0x7c0] ss:$24 sps:$4 sm:$0xff]   ;;  %v13245_v63 = vld [vmem:[#allocation16 + $0x794] ss:$24 sps:$4 sm:$0xff]   ;;  %v13243_v6 = vld [vmem:[#allocation16 + $0x790] ss:$24 sps:$4 sm:$0xff]  }
 0x84a   :  { %11212 = vst [vmem:[#allocation19 + $0x30] sm:$0xff] %v10858_v9  ;;  %v10860_v34 = vadd.f32 %v10859_v51, %v10817_v5  ;;  %11125 = vmatpush1.bf16.msra.mxu0 %v13165_v12  ;;  %v13240_v29 = vld [vmem:[#allocation16 + $0xac0] ss:$24 sps:$4 sm:$0xff]   ;;  %v13248_v35 = vld [vmem:[#allocation16 + $0xa94] ss:$24 sps:$4 sm:$0xff]   ;;  %v8751_v9 = vrot.slane %v14442_v25, %v14554_v52 }
 0x84b   :  { %11126 = vmatprep.subr.bf16.mxu0 %v13173_v3  ;;  %v13246_v12 = vld [vmem:[#allocation16 + $0xa90] ss:$24 sps:$4 sm:$0xff]  }
 0x84c   :  { %11213 = vst [vmem:[#allocation19 + $0x38] sm:$0xff] %v10860_v34  ;;  %11168 = vmatpush1.bf16.msra.mxu1 %v13168_v53  ;;  %v8755_v53 = vrot.slane %v14442_v25, %v14552_v18 }
 0x84d   :  { %11169 = vmatprep.subr.bf16.mxu1 %v13176_v61 }
 0x84e   :  { %11127 = vmatpush1.bf16.msra.mxu0 %v13171_v10 }
 0x84f   :  { %11128 = vmatprep.subr.bf16.mxu0 %v13179_v44 }
 0x850   :  { %11170 = vmatpush1.bf16.msra.mxu1 %v13174_v36 }
 0x851   :  { %11171 = vmatprep.subr.bf16.mxu1 %v13182_v14 }
 0x852   :  { %11129 = vmatpush1.bf16.msra.mxu0 %v13177_v55 }
 0x853   :  { %11130 = vmatprep.subr.bf16.mxu0 %v13185_v42 }
 0x854   :  { %11172 = vmatpush1.bf16.msra.mxu1 %v13180_v56 }
 0x855   :  { %11173 = vmatprep.subr.bf16.mxu1 %v13188_v20 }
 0x856   :  { %11131 = vmatpush1.bf16.msra.mxu0 %v13183_v37 }
 0x857   :  { %11132 = vmatprep.subr.bf16.mxu0 %v13191_v8 }
 0x858   :  { %11174 = vmatpush1.bf16.msra.mxu1 %v13186_v57 }
 0x859   :  { %11175 = vmatprep.subr.bf16.mxu1 %v13194_v31 }
 0x85a   :  { %11133 = vmatpush1.bf16.msra.mxu0 %v13189_v41 }
 0x85b   :  { %11134 = vmatprep.subr.bf16.mxu0 %v13197_v7 }
 0x85c   :  { %11176 = vmatpush1.bf16.msra.mxu1 %v13192_v27 }
 0x85d   :  { %11177 = vmatprep.subr.bf16.mxu1 %v13200_v23 }
 0x85e   :  { %11135 = vmatpush1.bf16.msra.mxu0 %v13195_v46 }
 0x85f   :  { %11136 = vmatprep.subr.bf16.mxu0 %v13203_v2 }
 0x860   :  { %11178 = vmatpush1.bf16.msra.mxu1 %v13198_v13 }
 0x861   :  { %11179 = vmatprep.subr.bf16.mxu1 %v13206_v32 }
 0x862   :  { %11137 = vmatpush2.bf16.msra.mxu0 %v13201_v22 }
 0x863   :  { %11138 = vmatprep.subr.bf16.mxu0 %v13209_v59 }
 0x864   :  { %11180 = vmatpush2.bf16.msra.mxu1 %v13204_v30 }
 0x865   :  { %11181 = vmatprep.subr.bf16.mxu1 %v13212_v19 }
 0x866   :  { %11139 = vmatpush2.bf16.msra.mxu0 %v13207_v28  ;;  %v14555_v28 = vld [vmem:[#allocation31_spill] sm:$0xff] }
 0x867   :  { %11140 = vmatprep.subr.bf16.mxu0 %v13215_v17  ;;  %v8759_v17 = vrot.slane %v14442_v25, %v14555_v28 }
 0x868   :  { %11182 = vmatpush2.bf16.msra.mxu1 %v13210_v21 }
 0x869   :  { %11183 = vmatprep.subr.bf16.mxu1 %v13218_v33  ;;  %v14556_v33 = vld [vmem:[#allocation32_spill] sm:$0xff] }
 0x86a   :  { %11141 = vmatpush2.bf16.msra.mxu0 %v13213_v54  ;;  %v8763_v54 = vrot.slane %v14442_v25, %v14556_v33 }
 0x86b   :  { %11142 = vmatprep.subr.bf16.mxu0 %v13221_v58 }
 0x86c   :  { %11184 = vmatpush2.bf16.msra.mxu1 %v13216_v38 }
 0x86d   :  { %11185 = vmatprep.subr.bf16.mxu1 %v13224_v47 }
 0x86e   :  { %11143 = vmatpush2.bf16.msra.mxu0 %v13219_v11 }
 0x86f   :  { %11144 = vmatprep.subr.bf16.mxu0 %v13227_v40 }
 0x870   :  { %11186 = vmatpush2.bf16.msra.mxu1 %v13222_v39 }
 0x871   :  { %11187 = vmatprep.subr.bf16.mxu1 %v13230_v16 }
 0x872   :  { %11145 = vmatpush2.bf16.msra.mxu0 %v13225_v60 }
 0x873   :  { %11146 = vmatprep.subr.bf16.mxu0 %v13233_v62 }
 0x874   :  { %11188 = vmatpush2.bf16.msra.mxu1 %v13228_v4 }
 0x875   :  { %11189 = vmatprep.subr.bf16.mxu1 %v13236_v48 }
 0x876   :  { %11147 = vmatpush2.bf16.msra.mxu0 %v13231_v1 }
 0x877   :  { %11148 = vmatprep.subr.bf16.mxu0 %v13239_v24 }
 0x878   :  { %11190 = vmatpush2.bf16.msra.mxu1 %v13234_v26 }
 0x879   :  { %11191 = vmatprep.subr.bf16.mxu1 %v13242_v15 }
 0x87a   :  { %11149 = vmatpush2.bf16.msra.mxu0 %v13237_v0 }
 0x87b   :  { %11150 = vmatprep.subr.bf16.mxu0 %v13245_v63 }
 0x87c   :  { %11192 = vmatpush2.bf16.msra.mxu1 %v13240_v29 }
 0x87d   :  { %11193 = vmatprep.subr.bf16.mxu1 %v13248_v35 }
 0x87e   :  { %11151 = vmatpush2.bf16.msra.mxu0 %v13243_v6 }
 0x880   :  { %11194 = vmatpush2.bf16.msra.mxu1 %v13246_v12 }
 0x881   :  { %11153 = vmatmul.mubr.bf16.vlgmr.msra.gmra.mxu0 %v14426_v49  ;;  %v10896_v45 = vpop.f32.mrf.mxu0 }
 0x882   :  { %v10897_v61 = vadd.f32 %v10896_v45, %v8751_v9 }
 0x883   :  { %11196 = vmatmul.mubr.bf16.vlgmr.msra.gmra.mxu1 %v14428_v43  ;;  %v10939_v50 = vpop.f32.mrf.mxu1  ;;  %v10898_v3 = vpop.f32.mrf.mxu0 }
 0x884   :  { %v10899_v10 = vadd.f32 %v10898_v3, %v8755_v53  ;;  %v10940_v36 = vadd.f32 %v10939_v50, %v10897_v61 }
 0x885   :  { %v10941_v5 = vpop.f32.mrf.mxu1  ;;  %v10900_v51 = vpop.f32.mrf.mxu0 }
 0x886   :  { %v10901_v14 = vadd.f32 %v10900_v51, %v8751_v9  ;;  %v10942_v43 = vadd.f32 %v10941_v5, %v10899_v10 }
 0x887   :  { %v10943_v34 = vpop.f32.mrf.mxu1  ;;  %v10902_v44 = vpop.f32.mrf.mxu0 }
 0x888   :  { %v10903_v42 = vadd.f32 %v10902_v44, %v8755_v53  ;;  %v10944_v8 = vadd.f32 %v10943_v34, %v10901_v14 }
 0x889   :  { %v10945_v49 = vpop.f32.mrf.mxu1 }
 0x88a   :  { %v10946_v18 = vadd.f32 %v10945_v49, %v10903_v42 }
 0x8c1   :  { %v10982_v55 = vpop.f32.mrf.mxu0 }
 0x8c2   :  { %v10983_v56 = vadd.f32 %v10982_v55, %v10940_v36 }
 0x8c3   :  { %v11025_v20 = vpop.f32.mrf.mxu1  ;;  %v10984_v37 = vpop.f32.mrf.mxu0 }
 0x8c4   :  { %v11026_v52 = vadd.f32 %v11025_v20, %v10983_v56  ;;  %v10985_v57 = vadd.f32 %v10984_v37, %v10942_v43 }
 0x8c5   :  { %v11027_v31 = vpop.f32.mrf.mxu1  ;;  %v10986_v41 = vpop.f32.mrf.mxu0 }
 0x8c6   :  { %11208 = vst [vmem:[#allocation19 + $0x10] sm:$0xff] %v11026_v52  ;;  %v11028_v7 = vadd.f32 %v11027_v31, %v10985_v57  ;;  %v10987_v27 = vadd.f32 %v10986_v41, %v10944_v8 }
 0x8c7   :  { %v11029_v23 = vpop.f32.mrf.mxu1  ;;  %v10988_v46 = vpop.f32.mrf.mxu0 }
 0x8c8   :  { %11209 = vst [vmem:[#allocation19 + $0x18] sm:$0xff] %v11028_v7  ;;  %v11030_v2 = vadd.f32 %v11029_v23, %v10987_v27  ;;  %v10989_v13 = vadd.f32 %v10988_v46, %v10946_v18 }
 0x8c9   :  { %v11031_v32 = vpop.f32.mrf.mxu1 }
 0x8ca   :  { %11214 = vst [vmem:[#allocation19 + $0x40] sm:$0xff] %v11030_v2  ;;  %v11032_v22 = vadd.f32 %v11031_v32, %v10989_v13 }
 0x8cc   :  { %11215 = vst [vmem:[#allocation19 + $0x48] sm:$0xff] %v11032_v22 }
 0x901   :  { %v11068_v59 = vpop.f32.mrf.mxu0 }
 0x902   :  { %v11069_v38 = vadd.f32 %v11068_v59, %v8759_v17 }
 0x903   :  { %v11111_v30 = vpop.f32.mrf.mxu1  ;;  %v11070_v19 = vpop.f32.mrf.mxu0 }
 0x904   :  { %v11071_v11 = vadd.f32 %v11070_v19, %v8763_v54  ;;  %v11112_v39 = vadd.f32 %v11111_v30, %v11069_v38 }
 0x905   :  { %v11113_v21 = vpop.f32.mrf.mxu1  ;;  %v11072_v58 = vpop.f32.mrf.mxu0 }
 0x906   :  { %v11073_v16 = vadd.f32 %v11072_v58, %v8759_v17  ;;  %v11114_v4 = vadd.f32 %v11113_v21, %v11071_v11 }
 0x907   :  { %v11115_v47 = vpop.f32.mrf.mxu1  ;;  %v11074_v40 = vpop.f32.mrf.mxu0 }
 0x908   :  { %v11075_v48 = vadd.f32 %v11074_v40, %v8763_v54  ;;  %v11116_v15 = vadd.f32 %v11115_v47, %v11073_v16 }
 0x909   :  { %v11117_v60 = vpop.f32.mrf.mxu1 }
 0x90a   :  { %v11118_v25 = vadd.f32 %v11117_v60, %v11075_v48 }
 0x941   :  { %v11154_v62 = vpop.f32.mrf.mxu0 }
 0x942   :  { %v11155_v1 = vadd.f32 %v11154_v62, %v11112_v39 }
 0x943   :  { %v11197_v24 = vpop.f32.mrf.mxu1  ;;  %v11156_v26 = vpop.f32.mrf.mxu0 }
 0x944   :  { %v11198_v0 = vadd.f32 %v11197_v24, %v11155_v1  ;;  %v11157_v63 = vadd.f32 %v11156_v26, %v11114_v4 }
 0x945   :  { %v11199_v29 = vpop.f32.mrf.mxu1  ;;  %v11158_v35 = vpop.f32.mrf.mxu0 }
 0x946   :  { %11210 = vst [vmem:[#allocation19 + $0x20] sm:$0xff] %v11198_v0  ;;  %v11200_v6 = vadd.f32 %v11199_v29, %v11157_v63  ;;  %v11159_v12 = vadd.f32 %v11158_v35, %v11116_v15 }
 0x947   :  { %v11201_v45 = vpop.f32.mrf.mxu1  ;;  %v11160_v50 = vpop.f32.mrf.mxu0 }
 0x948   :  { %11211 = vst [vmem:[#allocation19 + $0x28] sm:$0xff] %v11200_v6  ;;  %v11202_v3 = vadd.f32 %v11201_v45, %v11159_v12  ;;  %v11161_v9 = vadd.f32 %v11160_v50, %v11118_v25 }
 0x949   :  { %v11203_v5 = vpop.f32.mrf.mxu1 }
 0x94a   :  { %11216 = vst [vmem:[#allocation19 + $0x50] sm:$0xff] %v11202_v3  ;;  %v11204_v53 = vadd.f32 %v11203_v5, %v11161_v9 }
 0x94c   :  { %11217 = vst [vmem:[#allocation19 + $0x58] sm:$0xff] %v11204_v53 }
 0x94d   :  { %13468 = shalt.err (!%p13465_p12)
}
 0x94e   :  { %s13506_s4 = smov 768   ;;  %s13507_s15 = smov 48  }
 0x94f   :  { %11229 = dma.vmem_to_hbm [thread:$0]  %s11224_s14, 1536, %s14476_s11, [#allocation4], %s13506_s4, %s13506_s4, %s13507_s15  }
 0x950   :  { %13489 = dma.done.wait [#allocation4], 1536  }
 0x951   :  { %13490 = vsyncadd [#allocation4], 4294965760 }
 0x952   :  { %11233 = vsyncpa [#allocation3], 1 }
 0x953   :  { %11234 = vsyncpa [#allocation6], 1 }
 0x954   :  { %11235 = vsyncpa [#allocation9], 1 }
 0x955   :  { %11236 = vsyncpa [#allocation12], 1 }
 0x956   :  { %11237 = vsyncpa [#allocation15], 1 }
 0x957   :  { %11238 = vsyncpa [#allocation18], 1 }
 0x958   :  { %11239 = vsyncpa [#allocation4], 1 }

</bundles_post_ra>
